<compile_context>
chip_gen: v6e
topology: v6e:2x2x1
jax: 0.10.0
libtpu: 0.0.40
codegen_flags: <defaults>
</compile_context>

<pallas_src>
import functools

import jax
import jax.numpy as jnp
from jax.experimental import pallas as pl
from jax.experimental.pallas import tpu as pltpu

SELU_ALPHA = 1.6732632423543772
SELU_SCALE = 1.0507009873554805
BN_EPS = 1e-5


def _round_up(x, m):
    return (x + m - 1) // m * m


# ------------------------------ in-kernel math --------------------------------
def _selu(x):
    neg = SELU_ALPHA * (jnp.exp(jnp.minimum(x, 0.0)) - 1.0)
    return SELU_SCALE * jnp.where(x > 0, x, neg)


def _batchnorm_rows(z, gamma, beta):
    # Training-mode per-channel (=row) batch statistics, ONE pass:
    # sum and sum-of-squares instead of mean + centered second reduction.
    inv_n = 1.0 / z.shape[1]
    s1 = jnp.sum(z, axis=1, keepdims=True)
    s2 = jnp.sum(z * z, axis=1, keepdims=True)
    mean = s1 * inv_n
    var = jnp.maximum(s2 * inv_n - mean * mean, 0.0)   # guard tiny negative
    return (z - mean) * jax.lax.rsqrt(var + BN_EPS) * gamma + beta


def _maxpool3_flat(x, first, last):
    # MaxPool1d(kernel=3, stride=1, padding=1) on the (C, N*L) layout.
    # Neighbours come from XLU lane rotations; at sequence boundaries the
    # wrapped neighbour is replaced by the centre value, which is equivalent
    # to PyTorch's -inf padding under max.
    nl = x.shape[1]
    prv = pltpu.roll(x, shift=1, axis=1)         # prv[:, j] = x[:, j-1] (wraps)
    nxt = pltpu.roll(x, shift=nl - 1, axis=1)    # nxt[:, j] = x[:, j+1] (wraps)
    prv = jnp.where(first, x, prv)
    nxt = jnp.where(last, x, nxt)
    return jnp.maximum(jnp.maximum(x, prv), nxt)


def _build_im2col(z_bn, im2col_ref, col_mod, length, k_max):
    """Fill rows [0, Kmax*Cb) of the patch matrix with all 'same'-conv taps."""
    cb, nl = z_bn.shape
    half = k_max // 2
    for t in range(k_max):                 # tap t reads window offset d = t - Kmax//2
        d = t - half
        if d == 0:
            win = z_bn
        else:
            rolled = pltpu.roll(z_bn, shift=(-d) % nl, axis=1)   # rolled[:, j] = z[:, j+d]
            if d > 0:
                win = jnp.where(col_mod >= length - d, 0.0, rolled)
            else:
                win = jnp.where(col_mod < -d, 0.0, rolled)
        # Aligned store: row offset multiple of Cb(=8), full 128-multiple lanes.
        im2col_ref[t * cb:(t + 1) * cb, :] = win


def _inception_module(x, w_bneck, w_block, gamma, beta, im2col_ref,
                      col_mod, first, last, *, length, k_max, c_pad):
    cb = w_bneck.shape[0]
    # Bottleneck 1x1 conv (bias=False).
    z_bn = jnp.dot(w_bneck, x, preferred_element_type=jnp.float32)        # (Cb, N*L)
    # Patch-matrix rows [0, Kmax*Cb): the three wide "same" convolutions.
    _build_im2col(z_bn, im2col_ref, col_mod, length, k_max)
    # Patch-matrix rows [Kmax*Cb, Kmax*Cb + C_pad): maxpool branch (zero-padded).
    pool = _maxpool3_flat(x, first, last)
    if pool.shape[0] < c_pad:
        pool = jnp.concatenate(
            [pool, jnp.zeros((c_pad - pool.shape[0], pool.shape[1]), pool.dtype)],
            axis=0)
    kb = k_max * cb
    im2col_ref[kb:kb + c_pad, :] = pool
    # ONE fused MXU matmul: output rows are [conv_k1, conv_k2, conv_k3, conv_mp].
    z = jnp.dot(w_block, im2col_ref[...], preferred_element_type=jnp.float32)  # (4F, N*L)
    return _selu(_batchnorm_rows(z, gamma, beta))


def _inception_block_kernel(x_ref, wb_ref, wblk_ref, wr_ref, gb_ref,
                            out_ref, im2col_ref, *,
                            n_batch, length, k_max, c_in, c_pad):
    cb = wb_ref.shape[1]
    out_ch = gb_ref.shape[0]

    # Hoisted column-index masks, built ONCE and reused by all three modules
    # (JAX does not CSE broadcast_in_dim).
    tile = jax.lax.broadcasted_iota(jnp.int32, (cb, length), 1)
    col_mod = jnp.concatenate([tile] * n_batch, axis=1)      # column index mod L, (Cb, N*L)
    row_mod = col_mod[0:1, :]
    first = row_mod == 0                                     # first column of each sequence
    last = row_mod == (length - 1)                           # last column of each sequence

    x = x_ref[...]
    gb = gb_ref[...]                      # (4F, 8): [g1, b1, g2, b2, g3, b3, gr, br]

    z = x
    for i in range(3):
        cin = c_in if i == 0 else out_ch
        w_bneck = wb_ref[i][:, :cin]
        z = _inception_module(z, w_bneck, wblk_ref[i],
                              gb[:, 2 * i:2 * i + 1], gb[:, 2 * i + 1:2 * i + 2],
                              im2col_ref, col_mod, first, last,
                              length=length, k_max=k_max, c_pad=c_pad)

    # Residual: Conv1d(1x1) -> BatchNorm1d.  The conv bias is exactly cancelled
    # by the training-mode BN mean subtraction, so it is never computed.
    r = jnp.dot(wr_ref[...], x, preferred_element_type=jnp.float32)
    r = _batchnorm_rows(r, gb[:, 6:7], gb[:, 7:8])
    out_ref[...] = _selu(z + r).astype(out_ref.dtype)


# --------------------------------- wrapper ------------------------------------
def inception_block_fwd(x, kp):
    """x: (N, C_in, L) f32; kp: kernel-ready params from prepare_params."""
    n, c_in, length = x.shape
    nl = n * length
    wb, wblk, wr, gb = kp["wb"], kp["wblk"], kp["wr"], kp["gb"]
    _, cb, c_pad = wb.shape
    out_ch = gb.shape[0]
    kc = wblk.shape[2] - c_pad
    k_max = kc // cb

    # Alignment contract: aligned im2col stores + lane-dense output stores.
    assert cb % 8 == 0, "bottleneck_channels must be a multiple of 8"
    assert length % 128 == 0, "sequence length must be a multiple of 128"
    assert nl % 128 == 0      # multiples of 256 best fill the v6e/v7x MXU width

    # (N, C, L) -> (C, N*L): channels on sublanes, batch*length on lanes.
    x_flat = jnp.transpose(x, (1, 0, 2)).reshape(c_in, nl).astype(jnp.float32)

    kernel = functools.partial(_inception_block_kernel, n_batch=n, length=length,
                               k_max=k_max, c_in=c_in, c_pad=c_pad)
    operands = (x_flat, wb, wblk, wr, gb)

    flops = 2 * nl * (cb * (c_in + 2 * out_ch)        # bottleneck 1x1 convs
                      + 3 * out_ch * (kc + c_pad)     # fused wide + maxpool matmuls
                      + out_ch * c_in)                # residual 1x1 conv
    bytes_accessed = 4 * (sum(op.size for op in operands) + out_ch * nl)
    vmem = functools.partial(pl.BlockSpec, memory_space=pltpu.MemorySpace.VMEM)

    out_flat = pl.pallas_call(
        kernel,
        out_shape=jax.ShapeDtypeStruct((out_ch, nl), jnp.float32),
        in_specs=[vmem() for _ in operands],
        out_specs=vmem(),
        scratch_shapes=[pltpu.VMEM((kc + c_pad, nl), jnp.float32)],
        compiler_params=pltpu.CompilerParams(vmem_limit_bytes=32 * 1024 * 1024),
        cost_estimate=pl.CostEstimate(flops=flops,
                                      transcendentals=4 * out_ch * nl,
                                      bytes_accessed=bytes_accessed),
    )(*operands)
    return jnp.transpose(out_flat.reshape(out_ch, n, length), (1, 0, 2))


# -------------------------- parameter set-up / repack --------------------------
def _conv_weight(key, co, ci, k):
    scale = 1.0 / jnp.sqrt(jnp.float32(ci * k))
    return jax.random.normal(key, (co, ci, k), jnp.float32) * scale   # torch layout


def init_params(key, in_channels, n_filters, bottleneck_channels, kernel_sizes):
    ks = tuple(kernel_sizes)
    assert all(k % 2 == 1 for k in ks), "kernel sizes must be odd for 'same' padding"
    out_ch = 4 * n_filters
    keys = jax.random.split(key, 20)
    it = iter(range(20))

    def module_params(cin):
        assert cin > 1  # bottleneck path only (see TODO at top)
        return {
            "w_bottleneck": _conv_weight(keys[next(it)], bottleneck_channels, cin, 1),
            "w1": _conv_weight(keys[next(it)], n_filters, bottleneck_channels, ks[0]),
            "w2": _conv_weight(keys[next(it)], n_filters, bottleneck_channels, ks[1]),
            "w3": _conv_weight(keys[next(it)], n_filters, bottleneck_channels, ks[2]),
            "w_mp": _conv_weight(keys[next(it)], n_filters, cin, 1),
            "bn_gamma": jnp.ones((out_ch,), jnp.float32),   # PyTorch BN default init
            "bn_beta": jnp.zeros((out_ch,), jnp.float32),
        }

    return {
        "m1": module_params(in_channels),
        "m2": module_params(out_ch),
        "m3": module_params(out_ch),
        "res_w": _conv_weight(keys[next(it)], out_ch, in_channels, 1),
        "res_b": jax.random.normal(keys[next(it)], (out_ch,), jnp.float32) * 0.05,
        "res_gamma": jnp.ones((out_ch,), jnp.float32),
        "res_beta": jnp.zeros((out_ch,), jnp.float32),
    }


def _wide_weight_matrix(ws, k_max):
    """Stack torch-layout (F, Cb, K) wide-conv weights into (3F, Kmax*Cb)."""
    mats = []
    for w in ws:
        f, cb, k = w.shape
        start = k_max // 2 - k // 2          # zero-pad taps to the Kmax grid
        full = jnp.zeros((f, k_max, cb), jnp.float32)
        full = full.at[:, start:start + k, :].set(jnp.transpose(w, (0, 2, 1)))
        mats.append(full.reshape(f, k_max * cb))
    return jnp.concatenate(mats, axis=0)


def prepare_params(params, kernel_sizes):
    """One-time (outside jit) repack of torch-layout params into 4 kernel operands."""
    k_max = max(kernel_sizes)
    cb, c_in = params["m1"]["w_bottleneck"].shape[:2]
    out_ch = params["m1"]["bn_gamma"].shape[0]
    n_filters = out_ch // 4
    c_pad = _round_up(max(c_in, out_ch), 8)
    kc = k_max * cb
    assert cb % 8 == 0, "bottleneck_channels must be a multiple of 8"

    def module(p, cin):
        # Bottleneck 1x1 weight, zero-padded on input channels to C_pad.
        wb_m = jnp.zeros((cb, c_pad), jnp.float32).at[:, :cin].set(
            p["w_bottleneck"][:, :, 0])
        # Block weight [[W_wide, 0], [0, W_maxpool]] -> one (4F, Kc+C_pad) matmul.
        blk = jnp.zeros((out_ch, kc + c_pad), jnp.float32)
        blk = blk.at[:3 * n_filters, :kc].set(
            _wide_weight_matrix([p["w1"], p["w2"], p["w3"]], k_max))
        blk = blk.at[3 * n_filters:, kc:kc + cin].set(p["w_mp"][:, :, 0])
        return wb_m, blk, p["bn_gamma"], p["bn_beta"]

    wbs, blks, cols = [], [], []
    for name, cin in (("m1", c_in), ("m2", out_ch), ("m3", out_ch)):
        wb_m, blk, g, b = module(params[name], cin)
        wbs.append(wb_m); blks.append(blk); cols += [g, b]
    cols += [params["res_gamma"], params["res_beta"]]
    # NOTE: params["res_b"] intentionally unused -- cancelled by training-mode BN.
    return {
        "wb": jnp.stack(wbs),            # (3, Cb, C_pad)
        "wblk": jnp.stack(blks),         # (3, 4F, Kmax*Cb + C_pad)
        "wr": params["res_w"][:, :, 0],  # (4F, C_in)
        "gb": jnp.stack(cols, axis=1),   # (4F, 8): g1,b1,g2,b2,g3,b3,gr,br
    }


# --------------------------- pure-JAX reference (check) ------------------------
def _ref_conv1d(x, w, b=None):
    pad = w.shape[2] // 2
    y = jax.lax.conv_general_dilated(
        x, w, window_strides=(1,), padding=[(pad, pad)],
        dimension_numbers=("NCH", "OIH", "NCH"))
    if b is not None:
        y = y + b[None, :, None]
    return y


def _ref_maxpool3(x):
    return jax.lax.reduce_window(
        x, -jnp.inf, jax.lax.max, window_dimensions=(1, 1, 3),
        window_strides=(1, 1, 1), padding=((0, 0), (0, 0), (1, 1)))


def _ref_bn(x, gamma, beta):
    mean = jnp.mean(x, axis=(0, 2), keepdims=True)
    var = jnp.mean(jnp.square(x - mean), axis=(0, 2), keepdims=True)
    return (x - mean) * jax.lax.rsqrt(var + BN_EPS) * gamma[None, :, None] \
        + beta[None, :, None]


def _ref_module(x, p):
    zb = _ref_conv1d(x, p["w_bottleneck"])
    zmp = _ref_maxpool3(x)
    z = jnp.concatenate([_ref_conv1d(zb, p["w1"]),
                         _ref_conv1d(zb, p["w2"]),
                         _ref_conv1d(zb, p["w3"]),
                         _ref_conv1d(zmp, p["w_mp"])], axis=1)
    return jax.nn.selu(_ref_bn(z, p["bn_gamma"], p["bn_beta"]))


def _ref_block(x, params):
    z = _ref_module(x, params["m1"])
    z = _ref_module(z, params["m2"])
    z = _ref_module(z, params["m3"])
    r = _ref_bn(_ref_conv1d(x, params["res_w"], params["res_b"]),
                params["res_gamma"], params["res_beta"])
    return jax.nn.selu(z + r)


# ------------------------------------ main -------------------------------------
if __name__ == "__main__":
    # Small shapes consistent with the module: batch=2, in_channels=4, length=128.
    N, C_IN, L = 2, 4, 128
    N_FILTERS = 8            # -> 4 * n_filters = 32 output channels
    BOTTLENECK = 8
    KERNEL_SIZES = (9, 19, 39)

    root = jax.random.PRNGKey(0)
    k_x, k_p = jax.random.split(root)
    x = jax.random.normal(k_x, (N, C_IN, L), jnp.float32)
    params = init_params(k_p, C_IN, N_FILTERS, BOTTLENECK, KERNEL_SIZES)
    kparams = prepare_params(params, KERNEL_SIZES)   # one-time weight repack

    fwd = jax.jit(inception_block_fwd)
    out = jax.block_until_ready(fwd(x, kparams))

    assert out.shape == (N, 4 * N_FILTERS, L), out.shape
    assert bool(jnp.all(jnp.isfinite(out)))

    ref = _ref_block(x, params)
    assert bool(jnp.allclose(out, ref, rtol=5e-3, atol=5e-3)), \
        float(jnp.max(jnp.abs(out - ref)))

    print("KERNEL_OK")
</pallas_src>

<mosaic_0001>
module attributes {stable_mosaic.version = 11 : i64} {
  func.func @_inception_block_kernel(%arg0: memref<4x256xf32, #tpu.memory_space<vmem>>, %arg1: memref<3x8x32xf32, #tpu.memory_space<vmem>>, %arg2: memref<3x32x344xf32, #tpu.memory_space<vmem>>, %arg3: memref<32x4xf32, #tpu.memory_space<vmem>>, %arg4: memref<32x8xf32, #tpu.memory_space<vmem>>, %arg5: memref<32x256xf32, #tpu.memory_space<vmem>>, %arg6: memref<344x256xf32, #tpu.memory_space<vmem>>) attributes {dimension_semantics = [], scalar_prefetch = 0 : i64, scratch_operands = 1 : i64, tpu.core_type = #tpu.core_type<tc>} {
    %0 = tpu.iota {dimensions = array<i32: 1>} : vector<8x128xi32>
    %1 = tpu.concatenate %0, %0 in 1 : vector<8x128xi32>, vector<8x128xi32> -> vector<8x256xi32>
    %2 = vector.extract_strided_slice %1 {offsets = [0, 0], sizes = [1, 256], strides = [1, 1]} : vector<8x256xi32> to vector<1x256xi32>
    %c0_i32 = arith.constant 0 : i32
    %3 = vector.broadcast %c0_i32 : i32 to vector<1x256xi32>
    %4 = arith.cmpi eq, %2, %3 : vector<1x256xi32>
    %c127_i32 = arith.constant 127 : i32
    %5 = vector.broadcast %c127_i32 : i32 to vector<1x256xi32>
    %6 = arith.cmpi eq, %2, %5 : vector<1x256xi32>
    %c0 = arith.constant 0 : index
    %c0_0 = arith.constant 0 : index
    %7 = vector.load %arg0[%c0, %c0_0] : memref<4x256xf32, #tpu.memory_space<vmem>>, vector<4x256xf32>
    %c0_1 = arith.constant 0 : index
    %c0_2 = arith.constant 0 : index
    %8 = vector.load %arg4[%c0_1, %c0_2] : memref<32x8xf32, #tpu.memory_space<vmem>>, vector<32x8xf32>
    %c0_3 = arith.constant 0 : index
    %c0_4 = arith.constant 0 : index
    %c0_5 = arith.constant 0 : index
    %9 = vector.load %arg1[%c0_3, %c0_4, %c0_5] : memref<3x8x32xf32, #tpu.memory_space<vmem>>, vector<1x8x32xf32>
    %10 = vector.shape_cast %9 : vector<1x8x32xf32> to vector<8x32xf32>
    %11 = vector.extract_strided_slice %10 {offsets = [0, 0], sizes = [8, 4], strides = [1, 1]} : vector<8x32xf32> to vector<8x4xf32>
    %c0_6 = arith.constant 0 : index
    %c0_7 = arith.constant 0 : index
    %c0_8 = arith.constant 0 : index
    %12 = vector.load %arg2[%c0_6, %c0_7, %c0_8] : memref<3x32x344xf32, #tpu.memory_space<vmem>>, vector<1x32x344xf32>
    %13 = vector.shape_cast %12 : vector<1x32x344xf32> to vector<32x344xf32>
    %14 = vector.extract_strided_slice %8 {offsets = [0, 0], sizes = [32, 1], strides = [1, 1]} : vector<32x8xf32> to vector<32x1xf32>
    %15 = vector.extract_strided_slice %8 {offsets = [0, 1], sizes = [32, 1], strides = [1, 1]} : vector<32x8xf32> to vector<32x1xf32>
    %cst = arith.constant dense<0.000000e+00> : vector<8x256xf32>
    %16 = tpu.matmul %11, %7, %cst {dimension_numbers = #tpu.dot_dimension_numbers<[1], [0], [0], [1], [0, 0, 1, 1], [], []>} : vector<8x4xf32>, vector<4x256xf32>, vector<8x256xf32> -> vector<8x256xf32>
    %c19_i32 = arith.constant 19 : i32
    %17 = tpu.dynamic_rotate %16 by %c19_i32 dim 1 : vector<8x256xf32>, i32 -> vector<8x256xf32>
    %c19_i32_9 = arith.constant 19 : i32
    %18 = vector.broadcast %c19_i32_9 : i32 to vector<8x256xi32>
    %19 = arith.cmpi slt, %1, %18 : vector<8x256xi32>
    %cst_10 = arith.constant 0.000000e+00 : f32
    %20 = vector.broadcast %cst_10 : f32 to vector<8x256xf32>
    %21 = arith.select %19, %20, %17 : vector<8x256xi1>, vector<8x256xf32>
    %c0_11 = arith.constant 0 : index
    %c0_12 = arith.constant 0 : index
    %22 = vector.load %arg6[%c0_11, %c0_12] : memref<344x256xf32, #tpu.memory_space<vmem>>, vector<8x256xf32>
    tpu.vector_store %arg6[%c0_11, %c0_12], %21 {strides = array<i32>} : memref<344x256xf32, #tpu.memory_space<vmem>>, vector<8x256xf32>,
    %c18_i32 = arith.constant 18 : i32
    %23 = tpu.dynamic_rotate %16 by %c18_i32 dim 1 : vector<8x256xf32>, i32 -> vector<8x256xf32>
    %c18_i32_13 = arith.constant 18 : i32
    %24 = vector.broadcast %c18_i32_13 : i32 to vector<8x256xi32>
    %25 = arith.cmpi slt, %1, %24 : vector<8x256xi32>
    %cst_14 = arith.constant 0.000000e+00 : f32
    %26 = vector.broadcast %cst_14 : f32 to vector<8x256xf32>
    %27 = arith.select %25, %26, %23 : vector<8x256xi1>, vector<8x256xf32>
    %c8 = arith.constant 8 : index
    %c0_15 = arith.constant 0 : index
    %28 = vector.load %arg6[%c8, %c0_15] : memref<344x256xf32, #tpu.memory_space<vmem>>, vector<8x256xf32>
    tpu.vector_store %arg6[%c8, %c0_15], %27 {strides = array<i32>} : memref<344x256xf32, #tpu.memory_space<vmem>>, vector<8x256xf32>,
    %c17_i32 = arith.constant 17 : i32
    %29 = tpu.dynamic_rotate %16 by %c17_i32 dim 1 : vector<8x256xf32>, i32 -> vector<8x256xf32>
    %c17_i32_16 = arith.constant 17 : i32
    %30 = vector.broadcast %c17_i32_16 : i32 to vector<8x256xi32>
    %31 = arith.cmpi slt, %1, %30 : vector<8x256xi32>
    %cst_17 = arith.constant 0.000000e+00 : f32
    %32 = vector.broadcast %cst_17 : f32 to vector<8x256xf32>
    %33 = arith.select %31, %32, %29 : vector<8x256xi1>, vector<8x256xf32>
    %c16 = arith.constant 16 : index
    %c0_18 = arith.constant 0 : index
    %34 = vector.load %arg6[%c16, %c0_18] : memref<344x256xf32, #tpu.memory_space<vmem>>, vector<8x256xf32>
    tpu.vector_store %arg6[%c16, %c0_18], %33 {strides = array<i32>} : memref<344x256xf32, #tpu.memory_space<vmem>>, vector<8x256xf32>,
    %c16_i32 = arith.constant 16 : i32
    %35 = tpu.dynamic_rotate %16 by %c16_i32 dim 1 : vector<8x256xf32>, i32 -> vector<8x256xf32>
    %c16_i32_19 = arith.constant 16 : i32
    %36 = vector.broadcast %c16_i32_19 : i32 to vector<8x256xi32>
    %37 = arith.cmpi slt, %1, %36 : vector<8x256xi32>
    %cst_20 = arith.constant 0.000000e+00 : f32
    %38 = vector.broadcast %cst_20 : f32 to vector<8x256xf32>
    %39 = arith.select %37, %38, %35 : vector<8x256xi1>, vector<8x256xf32>
    %c24 = arith.constant 24 : index
    %c0_21 = arith.constant 0 : index
    %40 = vector.load %arg6[%c24, %c0_21] : memref<344x256xf32, #tpu.memory_space<vmem>>, vector<8x256xf32>
    tpu.vector_store %arg6[%c24, %c0_21], %39 {strides = array<i32>} : memref<344x256xf32, #tpu.memory_space<vmem>>, vector<8x256xf32>,
    %c15_i32 = arith.constant 15 : i32
    %41 = tpu.dynamic_rotate %16 by %c15_i32 dim 1 : vector<8x256xf32>, i32 -> vector<8x256xf32>
    %c15_i32_22 = arith.constant 15 : i32
    %42 = vector.broadcast %c15_i32_22 : i32 to vector<8x256xi32>
    %43 = arith.cmpi slt, %1, %42 : vector<8x256xi32>
    %cst_23 = arith.constant 0.000000e+00 : f32
    %44 = vector.broadcast %cst_23 : f32 to vector<8x256xf32>
    %45 = arith.select %43, %44, %41 : vector<8x256xi1>, vector<8x256xf32>
    %c32 = arith.constant 32 : index
    %c0_24 = arith.constant 0 : index
    %46 = vector.load %arg6[%c32, %c0_24] : memref<344x256xf32, #tpu.memory_space<vmem>>, vector<8x256xf32>
    tpu.vector_store %arg6[%c32, %c0_24], %45 {strides = array<i32>} : memref<344x256xf32, #tpu.memory_space<vmem>>, vector<8x256xf32>,
    %c14_i32 = arith.constant 14 : i32
    %47 = tpu.dynamic_rotate %16 by %c14_i32 dim 1 : vector<8x256xf32>, i32 -> vector<8x256xf32>
    %c14_i32_25 = arith.constant 14 : i32
    %48 = vector.broadcast %c14_i32_25 : i32 to vector<8x256xi32>
    %49 = arith.cmpi slt, %1, %48 : vector<8x256xi32>
    %cst_26 = arith.constant 0.000000e+00 : f32
    %50 = vector.broadcast %cst_26 : f32 to vector<8x256xf32>
    %51 = arith.select %49, %50, %47 : vector<8x256xi1>, vector<8x256xf32>
    %c40 = arith.constant 40 : index
    %c0_27 = arith.constant 0 : index
    %52 = vector.load %arg6[%c40, %c0_27] : memref<344x256xf32, #tpu.memory_space<vmem>>, vector<8x256xf32>
    tpu.vector_store %arg6[%c40, %c0_27], %51 {strides = array<i32>} : memref<344x256xf32, #tpu.memory_space<vmem>>, vector<8x256xf32>,
    %c13_i32 = arith.constant 13 : i32
    %53 = tpu.dynamic_rotate %16 by %c13_i32 dim 1 : vector<8x256xf32>, i32 -> vector<8x256xf32>
    %c13_i32_28 = arith.constant 13 : i32
    %54 = vector.broadcast %c13_i32_28 : i32 to vector<8x256xi32>
    %55 = arith.cmpi slt, %1, %54 : vector<8x256xi32>
    %cst_29 = arith.constant 0.000000e+00 : f32
    %56 = vector.broadcast %cst_29 : f32 to vector<8x256xf32>
    %57 = arith.select %55, %56, %53 : vector<8x256xi1>, vector<8x256xf32>
    %c48 = arith.constant 48 : index
    %c0_30 = arith.constant 0 : index
    %58 = vector.load %arg6[%c48, %c0_30] : memref<344x256xf32, #tpu.memory_space<vmem>>, vector<8x256xf32>
    tpu.vector_store %arg6[%c48, %c0_30], %57 {strides = array<i32>} : memref<344x256xf32, #tpu.memory_space<vmem>>, vector<8x256xf32>,
    %c12_i32 = arith.constant 12 : i32
    %59 = tpu.dynamic_rotate %16 by %c12_i32 dim 1 : vector<8x256xf32>, i32 -> vector<8x256xf32>
    %c12_i32_31 = arith.constant 12 : i32
    %60 = vector.broadcast %c12_i32_31 : i32 to vector<8x256xi32>
    %61 = arith.cmpi slt, %1, %60 : vector<8x256xi32>
    %cst_32 = arith.constant 0.000000e+00 : f32
    %62 = vector.broadcast %cst_32 : f32 to vector<8x256xf32>
    %63 = arith.select %61, %62, %59 : vector<8x256xi1>, vector<8x256xf32>
    %c56 = arith.constant 56 : index
    %c0_33 = arith.constant 0 : index
    %64 = vector.load %arg6[%c56, %c0_33] : memref<344x256xf32, #tpu.memory_space<vmem>>, vector<8x256xf32>
    tpu.vector_store %arg6[%c56, %c0_33], %63 {strides = array<i32>} : memref<344x256xf32, #tpu.memory_space<vmem>>, vector<8x256xf32>,
    %c11_i32 = arith.constant 11 : i32
    %65 = tpu.dynamic_rotate %16 by %c11_i32 dim 1 : vector<8x256xf32>, i32 -> vector<8x256xf32>
    %c11_i32_34 = arith.constant 11 : i32
    %66 = vector.broadcast %c11_i32_34 : i32 to vector<8x256xi32>
    %67 = arith.cmpi slt, %1, %66 : vector<8x256xi32>
    %cst_35 = arith.constant 0.000000e+00 : f32
    %68 = vector.broadcast %cst_35 : f32 to vector<8x256xf32>
    %69 = arith.select %67, %68, %65 : vector<8x256xi1>, vector<8x256xf32>
    %c64 = arith.constant 64 : index
    %c0_36 = arith.constant 0 : index
    %70 = vector.load %arg6[%c64, %c0_36] : memref<344x256xf32, #tpu.memory_space<vmem>>, vector<8x256xf32>
    tpu.vector_store %arg6[%c64, %c0_36], %69 {strides = array<i32>} : memref<344x256xf32, #tpu.memory_space<vmem>>, vector<8x256xf32>,
    %c10_i32 = arith.constant 10 : i32
    %71 = tpu.dynamic_rotate %16 by %c10_i32 dim 1 : vector<8x256xf32>, i32 -> vector<8x256xf32>
    %c10_i32_37 = arith.constant 10 : i32
    %72 = vector.broadcast %c10_i32_37 : i32 to vector<8x256xi32>
    %73 = arith.cmpi slt, %1, %72 : vector<8x256xi32>
    %cst_38 = arith.constant 0.000000e+00 : f32
    %74 = vector.broadcast %cst_38 : f32 to vector<8x256xf32>
    %75 = arith.select %73, %74, %71 : vector<8x256xi1>, vector<8x256xf32>
    %c72 = arith.constant 72 : index
    %c0_39 = arith.constant 0 : index
    %76 = vector.load %arg6[%c72, %c0_39] : memref<344x256xf32, #tpu.memory_space<vmem>>, vector<8x256xf32>
    tpu.vector_store %arg6[%c72, %c0_39], %75 {strides = array<i32>} : memref<344x256xf32, #tpu.memory_space<vmem>>, vector<8x256xf32>,
    %c9_i32 = arith.constant 9 : i32
    %77 = tpu.dynamic_rotate %16 by %c9_i32 dim 1 : vector<8x256xf32>, i32 -> vector<8x256xf32>
    %c9_i32_40 = arith.constant 9 : i32
    %78 = vector.broadcast %c9_i32_40 : i32 to vector<8x256xi32>
    %79 = arith.cmpi slt, %1, %78 : vector<8x256xi32>
    %cst_41 = arith.constant 0.000000e+00 : f32
    %80 = vector.broadcast %cst_41 : f32 to vector<8x256xf32>
    %81 = arith.select %79, %80, %77 : vector<8x256xi1>, vector<8x256xf32>
    %c80 = arith.constant 80 : index
    %c0_42 = arith.constant 0 : index
    %82 = vector.load %arg6[%c80, %c0_42] : memref<344x256xf32, #tpu.memory_space<vmem>>, vector<8x256xf32>
    tpu.vector_store %arg6[%c80, %c0_42], %81 {strides = array<i32>} : memref<344x256xf32, #tpu.memory_space<vmem>>, vector<8x256xf32>,
    %c8_i32 = arith.constant 8 : i32
    %83 = tpu.dynamic_rotate %16 by %c8_i32 dim 1 : vector<8x256xf32>, i32 -> vector<8x256xf32>
    %c8_i32_43 = arith.constant 8 : i32
    %84 = vector.broadcast %c8_i32_43 : i32 to vector<8x256xi32>
    %85 = arith.cmpi slt, %1, %84 : vector<8x256xi32>
    %cst_44 = arith.constant 0.000000e+00 : f32
    %86 = vector.broadcast %cst_44 : f32 to vector<8x256xf32>
    %87 = arith.select %85, %86, %83 : vector<8x256xi1>, vector<8x256xf32>
    %c88 = arith.constant 88 : index
    %c0_45 = arith.constant 0 : index
    %88 = vector.load %arg6[%c88, %c0_45] : memref<344x256xf32, #tpu.memory_space<vmem>>, vector<8x256xf32>
    tpu.vector_store %arg6[%c88, %c0_45], %87 {strides = array<i32>} : memref<344x256xf32, #tpu.memory_space<vmem>>, vector<8x256xf32>,
    %c7_i32 = arith.constant 7 : i32
    %89 = tpu.dynamic_rotate %16 by %c7_i32 dim 1 : vector<8x256xf32>, i32 -> vector<8x256xf32>
    %c7_i32_46 = arith.constant 7 : i32
    %90 = vector.broadcast %c7_i32_46 : i32 to vector<8x256xi32>
    %91 = arith.cmpi slt, %1, %90 : vector<8x256xi32>
    %cst_47 = arith.constant 0.000000e+00 : f32
    %92 = vector.broadcast %cst_47 : f32 to vector<8x256xf32>
    %93 = arith.select %91, %92, %89 : vector<8x256xi1>, vector<8x256xf32>
    %c96 = arith.constant 96 : index
    %c0_48 = arith.constant 0 : index
    %94 = vector.load %arg6[%c96, %c0_48] : memref<344x256xf32, #tpu.memory_space<vmem>>, vector<8x256xf32>
    tpu.vector_store %arg6[%c96, %c0_48], %93 {strides = array<i32>} : memref<344x256xf32, #tpu.memory_space<vmem>>, vector<8x256xf32>,
    %c6_i32 = arith.constant 6 : i32
    %95 = tpu.dynamic_rotate %16 by %c6_i32 dim 1 : vector<8x256xf32>, i32 -> vector<8x256xf32>
    %c6_i32_49 = arith.constant 6 : i32
    %96 = vector.broadcast %c6_i32_49 : i32 to vector<8x256xi32>
    %97 = arith.cmpi slt, %1, %96 : vector<8x256xi32>
    %cst_50 = arith.constant 0.000000e+00 : f32
    %98 = vector.broadcast %cst_50 : f32 to vector<8x256xf32>
    %99 = arith.select %97, %98, %95 : vector<8x256xi1>, vector<8x256xf32>
    %c104 = arith.constant 104 : index
    %c0_51 = arith.constant 0 : index
    %100 = vector.load %arg6[%c104, %c0_51] : memref<344x256xf32, #tpu.memory_space<vmem>>, vector<8x256xf32>
    tpu.vector_store %arg6[%c104, %c0_51], %99 {strides = array<i32>} : memref<344x256xf32, #tpu.memory_space<vmem>>, vector<8x256xf32>,
    %c5_i32 = arith.constant 5 : i32
    %101 = tpu.dynamic_rotate %16 by %c5_i32 dim 1 : vector<8x256xf32>, i32 -> vector<8x256xf32>
    %c5_i32_52 = arith.constant 5 : i32
    %102 = vector.broadcast %c5_i32_52 : i32 to vector<8x256xi32>
    %103 = arith.cmpi slt, %1, %102 : vector<8x256xi32>
    %cst_53 = arith.constant 0.000000e+00 : f32
    %104 = vector.broadcast %cst_53 : f32 to vector<8x256xf32>
    %105 = arith.select %103, %104, %101 : vector<8x256xi1>, vector<8x256xf32>
    %c112 = arith.constant 112 : index
    %c0_54 = arith.constant 0 : index
    %106 = vector.load %arg6[%c112, %c0_54] : memref<344x256xf32, #tpu.memory_space<vmem>>, vector<8x256xf32>
    tpu.vector_store %arg6[%c112, %c0_54], %105 {strides = array<i32>} : memref<344x256xf32, #tpu.memory_space<vmem>>, vector<8x256xf32>,
    %c4_i32 = arith.constant 4 : i32
    %107 = tpu.dynamic_rotate %16 by %c4_i32 dim 1 : vector<8x256xf32>, i32 -> vector<8x256xf32>
    %c4_i32_55 = arith.constant 4 : i32
    %108 = vector.broadcast %c4_i32_55 : i32 to vector<8x256xi32>
    %109 = arith.cmpi slt, %1, %108 : vector<8x256xi32>
    %cst_56 = arith.constant 0.000000e+00 : f32
    %110 = vector.broadcast %cst_56 : f32 to vector<8x256xf32>
    %111 = arith.select %109, %110, %107 : vector<8x256xi1>, vector<8x256xf32>
    %c120 = arith.constant 120 : index
    %c0_57 = arith.constant 0 : index
    %112 = vector.load %arg6[%c120, %c0_57] : memref<344x256xf32, #tpu.memory_space<vmem>>, vector<8x256xf32>
    tpu.vector_store %arg6[%c120, %c0_57], %111 {strides = array<i32>} : memref<344x256xf32, #tpu.memory_space<vmem>>, vector<8x256xf32>,
    %c3_i32 = arith.constant 3 : i32
    %113 = tpu.dynamic_rotate %16 by %c3_i32 dim 1 : vector<8x256xf32>, i32 -> vector<8x256xf32>
    %c3_i32_58 = arith.constant 3 : i32
    %114 = vector.broadcast %c3_i32_58 : i32 to vector<8x256xi32>
    %115 = arith.cmpi slt, %1, %114 : vector<8x256xi32>
    %cst_59 = arith.constant 0.000000e+00 : f32
    %116 = vector.broadcast %cst_59 : f32 to vector<8x256xf32>
    %117 = arith.select %115, %116, %113 : vector<8x256xi1>, vector<8x256xf32>
    %c128 = arith.constant 128 : index
    %c0_60 = arith.constant 0 : index
    %118 = vector.load %arg6[%c128, %c0_60] : memref<344x256xf32, #tpu.memory_space<vmem>>, vector<8x256xf32>
    tpu.vector_store %arg6[%c128, %c0_60], %117 {strides = array<i32>} : memref<344x256xf32, #tpu.memory_space<vmem>>, vector<8x256xf32>,
    %c2_i32 = arith.constant 2 : i32
    %119 = tpu.dynamic_rotate %16 by %c2_i32 dim 1 : vector<8x256xf32>, i32 -> vector<8x256xf32>
    %c2_i32_61 = arith.constant 2 : i32
    %120 = vector.broadcast %c2_i32_61 : i32 to vector<8x256xi32>
    %121 = arith.cmpi slt, %1, %120 : vector<8x256xi32>
    %cst_62 = arith.constant 0.000000e+00 : f32
    %122 = vector.broadcast %cst_62 : f32 to vector<8x256xf32>
    %123 = arith.select %121, %122, %119 : vector<8x256xi1>, vector<8x256xf32>
    %c136 = arith.constant 136 : index
    %c0_63 = arith.constant 0 : index
    %124 = vector.load %arg6[%c136, %c0_63] : memref<344x256xf32, #tpu.memory_space<vmem>>, vector<8x256xf32>
    tpu.vector_store %arg6[%c136, %c0_63], %123 {strides = array<i32>} : memref<344x256xf32, #tpu.memory_space<vmem>>, vector<8x256xf32>,
    %c1_i32 = arith.constant 1 : i32
    %125 = tpu.dynamic_rotate %16 by %c1_i32 dim 1 : vector<8x256xf32>, i32 -> vector<8x256xf32>
    %c1_i32_64 = arith.constant 1 : i32
    %126 = vector.broadcast %c1_i32_64 : i32 to vector<8x256xi32>
    %127 = arith.cmpi slt, %1, %126 : vector<8x256xi32>
    %cst_65 = arith.constant 0.000000e+00 : f32
    %128 = vector.broadcast %cst_65 : f32 to vector<8x256xf32>
    %129 = arith.select %127, %128, %125 : vector<8x256xi1>, vector<8x256xf32>
    %c144 = arith.constant 144 : index
    %c0_66 = arith.constant 0 : index
    %130 = vector.load %arg6[%c144, %c0_66] : memref<344x256xf32, #tpu.memory_space<vmem>>, vector<8x256xf32>
    tpu.vector_store %arg6[%c144, %c0_66], %129 {strides = array<i32>} : memref<344x256xf32, #tpu.memory_space<vmem>>, vector<8x256xf32>,
    %c152 = arith.constant 152 : index
    %c0_67 = arith.constant 0 : index
    %131 = vector.load %arg6[%c152, %c0_67] : memref<344x256xf32, #tpu.memory_space<vmem>>, vector<8x256xf32>
    tpu.vector_store %arg6[%c152, %c0_67], %16 {strides = array<i32>} : memref<344x256xf32, #tpu.memory_space<vmem>>, vector<8x256xf32>,
    %c255_i32 = arith.constant 255 : i32
    %132 = tpu.dynamic_rotate %16 by %c255_i32 dim 1 : vector<8x256xf32>, i32 -> vector<8x256xf32>
    %c127_i32_68 = arith.constant 127 : i32
    %133 = vector.broadcast %c127_i32_68 : i32 to vector<8x256xi32>
    %134 = arith.cmpi sge, %1, %133 : vector<8x256xi32>
    %cst_69 = arith.constant 0.000000e+00 : f32
    %135 = vector.broadcast %cst_69 : f32 to vector<8x256xf32>
    %136 = arith.select %134, %135, %132 : vector<8x256xi1>, vector<8x256xf32>
    %c160 = arith.constant 160 : index
    %c0_70 = arith.constant 0 : index
    %137 = vector.load %arg6[%c160, %c0_70] : memref<344x256xf32, #tpu.memory_space<vmem>>, vector<8x256xf32>
    tpu.vector_store %arg6[%c160, %c0_70], %136 {strides = array<i32>} : memref<344x256xf32, #tpu.memory_space<vmem>>, vector<8x256xf32>,
    %c254_i32 = arith.constant 254 : i32
    %138 = tpu.dynamic_rotate %16 by %c254_i32 dim 1 : vector<8x256xf32>, i32 -> vector<8x256xf32>
    %c126_i32 = arith.constant 126 : i32
    %139 = vector.broadcast %c126_i32 : i32 to vector<8x256xi32>
    %140 = arith.cmpi sge, %1, %139 : vector<8x256xi32>
    %cst_71 = arith.constant 0.000000e+00 : f32
    %141 = vector.broadcast %cst_71 : f32 to vector<8x256xf32>
    %142 = arith.select %140, %141, %138 : vector<8x256xi1>, vector<8x256xf32>
    %c168 = arith.constant 168 : index
    %c0_72 = arith.constant 0 : index
    %143 = vector.load %arg6[%c168, %c0_72] : memref<344x256xf32, #tpu.memory_space<vmem>>, vector<8x256xf32>
    tpu.vector_store %arg6[%c168, %c0_72], %142 {strides = array<i32>} : memref<344x256xf32, #tpu.memory_space<vmem>>, vector<8x256xf32>,
    %c253_i32 = arith.constant 253 : i32
    %144 = tpu.dynamic_rotate %16 by %c253_i32 dim 1 : vector<8x256xf32>, i32 -> vector<8x256xf32>
    %c125_i32 = arith.constant 125 : i32
    %145 = vector.broadcast %c125_i32 : i32 to vector<8x256xi32>
    %146 = arith.cmpi sge, %1, %145 : vector<8x256xi32>
    %cst_73 = arith.constant 0.000000e+00 : f32
    %147 = vector.broadcast %cst_73 : f32 to vector<8x256xf32>
    %148 = arith.select %146, %147, %144 : vector<8x256xi1>, vector<8x256xf32>
    %c176 = arith.constant 176 : index
    %c0_74 = arith.constant 0 : index
    %149 = vector.load %arg6[%c176, %c0_74] : memref<344x256xf32, #tpu.memory_space<vmem>>, vector<8x256xf32>
    tpu.vector_store %arg6[%c176, %c0_74], %148 {strides = array<i32>} : memref<344x256xf32, #tpu.memory_space<vmem>>, vector<8x256xf32>,
    %c252_i32 = arith.constant 252 : i32
    %150 = tpu.dynamic_rotate %16 by %c252_i32 dim 1 : vector<8x256xf32>, i32 -> vector<8x256xf32>
    %c124_i32 = arith.constant 124 : i32
    %151 = vector.broadcast %c124_i32 : i32 to vector<8x256xi32>
    %152 = arith.cmpi sge, %1, %151 : vector<8x256xi32>
    %cst_75 = arith.constant 0.000000e+00 : f32
    %153 = vector.broadcast %cst_75 : f32 to vector<8x256xf32>
    %154 = arith.select %152, %153, %150 : vector<8x256xi1>, vector<8x256xf32>
    %c184 = arith.constant 184 : index
    %c0_76 = arith.constant 0 : index
    %155 = vector.load %arg6[%c184, %c0_76] : memref<344x256xf32, #tpu.memory_space<vmem>>, vector<8x256xf32>
    tpu.vector_store %arg6[%c184, %c0_76], %154 {strides = array<i32>} : memref<344x256xf32, #tpu.memory_space<vmem>>, vector<8x256xf32>,
    %c251_i32 = arith.constant 251 : i32
    %156 = tpu.dynamic_rotate %16 by %c251_i32 dim 1 : vector<8x256xf32>, i32 -> vector<8x256xf32>
    %c123_i32 = arith.constant 123 : i32
    %157 = vector.broadcast %c123_i32 : i32 to vector<8x256xi32>
    %158 = arith.cmpi sge, %1, %157 : vector<8x256xi32>
    %cst_77 = arith.constant 0.000000e+00 : f32
    %159 = vector.broadcast %cst_77 : f32 to vector<8x256xf32>
    %160 = arith.select %158, %159, %156 : vector<8x256xi1>, vector<8x256xf32>
    %c192 = arith.constant 192 : index
    %c0_78 = arith.constant 0 : index
    %161 = vector.load %arg6[%c192, %c0_78] : memref<344x256xf32, #tpu.memory_space<vmem>>, vector<8x256xf32>
    tpu.vector_store %arg6[%c192, %c0_78], %160 {strides = array<i32>} : memref<344x256xf32, #tpu.memory_space<vmem>>, vector<8x256xf32>,
    %c250_i32 = arith.constant 250 : i32
    %162 = tpu.dynamic_rotate %16 by %c250_i32 dim 1 : vector<8x256xf32>, i32 -> vector<8x256xf32>
    %c122_i32 = arith.constant 122 : i32
    %163 = vector.broadcast %c122_i32 : i32 to vector<8x256xi32>
    %164 = arith.cmpi sge, %1, %163 : vector<8x256xi32>
    %cst_79 = arith.constant 0.000000e+00 : f32
    %165 = vector.broadcast %cst_79 : f32 to vector<8x256xf32>
    %166 = arith.select %164, %165, %162 : vector<8x256xi1>, vector<8x256xf32>
    %c200 = arith.constant 200 : index
    %c0_80 = arith.constant 0 : index
    %167 = vector.load %arg6[%c200, %c0_80] : memref<344x256xf32, #tpu.memory_space<vmem>>, vector<8x256xf32>
    tpu.vector_store %arg6[%c200, %c0_80], %166 {strides = array<i32>} : memref<344x256xf32, #tpu.memory_space<vmem>>, vector<8x256xf32>,
    %c249_i32 = arith.constant 249 : i32
    %168 = tpu.dynamic_rotate %16 by %c249_i32 dim 1 : vector<8x256xf32>, i32 -> vector<8x256xf32>
    %c121_i32 = arith.constant 121 : i32
    %169 = vector.broadcast %c121_i32 : i32 to vector<8x256xi32>
    %170 = arith.cmpi sge, %1, %169 : vector<8x256xi32>
    %cst_81 = arith.constant 0.000000e+00 : f32
    %171 = vector.broadcast %cst_81 : f32 to vector<8x256xf32>
    %172 = arith.select %170, %171, %168 : vector<8x256xi1>, vector<8x256xf32>
    %c208 = arith.constant 208 : index
    %c0_82 = arith.constant 0 : index
    %173 = vector.load %arg6[%c208, %c0_82] : memref<344x256xf32, #tpu.memory_space<vmem>>, vector<8x256xf32>
    tpu.vector_store %arg6[%c208, %c0_82], %172 {strides = array<i32>} : memref<344x256xf32, #tpu.memory_space<vmem>>, vector<8x256xf32>,
    %c248_i32 = arith.constant 248 : i32
    %174 = tpu.dynamic_rotate %16 by %c248_i32 dim 1 : vector<8x256xf32>, i32 -> vector<8x256xf32>
    %c120_i32 = arith.constant 120 : i32
    %175 = vector.broadcast %c120_i32 : i32 to vector<8x256xi32>
    %176 = arith.cmpi sge, %1, %175 : vector<8x256xi32>
    %cst_83 = arith.constant 0.000000e+00 : f32
    %177 = vector.broadcast %cst_83 : f32 to vector<8x256xf32>
    %178 = arith.select %176, %177, %174 : vector<8x256xi1>, vector<8x256xf32>
    %c216 = arith.constant 216 : index
    %c0_84 = arith.constant 0 : index
    %179 = vector.load %arg6[%c216, %c0_84] : memref<344x256xf32, #tpu.memory_space<vmem>>, vector<8x256xf32>
    tpu.vector_store %arg6[%c216, %c0_84], %178 {strides = array<i32>} : memref<344x256xf32, #tpu.memory_space<vmem>>, vector<8x256xf32>,
    %c247_i32 = arith.constant 247 : i32
    %180 = tpu.dynamic_rotate %16 by %c247_i32 dim 1 : vector<8x256xf32>, i32 -> vector<8x256xf32>
    %c119_i32 = arith.constant 119 : i32
    %181 = vector.broadcast %c119_i32 : i32 to vector<8x256xi32>
    %182 = arith.cmpi sge, %1, %181 : vector<8x256xi32>
    %cst_85 = arith.constant 0.000000e+00 : f32
    %183 = vector.broadcast %cst_85 : f32 to vector<8x256xf32>
    %184 = arith.select %182, %183, %180 : vector<8x256xi1>, vector<8x256xf32>
    %c224 = arith.constant 224 : index
    %c0_86 = arith.constant 0 : index
    %185 = vector.load %arg6[%c224, %c0_86] : memref<344x256xf32, #tpu.memory_space<vmem>>, vector<8x256xf32>
    tpu.vector_store %arg6[%c224, %c0_86], %184 {strides = array<i32>} : memref<344x256xf32, #tpu.memory_space<vmem>>, vector<8x256xf32>,
    %c246_i32 = arith.constant 246 : i32
    %186 = tpu.dynamic_rotate %16 by %c246_i32 dim 1 : vector<8x256xf32>, i32 -> vector<8x256xf32>
    %c118_i32 = arith.constant 118 : i32
    %187 = vector.broadcast %c118_i32 : i32 to vector<8x256xi32>
    %188 = arith.cmpi sge, %1, %187 : vector<8x256xi32>
    %cst_87 = arith.constant 0.000000e+00 : f32
    %189 = vector.broadcast %cst_87 : f32 to vector<8x256xf32>
    %190 = arith.select %188, %189, %186 : vector<8x256xi1>, vector<8x256xf32>
    %c232 = arith.constant 232 : index
    %c0_88 = arith.constant 0 : index
    %191 = vector.load %arg6[%c232, %c0_88] : memref<344x256xf32, #tpu.memory_space<vmem>>, vector<8x256xf32>
    tpu.vector_store %arg6[%c232, %c0_88], %190 {strides = array<i32>} : memref<344x256xf32, #tpu.memory_space<vmem>>, vector<8x256xf32>,
    %c245_i32 = arith.constant 245 : i32
    %192 = tpu.dynamic_rotate %16 by %c245_i32 dim 1 : vector<8x256xf32>, i32 -> vector<8x256xf32>
    %c117_i32 = arith.constant 117 : i32
    %193 = vector.broadcast %c117_i32 : i32 to vector<8x256xi32>
    %194 = arith.cmpi sge, %1, %193 : vector<8x256xi32>
    %cst_89 = arith.constant 0.000000e+00 : f32
    %195 = vector.broadcast %cst_89 : f32 to vector<8x256xf32>
    %196 = arith.select %194, %195, %192 : vector<8x256xi1>, vector<8x256xf32>
    %c240 = arith.constant 240 : index
    %c0_90 = arith.constant 0 : index
    %197 = vector.load %arg6[%c240, %c0_90] : memref<344x256xf32, #tpu.memory_space<vmem>>, vector<8x256xf32>
    tpu.vector_store %arg6[%c240, %c0_90], %196 {strides = array<i32>} : memref<344x256xf32, #tpu.memory_space<vmem>>, vector<8x256xf32>,
    %c244_i32 = arith.constant 244 : i32
    %198 = tpu.dynamic_rotate %16 by %c244_i32 dim 1 : vector<8x256xf32>, i32 -> vector<8x256xf32>
    %c116_i32 = arith.constant 116 : i32
    %199 = vector.broadcast %c116_i32 : i32 to vector<8x256xi32>
    %200 = arith.cmpi sge, %1, %199 : vector<8x256xi32>
    %cst_91 = arith.constant 0.000000e+00 : f32
    %201 = vector.broadcast %cst_91 : f32 to vector<8x256xf32>
    %202 = arith.select %200, %201, %198 : vector<8x256xi1>, vector<8x256xf32>
    %c248 = arith.constant 248 : index
    %c0_92 = arith.constant 0 : index
    %203 = vector.load %arg6[%c248, %c0_92] : memref<344x256xf32, #tpu.memory_space<vmem>>, vector<8x256xf32>
    tpu.vector_store %arg6[%c248, %c0_92], %202 {strides = array<i32>} : memref<344x256xf32, #tpu.memory_space<vmem>>, vector<8x256xf32>,
    %c243_i32 = arith.constant 243 : i32
    %204 = tpu.dynamic_rotate %16 by %c243_i32 dim 1 : vector<8x256xf32>, i32 -> vector<8x256xf32>
    %c115_i32 = arith.constant 115 : i32
    %205 = vector.broadcast %c115_i32 : i32 to vector<8x256xi32>
    %206 = arith.cmpi sge, %1, %205 : vector<8x256xi32>
    %cst_93 = arith.constant 0.000000e+00 : f32
    %207 = vector.broadcast %cst_93 : f32 to vector<8x256xf32>
    %208 = arith.select %206, %207, %204 : vector<8x256xi1>, vector<8x256xf32>
    %c256 = arith.constant 256 : index
    %c0_94 = arith.constant 0 : index
    %209 = vector.load %arg6[%c256, %c0_94] : memref<344x256xf32, #tpu.memory_space<vmem>>, vector<8x256xf32>
    tpu.vector_store %arg6[%c256, %c0_94], %208 {strides = array<i32>} : memref<344x256xf32, #tpu.memory_space<vmem>>, vector<8x256xf32>,
    %c242_i32 = arith.constant 242 : i32
    %210 = tpu.dynamic_rotate %16 by %c242_i32 dim 1 : vector<8x256xf32>, i32 -> vector<8x256xf32>
    %c114_i32 = arith.constant 114 : i32
    %211 = vector.broadcast %c114_i32 : i32 to vector<8x256xi32>
    %212 = arith.cmpi sge, %1, %211 : vector<8x256xi32>
    %cst_95 = arith.constant 0.000000e+00 : f32
    %213 = vector.broadcast %cst_95 : f32 to vector<8x256xf32>
    %214 = arith.select %212, %213, %210 : vector<8x256xi1>, vector<8x256xf32>
    %c264 = arith.constant 264 : index
    %c0_96 = arith.constant 0 : index
    %215 = vector.load %arg6[%c264, %c0_96] : memref<344x256xf32, #tpu.memory_space<vmem>>, vector<8x256xf32>
    tpu.vector_store %arg6[%c264, %c0_96], %214 {strides = array<i32>} : memref<344x256xf32, #tpu.memory_space<vmem>>, vector<8x256xf32>,
    %c241_i32 = arith.constant 241 : i32
    %216 = tpu.dynamic_rotate %16 by %c241_i32 dim 1 : vector<8x256xf32>, i32 -> vector<8x256xf32>
    %c113_i32 = arith.constant 113 : i32
    %217 = vector.broadcast %c113_i32 : i32 to vector<8x256xi32>
    %218 = arith.cmpi sge, %1, %217 : vector<8x256xi32>
    %cst_97 = arith.constant 0.000000e+00 : f32
    %219 = vector.broadcast %cst_97 : f32 to vector<8x256xf32>
    %220 = arith.select %218, %219, %216 : vector<8x256xi1>, vector<8x256xf32>
    %c272 = arith.constant 272 : index
    %c0_98 = arith.constant 0 : index
    %221 = vector.load %arg6[%c272, %c0_98] : memref<344x256xf32, #tpu.memory_space<vmem>>, vector<8x256xf32>
    tpu.vector_store %arg6[%c272, %c0_98], %220 {strides = array<i32>} : memref<344x256xf32, #tpu.memory_space<vmem>>, vector<8x256xf32>,
    %c240_i32 = arith.constant 240 : i32
    %222 = tpu.dynamic_rotate %16 by %c240_i32 dim 1 : vector<8x256xf32>, i32 -> vector<8x256xf32>
    %c112_i32 = arith.constant 112 : i32
    %223 = vector.broadcast %c112_i32 : i32 to vector<8x256xi32>
    %224 = arith.cmpi sge, %1, %223 : vector<8x256xi32>
    %cst_99 = arith.constant 0.000000e+00 : f32
    %225 = vector.broadcast %cst_99 : f32 to vector<8x256xf32>
    %226 = arith.select %224, %225, %222 : vector<8x256xi1>, vector<8x256xf32>
    %c280 = arith.constant 280 : index
    %c0_100 = arith.constant 0 : index
    %227 = vector.load %arg6[%c280, %c0_100] : memref<344x256xf32, #tpu.memory_space<vmem>>, vector<8x256xf32>
    tpu.vector_store %arg6[%c280, %c0_100], %226 {strides = array<i32>} : memref<344x256xf32, #tpu.memory_space<vmem>>, vector<8x256xf32>,
    %c239_i32 = arith.constant 239 : i32
    %228 = tpu.dynamic_rotate %16 by %c239_i32 dim 1 : vector<8x256xf32>, i32 -> vector<8x256xf32>
    %c111_i32 = arith.constant 111 : i32
    %229 = vector.broadcast %c111_i32 : i32 to vector<8x256xi32>
    %230 = arith.cmpi sge, %1, %229 : vector<8x256xi32>
    %cst_101 = arith.constant 0.000000e+00 : f32
    %231 = vector.broadcast %cst_101 : f32 to vector<8x256xf32>
    %232 = arith.select %230, %231, %228 : vector<8x256xi1>, vector<8x256xf32>
    %c288 = arith.constant 288 : index
    %c0_102 = arith.constant 0 : index
    %233 = vector.load %arg6[%c288, %c0_102] : memref<344x256xf32, #tpu.memory_space<vmem>>, vector<8x256xf32>
    tpu.vector_store %arg6[%c288, %c0_102], %232 {strides = array<i32>} : memref<344x256xf32, #tpu.memory_space<vmem>>, vector<8x256xf32>,
    %c238_i32 = arith.constant 238 : i32
    %234 = tpu.dynamic_rotate %16 by %c238_i32 dim 1 : vector<8x256xf32>, i32 -> vector<8x256xf32>
    %c110_i32 = arith.constant 110 : i32
    %235 = vector.broadcast %c110_i32 : i32 to vector<8x256xi32>
    %236 = arith.cmpi sge, %1, %235 : vector<8x256xi32>
    %cst_103 = arith.constant 0.000000e+00 : f32
    %237 = vector.broadcast %cst_103 : f32 to vector<8x256xf32>
    %238 = arith.select %236, %237, %234 : vector<8x256xi1>, vector<8x256xf32>
    %c296 = arith.constant 296 : index
    %c0_104 = arith.constant 0 : index
    %239 = vector.load %arg6[%c296, %c0_104] : memref<344x256xf32, #tpu.memory_space<vmem>>, vector<8x256xf32>
    tpu.vector_store %arg6[%c296, %c0_104], %238 {strides = array<i32>} : memref<344x256xf32, #tpu.memory_space<vmem>>, vector<8x256xf32>,
    %c237_i32 = arith.constant 237 : i32
    %240 = tpu.dynamic_rotate %16 by %c237_i32 dim 1 : vector<8x256xf32>, i32 -> vector<8x256xf32>
    %c109_i32 = arith.constant 109 : i32
    %241 = vector.broadcast %c109_i32 : i32 to vector<8x256xi32>
    %242 = arith.cmpi sge, %1, %241 : vector<8x256xi32>
    %cst_105 = arith.constant 0.000000e+00 : f32
    %243 = vector.broadcast %cst_105 : f32 to vector<8x256xf32>
    %244 = arith.select %242, %243, %240 : vector<8x256xi1>, vector<8x256xf32>
    %c304 = arith.constant 304 : index
    %c0_106 = arith.constant 0 : index
    %245 = vector.load %arg6[%c304, %c0_106] : memref<344x256xf32, #tpu.memory_space<vmem>>, vector<8x256xf32>
    tpu.vector_store %arg6[%c304, %c0_106], %244 {strides = array<i32>} : memref<344x256xf32, #tpu.memory_space<vmem>>, vector<8x256xf32>,
    %c1_i32_107 = arith.constant 1 : i32
    %246 = tpu.dynamic_rotate %7 by %c1_i32_107 dim 1 : vector<4x256xf32>, i32 -> vector<4x256xf32>
    %c255_i32_108 = arith.constant 255 : i32
    %247 = tpu.dynamic_rotate %7 by %c255_i32_108 dim 1 : vector<4x256xf32>, i32 -> vector<4x256xf32>
    %248 = vector.shape_cast %4 : vector<1x256xi1> to vector<1x256xi1>
    %249 = vector.broadcast %248 : vector<1x256xi1> to vector<4x256xi1>
    %250 = arith.select %249, %7, %246 : vector<4x256xi1>, vector<4x256xf32>
    %251 = vector.shape_cast %6 : vector<1x256xi1> to vector<1x256xi1>
    %252 = vector.broadcast %251 : vector<1x256xi1> to vector<4x256xi1>
    %253 = arith.select %252, %7, %247 : vector<4x256xi1>, vector<4x256xf32>
    %254 = arith.maximumf %7, %250 : vector<4x256xf32>
    %255 = arith.maximumf %254, %253 : vector<4x256xf32>
    %cst_109 = arith.constant 0.000000e+00 : f32
    %256 = vector.broadcast %cst_109 : f32 to vector<28x256xf32>
    %257 = tpu.concatenate %255, %256 in 0 : vector<4x256xf32>, vector<28x256xf32> -> vector<32x256xf32>
    %c312 = arith.constant 312 : index
    %c0_110 = arith.constant 0 : index
    %258 = vector.load %arg6[%c312, %c0_110] : memref<344x256xf32, #tpu.memory_space<vmem>>, vector<32x256xf32>
    tpu.vector_store %arg6[%c312, %c0_110], %257 {strides = array<i32>} : memref<344x256xf32, #tpu.memory_space<vmem>>, vector<32x256xf32>,
    %c0_111 = arith.constant 0 : index
    %c0_112 = arith.constant 0 : index
    %259 = vector.load %arg6[%c0_111, %c0_112] : memref<344x256xf32, #tpu.memory_space<vmem>>, vector<344x256xf32>
    %cst_113 = arith.constant dense<0.000000e+00> : vector<32x256xf32>
    %260 = tpu.matmul %13, %259, %cst_113 {dimension_numbers = #tpu.dot_dimension_numbers<[1], [0], [0], [1], [0, 0, 1, 1], [], []>} : vector<32x344xf32>, vector<344x256xf32>, vector<32x256xf32> -> vector<32x256xf32>
    %cst_114 = arith.constant dense<0.000000e+00> : vector<32xf32>
    %261 = vector.multi_reduction <add>, %260, %cst_114 [1] : vector<32x256xf32> to vector<32xf32>
    %262 = vector.shape_cast %261 : vector<32xf32> to vector<32x1xf32>
    %263 = arith.mulf %260, %260 : vector<32x256xf32>
    %cst_115 = arith.constant dense<0.000000e+00> : vector<32xf32>
    %264 = vector.multi_reduction <add>, %263, %cst_115 [1] : vector<32x256xf32> to vector<32xf32>
    %265 = vector.shape_cast %264 : vector<32xf32> to vector<32x1xf32>
    %cst_116 = arith.constant 3.906250e-03 : f32
    %266 = vector.broadcast %cst_116 : f32 to vector<32x1xf32>
    %267 = arith.mulf %262, %266 : vector<32x1xf32>
    %cst_117 = arith.constant 3.906250e-03 : f32
    %268 = vector.broadcast %cst_117 : f32 to vector<32x1xf32>
    %269 = arith.mulf %265, %268 : vector<32x1xf32>
    %270 = arith.mulf %267, %267 : vector<32x1xf32>
    %271 = arith.subf %269, %270 : vector<32x1xf32>
    %cst_118 = arith.constant 0.000000e+00 : f32
    %272 = vector.broadcast %cst_118 : f32 to vector<32x1xf32>
    %273 = arith.maximumf %271, %272 : vector<32x1xf32>
    %274 = vector.broadcast %267 : vector<32x1xf32> to vector<32x256xf32>
    %275 = arith.subf %260, %274 : vector<32x256xf32>
    %cst_119 = arith.constant 9.99999974E-6 : f32
    %276 = vector.broadcast %cst_119 : f32 to vector<32x1xf32>
    %277 = arith.addf %273, %276 : vector<32x1xf32>
    %278 = math.rsqrt %277 : vector<32x1xf32>
    %279 = vector.broadcast %278 : vector<32x1xf32> to vector<32x256xf32>
    %280 = arith.mulf %275, %279 : vector<32x256xf32>
    %281 = vector.broadcast %14 : vector<32x1xf32> to vector<32x256xf32>
    %282 = arith.mulf %280, %281 : vector<32x256xf32>
    %283 = vector.broadcast %15 : vector<32x1xf32> to vector<32x256xf32>
    %284 = arith.addf %282, %283 : vector<32x256xf32>
    %cst_120 = arith.constant 0.000000e+00 : f32
    %285 = vector.broadcast %cst_120 : f32 to vector<32x256xf32>
    %286 = arith.minimumf %284, %285 : vector<32x256xf32>
    %287 = math.exp %286 : vector<32x256xf32>
    %cst_121 = arith.constant 1.000000e+00 : f32
    %288 = vector.broadcast %cst_121 : f32 to vector<32x256xf32>
    %289 = arith.subf %287, %288 : vector<32x256xf32>
    %cst_122 = arith.constant 1.67326319 : f32
    %290 = vector.broadcast %cst_122 : f32 to vector<32x256xf32>
    %291 = arith.mulf %290, %289 : vector<32x256xf32>
    %cst_123 = arith.constant 0.000000e+00 : f32
    %292 = vector.broadcast %cst_123 : f32 to vector<32x256xf32>
    %293 = arith.cmpf ogt, %284, %292 : vector<32x256xf32>
    %294 = arith.select %293, %284, %291 : vector<32x256xi1>, vector<32x256xf32>
    %cst_124 = arith.constant 1.05070102 : f32
    %295 = vector.broadcast %cst_124 : f32 to vector<32x256xf32>
    %296 = arith.mulf %295, %294 : vector<32x256xf32>
    %c1 = arith.constant 1 : index
    %c0_125 = arith.constant 0 : index
    %c0_126 = arith.constant 0 : index
    %297 = vector.load %arg1[%c1, %c0_125, %c0_126] : memref<3x8x32xf32, #tpu.memory_space<vmem>>, vector<1x8x32xf32>
    %298 = vector.shape_cast %297 : vector<1x8x32xf32> to vector<8x32xf32>
    %c1_127 = arith.constant 1 : index
    %c0_128 = arith.constant 0 : index
    %c0_129 = arith.constant 0 : index
    %299 = vector.load %arg2[%c1_127, %c0_128, %c0_129] : memref<3x32x344xf32, #tpu.memory_space<vmem>>, vector<1x32x344xf32>
    %300 = vector.shape_cast %299 : vector<1x32x344xf32> to vector<32x344xf32>
    %301 = vector.extract_strided_slice %8 {offsets = [0, 2], sizes = [32, 1], strides = [1, 1]} : vector<32x8xf32> to vector<32x1xf32>
    %302 = vector.extract_strided_slice %8 {offsets = [0, 3], sizes = [32, 1], strides = [1, 1]} : vector<32x8xf32> to vector<32x1xf32>
    %cst_130 = arith.constant dense<0.000000e+00> : vector<8x256xf32>
    %303 = tpu.matmul %298, %296, %cst_130 {dimension_numbers = #tpu.dot_dimension_numbers<[1], [0], [0], [1], [0, 0, 1, 1], [], []>} : vector<8x32xf32>, vector<32x256xf32>, vector<8x256xf32> -> vector<8x256xf32>
    %c19_i32_131 = arith.constant 19 : i32
    %304 = tpu.dynamic_rotate %303 by %c19_i32_131 dim 1 : vector<8x256xf32>, i32 -> vector<8x256xf32>
    %c19_i32_132 = arith.constant 19 : i32
    %305 = vector.broadcast %c19_i32_132 : i32 to vector<8x256xi32>
    %306 = arith.cmpi slt, %1, %305 : vector<8x256xi32>
    %cst_133 = arith.constant 0.000000e+00 : f32
    %307 = vector.broadcast %cst_133 : f32 to vector<8x256xf32>
    %308 = arith.select %306, %307, %304 : vector<8x256xi1>, vector<8x256xf32>
    %c0_134 = arith.constant 0 : index
    %c0_135 = arith.constant 0 : index
    %309 = vector.load %arg6[%c0_134, %c0_135] : memref<344x256xf32, #tpu.memory_space<vmem>>, vector<8x256xf32>
    tpu.vector_store %arg6[%c0_134, %c0_135], %308 {strides = array<i32>} : memref<344x256xf32, #tpu.memory_space<vmem>>, vector<8x256xf32>,
    %c18_i32_136 = arith.constant 18 : i32
    %310 = tpu.dynamic_rotate %303 by %c18_i32_136 dim 1 : vector<8x256xf32>, i32 -> vector<8x256xf32>
    %c18_i32_137 = arith.constant 18 : i32
    %311 = vector.broadcast %c18_i32_137 : i32 to vector<8x256xi32>
    %312 = arith.cmpi slt, %1, %311 : vector<8x256xi32>
    %cst_138 = arith.constant 0.000000e+00 : f32
    %313 = vector.broadcast %cst_138 : f32 to vector<8x256xf32>
    %314 = arith.select %312, %313, %310 : vector<8x256xi1>, vector<8x256xf32>
    %c8_139 = arith.constant 8 : index
    %c0_140 = arith.constant 0 : index
    %315 = vector.load %arg6[%c8_139, %c0_140] : memref<344x256xf32, #tpu.memory_space<vmem>>, vector<8x256xf32>
    tpu.vector_store %arg6[%c8_139, %c0_140], %314 {strides = array<i32>} : memref<344x256xf32, #tpu.memory_space<vmem>>, vector<8x256xf32>,
    %c17_i32_141 = arith.constant 17 : i32
    %316 = tpu.dynamic_rotate %303 by %c17_i32_141 dim 1 : vector<8x256xf32>, i32 -> vector<8x256xf32>
    %c17_i32_142 = arith.constant 17 : i32
    %317 = vector.broadcast %c17_i32_142 : i32 to vector<8x256xi32>
    %318 = arith.cmpi slt, %1, %317 : vector<8x256xi32>
    %cst_143 = arith.constant 0.000000e+00 : f32
    %319 = vector.broadcast %cst_143 : f32 to vector<8x256xf32>
    %320 = arith.select %318, %319, %316 : vector<8x256xi1>, vector<8x256xf32>
    %c16_144 = arith.constant 16 : index
    %c0_145 = arith.constant 0 : index
    %321 = vector.load %arg6[%c16_144, %c0_145] : memref<344x256xf32, #tpu.memory_space<vmem>>, vector<8x256xf32>
    tpu.vector_store %arg6[%c16_144, %c0_145], %320 {strides = array<i32>} : memref<344x256xf32, #tpu.memory_space<vmem>>, vector<8x256xf32>,
    %c16_i32_146 = arith.constant 16 : i32
    %322 = tpu.dynamic_rotate %303 by %c16_i32_146 dim 1 : vector<8x256xf32>, i32 -> vector<8x256xf32>
    %c16_i32_147 = arith.constant 16 : i32
    %323 = vector.broadcast %c16_i32_147 : i32 to vector<8x256xi32>
    %324 = arith.cmpi slt, %1, %323 : vector<8x256xi32>
    %cst_148 = arith.constant 0.000000e+00 : f32
    %325 = vector.broadcast %cst_148 : f32 to vector<8x256xf32>
    %326 = arith.select %324, %325, %322 : vector<8x256xi1>, vector<8x256xf32>
    %c24_149 = arith.constant 24 : index
    %c0_150 = arith.constant 0 : index
    %327 = vector.load %arg6[%c24_149, %c0_150] : memref<344x256xf32, #tpu.memory_space<vmem>>, vector<8x256xf32>
    tpu.vector_store %arg6[%c24_149, %c0_150], %326 {strides = array<i32>} : memref<344x256xf32, #tpu.memory_space<vmem>>, vector<8x256xf32>,
    %c15_i32_151 = arith.constant 15 : i32
    %328 = tpu.dynamic_rotate %303 by %c15_i32_151 dim 1 : vector<8x256xf32>, i32 -> vector<8x256xf32>
    %c15_i32_152 = arith.constant 15 : i32
    %329 = vector.broadcast %c15_i32_152 : i32 to vector<8x256xi32>
    %330 = arith.cmpi slt, %1, %329 : vector<8x256xi32>
    %cst_153 = arith.constant 0.000000e+00 : f32
    %331 = vector.broadcast %cst_153 : f32 to vector<8x256xf32>
    %332 = arith.select %330, %331, %328 : vector<8x256xi1>, vector<8x256xf32>
    %c32_154 = arith.constant 32 : index
    %c0_155 = arith.constant 0 : index
    %333 = vector.load %arg6[%c32_154, %c0_155] : memref<344x256xf32, #tpu.memory_space<vmem>>, vector<8x256xf32>
    tpu.vector_store %arg6[%c32_154, %c0_155], %332 {strides = array<i32>} : memref<344x256xf32, #tpu.memory_space<vmem>>, vector<8x256xf32>,
    %c14_i32_156 = arith.constant 14 : i32
    %334 = tpu.dynamic_rotate %303 by %c14_i32_156 dim 1 : vector<8x256xf32>, i32 -> vector<8x256xf32>
    %c14_i32_157 = arith.constant 14 : i32
    %335 = vector.broadcast %c14_i32_157 : i32 to vector<8x256xi32>
    %336 = arith.cmpi slt, %1, %335 : vector<8x256xi32>
    %cst_158 = arith.constant 0.000000e+00 : f32
    %337 = vector.broadcast %cst_158 : f32 to vector<8x256xf32>
    %338 = arith.select %336, %337, %334 : vector<8x256xi1>, vector<8x256xf32>
    %c40_159 = arith.constant 40 : index
    %c0_160 = arith.constant 0 : index
    %339 = vector.load %arg6[%c40_159, %c0_160] : memref<344x256xf32, #tpu.memory_space<vmem>>, vector<8x256xf32>
    tpu.vector_store %arg6[%c40_159, %c0_160], %338 {strides = array<i32>} : memref<344x256xf32, #tpu.memory_space<vmem>>, vector<8x256xf32>,
    %c13_i32_161 = arith.constant 13 : i32
    %340 = tpu.dynamic_rotate %303 by %c13_i32_161 dim 1 : vector<8x256xf32>, i32 -> vector<8x256xf32>
    %c13_i32_162 = arith.constant 13 : i32
    %341 = vector.broadcast %c13_i32_162 : i32 to vector<8x256xi32>
    %342 = arith.cmpi slt, %1, %341 : vector<8x256xi32>
    %cst_163 = arith.constant 0.000000e+00 : f32
    %343 = vector.broadcast %cst_163 : f32 to vector<8x256xf32>
    %344 = arith.select %342, %343, %340 : vector<8x256xi1>, vector<8x256xf32>
    %c48_164 = arith.constant 48 : index
    %c0_165 = arith.constant 0 : index
    %345 = vector.load %arg6[%c48_164, %c0_165] : memref<344x256xf32, #tpu.memory_space<vmem>>, vector<8x256xf32>
    tpu.vector_store %arg6[%c48_164, %c0_165], %344 {strides = array<i32>} : memref<344x256xf32, #tpu.memory_space<vmem>>, vector<8x256xf32>,
    %c12_i32_166 = arith.constant 12 : i32
    %346 = tpu.dynamic_rotate %303 by %c12_i32_166 dim 1 : vector<8x256xf32>, i32 -> vector<8x256xf32>
    %c12_i32_167 = arith.constant 12 : i32
    %347 = vector.broadcast %c12_i32_167 : i32 to vector<8x256xi32>
    %348 = arith.cmpi slt, %1, %347 : vector<8x256xi32>
    %cst_168 = arith.constant 0.000000e+00 : f32
    %349 = vector.broadcast %cst_168 : f32 to vector<8x256xf32>
    %350 = arith.select %348, %349, %346 : vector<8x256xi1>, vector<8x256xf32>
    %c56_169 = arith.constant 56 : index
    %c0_170 = arith.constant 0 : index
    %351 = vector.load %arg6[%c56_169, %c0_170] : memref<344x256xf32, #tpu.memory_space<vmem>>, vector<8x256xf32>
    tpu.vector_store %arg6[%c56_169, %c0_170], %350 {strides = array<i32>} : memref<344x256xf32, #tpu.memory_space<vmem>>, vector<8x256xf32>,
    %c11_i32_171 = arith.constant 11 : i32
    %352 = tpu.dynamic_rotate %303 by %c11_i32_171 dim 1 : vector<8x256xf32>, i32 -> vector<8x256xf32>
    %c11_i32_172 = arith.constant 11 : i32
    %353 = vector.broadcast %c11_i32_172 : i32 to vector<8x256xi32>
    %354 = arith.cmpi slt, %1, %353 : vector<8x256xi32>
    %cst_173 = arith.constant 0.000000e+00 : f32
    %355 = vector.broadcast %cst_173 : f32 to vector<8x256xf32>
    %356 = arith.select %354, %355, %352 : vector<8x256xi1>, vector<8x256xf32>
    %c64_174 = arith.constant 64 : index
    %c0_175 = arith.constant 0 : index
    %357 = vector.load %arg6[%c64_174, %c0_175] : memref<344x256xf32, #tpu.memory_space<vmem>>, vector<8x256xf32>
    tpu.vector_store %arg6[%c64_174, %c0_175], %356 {strides = array<i32>} : memref<344x256xf32, #tpu.memory_space<vmem>>, vector<8x256xf32>,
    %c10_i32_176 = arith.constant 10 : i32
    %358 = tpu.dynamic_rotate %303 by %c10_i32_176 dim 1 : vector<8x256xf32>, i32 -> vector<8x256xf32>
    %c10_i32_177 = arith.constant 10 : i32
    %359 = vector.broadcast %c10_i32_177 : i32 to vector<8x256xi32>
    %360 = arith.cmpi slt, %1, %359 : vector<8x256xi32>
    %cst_178 = arith.constant 0.000000e+00 : f32
    %361 = vector.broadcast %cst_178 : f32 to vector<8x256xf32>
    %362 = arith.select %360, %361, %358 : vector<8x256xi1>, vector<8x256xf32>
    %c72_179 = arith.constant 72 : index
    %c0_180 = arith.constant 0 : index
    %363 = vector.load %arg6[%c72_179, %c0_180] : memref<344x256xf32, #tpu.memory_space<vmem>>, vector<8x256xf32>
    tpu.vector_store %arg6[%c72_179, %c0_180], %362 {strides = array<i32>} : memref<344x256xf32, #tpu.memory_space<vmem>>, vector<8x256xf32>,
    %c9_i32_181 = arith.constant 9 : i32
    %364 = tpu.dynamic_rotate %303 by %c9_i32_181 dim 1 : vector<8x256xf32>, i32 -> vector<8x256xf32>
    %c9_i32_182 = arith.constant 9 : i32
    %365 = vector.broadcast %c9_i32_182 : i32 to vector<8x256xi32>
    %366 = arith.cmpi slt, %1, %365 : vector<8x256xi32>
    %cst_183 = arith.constant 0.000000e+00 : f32
    %367 = vector.broadcast %cst_183 : f32 to vector<8x256xf32>
    %368 = arith.select %366, %367, %364 : vector<8x256xi1>, vector<8x256xf32>
    %c80_184 = arith.constant 80 : index
    %c0_185 = arith.constant 0 : index
    %369 = vector.load %arg6[%c80_184, %c0_185] : memref<344x256xf32, #tpu.memory_space<vmem>>, vector<8x256xf32>
    tpu.vector_store %arg6[%c80_184, %c0_185], %368 {strides = array<i32>} : memref<344x256xf32, #tpu.memory_space<vmem>>, vector<8x256xf32>,
    %c8_i32_186 = arith.constant 8 : i32
    %370 = tpu.dynamic_rotate %303 by %c8_i32_186 dim 1 : vector<8x256xf32>, i32 -> vector<8x256xf32>
    %c8_i32_187 = arith.constant 8 : i32
    %371 = vector.broadcast %c8_i32_187 : i32 to vector<8x256xi32>
    %372 = arith.cmpi slt, %1, %371 : vector<8x256xi32>
    %cst_188 = arith.constant 0.000000e+00 : f32
    %373 = vector.broadcast %cst_188 : f32 to vector<8x256xf32>
    %374 = arith.select %372, %373, %370 : vector<8x256xi1>, vector<8x256xf32>
    %c88_189 = arith.constant 88 : index
    %c0_190 = arith.constant 0 : index
    %375 = vector.load %arg6[%c88_189, %c0_190] : memref<344x256xf32, #tpu.memory_space<vmem>>, vector<8x256xf32>
    tpu.vector_store %arg6[%c88_189, %c0_190], %374 {strides = array<i32>} : memref<344x256xf32, #tpu.memory_space<vmem>>, vector<8x256xf32>,
    %c7_i32_191 = arith.constant 7 : i32
    %376 = tpu.dynamic_rotate %303 by %c7_i32_191 dim 1 : vector<8x256xf32>, i32 -> vector<8x256xf32>
    %c7_i32_192 = arith.constant 7 : i32
    %377 = vector.broadcast %c7_i32_192 : i32 to vector<8x256xi32>
    %378 = arith.cmpi slt, %1, %377 : vector<8x256xi32>
    %cst_193 = arith.constant 0.000000e+00 : f32
    %379 = vector.broadcast %cst_193 : f32 to vector<8x256xf32>
    %380 = arith.select %378, %379, %376 : vector<8x256xi1>, vector<8x256xf32>
    %c96_194 = arith.constant 96 : index
    %c0_195 = arith.constant 0 : index
    %381 = vector.load %arg6[%c96_194, %c0_195] : memref<344x256xf32, #tpu.memory_space<vmem>>, vector<8x256xf32>
    tpu.vector_store %arg6[%c96_194, %c0_195], %380 {strides = array<i32>} : memref<344x256xf32, #tpu.memory_space<vmem>>, vector<8x256xf32>,
    %c6_i32_196 = arith.constant 6 : i32
    %382 = tpu.dynamic_rotate %303 by %c6_i32_196 dim 1 : vector<8x256xf32>, i32 -> vector<8x256xf32>
    %c6_i32_197 = arith.constant 6 : i32
    %383 = vector.broadcast %c6_i32_197 : i32 to vector<8x256xi32>
    %384 = arith.cmpi slt, %1, %383 : vector<8x256xi32>
    %cst_198 = arith.constant 0.000000e+00 : f32
    %385 = vector.broadcast %cst_198 : f32 to vector<8x256xf32>
    %386 = arith.select %384, %385, %382 : vector<8x256xi1>, vector<8x256xf32>
    %c104_199 = arith.constant 104 : index
    %c0_200 = arith.constant 0 : index
    %387 = vector.load %arg6[%c104_199, %c0_200] : memref<344x256xf32, #tpu.memory_space<vmem>>, vector<8x256xf32>
    tpu.vector_store %arg6[%c104_199, %c0_200], %386 {strides = array<i32>} : memref<344x256xf32, #tpu.memory_space<vmem>>, vector<8x256xf32>,
    %c5_i32_201 = arith.constant 5 : i32
    %388 = tpu.dynamic_rotate %303 by %c5_i32_201 dim 1 : vector<8x256xf32>, i32 -> vector<8x256xf32>
    %c5_i32_202 = arith.constant 5 : i32
    %389 = vector.broadcast %c5_i32_202 : i32 to vector<8x256xi32>
    %390 = arith.cmpi slt, %1, %389 : vector<8x256xi32>
    %cst_203 = arith.constant 0.000000e+00 : f32
    %391 = vector.broadcast %cst_203 : f32 to vector<8x256xf32>
    %392 = arith.select %390, %391, %388 : vector<8x256xi1>, vector<8x256xf32>
    %c112_204 = arith.constant 112 : index
    %c0_205 = arith.constant 0 : index
    %393 = vector.load %arg6[%c112_204, %c0_205] : memref<344x256xf32, #tpu.memory_space<vmem>>, vector<8x256xf32>
    tpu.vector_store %arg6[%c112_204, %c0_205], %392 {strides = array<i32>} : memref<344x256xf32, #tpu.memory_space<vmem>>, vector<8x256xf32>,
    %c4_i32_206 = arith.constant 4 : i32
    %394 = tpu.dynamic_rotate %303 by %c4_i32_206 dim 1 : vector<8x256xf32>, i32 -> vector<8x256xf32>
    %c4_i32_207 = arith.constant 4 : i32
    %395 = vector.broadcast %c4_i32_207 : i32 to vector<8x256xi32>
    %396 = arith.cmpi slt, %1, %395 : vector<8x256xi32>
    %cst_208 = arith.constant 0.000000e+00 : f32
    %397 = vector.broadcast %cst_208 : f32 to vector<8x256xf32>
    %398 = arith.select %396, %397, %394 : vector<8x256xi1>, vector<8x256xf32>
    %c120_209 = arith.constant 120 : index
    %c0_210 = arith.constant 0 : index
    %399 = vector.load %arg6[%c120_209, %c0_210] : memref<344x256xf32, #tpu.memory_space<vmem>>, vector<8x256xf32>
    tpu.vector_store %arg6[%c120_209, %c0_210], %398 {strides = array<i32>} : memref<344x256xf32, #tpu.memory_space<vmem>>, vector<8x256xf32>,
    %c3_i32_211 = arith.constant 3 : i32
    %400 = tpu.dynamic_rotate %303 by %c3_i32_211 dim 1 : vector<8x256xf32>, i32 -> vector<8x256xf32>
    %c3_i32_212 = arith.constant 3 : i32
    %401 = vector.broadcast %c3_i32_212 : i32 to vector<8x256xi32>
    %402 = arith.cmpi slt, %1, %401 : vector<8x256xi32>
    %cst_213 = arith.constant 0.000000e+00 : f32
    %403 = vector.broadcast %cst_213 : f32 to vector<8x256xf32>
    %404 = arith.select %402, %403, %400 : vector<8x256xi1>, vector<8x256xf32>
    %c128_214 = arith.constant 128 : index
    %c0_215 = arith.constant 0 : index
    %405 = vector.load %arg6[%c128_214, %c0_215] : memref<344x256xf32, #tpu.memory_space<vmem>>, vector<8x256xf32>
    tpu.vector_store %arg6[%c128_214, %c0_215], %404 {strides = array<i32>} : memref<344x256xf32, #tpu.memory_space<vmem>>, vector<8x256xf32>,
    %c2_i32_216 = arith.constant 2 : i32
    %406 = tpu.dynamic_rotate %303 by %c2_i32_216 dim 1 : vector<8x256xf32>, i32 -> vector<8x256xf32>
    %c2_i32_217 = arith.constant 2 : i32
    %407 = vector.broadcast %c2_i32_217 : i32 to vector<8x256xi32>
    %408 = arith.cmpi slt, %1, %407 : vector<8x256xi32>
    %cst_218 = arith.constant 0.000000e+00 : f32
    %409 = vector.broadcast %cst_218 : f32 to vector<8x256xf32>
    %410 = arith.select %408, %409, %406 : vector<8x256xi1>, vector<8x256xf32>
    %c136_219 = arith.constant 136 : index
    %c0_220 = arith.constant 0 : index
    %411 = vector.load %arg6[%c136_219, %c0_220] : memref<344x256xf32, #tpu.memory_space<vmem>>, vector<8x256xf32>
    tpu.vector_store %arg6[%c136_219, %c0_220], %410 {strides = array<i32>} : memref<344x256xf32, #tpu.memory_space<vmem>>, vector<8x256xf32>,
    %c1_i32_221 = arith.constant 1 : i32
    %412 = tpu.dynamic_rotate %303 by %c1_i32_221 dim 1 : vector<8x256xf32>, i32 -> vector<8x256xf32>
    %c1_i32_222 = arith.constant 1 : i32
    %413 = vector.broadcast %c1_i32_222 : i32 to vector<8x256xi32>
    %414 = arith.cmpi slt, %1, %413 : vector<8x256xi32>
    %cst_223 = arith.constant 0.000000e+00 : f32
    %415 = vector.broadcast %cst_223 : f32 to vector<8x256xf32>
    %416 = arith.select %414, %415, %412 : vector<8x256xi1>, vector<8x256xf32>
    %c144_224 = arith.constant 144 : index
    %c0_225 = arith.constant 0 : index
    %417 = vector.load %arg6[%c144_224, %c0_225] : memref<344x256xf32, #tpu.memory_space<vmem>>, vector<8x256xf32>
    tpu.vector_store %arg6[%c144_224, %c0_225], %416 {strides = array<i32>} : memref<344x256xf32, #tpu.memory_space<vmem>>, vector<8x256xf32>,
    %c152_226 = arith.constant 152 : index
    %c0_227 = arith.constant 0 : index
    %418 = vector.load %arg6[%c152_226, %c0_227] : memref<344x256xf32, #tpu.memory_space<vmem>>, vector<8x256xf32>
    tpu.vector_store %arg6[%c152_226, %c0_227], %303 {strides = array<i32>} : memref<344x256xf32, #tpu.memory_space<vmem>>, vector<8x256xf32>,
    %c255_i32_228 = arith.constant 255 : i32
    %419 = tpu.dynamic_rotate %303 by %c255_i32_228 dim 1 : vector<8x256xf32>, i32 -> vector<8x256xf32>
    %c127_i32_229 = arith.constant 127 : i32
    %420 = vector.broadcast %c127_i32_229 : i32 to vector<8x256xi32>
    %421 = arith.cmpi sge, %1, %420 : vector<8x256xi32>
    %cst_230 = arith.constant 0.000000e+00 : f32
    %422 = vector.broadcast %cst_230 : f32 to vector<8x256xf32>
    %423 = arith.select %421, %422, %419 : vector<8x256xi1>, vector<8x256xf32>
    %c160_231 = arith.constant 160 : index
    %c0_232 = arith.constant 0 : index
    %424 = vector.load %arg6[%c160_231, %c0_232] : memref<344x256xf32, #tpu.memory_space<vmem>>, vector<8x256xf32>
    tpu.vector_store %arg6[%c160_231, %c0_232], %423 {strides = array<i32>} : memref<344x256xf32, #tpu.memory_space<vmem>>, vector<8x256xf32>,
    %c254_i32_233 = arith.constant 254 : i32
    %425 = tpu.dynamic_rotate %303 by %c254_i32_233 dim 1 : vector<8x256xf32>, i32 -> vector<8x256xf32>
    %c126_i32_234 = arith.constant 126 : i32
    %426 = vector.broadcast %c126_i32_234 : i32 to vector<8x256xi32>
    %427 = arith.cmpi sge, %1, %426 : vector<8x256xi32>
    %cst_235 = arith.constant 0.000000e+00 : f32
    %428 = vector.broadcast %cst_235 : f32 to vector<8x256xf32>
    %429 = arith.select %427, %428, %425 : vector<8x256xi1>, vector<8x256xf32>
    %c168_236 = arith.constant 168 : index
    %c0_237 = arith.constant 0 : index
    %430 = vector.load %arg6[%c168_236, %c0_237] : memref<344x256xf32, #tpu.memory_space<vmem>>, vector<8x256xf32>
    tpu.vector_store %arg6[%c168_236, %c0_237], %429 {strides = array<i32>} : memref<344x256xf32, #tpu.memory_space<vmem>>, vector<8x256xf32>,
    %c253_i32_238 = arith.constant 253 : i32
    %431 = tpu.dynamic_rotate %303 by %c253_i32_238 dim 1 : vector<8x256xf32>, i32 -> vector<8x256xf32>
    %c125_i32_239 = arith.constant 125 : i32
    %432 = vector.broadcast %c125_i32_239 : i32 to vector<8x256xi32>
    %433 = arith.cmpi sge, %1, %432 : vector<8x256xi32>
    %cst_240 = arith.constant 0.000000e+00 : f32
    %434 = vector.broadcast %cst_240 : f32 to vector<8x256xf32>
    %435 = arith.select %433, %434, %431 : vector<8x256xi1>, vector<8x256xf32>
    %c176_241 = arith.constant 176 : index
    %c0_242 = arith.constant 0 : index
    %436 = vector.load %arg6[%c176_241, %c0_242] : memref<344x256xf32, #tpu.memory_space<vmem>>, vector<8x256xf32>
    tpu.vector_store %arg6[%c176_241, %c0_242], %435 {strides = array<i32>} : memref<344x256xf32, #tpu.memory_space<vmem>>, vector<8x256xf32>,
    %c252_i32_243 = arith.constant 252 : i32
    %437 = tpu.dynamic_rotate %303 by %c252_i32_243 dim 1 : vector<8x256xf32>, i32 -> vector<8x256xf32>
    %c124_i32_244 = arith.constant 124 : i32
    %438 = vector.broadcast %c124_i32_244 : i32 to vector<8x256xi32>
    %439 = arith.cmpi sge, %1, %438 : vector<8x256xi32>
    %cst_245 = arith.constant 0.000000e+00 : f32
    %440 = vector.broadcast %cst_245 : f32 to vector<8x256xf32>
    %441 = arith.select %439, %440, %437 : vector<8x256xi1>, vector<8x256xf32>
    %c184_246 = arith.constant 184 : index
    %c0_247 = arith.constant 0 : index
    %442 = vector.load %arg6[%c184_246, %c0_247] : memref<344x256xf32, #tpu.memory_space<vmem>>, vector<8x256xf32>
    tpu.vector_store %arg6[%c184_246, %c0_247], %441 {strides = array<i32>} : memref<344x256xf32, #tpu.memory_space<vmem>>, vector<8x256xf32>,
    %c251_i32_248 = arith.constant 251 : i32
    %443 = tpu.dynamic_rotate %303 by %c251_i32_248 dim 1 : vector<8x256xf32>, i32 -> vector<8x256xf32>
    %c123_i32_249 = arith.constant 123 : i32
    %444 = vector.broadcast %c123_i32_249 : i32 to vector<8x256xi32>
    %445 = arith.cmpi sge, %1, %444 : vector<8x256xi32>
    %cst_250 = arith.constant 0.000000e+00 : f32
    %446 = vector.broadcast %cst_250 : f32 to vector<8x256xf32>
    %447 = arith.select %445, %446, %443 : vector<8x256xi1>, vector<8x256xf32>
    %c192_251 = arith.constant 192 : index
    %c0_252 = arith.constant 0 : index
    %448 = vector.load %arg6[%c192_251, %c0_252] : memref<344x256xf32, #tpu.memory_space<vmem>>, vector<8x256xf32>
    tpu.vector_store %arg6[%c192_251, %c0_252], %447 {strides = array<i32>} : memref<344x256xf32, #tpu.memory_space<vmem>>, vector<8x256xf32>,
    %c250_i32_253 = arith.constant 250 : i32
    %449 = tpu.dynamic_rotate %303 by %c250_i32_253 dim 1 : vector<8x256xf32>, i32 -> vector<8x256xf32>
    %c122_i32_254 = arith.constant 122 : i32
    %450 = vector.broadcast %c122_i32_254 : i32 to vector<8x256xi32>
    %451 = arith.cmpi sge, %1, %450 : vector<8x256xi32>
    %cst_255 = arith.constant 0.000000e+00 : f32
    %452 = vector.broadcast %cst_255 : f32 to vector<8x256xf32>
    %453 = arith.select %451, %452, %449 : vector<8x256xi1>, vector<8x256xf32>
    %c200_256 = arith.constant 200 : index
    %c0_257 = arith.constant 0 : index
    %454 = vector.load %arg6[%c200_256, %c0_257] : memref<344x256xf32, #tpu.memory_space<vmem>>, vector<8x256xf32>
    tpu.vector_store %arg6[%c200_256, %c0_257], %453 {strides = array<i32>} : memref<344x256xf32, #tpu.memory_space<vmem>>, vector<8x256xf32>,
    %c249_i32_258 = arith.constant 249 : i32
    %455 = tpu.dynamic_rotate %303 by %c249_i32_258 dim 1 : vector<8x256xf32>, i32 -> vector<8x256xf32>
    %c121_i32_259 = arith.constant 121 : i32
    %456 = vector.broadcast %c121_i32_259 : i32 to vector<8x256xi32>
    %457 = arith.cmpi sge, %1, %456 : vector<8x256xi32>
    %cst_260 = arith.constant 0.000000e+00 : f32
    %458 = vector.broadcast %cst_260 : f32 to vector<8x256xf32>
    %459 = arith.select %457, %458, %455 : vector<8x256xi1>, vector<8x256xf32>
    %c208_261 = arith.constant 208 : index
    %c0_262 = arith.constant 0 : index
    %460 = vector.load %arg6[%c208_261, %c0_262] : memref<344x256xf32, #tpu.memory_space<vmem>>, vector<8x256xf32>
    tpu.vector_store %arg6[%c208_261, %c0_262], %459 {strides = array<i32>} : memref<344x256xf32, #tpu.memory_space<vmem>>, vector<8x256xf32>,
    %c248_i32_263 = arith.constant 248 : i32
    %461 = tpu.dynamic_rotate %303 by %c248_i32_263 dim 1 : vector<8x256xf32>, i32 -> vector<8x256xf32>
    %c120_i32_264 = arith.constant 120 : i32
    %462 = vector.broadcast %c120_i32_264 : i32 to vector<8x256xi32>
    %463 = arith.cmpi sge, %1, %462 : vector<8x256xi32>
    %cst_265 = arith.constant 0.000000e+00 : f32
    %464 = vector.broadcast %cst_265 : f32 to vector<8x256xf32>
    %465 = arith.select %463, %464, %461 : vector<8x256xi1>, vector<8x256xf32>
    %c216_266 = arith.constant 216 : index
    %c0_267 = arith.constant 0 : index
    %466 = vector.load %arg6[%c216_266, %c0_267] : memref<344x256xf32, #tpu.memory_space<vmem>>, vector<8x256xf32>
    tpu.vector_store %arg6[%c216_266, %c0_267], %465 {strides = array<i32>} : memref<344x256xf32, #tpu.memory_space<vmem>>, vector<8x256xf32>,
    %c247_i32_268 = arith.constant 247 : i32
    %467 = tpu.dynamic_rotate %303 by %c247_i32_268 dim 1 : vector<8x256xf32>, i32 -> vector<8x256xf32>
    %c119_i32_269 = arith.constant 119 : i32
    %468 = vector.broadcast %c119_i32_269 : i32 to vector<8x256xi32>
    %469 = arith.cmpi sge, %1, %468 : vector<8x256xi32>
    %cst_270 = arith.constant 0.000000e+00 : f32
    %470 = vector.broadcast %cst_270 : f32 to vector<8x256xf32>
    %471 = arith.select %469, %470, %467 : vector<8x256xi1>, vector<8x256xf32>
    %c224_271 = arith.constant 224 : index
    %c0_272 = arith.constant 0 : index
    %472 = vector.load %arg6[%c224_271, %c0_272] : memref<344x256xf32, #tpu.memory_space<vmem>>, vector<8x256xf32>
    tpu.vector_store %arg6[%c224_271, %c0_272], %471 {strides = array<i32>} : memref<344x256xf32, #tpu.memory_space<vmem>>, vector<8x256xf32>,
    %c246_i32_273 = arith.constant 246 : i32
    %473 = tpu.dynamic_rotate %303 by %c246_i32_273 dim 1 : vector<8x256xf32>, i32 -> vector<8x256xf32>
    %c118_i32_274 = arith.constant 118 : i32
    %474 = vector.broadcast %c118_i32_274 : i32 to vector<8x256xi32>
    %475 = arith.cmpi sge, %1, %474 : vector<8x256xi32>
    %cst_275 = arith.constant 0.000000e+00 : f32
    %476 = vector.broadcast %cst_275 : f32 to vector<8x256xf32>
    %477 = arith.select %475, %476, %473 : vector<8x256xi1>, vector<8x256xf32>
    %c232_276 = arith.constant 232 : index
    %c0_277 = arith.constant 0 : index
    %478 = vector.load %arg6[%c232_276, %c0_277] : memref<344x256xf32, #tpu.memory_space<vmem>>, vector<8x256xf32>
    tpu.vector_store %arg6[%c232_276, %c0_277], %477 {strides = array<i32>} : memref<344x256xf32, #tpu.memory_space<vmem>>, vector<8x256xf32>,
    %c245_i32_278 = arith.constant 245 : i32
    %479 = tpu.dynamic_rotate %303 by %c245_i32_278 dim 1 : vector<8x256xf32>, i32 -> vector<8x256xf32>
    %c117_i32_279 = arith.constant 117 : i32
    %480 = vector.broadcast %c117_i32_279 : i32 to vector<8x256xi32>
    %481 = arith.cmpi sge, %1, %480 : vector<8x256xi32>
    %cst_280 = arith.constant 0.000000e+00 : f32
    %482 = vector.broadcast %cst_280 : f32 to vector<8x256xf32>
    %483 = arith.select %481, %482, %479 : vector<8x256xi1>, vector<8x256xf32>
    %c240_281 = arith.constant 240 : index
    %c0_282 = arith.constant 0 : index
    %484 = vector.load %arg6[%c240_281, %c0_282] : memref<344x256xf32, #tpu.memory_space<vmem>>, vector<8x256xf32>
    tpu.vector_store %arg6[%c240_281, %c0_282], %483 {strides = array<i32>} : memref<344x256xf32, #tpu.memory_space<vmem>>, vector<8x256xf32>,
    %c244_i32_283 = arith.constant 244 : i32
    %485 = tpu.dynamic_rotate %303 by %c244_i32_283 dim 1 : vector<8x256xf32>, i32 -> vector<8x256xf32>
    %c116_i32_284 = arith.constant 116 : i32
    %486 = vector.broadcast %c116_i32_284 : i32 to vector<8x256xi32>
    %487 = arith.cmpi sge, %1, %486 : vector<8x256xi32>
    %cst_285 = arith.constant 0.000000e+00 : f32
    %488 = vector.broadcast %cst_285 : f32 to vector<8x256xf32>
    %489 = arith.select %487, %488, %485 : vector<8x256xi1>, vector<8x256xf32>
    %c248_286 = arith.constant 248 : index
    %c0_287 = arith.constant 0 : index
    %490 = vector.load %arg6[%c248_286, %c0_287] : memref<344x256xf32, #tpu.memory_space<vmem>>, vector<8x256xf32>
    tpu.vector_store %arg6[%c248_286, %c0_287], %489 {strides = array<i32>} : memref<344x256xf32, #tpu.memory_space<vmem>>, vector<8x256xf32>,
    %c243_i32_288 = arith.constant 243 : i32
    %491 = tpu.dynamic_rotate %303 by %c243_i32_288 dim 1 : vector<8x256xf32>, i32 -> vector<8x256xf32>
    %c115_i32_289 = arith.constant 115 : i32
    %492 = vector.broadcast %c115_i32_289 : i32 to vector<8x256xi32>
    %493 = arith.cmpi sge, %1, %492 : vector<8x256xi32>
    %cst_290 = arith.constant 0.000000e+00 : f32
    %494 = vector.broadcast %cst_290 : f32 to vector<8x256xf32>
    %495 = arith.select %493, %494, %491 : vector<8x256xi1>, vector<8x256xf32>
    %c256_291 = arith.constant 256 : index
    %c0_292 = arith.constant 0 : index
    %496 = vector.load %arg6[%c256_291, %c0_292] : memref<344x256xf32, #tpu.memory_space<vmem>>, vector<8x256xf32>
    tpu.vector_store %arg6[%c256_291, %c0_292], %495 {strides = array<i32>} : memref<344x256xf32, #tpu.memory_space<vmem>>, vector<8x256xf32>,
    %c242_i32_293 = arith.constant 242 : i32
    %497 = tpu.dynamic_rotate %303 by %c242_i32_293 dim 1 : vector<8x256xf32>, i32 -> vector<8x256xf32>
    %c114_i32_294 = arith.constant 114 : i32
    %498 = vector.broadcast %c114_i32_294 : i32 to vector<8x256xi32>
    %499 = arith.cmpi sge, %1, %498 : vector<8x256xi32>
    %cst_295 = arith.constant 0.000000e+00 : f32
    %500 = vector.broadcast %cst_295 : f32 to vector<8x256xf32>
    %501 = arith.select %499, %500, %497 : vector<8x256xi1>, vector<8x256xf32>
    %c264_296 = arith.constant 264 : index
    %c0_297 = arith.constant 0 : index
    %502 = vector.load %arg6[%c264_296, %c0_297] : memref<344x256xf32, #tpu.memory_space<vmem>>, vector<8x256xf32>
    tpu.vector_store %arg6[%c264_296, %c0_297], %501 {strides = array<i32>} : memref<344x256xf32, #tpu.memory_space<vmem>>, vector<8x256xf32>,
    %c241_i32_298 = arith.constant 241 : i32
    %503 = tpu.dynamic_rotate %303 by %c241_i32_298 dim 1 : vector<8x256xf32>, i32 -> vector<8x256xf32>
    %c113_i32_299 = arith.constant 113 : i32
    %504 = vector.broadcast %c113_i32_299 : i32 to vector<8x256xi32>
    %505 = arith.cmpi sge, %1, %504 : vector<8x256xi32>
    %cst_300 = arith.constant 0.000000e+00 : f32
    %506 = vector.broadcast %cst_300 : f32 to vector<8x256xf32>
    %507 = arith.select %505, %506, %503 : vector<8x256xi1>, vector<8x256xf32>
    %c272_301 = arith.constant 272 : index
    %c0_302 = arith.constant 0 : index
    %508 = vector.load %arg6[%c272_301, %c0_302] : memref<344x256xf32, #tpu.memory_space<vmem>>, vector<8x256xf32>
    tpu.vector_store %arg6[%c272_301, %c0_302], %507 {strides = array<i32>} : memref<344x256xf32, #tpu.memory_space<vmem>>, vector<8x256xf32>,
    %c240_i32_303 = arith.constant 240 : i32
    %509 = tpu.dynamic_rotate %303 by %c240_i32_303 dim 1 : vector<8x256xf32>, i32 -> vector<8x256xf32>
    %c112_i32_304 = arith.constant 112 : i32
    %510 = vector.broadcast %c112_i32_304 : i32 to vector<8x256xi32>
    %511 = arith.cmpi sge, %1, %510 : vector<8x256xi32>
    %cst_305 = arith.constant 0.000000e+00 : f32
    %512 = vector.broadcast %cst_305 : f32 to vector<8x256xf32>
    %513 = arith.select %511, %512, %509 : vector<8x256xi1>, vector<8x256xf32>
    %c280_306 = arith.constant 280 : index
    %c0_307 = arith.constant 0 : index
    %514 = vector.load %arg6[%c280_306, %c0_307] : memref<344x256xf32, #tpu.memory_space<vmem>>, vector<8x256xf32>
    tpu.vector_store %arg6[%c280_306, %c0_307], %513 {strides = array<i32>} : memref<344x256xf32, #tpu.memory_space<vmem>>, vector<8x256xf32>,
    %c239_i32_308 = arith.constant 239 : i32
    %515 = tpu.dynamic_rotate %303 by %c239_i32_308 dim 1 : vector<8x256xf32>, i32 -> vector<8x256xf32>
    %c111_i32_309 = arith.constant 111 : i32
    %516 = vector.broadcast %c111_i32_309 : i32 to vector<8x256xi32>
    %517 = arith.cmpi sge, %1, %516 : vector<8x256xi32>
    %cst_310 = arith.constant 0.000000e+00 : f32
    %518 = vector.broadcast %cst_310 : f32 to vector<8x256xf32>
    %519 = arith.select %517, %518, %515 : vector<8x256xi1>, vector<8x256xf32>
    %c288_311 = arith.constant 288 : index
    %c0_312 = arith.constant 0 : index
    %520 = vector.load %arg6[%c288_311, %c0_312] : memref<344x256xf32, #tpu.memory_space<vmem>>, vector<8x256xf32>
    tpu.vector_store %arg6[%c288_311, %c0_312], %519 {strides = array<i32>} : memref<344x256xf32, #tpu.memory_space<vmem>>, vector<8x256xf32>,
    %c238_i32_313 = arith.constant 238 : i32
    %521 = tpu.dynamic_rotate %303 by %c238_i32_313 dim 1 : vector<8x256xf32>, i32 -> vector<8x256xf32>
    %c110_i32_314 = arith.constant 110 : i32
    %522 = vector.broadcast %c110_i32_314 : i32 to vector<8x256xi32>
    %523 = arith.cmpi sge, %1, %522 : vector<8x256xi32>
    %cst_315 = arith.constant 0.000000e+00 : f32
    %524 = vector.broadcast %cst_315 : f32 to vector<8x256xf32>
    %525 = arith.select %523, %524, %521 : vector<8x256xi1>, vector<8x256xf32>
    %c296_316 = arith.constant 296 : index
    %c0_317 = arith.constant 0 : index
    %526 = vector.load %arg6[%c296_316, %c0_317] : memref<344x256xf32, #tpu.memory_space<vmem>>, vector<8x256xf32>
    tpu.vector_store %arg6[%c296_316, %c0_317], %525 {strides = array<i32>} : memref<344x256xf32, #tpu.memory_space<vmem>>, vector<8x256xf32>,
    %c237_i32_318 = arith.constant 237 : i32
    %527 = tpu.dynamic_rotate %303 by %c237_i32_318 dim 1 : vector<8x256xf32>, i32 -> vector<8x256xf32>
    %c109_i32_319 = arith.constant 109 : i32
    %528 = vector.broadcast %c109_i32_319 : i32 to vector<8x256xi32>
    %529 = arith.cmpi sge, %1, %528 : vector<8x256xi32>
    %cst_320 = arith.constant 0.000000e+00 : f32
    %530 = vector.broadcast %cst_320 : f32 to vector<8x256xf32>
    %531 = arith.select %529, %530, %527 : vector<8x256xi1>, vector<8x256xf32>
    %c304_321 = arith.constant 304 : index
    %c0_322 = arith.constant 0 : index
    %532 = vector.load %arg6[%c304_321, %c0_322] : memref<344x256xf32, #tpu.memory_space<vmem>>, vector<8x256xf32>
    tpu.vector_store %arg6[%c304_321, %c0_322], %531 {strides = array<i32>} : memref<344x256xf32, #tpu.memory_space<vmem>>, vector<8x256xf32>,
    %c1_i32_323 = arith.constant 1 : i32
    %533 = tpu.dynamic_rotate %296 by %c1_i32_323 dim 1 : vector<32x256xf32>, i32 -> vector<32x256xf32>
    %c255_i32_324 = arith.constant 255 : i32
    %534 = tpu.dynamic_rotate %296 by %c255_i32_324 dim 1 : vector<32x256xf32>, i32 -> vector<32x256xf32>
    %535 = vector.shape_cast %4 : vector<1x256xi1> to vector<1x256xi1>
    %536 = vector.broadcast %535 : vector<1x256xi1> to vector<32x256xi1>
    %537 = arith.select %536, %296, %533 : vector<32x256xi1>, vector<32x256xf32>
    %538 = vector.shape_cast %6 : vector<1x256xi1> to vector<1x256xi1>
    %539 = vector.broadcast %538 : vector<1x256xi1> to vector<32x256xi1>
    %540 = arith.select %539, %296, %534 : vector<32x256xi1>, vector<32x256xf32>
    %541 = arith.maximumf %296, %537 : vector<32x256xf32>
    %542 = arith.maximumf %541, %540 : vector<32x256xf32>
    %c312_325 = arith.constant 312 : index
    %c0_326 = arith.constant 0 : index
    %543 = vector.load %arg6[%c312_325, %c0_326] : memref<344x256xf32, #tpu.memory_space<vmem>>, vector<32x256xf32>
    tpu.vector_store %arg6[%c312_325, %c0_326], %542 {strides = array<i32>} : memref<344x256xf32, #tpu.memory_space<vmem>>, vector<32x256xf32>,
    %c0_327 = arith.constant 0 : index
    %c0_328 = arith.constant 0 : index
    %544 = vector.load %arg6[%c0_327, %c0_328] : memref<344x256xf32, #tpu.memory_space<vmem>>, vector<344x256xf32>
    %cst_329 = arith.constant dense<0.000000e+00> : vector<32x256xf32>
    %545 = tpu.matmul %300, %544, %cst_329 {dimension_numbers = #tpu.dot_dimension_numbers<[1], [0], [0], [1], [0, 0, 1, 1], [], []>} : vector<32x344xf32>, vector<344x256xf32>, vector<32x256xf32> -> vector<32x256xf32>
    %cst_330 = arith.constant dense<0.000000e+00> : vector<32xf32>
    %546 = vector.multi_reduction <add>, %545, %cst_330 [1] : vector<32x256xf32> to vector<32xf32>
    %547 = vector.shape_cast %546 : vector<32xf32> to vector<32x1xf32>
    %548 = arith.mulf %545, %545 : vector<32x256xf32>
    %cst_331 = arith.constant dense<0.000000e+00> : vector<32xf32>
    %549 = vector.multi_reduction <add>, %548, %cst_331 [1] : vector<32x256xf32> to vector<32xf32>
    %550 = vector.shape_cast %549 : vector<32xf32> to vector<32x1xf32>
    %cst_332 = arith.constant 3.906250e-03 : f32
    %551 = vector.broadcast %cst_332 : f32 to vector<32x1xf32>
    %552 = arith.mulf %547, %551 : vector<32x1xf32>
    %cst_333 = arith.constant 3.906250e-03 : f32
    %553 = vector.broadcast %cst_333 : f32 to vector<32x1xf32>
    %554 = arith.mulf %550, %553 : vector<32x1xf32>
    %555 = arith.mulf %552, %552 : vector<32x1xf32>
    %556 = arith.subf %554, %555 : vector<32x1xf32>
    %cst_334 = arith.constant 0.000000e+00 : f32
    %557 = vector.broadcast %cst_334 : f32 to vector<32x1xf32>
    %558 = arith.maximumf %556, %557 : vector<32x1xf32>
    %559 = vector.broadcast %552 : vector<32x1xf32> to vector<32x256xf32>
    %560 = arith.subf %545, %559 : vector<32x256xf32>
    %cst_335 = arith.constant 9.99999974E-6 : f32
    %561 = vector.broadcast %cst_335 : f32 to vector<32x1xf32>
    %562 = arith.addf %558, %561 : vector<32x1xf32>
    %563 = math.rsqrt %562 : vector<32x1xf32>
    %564 = vector.broadcast %563 : vector<32x1xf32> to vector<32x256xf32>
    %565 = arith.mulf %560, %564 : vector<32x256xf32>
    %566 = vector.broadcast %301 : vector<32x1xf32> to vector<32x256xf32>
    %567 = arith.mulf %565, %566 : vector<32x256xf32>
    %568 = vector.broadcast %302 : vector<32x1xf32> to vector<32x256xf32>
    %569 = arith.addf %567, %568 : vector<32x256xf32>
    %cst_336 = arith.constant 0.000000e+00 : f32
    %570 = vector.broadcast %cst_336 : f32 to vector<32x256xf32>
    %571 = arith.minimumf %569, %570 : vector<32x256xf32>
    %572 = math.exp %571 : vector<32x256xf32>
    %cst_337 = arith.constant 1.000000e+00 : f32
    %573 = vector.broadcast %cst_337 : f32 to vector<32x256xf32>
    %574 = arith.subf %572, %573 : vector<32x256xf32>
    %cst_338 = arith.constant 1.67326319 : f32
    %575 = vector.broadcast %cst_338 : f32 to vector<32x256xf32>
    %576 = arith.mulf %575, %574 : vector<32x256xf32>
    %cst_339 = arith.constant 0.000000e+00 : f32
    %577 = vector.broadcast %cst_339 : f32 to vector<32x256xf32>
    %578 = arith.cmpf ogt, %569, %577 : vector<32x256xf32>
    %579 = arith.select %578, %569, %576 : vector<32x256xi1>, vector<32x256xf32>
    %cst_340 = arith.constant 1.05070102 : f32
    %580 = vector.broadcast %cst_340 : f32 to vector<32x256xf32>
    %581 = arith.mulf %580, %579 : vector<32x256xf32>
    %c2 = arith.constant 2 : index
    %c0_341 = arith.constant 0 : index
    %c0_342 = arith.constant 0 : index
    %582 = vector.load %arg1[%c2, %c0_341, %c0_342] : memref<3x8x32xf32, #tpu.memory_space<vmem>>, vector<1x8x32xf32>
    %583 = vector.shape_cast %582 : vector<1x8x32xf32> to vector<8x32xf32>
    %c2_343 = arith.constant 2 : index
    %c0_344 = arith.constant 0 : index
    %c0_345 = arith.constant 0 : index
    %584 = vector.load %arg2[%c2_343, %c0_344, %c0_345] : memref<3x32x344xf32, #tpu.memory_space<vmem>>, vector<1x32x344xf32>
    %585 = vector.shape_cast %584 : vector<1x32x344xf32> to vector<32x344xf32>
    %586 = vector.extract_strided_slice %8 {offsets = [0, 4], sizes = [32, 1], strides = [1, 1]} : vector<32x8xf32> to vector<32x1xf32>
    %587 = vector.extract_strided_slice %8 {offsets = [0, 5], sizes = [32, 1], strides = [1, 1]} : vector<32x8xf32> to vector<32x1xf32>
    %cst_346 = arith.constant dense<0.000000e+00> : vector<8x256xf32>
    %588 = tpu.matmul %583, %581, %cst_346 {dimension_numbers = #tpu.dot_dimension_numbers<[1], [0], [0], [1], [0, 0, 1, 1], [], []>} : vector<8x32xf32>, vector<32x256xf32>, vector<8x256xf32> -> vector<8x256xf32>
    %c19_i32_347 = arith.constant 19 : i32
    %589 = tpu.dynamic_rotate %588 by %c19_i32_347 dim 1 : vector<8x256xf32>, i32 -> vector<8x256xf32>
    %c19_i32_348 = arith.constant 19 : i32
    %590 = vector.broadcast %c19_i32_348 : i32 to vector<8x256xi32>
    %591 = arith.cmpi slt, %1, %590 : vector<8x256xi32>
    %cst_349 = arith.constant 0.000000e+00 : f32
    %592 = vector.broadcast %cst_349 : f32 to vector<8x256xf32>
    %593 = arith.select %591, %592, %589 : vector<8x256xi1>, vector<8x256xf32>
    %c0_350 = arith.constant 0 : index
    %c0_351 = arith.constant 0 : index
    %594 = vector.load %arg6[%c0_350, %c0_351] : memref<344x256xf32, #tpu.memory_space<vmem>>, vector<8x256xf32>
    tpu.vector_store %arg6[%c0_350, %c0_351], %593 {strides = array<i32>} : memref<344x256xf32, #tpu.memory_space<vmem>>, vector<8x256xf32>,
    %c18_i32_352 = arith.constant 18 : i32
    %595 = tpu.dynamic_rotate %588 by %c18_i32_352 dim 1 : vector<8x256xf32>, i32 -> vector<8x256xf32>
    %c18_i32_353 = arith.constant 18 : i32
    %596 = vector.broadcast %c18_i32_353 : i32 to vector<8x256xi32>
    %597 = arith.cmpi slt, %1, %596 : vector<8x256xi32>
    %cst_354 = arith.constant 0.000000e+00 : f32
    %598 = vector.broadcast %cst_354 : f32 to vector<8x256xf32>
    %599 = arith.select %597, %598, %595 : vector<8x256xi1>, vector<8x256xf32>
    %c8_355 = arith.constant 8 : index
    %c0_356 = arith.constant 0 : index
    %600 = vector.load %arg6[%c8_355, %c0_356] : memref<344x256xf32, #tpu.memory_space<vmem>>, vector<8x256xf32>
    tpu.vector_store %arg6[%c8_355, %c0_356], %599 {strides = array<i32>} : memref<344x256xf32, #tpu.memory_space<vmem>>, vector<8x256xf32>,
    %c17_i32_357 = arith.constant 17 : i32
    %601 = tpu.dynamic_rotate %588 by %c17_i32_357 dim 1 : vector<8x256xf32>, i32 -> vector<8x256xf32>
    %c17_i32_358 = arith.constant 17 : i32
    %602 = vector.broadcast %c17_i32_358 : i32 to vector<8x256xi32>
    %603 = arith.cmpi slt, %1, %602 : vector<8x256xi32>
    %cst_359 = arith.constant 0.000000e+00 : f32
    %604 = vector.broadcast %cst_359 : f32 to vector<8x256xf32>
    %605 = arith.select %603, %604, %601 : vector<8x256xi1>, vector<8x256xf32>
    %c16_360 = arith.constant 16 : index
    %c0_361 = arith.constant 0 : index
    %606 = vector.load %arg6[%c16_360, %c0_361] : memref<344x256xf32, #tpu.memory_space<vmem>>, vector<8x256xf32>
    tpu.vector_store %arg6[%c16_360, %c0_361], %605 {strides = array<i32>} : memref<344x256xf32, #tpu.memory_space<vmem>>, vector<8x256xf32>,
    %c16_i32_362 = arith.constant 16 : i32
    %607 = tpu.dynamic_rotate %588 by %c16_i32_362 dim 1 : vector<8x256xf32>, i32 -> vector<8x256xf32>
    %c16_i32_363 = arith.constant 16 : i32
    %608 = vector.broadcast %c16_i32_363 : i32 to vector<8x256xi32>
    %609 = arith.cmpi slt, %1, %608 : vector<8x256xi32>
    %cst_364 = arith.constant 0.000000e+00 : f32
    %610 = vector.broadcast %cst_364 : f32 to vector<8x256xf32>
    %611 = arith.select %609, %610, %607 : vector<8x256xi1>, vector<8x256xf32>
    %c24_365 = arith.constant 24 : index
    %c0_366 = arith.constant 0 : index
    %612 = vector.load %arg6[%c24_365, %c0_366] : memref<344x256xf32, #tpu.memory_space<vmem>>, vector<8x256xf32>
    tpu.vector_store %arg6[%c24_365, %c0_366], %611 {strides = array<i32>} : memref<344x256xf32, #tpu.memory_space<vmem>>, vector<8x256xf32>,
    %c15_i32_367 = arith.constant 15 : i32
    %613 = tpu.dynamic_rotate %588 by %c15_i32_367 dim 1 : vector<8x256xf32>, i32 -> vector<8x256xf32>
    %c15_i32_368 = arith.constant 15 : i32
    %614 = vector.broadcast %c15_i32_368 : i32 to vector<8x256xi32>
    %615 = arith.cmpi slt, %1, %614 : vector<8x256xi32>
    %cst_369 = arith.constant 0.000000e+00 : f32
    %616 = vector.broadcast %cst_369 : f32 to vector<8x256xf32>
    %617 = arith.select %615, %616, %613 : vector<8x256xi1>, vector<8x256xf32>
    %c32_370 = arith.constant 32 : index
    %c0_371 = arith.constant 0 : index
    %618 = vector.load %arg6[%c32_370, %c0_371] : memref<344x256xf32, #tpu.memory_space<vmem>>, vector<8x256xf32>
    tpu.vector_store %arg6[%c32_370, %c0_371], %617 {strides = array<i32>} : memref<344x256xf32, #tpu.memory_space<vmem>>, vector<8x256xf32>,
    %c14_i32_372 = arith.constant 14 : i32
    %619 = tpu.dynamic_rotate %588 by %c14_i32_372 dim 1 : vector<8x256xf32>, i32 -> vector<8x256xf32>
    %c14_i32_373 = arith.constant 14 : i32
    %620 = vector.broadcast %c14_i32_373 : i32 to vector<8x256xi32>
    %621 = arith.cmpi slt, %1, %620 : vector<8x256xi32>
    %cst_374 = arith.constant 0.000000e+00 : f32
    %622 = vector.broadcast %cst_374 : f32 to vector<8x256xf32>
    %623 = arith.select %621, %622, %619 : vector<8x256xi1>, vector<8x256xf32>
    %c40_375 = arith.constant 40 : index
    %c0_376 = arith.constant 0 : index
    %624 = vector.load %arg6[%c40_375, %c0_376] : memref<344x256xf32, #tpu.memory_space<vmem>>, vector<8x256xf32>
    tpu.vector_store %arg6[%c40_375, %c0_376], %623 {strides = array<i32>} : memref<344x256xf32, #tpu.memory_space<vmem>>, vector<8x256xf32>,
    %c13_i32_377 = arith.constant 13 : i32
    %625 = tpu.dynamic_rotate %588 by %c13_i32_377 dim 1 : vector<8x256xf32>, i32 -> vector<8x256xf32>
    %c13_i32_378 = arith.constant 13 : i32
    %626 = vector.broadcast %c13_i32_378 : i32 to vector<8x256xi32>
    %627 = arith.cmpi slt, %1, %626 : vector<8x256xi32>
    %cst_379 = arith.constant 0.000000e+00 : f32
    %628 = vector.broadcast %cst_379 : f32 to vector<8x256xf32>
    %629 = arith.select %627, %628, %625 : vector<8x256xi1>, vector<8x256xf32>
    %c48_380 = arith.constant 48 : index
    %c0_381 = arith.constant 0 : index
    %630 = vector.load %arg6[%c48_380, %c0_381] : memref<344x256xf32, #tpu.memory_space<vmem>>, vector<8x256xf32>
    tpu.vector_store %arg6[%c48_380, %c0_381], %629 {strides = array<i32>} : memref<344x256xf32, #tpu.memory_space<vmem>>, vector<8x256xf32>,
    %c12_i32_382 = arith.constant 12 : i32
    %631 = tpu.dynamic_rotate %588 by %c12_i32_382 dim 1 : vector<8x256xf32>, i32 -> vector<8x256xf32>
    %c12_i32_383 = arith.constant 12 : i32
    %632 = vector.broadcast %c12_i32_383 : i32 to vector<8x256xi32>
    %633 = arith.cmpi slt, %1, %632 : vector<8x256xi32>
    %cst_384 = arith.constant 0.000000e+00 : f32
    %634 = vector.broadcast %cst_384 : f32 to vector<8x256xf32>
    %635 = arith.select %633, %634, %631 : vector<8x256xi1>, vector<8x256xf32>
    %c56_385 = arith.constant 56 : index
    %c0_386 = arith.constant 0 : index
    %636 = vector.load %arg6[%c56_385, %c0_386] : memref<344x256xf32, #tpu.memory_space<vmem>>, vector<8x256xf32>
    tpu.vector_store %arg6[%c56_385, %c0_386], %635 {strides = array<i32>} : memref<344x256xf32, #tpu.memory_space<vmem>>, vector<8x256xf32>,
    %c11_i32_387 = arith.constant 11 : i32
    %637 = tpu.dynamic_rotate %588 by %c11_i32_387 dim 1 : vector<8x256xf32>, i32 -> vector<8x256xf32>
    %c11_i32_388 = arith.constant 11 : i32
    %638 = vector.broadcast %c11_i32_388 : i32 to vector<8x256xi32>
    %639 = arith.cmpi slt, %1, %638 : vector<8x256xi32>
    %cst_389 = arith.constant 0.000000e+00 : f32
    %640 = vector.broadcast %cst_389 : f32 to vector<8x256xf32>
    %641 = arith.select %639, %640, %637 : vector<8x256xi1>, vector<8x256xf32>
    %c64_390 = arith.constant 64 : index
    %c0_391 = arith.constant 0 : index
    %642 = vector.load %arg6[%c64_390, %c0_391] : memref<344x256xf32, #tpu.memory_space<vmem>>, vector<8x256xf32>
    tpu.vector_store %arg6[%c64_390, %c0_391], %641 {strides = array<i32>} : memref<344x256xf32, #tpu.memory_space<vmem>>, vector<8x256xf32>,
    %c10_i32_392 = arith.constant 10 : i32
    %643 = tpu.dynamic_rotate %588 by %c10_i32_392 dim 1 : vector<8x256xf32>, i32 -> vector<8x256xf32>
    %c10_i32_393 = arith.constant 10 : i32
    %644 = vector.broadcast %c10_i32_393 : i32 to vector<8x256xi32>
    %645 = arith.cmpi slt, %1, %644 : vector<8x256xi32>
    %cst_394 = arith.constant 0.000000e+00 : f32
    %646 = vector.broadcast %cst_394 : f32 to vector<8x256xf32>
    %647 = arith.select %645, %646, %643 : vector<8x256xi1>, vector<8x256xf32>
    %c72_395 = arith.constant 72 : index
    %c0_396 = arith.constant 0 : index
    %648 = vector.load %arg6[%c72_395, %c0_396] : memref<344x256xf32, #tpu.memory_space<vmem>>, vector<8x256xf32>
    tpu.vector_store %arg6[%c72_395, %c0_396], %647 {strides = array<i32>} : memref<344x256xf32, #tpu.memory_space<vmem>>, vector<8x256xf32>,
    %c9_i32_397 = arith.constant 9 : i32
    %649 = tpu.dynamic_rotate %588 by %c9_i32_397 dim 1 : vector<8x256xf32>, i32 -> vector<8x256xf32>
    %c9_i32_398 = arith.constant 9 : i32
    %650 = vector.broadcast %c9_i32_398 : i32 to vector<8x256xi32>
    %651 = arith.cmpi slt, %1, %650 : vector<8x256xi32>
    %cst_399 = arith.constant 0.000000e+00 : f32
    %652 = vector.broadcast %cst_399 : f32 to vector<8x256xf32>
    %653 = arith.select %651, %652, %649 : vector<8x256xi1>, vector<8x256xf32>
    %c80_400 = arith.constant 80 : index
    %c0_401 = arith.constant 0 : index
    %654 = vector.load %arg6[%c80_400, %c0_401] : memref<344x256xf32, #tpu.memory_space<vmem>>, vector<8x256xf32>
    tpu.vector_store %arg6[%c80_400, %c0_401], %653 {strides = array<i32>} : memref<344x256xf32, #tpu.memory_space<vmem>>, vector<8x256xf32>,
    %c8_i32_402 = arith.constant 8 : i32
    %655 = tpu.dynamic_rotate %588 by %c8_i32_402 dim 1 : vector<8x256xf32>, i32 -> vector<8x256xf32>
    %c8_i32_403 = arith.constant 8 : i32
    %656 = vector.broadcast %c8_i32_403 : i32 to vector<8x256xi32>
    %657 = arith.cmpi slt, %1, %656 : vector<8x256xi32>
    %cst_404 = arith.constant 0.000000e+00 : f32
    %658 = vector.broadcast %cst_404 : f32 to vector<8x256xf32>
    %659 = arith.select %657, %658, %655 : vector<8x256xi1>, vector<8x256xf32>
    %c88_405 = arith.constant 88 : index
    %c0_406 = arith.constant 0 : index
    %660 = vector.load %arg6[%c88_405, %c0_406] : memref<344x256xf32, #tpu.memory_space<vmem>>, vector<8x256xf32>
    tpu.vector_store %arg6[%c88_405, %c0_406], %659 {strides = array<i32>} : memref<344x256xf32, #tpu.memory_space<vmem>>, vector<8x256xf32>,
    %c7_i32_407 = arith.constant 7 : i32
    %661 = tpu.dynamic_rotate %588 by %c7_i32_407 dim 1 : vector<8x256xf32>, i32 -> vector<8x256xf32>
    %c7_i32_408 = arith.constant 7 : i32
    %662 = vector.broadcast %c7_i32_408 : i32 to vector<8x256xi32>
    %663 = arith.cmpi slt, %1, %662 : vector<8x256xi32>
    %cst_409 = arith.constant 0.000000e+00 : f32
    %664 = vector.broadcast %cst_409 : f32 to vector<8x256xf32>
    %665 = arith.select %663, %664, %661 : vector<8x256xi1>, vector<8x256xf32>
    %c96_410 = arith.constant 96 : index
    %c0_411 = arith.constant 0 : index
    %666 = vector.load %arg6[%c96_410, %c0_411] : memref<344x256xf32, #tpu.memory_space<vmem>>, vector<8x256xf32>
    tpu.vector_store %arg6[%c96_410, %c0_411], %665 {strides = array<i32>} : memref<344x256xf32, #tpu.memory_space<vmem>>, vector<8x256xf32>,
    %c6_i32_412 = arith.constant 6 : i32
    %667 = tpu.dynamic_rotate %588 by %c6_i32_412 dim 1 : vector<8x256xf32>, i32 -> vector<8x256xf32>
    %c6_i32_413 = arith.constant 6 : i32
    %668 = vector.broadcast %c6_i32_413 : i32 to vector<8x256xi32>
    %669 = arith.cmpi slt, %1, %668 : vector<8x256xi32>
    %cst_414 = arith.constant 0.000000e+00 : f32
    %670 = vector.broadcast %cst_414 : f32 to vector<8x256xf32>
    %671 = arith.select %669, %670, %667 : vector<8x256xi1>, vector<8x256xf32>
    %c104_415 = arith.constant 104 : index
    %c0_416 = arith.constant 0 : index
    %672 = vector.load %arg6[%c104_415, %c0_416] : memref<344x256xf32, #tpu.memory_space<vmem>>, vector<8x256xf32>
    tpu.vector_store %arg6[%c104_415, %c0_416], %671 {strides = array<i32>} : memref<344x256xf32, #tpu.memory_space<vmem>>, vector<8x256xf32>,
    %c5_i32_417 = arith.constant 5 : i32
    %673 = tpu.dynamic_rotate %588 by %c5_i32_417 dim 1 : vector<8x256xf32>, i32 -> vector<8x256xf32>
    %c5_i32_418 = arith.constant 5 : i32
    %674 = vector.broadcast %c5_i32_418 : i32 to vector<8x256xi32>
    %675 = arith.cmpi slt, %1, %674 : vector<8x256xi32>
    %cst_419 = arith.constant 0.000000e+00 : f32
    %676 = vector.broadcast %cst_419 : f32 to vector<8x256xf32>
    %677 = arith.select %675, %676, %673 : vector<8x256xi1>, vector<8x256xf32>
    %c112_420 = arith.constant 112 : index
    %c0_421 = arith.constant 0 : index
    %678 = vector.load %arg6[%c112_420, %c0_421] : memref<344x256xf32, #tpu.memory_space<vmem>>, vector<8x256xf32>
    tpu.vector_store %arg6[%c112_420, %c0_421], %677 {strides = array<i32>} : memref<344x256xf32, #tpu.memory_space<vmem>>, vector<8x256xf32>,
    %c4_i32_422 = arith.constant 4 : i32
    %679 = tpu.dynamic_rotate %588 by %c4_i32_422 dim 1 : vector<8x256xf32>, i32 -> vector<8x256xf32>
    %c4_i32_423 = arith.constant 4 : i32
    %680 = vector.broadcast %c4_i32_423 : i32 to vector<8x256xi32>
    %681 = arith.cmpi slt, %1, %680 : vector<8x256xi32>
    %cst_424 = arith.constant 0.000000e+00 : f32
    %682 = vector.broadcast %cst_424 : f32 to vector<8x256xf32>
    %683 = arith.select %681, %682, %679 : vector<8x256xi1>, vector<8x256xf32>
    %c120_425 = arith.constant 120 : index
    %c0_426 = arith.constant 0 : index
    %684 = vector.load %arg6[%c120_425, %c0_426] : memref<344x256xf32, #tpu.memory_space<vmem>>, vector<8x256xf32>
    tpu.vector_store %arg6[%c120_425, %c0_426], %683 {strides = array<i32>} : memref<344x256xf32, #tpu.memory_space<vmem>>, vector<8x256xf32>,
    %c3_i32_427 = arith.constant 3 : i32
    %685 = tpu.dynamic_rotate %588 by %c3_i32_427 dim 1 : vector<8x256xf32>, i32 -> vector<8x256xf32>
    %c3_i32_428 = arith.constant 3 : i32
    %686 = vector.broadcast %c3_i32_428 : i32 to vector<8x256xi32>
    %687 = arith.cmpi slt, %1, %686 : vector<8x256xi32>
    %cst_429 = arith.constant 0.000000e+00 : f32
    %688 = vector.broadcast %cst_429 : f32 to vector<8x256xf32>
    %689 = arith.select %687, %688, %685 : vector<8x256xi1>, vector<8x256xf32>
    %c128_430 = arith.constant 128 : index
    %c0_431 = arith.constant 0 : index
    %690 = vector.load %arg6[%c128_430, %c0_431] : memref<344x256xf32, #tpu.memory_space<vmem>>, vector<8x256xf32>
    tpu.vector_store %arg6[%c128_430, %c0_431], %689 {strides = array<i32>} : memref<344x256xf32, #tpu.memory_space<vmem>>, vector<8x256xf32>,
    %c2_i32_432 = arith.constant 2 : i32
    %691 = tpu.dynamic_rotate %588 by %c2_i32_432 dim 1 : vector<8x256xf32>, i32 -> vector<8x256xf32>
    %c2_i32_433 = arith.constant 2 : i32
    %692 = vector.broadcast %c2_i32_433 : i32 to vector<8x256xi32>
    %693 = arith.cmpi slt, %1, %692 : vector<8x256xi32>
    %cst_434 = arith.constant 0.000000e+00 : f32
    %694 = vector.broadcast %cst_434 : f32 to vector<8x256xf32>
    %695 = arith.select %693, %694, %691 : vector<8x256xi1>, vector<8x256xf32>
    %c136_435 = arith.constant 136 : index
    %c0_436 = arith.constant 0 : index
    %696 = vector.load %arg6[%c136_435, %c0_436] : memref<344x256xf32, #tpu.memory_space<vmem>>, vector<8x256xf32>
    tpu.vector_store %arg6[%c136_435, %c0_436], %695 {strides = array<i32>} : memref<344x256xf32, #tpu.memory_space<vmem>>, vector<8x256xf32>,
    %c1_i32_437 = arith.constant 1 : i32
    %697 = tpu.dynamic_rotate %588 by %c1_i32_437 dim 1 : vector<8x256xf32>, i32 -> vector<8x256xf32>
    %c1_i32_438 = arith.constant 1 : i32
    %698 = vector.broadcast %c1_i32_438 : i32 to vector<8x256xi32>
    %699 = arith.cmpi slt, %1, %698 : vector<8x256xi32>
    %cst_439 = arith.constant 0.000000e+00 : f32
    %700 = vector.broadcast %cst_439 : f32 to vector<8x256xf32>
    %701 = arith.select %699, %700, %697 : vector<8x256xi1>, vector<8x256xf32>
    %c144_440 = arith.constant 144 : index
    %c0_441 = arith.constant 0 : index
    %702 = vector.load %arg6[%c144_440, %c0_441] : memref<344x256xf32, #tpu.memory_space<vmem>>, vector<8x256xf32>
    tpu.vector_store %arg6[%c144_440, %c0_441], %701 {strides = array<i32>} : memref<344x256xf32, #tpu.memory_space<vmem>>, vector<8x256xf32>,
    %c152_442 = arith.constant 152 : index
    %c0_443 = arith.constant 0 : index
    %703 = vector.load %arg6[%c152_442, %c0_443] : memref<344x256xf32, #tpu.memory_space<vmem>>, vector<8x256xf32>
    tpu.vector_store %arg6[%c152_442, %c0_443], %588 {strides = array<i32>} : memref<344x256xf32, #tpu.memory_space<vmem>>, vector<8x256xf32>,
    %c255_i32_444 = arith.constant 255 : i32
    %704 = tpu.dynamic_rotate %588 by %c255_i32_444 dim 1 : vector<8x256xf32>, i32 -> vector<8x256xf32>
    %c127_i32_445 = arith.constant 127 : i32
    %705 = vector.broadcast %c127_i32_445 : i32 to vector<8x256xi32>
    %706 = arith.cmpi sge, %1, %705 : vector<8x256xi32>
    %cst_446 = arith.constant 0.000000e+00 : f32
    %707 = vector.broadcast %cst_446 : f32 to vector<8x256xf32>
    %708 = arith.select %706, %707, %704 : vector<8x256xi1>, vector<8x256xf32>
    %c160_447 = arith.constant 160 : index
    %c0_448 = arith.constant 0 : index
    %709 = vector.load %arg6[%c160_447, %c0_448] : memref<344x256xf32, #tpu.memory_space<vmem>>, vector<8x256xf32>
    tpu.vector_store %arg6[%c160_447, %c0_448], %708 {strides = array<i32>} : memref<344x256xf32, #tpu.memory_space<vmem>>, vector<8x256xf32>,
    %c254_i32_449 = arith.constant 254 : i32
    %710 = tpu.dynamic_rotate %588 by %c254_i32_449 dim 1 : vector<8x256xf32>, i32 -> vector<8x256xf32>
    %c126_i32_450 = arith.constant 126 : i32
    %711 = vector.broadcast %c126_i32_450 : i32 to vector<8x256xi32>
    %712 = arith.cmpi sge, %1, %711 : vector<8x256xi32>
    %cst_451 = arith.constant 0.000000e+00 : f32
    %713 = vector.broadcast %cst_451 : f32 to vector<8x256xf32>
    %714 = arith.select %712, %713, %710 : vector<8x256xi1>, vector<8x256xf32>
    %c168_452 = arith.constant 168 : index
    %c0_453 = arith.constant 0 : index
    %715 = vector.load %arg6[%c168_452, %c0_453] : memref<344x256xf32, #tpu.memory_space<vmem>>, vector<8x256xf32>
    tpu.vector_store %arg6[%c168_452, %c0_453], %714 {strides = array<i32>} : memref<344x256xf32, #tpu.memory_space<vmem>>, vector<8x256xf32>,
    %c253_i32_454 = arith.constant 253 : i32
    %716 = tpu.dynamic_rotate %588 by %c253_i32_454 dim 1 : vector<8x256xf32>, i32 -> vector<8x256xf32>
    %c125_i32_455 = arith.constant 125 : i32
    %717 = vector.broadcast %c125_i32_455 : i32 to vector<8x256xi32>
    %718 = arith.cmpi sge, %1, %717 : vector<8x256xi32>
    %cst_456 = arith.constant 0.000000e+00 : f32
    %719 = vector.broadcast %cst_456 : f32 to vector<8x256xf32>
    %720 = arith.select %718, %719, %716 : vector<8x256xi1>, vector<8x256xf32>
    %c176_457 = arith.constant 176 : index
    %c0_458 = arith.constant 0 : index
    %721 = vector.load %arg6[%c176_457, %c0_458] : memref<344x256xf32, #tpu.memory_space<vmem>>, vector<8x256xf32>
    tpu.vector_store %arg6[%c176_457, %c0_458], %720 {strides = array<i32>} : memref<344x256xf32, #tpu.memory_space<vmem>>, vector<8x256xf32>,
    %c252_i32_459 = arith.constant 252 : i32
    %722 = tpu.dynamic_rotate %588 by %c252_i32_459 dim 1 : vector<8x256xf32>, i32 -> vector<8x256xf32>
    %c124_i32_460 = arith.constant 124 : i32
    %723 = vector.broadcast %c124_i32_460 : i32 to vector<8x256xi32>
    %724 = arith.cmpi sge, %1, %723 : vector<8x256xi32>
    %cst_461 = arith.constant 0.000000e+00 : f32
    %725 = vector.broadcast %cst_461 : f32 to vector<8x256xf32>
    %726 = arith.select %724, %725, %722 : vector<8x256xi1>, vector<8x256xf32>
    %c184_462 = arith.constant 184 : index
    %c0_463 = arith.constant 0 : index
    %727 = vector.load %arg6[%c184_462, %c0_463] : memref<344x256xf32, #tpu.memory_space<vmem>>, vector<8x256xf32>
    tpu.vector_store %arg6[%c184_462, %c0_463], %726 {strides = array<i32>} : memref<344x256xf32, #tpu.memory_space<vmem>>, vector<8x256xf32>,
    %c251_i32_464 = arith.constant 251 : i32
    %728 = tpu.dynamic_rotate %588 by %c251_i32_464 dim 1 : vector<8x256xf32>, i32 -> vector<8x256xf32>
    %c123_i32_465 = arith.constant 123 : i32
    %729 = vector.broadcast %c123_i32_465 : i32 to vector<8x256xi32>
    %730 = arith.cmpi sge, %1, %729 : vector<8x256xi32>
    %cst_466 = arith.constant 0.000000e+00 : f32
    %731 = vector.broadcast %cst_466 : f32 to vector<8x256xf32>
    %732 = arith.select %730, %731, %728 : vector<8x256xi1>, vector<8x256xf32>
    %c192_467 = arith.constant 192 : index
    %c0_468 = arith.constant 0 : index
    %733 = vector.load %arg6[%c192_467, %c0_468] : memref<344x256xf32, #tpu.memory_space<vmem>>, vector<8x256xf32>
    tpu.vector_store %arg6[%c192_467, %c0_468], %732 {strides = array<i32>} : memref<344x256xf32, #tpu.memory_space<vmem>>, vector<8x256xf32>,
    %c250_i32_469 = arith.constant 250 : i32
    %734 = tpu.dynamic_rotate %588 by %c250_i32_469 dim 1 : vector<8x256xf32>, i32 -> vector<8x256xf32>
    %c122_i32_470 = arith.constant 122 : i32
    %735 = vector.broadcast %c122_i32_470 : i32 to vector<8x256xi32>
    %736 = arith.cmpi sge, %1, %735 : vector<8x256xi32>
    %cst_471 = arith.constant 0.000000e+00 : f32
    %737 = vector.broadcast %cst_471 : f32 to vector<8x256xf32>
    %738 = arith.select %736, %737, %734 : vector<8x256xi1>, vector<8x256xf32>
    %c200_472 = arith.constant 200 : index
    %c0_473 = arith.constant 0 : index
    %739 = vector.load %arg6[%c200_472, %c0_473] : memref<344x256xf32, #tpu.memory_space<vmem>>, vector<8x256xf32>
    tpu.vector_store %arg6[%c200_472, %c0_473], %738 {strides = array<i32>} : memref<344x256xf32, #tpu.memory_space<vmem>>, vector<8x256xf32>,
    %c249_i32_474 = arith.constant 249 : i32
    %740 = tpu.dynamic_rotate %588 by %c249_i32_474 dim 1 : vector<8x256xf32>, i32 -> vector<8x256xf32>
    %c121_i32_475 = arith.constant 121 : i32
    %741 = vector.broadcast %c121_i32_475 : i32 to vector<8x256xi32>
    %742 = arith.cmpi sge, %1, %741 : vector<8x256xi32>
    %cst_476 = arith.constant 0.000000e+00 : f32
    %743 = vector.broadcast %cst_476 : f32 to vector<8x256xf32>
    %744 = arith.select %742, %743, %740 : vector<8x256xi1>, vector<8x256xf32>
    %c208_477 = arith.constant 208 : index
    %c0_478 = arith.constant 0 : index
    %745 = vector.load %arg6[%c208_477, %c0_478] : memref<344x256xf32, #tpu.memory_space<vmem>>, vector<8x256xf32>
    tpu.vector_store %arg6[%c208_477, %c0_478], %744 {strides = array<i32>} : memref<344x256xf32, #tpu.memory_space<vmem>>, vector<8x256xf32>,
    %c248_i32_479 = arith.constant 248 : i32
    %746 = tpu.dynamic_rotate %588 by %c248_i32_479 dim 1 : vector<8x256xf32>, i32 -> vector<8x256xf32>
    %c120_i32_480 = arith.constant 120 : i32
    %747 = vector.broadcast %c120_i32_480 : i32 to vector<8x256xi32>
    %748 = arith.cmpi sge, %1, %747 : vector<8x256xi32>
    %cst_481 = arith.constant 0.000000e+00 : f32
    %749 = vector.broadcast %cst_481 : f32 to vector<8x256xf32>
    %750 = arith.select %748, %749, %746 : vector<8x256xi1>, vector<8x256xf32>
    %c216_482 = arith.constant 216 : index
    %c0_483 = arith.constant 0 : index
    %751 = vector.load %arg6[%c216_482, %c0_483] : memref<344x256xf32, #tpu.memory_space<vmem>>, vector<8x256xf32>
    tpu.vector_store %arg6[%c216_482, %c0_483], %750 {strides = array<i32>} : memref<344x256xf32, #tpu.memory_space<vmem>>, vector<8x256xf32>,
    %c247_i32_484 = arith.constant 247 : i32
    %752 = tpu.dynamic_rotate %588 by %c247_i32_484 dim 1 : vector<8x256xf32>, i32 -> vector<8x256xf32>
    %c119_i32_485 = arith.constant 119 : i32
    %753 = vector.broadcast %c119_i32_485 : i32 to vector<8x256xi32>
    %754 = arith.cmpi sge, %1, %753 : vector<8x256xi32>
    %cst_486 = arith.constant 0.000000e+00 : f32
    %755 = vector.broadcast %cst_486 : f32 to vector<8x256xf32>
    %756 = arith.select %754, %755, %752 : vector<8x256xi1>, vector<8x256xf32>
    %c224_487 = arith.constant 224 : index
    %c0_488 = arith.constant 0 : index
    %757 = vector.load %arg6[%c224_487, %c0_488] : memref<344x256xf32, #tpu.memory_space<vmem>>, vector<8x256xf32>
    tpu.vector_store %arg6[%c224_487, %c0_488], %756 {strides = array<i32>} : memref<344x256xf32, #tpu.memory_space<vmem>>, vector<8x256xf32>,
    %c246_i32_489 = arith.constant 246 : i32
    %758 = tpu.dynamic_rotate %588 by %c246_i32_489 dim 1 : vector<8x256xf32>, i32 -> vector<8x256xf32>
    %c118_i32_490 = arith.constant 118 : i32
    %759 = vector.broadcast %c118_i32_490 : i32 to vector<8x256xi32>
    %760 = arith.cmpi sge, %1, %759 : vector<8x256xi32>
    %cst_491 = arith.constant 0.000000e+00 : f32
    %761 = vector.broadcast %cst_491 : f32 to vector<8x256xf32>
    %762 = arith.select %760, %761, %758 : vector<8x256xi1>, vector<8x256xf32>
    %c232_492 = arith.constant 232 : index
    %c0_493 = arith.constant 0 : index
    %763 = vector.load %arg6[%c232_492, %c0_493] : memref<344x256xf32, #tpu.memory_space<vmem>>, vector<8x256xf32>
    tpu.vector_store %arg6[%c232_492, %c0_493], %762 {strides = array<i32>} : memref<344x256xf32, #tpu.memory_space<vmem>>, vector<8x256xf32>,
    %c245_i32_494 = arith.constant 245 : i32
    %764 = tpu.dynamic_rotate %588 by %c245_i32_494 dim 1 : vector<8x256xf32>, i32 -> vector<8x256xf32>
    %c117_i32_495 = arith.constant 117 : i32
    %765 = vector.broadcast %c117_i32_495 : i32 to vector<8x256xi32>
    %766 = arith.cmpi sge, %1, %765 : vector<8x256xi32>
    %cst_496 = arith.constant 0.000000e+00 : f32
    %767 = vector.broadcast %cst_496 : f32 to vector<8x256xf32>
    %768 = arith.select %766, %767, %764 : vector<8x256xi1>, vector<8x256xf32>
    %c240_497 = arith.constant 240 : index
    %c0_498 = arith.constant 0 : index
    %769 = vector.load %arg6[%c240_497, %c0_498] : memref<344x256xf32, #tpu.memory_space<vmem>>, vector<8x256xf32>
    tpu.vector_store %arg6[%c240_497, %c0_498], %768 {strides = array<i32>} : memref<344x256xf32, #tpu.memory_space<vmem>>, vector<8x256xf32>,
    %c244_i32_499 = arith.constant 244 : i32
    %770 = tpu.dynamic_rotate %588 by %c244_i32_499 dim 1 : vector<8x256xf32>, i32 -> vector<8x256xf32>
    %c116_i32_500 = arith.constant 116 : i32
    %771 = vector.broadcast %c116_i32_500 : i32 to vector<8x256xi32>
    %772 = arith.cmpi sge, %1, %771 : vector<8x256xi32>
    %cst_501 = arith.constant 0.000000e+00 : f32
    %773 = vector.broadcast %cst_501 : f32 to vector<8x256xf32>
    %774 = arith.select %772, %773, %770 : vector<8x256xi1>, vector<8x256xf32>
    %c248_502 = arith.constant 248 : index
    %c0_503 = arith.constant 0 : index
    %775 = vector.load %arg6[%c248_502, %c0_503] : memref<344x256xf32, #tpu.memory_space<vmem>>, vector<8x256xf32>
    tpu.vector_store %arg6[%c248_502, %c0_503], %774 {strides = array<i32>} : memref<344x256xf32, #tpu.memory_space<vmem>>, vector<8x256xf32>,
    %c243_i32_504 = arith.constant 243 : i32
    %776 = tpu.dynamic_rotate %588 by %c243_i32_504 dim 1 : vector<8x256xf32>, i32 -> vector<8x256xf32>
    %c115_i32_505 = arith.constant 115 : i32
    %777 = vector.broadcast %c115_i32_505 : i32 to vector<8x256xi32>
    %778 = arith.cmpi sge, %1, %777 : vector<8x256xi32>
    %cst_506 = arith.constant 0.000000e+00 : f32
    %779 = vector.broadcast %cst_506 : f32 to vector<8x256xf32>
    %780 = arith.select %778, %779, %776 : vector<8x256xi1>, vector<8x256xf32>
    %c256_507 = arith.constant 256 : index
    %c0_508 = arith.constant 0 : index
    %781 = vector.load %arg6[%c256_507, %c0_508] : memref<344x256xf32, #tpu.memory_space<vmem>>, vector<8x256xf32>
    tpu.vector_store %arg6[%c256_507, %c0_508], %780 {strides = array<i32>} : memref<344x256xf32, #tpu.memory_space<vmem>>, vector<8x256xf32>,
    %c242_i32_509 = arith.constant 242 : i32
    %782 = tpu.dynamic_rotate %588 by %c242_i32_509 dim 1 : vector<8x256xf32>, i32 -> vector<8x256xf32>
    %c114_i32_510 = arith.constant 114 : i32
    %783 = vector.broadcast %c114_i32_510 : i32 to vector<8x256xi32>
    %784 = arith.cmpi sge, %1, %783 : vector<8x256xi32>
    %cst_511 = arith.constant 0.000000e+00 : f32
    %785 = vector.broadcast %cst_511 : f32 to vector<8x256xf32>
    %786 = arith.select %784, %785, %782 : vector<8x256xi1>, vector<8x256xf32>
    %c264_512 = arith.constant 264 : index
    %c0_513 = arith.constant 0 : index
    %787 = vector.load %arg6[%c264_512, %c0_513] : memref<344x256xf32, #tpu.memory_space<vmem>>, vector<8x256xf32>
    tpu.vector_store %arg6[%c264_512, %c0_513], %786 {strides = array<i32>} : memref<344x256xf32, #tpu.memory_space<vmem>>, vector<8x256xf32>,
    %c241_i32_514 = arith.constant 241 : i32
    %788 = tpu.dynamic_rotate %588 by %c241_i32_514 dim 1 : vector<8x256xf32>, i32 -> vector<8x256xf32>
    %c113_i32_515 = arith.constant 113 : i32
    %789 = vector.broadcast %c113_i32_515 : i32 to vector<8x256xi32>
    %790 = arith.cmpi sge, %1, %789 : vector<8x256xi32>
    %cst_516 = arith.constant 0.000000e+00 : f32
    %791 = vector.broadcast %cst_516 : f32 to vector<8x256xf32>
    %792 = arith.select %790, %791, %788 : vector<8x256xi1>, vector<8x256xf32>
    %c272_517 = arith.constant 272 : index
    %c0_518 = arith.constant 0 : index
    %793 = vector.load %arg6[%c272_517, %c0_518] : memref<344x256xf32, #tpu.memory_space<vmem>>, vector<8x256xf32>
    tpu.vector_store %arg6[%c272_517, %c0_518], %792 {strides = array<i32>} : memref<344x256xf32, #tpu.memory_space<vmem>>, vector<8x256xf32>,
    %c240_i32_519 = arith.constant 240 : i32
    %794 = tpu.dynamic_rotate %588 by %c240_i32_519 dim 1 : vector<8x256xf32>, i32 -> vector<8x256xf32>
    %c112_i32_520 = arith.constant 112 : i32
    %795 = vector.broadcast %c112_i32_520 : i32 to vector<8x256xi32>
    %796 = arith.cmpi sge, %1, %795 : vector<8x256xi32>
    %cst_521 = arith.constant 0.000000e+00 : f32
    %797 = vector.broadcast %cst_521 : f32 to vector<8x256xf32>
    %798 = arith.select %796, %797, %794 : vector<8x256xi1>, vector<8x256xf32>
    %c280_522 = arith.constant 280 : index
    %c0_523 = arith.constant 0 : index
    %799 = vector.load %arg6[%c280_522, %c0_523] : memref<344x256xf32, #tpu.memory_space<vmem>>, vector<8x256xf32>
    tpu.vector_store %arg6[%c280_522, %c0_523], %798 {strides = array<i32>} : memref<344x256xf32, #tpu.memory_space<vmem>>, vector<8x256xf32>,
    %c239_i32_524 = arith.constant 239 : i32
    %800 = tpu.dynamic_rotate %588 by %c239_i32_524 dim 1 : vector<8x256xf32>, i32 -> vector<8x256xf32>
    %c111_i32_525 = arith.constant 111 : i32
    %801 = vector.broadcast %c111_i32_525 : i32 to vector<8x256xi32>
    %802 = arith.cmpi sge, %1, %801 : vector<8x256xi32>
    %cst_526 = arith.constant 0.000000e+00 : f32
    %803 = vector.broadcast %cst_526 : f32 to vector<8x256xf32>
    %804 = arith.select %802, %803, %800 : vector<8x256xi1>, vector<8x256xf32>
    %c288_527 = arith.constant 288 : index
    %c0_528 = arith.constant 0 : index
    %805 = vector.load %arg6[%c288_527, %c0_528] : memref<344x256xf32, #tpu.memory_space<vmem>>, vector<8x256xf32>
    tpu.vector_store %arg6[%c288_527, %c0_528], %804 {strides = array<i32>} : memref<344x256xf32, #tpu.memory_space<vmem>>, vector<8x256xf32>,
    %c238_i32_529 = arith.constant 238 : i32
    %806 = tpu.dynamic_rotate %588 by %c238_i32_529 dim 1 : vector<8x256xf32>, i32 -> vector<8x256xf32>
    %c110_i32_530 = arith.constant 110 : i32
    %807 = vector.broadcast %c110_i32_530 : i32 to vector<8x256xi32>
    %808 = arith.cmpi sge, %1, %807 : vector<8x256xi32>
    %cst_531 = arith.constant 0.000000e+00 : f32
    %809 = vector.broadcast %cst_531 : f32 to vector<8x256xf32>
    %810 = arith.select %808, %809, %806 : vector<8x256xi1>, vector<8x256xf32>
    %c296_532 = arith.constant 296 : index
    %c0_533 = arith.constant 0 : index
    %811 = vector.load %arg6[%c296_532, %c0_533] : memref<344x256xf32, #tpu.memory_space<vmem>>, vector<8x256xf32>
    tpu.vector_store %arg6[%c296_532, %c0_533], %810 {strides = array<i32>} : memref<344x256xf32, #tpu.memory_space<vmem>>, vector<8x256xf32>,
    %c237_i32_534 = arith.constant 237 : i32
    %812 = tpu.dynamic_rotate %588 by %c237_i32_534 dim 1 : vector<8x256xf32>, i32 -> vector<8x256xf32>
    %c109_i32_535 = arith.constant 109 : i32
    %813 = vector.broadcast %c109_i32_535 : i32 to vector<8x256xi32>
    %814 = arith.cmpi sge, %1, %813 : vector<8x256xi32>
    %cst_536 = arith.constant 0.000000e+00 : f32
    %815 = vector.broadcast %cst_536 : f32 to vector<8x256xf32>
    %816 = arith.select %814, %815, %812 : vector<8x256xi1>, vector<8x256xf32>
    %c304_537 = arith.constant 304 : index
    %c0_538 = arith.constant 0 : index
    %817 = vector.load %arg6[%c304_537, %c0_538] : memref<344x256xf32, #tpu.memory_space<vmem>>, vector<8x256xf32>
    tpu.vector_store %arg6[%c304_537, %c0_538], %816 {strides = array<i32>} : memref<344x256xf32, #tpu.memory_space<vmem>>, vector<8x256xf32>,
    %c1_i32_539 = arith.constant 1 : i32
    %818 = tpu.dynamic_rotate %581 by %c1_i32_539 dim 1 : vector<32x256xf32>, i32 -> vector<32x256xf32>
    %c255_i32_540 = arith.constant 255 : i32
    %819 = tpu.dynamic_rotate %581 by %c255_i32_540 dim 1 : vector<32x256xf32>, i32 -> vector<32x256xf32>
    %820 = vector.shape_cast %4 : vector<1x256xi1> to vector<1x256xi1>
    %821 = vector.broadcast %820 : vector<1x256xi1> to vector<32x256xi1>
    %822 = arith.select %821, %581, %818 : vector<32x256xi1>, vector<32x256xf32>
    %823 = vector.shape_cast %6 : vector<1x256xi1> to vector<1x256xi1>
    %824 = vector.broadcast %823 : vector<1x256xi1> to vector<32x256xi1>
    %825 = arith.select %824, %581, %819 : vector<32x256xi1>, vector<32x256xf32>
    %826 = arith.maximumf %581, %822 : vector<32x256xf32>
    %827 = arith.maximumf %826, %825 : vector<32x256xf32>
    %c312_541 = arith.constant 312 : index
    %c0_542 = arith.constant 0 : index
    %828 = vector.load %arg6[%c312_541, %c0_542] : memref<344x256xf32, #tpu.memory_space<vmem>>, vector<32x256xf32>
    tpu.vector_store %arg6[%c312_541, %c0_542], %827 {strides = array<i32>} : memref<344x256xf32, #tpu.memory_space<vmem>>, vector<32x256xf32>,
    %c0_543 = arith.constant 0 : index
    %c0_544 = arith.constant 0 : index
    %829 = vector.load %arg6[%c0_543, %c0_544] : memref<344x256xf32, #tpu.memory_space<vmem>>, vector<344x256xf32>
    %cst_545 = arith.constant dense<0.000000e+00> : vector<32x256xf32>
    %830 = tpu.matmul %585, %829, %cst_545 {dimension_numbers = #tpu.dot_dimension_numbers<[1], [0], [0], [1], [0, 0, 1, 1], [], []>} : vector<32x344xf32>, vector<344x256xf32>, vector<32x256xf32> -> vector<32x256xf32>
    %cst_546 = arith.constant dense<0.000000e+00> : vector<32xf32>
    %831 = vector.multi_reduction <add>, %830, %cst_546 [1] : vector<32x256xf32> to vector<32xf32>
    %832 = vector.shape_cast %831 : vector<32xf32> to vector<32x1xf32>
    %833 = arith.mulf %830, %830 : vector<32x256xf32>
    %cst_547 = arith.constant dense<0.000000e+00> : vector<32xf32>
    %834 = vector.multi_reduction <add>, %833, %cst_547 [1] : vector<32x256xf32> to vector<32xf32>
    %835 = vector.shape_cast %834 : vector<32xf32> to vector<32x1xf32>
    %cst_548 = arith.constant 3.906250e-03 : f32
    %836 = vector.broadcast %cst_548 : f32 to vector<32x1xf32>
    %837 = arith.mulf %832, %836 : vector<32x1xf32>
    %cst_549 = arith.constant 3.906250e-03 : f32
    %838 = vector.broadcast %cst_549 : f32 to vector<32x1xf32>
    %839 = arith.mulf %835, %838 : vector<32x1xf32>
    %840 = arith.mulf %837, %837 : vector<32x1xf32>
    %841 = arith.subf %839, %840 : vector<32x1xf32>
    %cst_550 = arith.constant 0.000000e+00 : f32
    %842 = vector.broadcast %cst_550 : f32 to vector<32x1xf32>
    %843 = arith.maximumf %841, %842 : vector<32x1xf32>
    %844 = vector.broadcast %837 : vector<32x1xf32> to vector<32x256xf32>
    %845 = arith.subf %830, %844 : vector<32x256xf32>
    %cst_551 = arith.constant 9.99999974E-6 : f32
    %846 = vector.broadcast %cst_551 : f32 to vector<32x1xf32>
    %847 = arith.addf %843, %846 : vector<32x1xf32>
    %848 = math.rsqrt %847 : vector<32x1xf32>
    %849 = vector.broadcast %848 : vector<32x1xf32> to vector<32x256xf32>
    %850 = arith.mulf %845, %849 : vector<32x256xf32>
    %851 = vector.broadcast %586 : vector<32x1xf32> to vector<32x256xf32>
    %852 = arith.mulf %850, %851 : vector<32x256xf32>
    %853 = vector.broadcast %587 : vector<32x1xf32> to vector<32x256xf32>
    %854 = arith.addf %852, %853 : vector<32x256xf32>
    %cst_552 = arith.constant 0.000000e+00 : f32
    %855 = vector.broadcast %cst_552 : f32 to vector<32x256xf32>
    %856 = arith.minimumf %854, %855 : vector<32x256xf32>
    %857 = math.exp %856 : vector<32x256xf32>
    %cst_553 = arith.constant 1.000000e+00 : f32
    %858 = vector.broadcast %cst_553 : f32 to vector<32x256xf32>
    %859 = arith.subf %857, %858 : vector<32x256xf32>
    %cst_554 = arith.constant 1.67326319 : f32
    %860 = vector.broadcast %cst_554 : f32 to vector<32x256xf32>
    %861 = arith.mulf %860, %859 : vector<32x256xf32>
    %cst_555 = arith.constant 0.000000e+00 : f32
    %862 = vector.broadcast %cst_555 : f32 to vector<32x256xf32>
    %863 = arith.cmpf ogt, %854, %862 : vector<32x256xf32>
    %864 = arith.select %863, %854, %861 : vector<32x256xi1>, vector<32x256xf32>
    %cst_556 = arith.constant 1.05070102 : f32
    %865 = vector.broadcast %cst_556 : f32 to vector<32x256xf32>
    %866 = arith.mulf %865, %864 : vector<32x256xf32>
    %c0_557 = arith.constant 0 : index
    %c0_558 = arith.constant 0 : index
    %867 = vector.load %arg3[%c0_557, %c0_558] : memref<32x4xf32, #tpu.memory_space<vmem>>, vector<32x4xf32>
    %cst_559 = arith.constant dense<0.000000e+00> : vector<32x256xf32>
    %868 = tpu.matmul %867, %7, %cst_559 {dimension_numbers = #tpu.dot_dimension_numbers<[1], [0], [0], [1], [0, 0, 1, 1], [], []>} : vector<32x4xf32>, vector<4x256xf32>, vector<32x256xf32> -> vector<32x256xf32>
    %869 = vector.extract_strided_slice %8 {offsets = [0, 6], sizes = [32, 1], strides = [1, 1]} : vector<32x8xf32> to vector<32x1xf32>
    %870 = vector.extract_strided_slice %8 {offsets = [0, 7], sizes = [32, 1], strides = [1, 1]} : vector<32x8xf32> to vector<32x1xf32>
    %cst_560 = arith.constant dense<0.000000e+00> : vector<32xf32>
    %871 = vector.multi_reduction <add>, %868, %cst_560 [1] : vector<32x256xf32> to vector<32xf32>
    %872 = vector.shape_cast %871 : vector<32xf32> to vector<32x1xf32>
    %873 = arith.mulf %868, %868 : vector<32x256xf32>
    %cst_561 = arith.constant dense<0.000000e+00> : vector<32xf32>
    %874 = vector.multi_reduction <add>, %873, %cst_561 [1] : vector<32x256xf32> to vector<32xf32>
    %875 = vector.shape_cast %874 : vector<32xf32> to vector<32x1xf32>
    %cst_562 = arith.constant 3.906250e-03 : f32
    %876 = vector.broadcast %cst_562 : f32 to vector<32x1xf32>
    %877 = arith.mulf %872, %876 : vector<32x1xf32>
    %cst_563 = arith.constant 3.906250e-03 : f32
    %878 = vector.broadcast %cst_563 : f32 to vector<32x1xf32>
    %879 = arith.mulf %875, %878 : vector<32x1xf32>
    %880 = arith.mulf %877, %877 : vector<32x1xf32>
    %881 = arith.subf %879, %880 : vector<32x1xf32>
    %cst_564 = arith.constant 0.000000e+00 : f32
    %882 = vector.broadcast %cst_564 : f32 to vector<32x1xf32>
    %883 = arith.maximumf %881, %882 : vector<32x1xf32>
    %884 = vector.broadcast %877 : vector<32x1xf32> to vector<32x256xf32>
    %885 = arith.subf %868, %884 : vector<32x256xf32>
    %cst_565 = arith.constant 9.99999974E-6 : f32
    %886 = vector.broadcast %cst_565 : f32 to vector<32x1xf32>
    %887 = arith.addf %883, %886 : vector<32x1xf32>
    %888 = math.rsqrt %887 : vector<32x1xf32>
    %889 = vector.broadcast %888 : vector<32x1xf32> to vector<32x256xf32>
    %890 = arith.mulf %885, %889 : vector<32x256xf32>
    %891 = vector.broadcast %869 : vector<32x1xf32> to vector<32x256xf32>
    %892 = arith.mulf %890, %891 : vector<32x256xf32>
    %893 = vector.broadcast %870 : vector<32x1xf32> to vector<32x256xf32>
    %894 = arith.addf %892, %893 : vector<32x256xf32>
    %895 = arith.addf %866, %894 : vector<32x256xf32>
    %cst_566 = arith.constant 0.000000e+00 : f32
    %896 = vector.broadcast %cst_566 : f32 to vector<32x256xf32>
    %897 = arith.minimumf %895, %896 : vector<32x256xf32>
    %898 = math.exp %897 : vector<32x256xf32>
    %cst_567 = arith.constant 1.000000e+00 : f32
    %899 = vector.broadcast %cst_567 : f32 to vector<32x256xf32>
    %900 = arith.subf %898, %899 : vector<32x256xf32>
    %cst_568 = arith.constant 1.67326319 : f32
    %901 = vector.broadcast %cst_568 : f32 to vector<32x256xf32>
    %902 = arith.mulf %901, %900 : vector<32x256xf32>
    %cst_569 = arith.constant 0.000000e+00 : f32
    %903 = vector.broadcast %cst_569 : f32 to vector<32x256xf32>
    %904 = arith.cmpf ogt, %895, %903 : vector<32x256xf32>
    %905 = arith.select %904, %895, %902 : vector<32x256xi1>, vector<32x256xf32>
    %cst_570 = arith.constant 1.05070102 : f32
    %906 = vector.broadcast %cst_570 : f32 to vector<32x256xf32>
    %907 = arith.mulf %906, %905 : vector<32x256xf32>
    %c0_571 = arith.constant 0 : index
    %c0_572 = arith.constant 0 : index
    %908 = vector.load %arg5[%c0_571, %c0_572] : memref<32x256xf32, #tpu.memory_space<vmem>>, vector<32x256xf32>
    tpu.vector_store %arg5[%c0_571, %c0_572], %907 {strides = array<i32>} : memref<32x256xf32, #tpu.memory_space<vmem>>, vector<32x256xf32>,
    return
  }
}

</mosaic_0001>

<bundles_post_ra>
// kernel: inception_block_fwd.1
= control target key start
LH: loop header
LB: loop body
LE: loop exit
PB: predicated region body
PF: predicated region fallthrough
CT: control target
= control target key end

     0   :  { %10 = vsyncpa [#allocation4], 0  ;;  %s4195_s18 = smov [#allocation3]   ;;  %s6867_s0 = inlined_call_operand.vmem [shape: f32[4,256], index: 0, kind: input, shape index: {}]   ;;  %s6868_s1 = inlined_call_operand.vmem [shape: f32[3,8,32], index: 1, kind: input, shape index: {}]   ;;  %s6869_s2 = inlined_call_operand.hbm [shape: f32[3,32,344], index: 2, kind: input, shape index: {}]   ;;  %s6870_s3 = inlined_call_operand.vmem [shape: f32[32,4], index: 3, kind: input, shape index: {}]   ;;  %s6871_s4 = inlined_call_operand.vmem [shape: f32[32,8], index: 4, kind: input, shape index: {}]   ;;  %s6872_s5 = inlined_call_operand.vmem [shape: f32[32,256], index: 5, kind: output, shape index: {}]  }
   0x1   :  { %s20_s19 = sshll.u32 %s4195_s18, 4  ;;  %s21_s19 = int_to_ptr.vmem [resolvable:$true] %s20_s19 }
   0x2   :  { %s4181_s20 = scalar_lea.vmem %s21_s19, 4608  ;;  %p4186_p1 = scmp.lt.s32.totalorder %s21_s19, %s21_s19 }
   0x3   :  { %p4182_p0 = scmp.ne.s32.totalorder %s21_s19, %s4181_s20  ;;  %p4187_p2 = scmp.lt.s32.totalorder %s4181_s20, %s4181_s20 }
   0x5   :  { %p4188_p3 = por %p4187_p2, %p4186_p1 }
   0x7   :  { %p4189_p4 = pnand %p4188_p3, %p4182_p0 }
   0x9   :  { %4192 = shalt.err (!%p4189_p4)
}
   0xa   :  { %s4196_s21 = smov 384   ;;  %s4197_s22 = smov 24  }
   0xb   :  { %26 = dma.hbm_to_vmem [thread:$0]  %s6869_s2, 4608, %s21_s19, [#allocation4], %s4196_s21, %s4196_s21, %s4197_s22  }
   0xc   :  { %4193 = dma.done.wait [#allocation4], 4608  }
   0xd   :  { %4194 = vsyncadd [#allocation4], 4294962688  ;;  %v4198_v0 = vmov 0.0   ;;  %v4282_v1 = vld [vmem:[%s6867_s0] sm:$0xff]  ;;  %vm6908_vm0 = vcmask 1043456   ;;  %vm6897_vm1 = vcmask 31744   ;;  %v34_v4 = vlaneseq }
   0xe   :  { %131 = vmatprep.mubr.f32.mxu0 %v4198_v0  ;;  %v4286_v2 = vcombine.high %v4282_v1, %v4282_v1  ;;  %v43_v3 = vld [vmem:[%s6868_s1] sm:$0xff]  ;;  %s7011_s2 = smov 5   ;;  %s7013_s29 = smov 4   ;;  %v4226_v8 = vmov 0   ;;  %v45_v17 = vld [vmem:[#allocation3 + $0x8] sm:$0xff] }
   0xf   :  { %v4298_v5 = vand.u32 127, %v34_v4  ;;  %s4201_s30 = smov 1   ;;  %s7009_s6 = smov 6   ;;  %4045 = vset.pattern.permute.xlu1 %v4226_v8  ;;  %4046 = vset.pattern.permute.xlu0 %v4226_v8 }
  0x10   :  { %3459 = vmatprep.subr.msk.mxu0 %vm6908_vm0, %v4286_v2  ;;  %s4203_s7 = smov 127   ;;  %s7007_s8 = smov 7   ;;  %792 = vmatprep.mubr.f32.mxu1 %v45_v17 }
  0x11   :  { %3460 = vmatpush1.msk.msra.mxu0 %vm6908_vm0, %v4282_v1  ;;  %s7005_s9 = smov 8   ;;  %s7003_s10 = smov 9   ;;  %vm6906_vm2 = vcmp.lt.s32.totalorder %v4298_v5, 4  ;;  %vm6904_vm4 = vcmp.lt.s32.totalorder %v4298_v5, 5  ;;  %vm6902_vm6 = vcmp.lt.s32.totalorder %v4298_v5, 6  ;;  %vm6900_vm8 = vcmp.lt.s32.totalorder %v4298_v5, 7 }
  0x12   :  { %3461 = vmatmul.mubr.msk.f32.vlgmr.msra.gmra.mxu0 %vm6897_vm1, %v43_v3  ;;  %s6993_s11 = smov 10   ;;  %s6991_s12 = smov 11   ;;  %vm4545_vm3 = vmneg %vm6906_vm2  ;;  %vm6898_vm10 = vcmp.lt.s32.totalorder %v4298_v5, 8  ;;  %vm6899_vm12 = vcmp.lt.s32.totalorder %v4298_v5, 9  ;;  %vm6901_vm14 = vcmp.lt.s32.totalorder %v4298_v5, 10  ;;  %vm6903_vm1 = vcmp.lt.s32.totalorder %v4298_v5, 11 }
  0x13   :  { %1181 = vmatprep.mubr.f32.mxu0 %v4198_v0  ;;  %s6989_s13 = smov 12   ;;  %s6987_s14 = smov 13   ;;  %vm4560_vm5 = vmneg %vm6904_vm4 }
  0x14   :  { %s6985_s15 = smov 14   ;;  %s6983_s16 = smov 15   ;;  %vm4575_vm7 = vmneg %vm6902_vm6 }
  0x15   :  { %s6981_s17 = smov 16   ;;  %s6979_s18 = smov 17   ;;  %vm4598_vm9 = vmneg %vm6900_vm8 }
  0x16   :  { %s6977_s19 = smov 18   ;;  %s6975_s20 = smov 19   ;;  %vm4617_vm11 = vmneg %vm6898_vm10 }
  0x17   :  { %s6973_s21 = smov 116   ;;  %s6971_s22 = smov 117   ;;  %vm4640_vm13 = vmneg %vm6899_vm12 }
  0x18   :  { %s6959_s23 = smov 118   ;;  %s6873_s24 = smov 119   ;;  %vm4659_vm15 = vmneg %vm6901_vm14 }
  0x19   :  { %s6957_s25 = smov 120   ;;  %s6875_s26 = smov 121  }
  0x1a   :  { %s6877_s27 = smov 122   ;;  %s6955_s28 = smov 123  }
  0xd2   :  { %v4300_v6 = vpop.f32.mrf.mxu0 }
  0xd3   :  { %292 = vrot.lane.b32.xlu1 %v4300_v6, %s7011_s2  ;;  %303 = vrot.lane.b32.xlu0 %v4300_v6, %s7013_s29 }
  0xd4   :  { %v4314_v7 = vpop.f32.mrf.mxu0 }
  0xd7   :  { %580 = vrot.lane.b32.xlu1 %v4286_v2, %s4201_s30  ;;  %281 = vrot.lane.b32.xlu0 %v4300_v6, %s7009_s6 }
  0xdb   :  { %586 = vrot.lane.b32.xlu1 %v4286_v2, %s4203_s7  ;;  %270 = vrot.lane.b32.xlu0 %v4300_v6, %s7007_s8 }
  0xdf   :  { %259 = vrot.lane.b32.xlu0 %v4300_v6, %s7005_s9  ;;  %294 = vrot.lane.b32.xlu1 %v4314_v7, %s7011_s2 }
  0xe3   :  { %248 = vrot.lane.b32.xlu0 %v4300_v6, %s7003_s10  ;;  %283 = vrot.lane.b32.xlu1 %v4314_v7, %s7009_s6 }
  0xe7   :  { %237 = vrot.lane.b32.xlu0 %v4300_v6, %s6993_s11  ;;  %272 = vrot.lane.b32.xlu1 %v4314_v7, %s7007_s8 }
  0xeb   :  { %226 = vrot.lane.b32.xlu0 %v4300_v6, %s6991_s12  ;;  %261 = vrot.lane.b32.xlu1 %v4314_v7, %s7005_s9 }
  0xef   :  { %215 = vrot.lane.b32.xlu0 %v4300_v6, %s6989_s13  ;;  %250 = vrot.lane.b32.xlu1 %v4314_v7, %s7003_s10 }
  0xf3   :  { %204 = vrot.lane.b32.xlu0 %v4300_v6, %s6987_s14  ;;  %239 = vrot.lane.b32.xlu1 %v4314_v7, %s6993_s11 }
  0xf7   :  { %193 = vrot.lane.b32.xlu0 %v4300_v6, %s6985_s15  ;;  %228 = vrot.lane.b32.xlu1 %v4314_v7, %s6991_s12 }
  0xfb   :  { %182 = vrot.lane.b32.xlu0 %v4300_v6, %s6983_s16  ;;  %217 = vrot.lane.b32.xlu1 %v4314_v7, %s6989_s13 }
  0xff   :  { %171 = vrot.lane.b32.xlu0 %v4300_v6, %s6981_s17  ;;  %206 = vrot.lane.b32.xlu1 %v4314_v7, %s6987_s14 }
 0x103   :  { %160 = vrot.lane.b32.xlu0 %v4300_v6, %s6979_s18  ;;  %195 = vrot.lane.b32.xlu1 %v4314_v7, %s6985_s15 }
 0x107   :  { %149 = vrot.lane.b32.xlu0 %v4300_v6, %s6977_s19  ;;  %184 = vrot.lane.b32.xlu1 %v4314_v7, %s6983_s16 }
 0x10b   :  { %138 = vrot.lane.b32.xlu0 %v4300_v6, %s6975_s20  ;;  %173 = vrot.lane.b32.xlu1 %v4314_v7, %s6981_s17 }
 0x10f   :  { %481 = vrot.lane.b32.xlu0 %v4300_v6, %s6973_s21  ;;  %162 = vrot.lane.b32.xlu1 %v4314_v7, %s6979_s18 }
 0x113   :  { %469 = vrot.lane.b32.xlu0 %v4300_v6, %s6971_s22  ;;  %151 = vrot.lane.b32.xlu1 %v4314_v7, %s6977_s19 }
 0x117   :  { %457 = vrot.lane.b32.xlu0 %v4300_v6, %s6959_s23  ;;  %140 = vrot.lane.b32.xlu1 %v4314_v7, %s6975_s20 }
 0x11b   :  { %445 = vrot.lane.b32.xlu0 %v4300_v6, %s6873_s24  ;;  %483 = vrot.lane.b32.xlu1 %v4314_v7, %s6973_s21 }
 0x11f   :  { %471 = vrot.lane.b32.xlu1 %v4314_v7, %s6971_s22  ;;  %305 = vrot.lane.b32.xlu0 %v4314_v7, %s7013_s29 }
 0x123   :  { %459 = vrot.lane.b32.xlu1 %v4314_v7, %s6959_s23  ;;  %433 = vrot.lane.b32.xlu0 %v4300_v6, %s6957_s25  ;;  %s7097_s23 = smov 122  }
 0x127   :  { %447 = vrot.lane.b32.xlu1 %v4314_v7, %s6873_s24  ;;  %421 = vrot.lane.b32.xlu0 %v4300_v6, %s6875_s26  ;;  %s6883_s24 = smov 124  }
 0x12b   :  { %435 = vrot.lane.b32.xlu1 %v4314_v7, %s6957_s25  ;;  %409 = vrot.lane.b32.xlu0 %v4300_v6, %s6877_s27  ;;  %s7098_s25 = smov 123  }
 0x12f   :  { %423 = vrot.lane.b32.xlu1 %v4314_v7, %s6875_s26  ;;  %397 = vrot.lane.b32.xlu0 %v4300_v6, %s6955_s28  ;;  %s6881_s26 = smov 125  }
 0x133   :  { %411 = vrot.lane.b32.xlu1 %v4314_v7, %s6877_s27  ;;  %385 = vrot.lane.b32.xlu0 %v4300_v6, %s6883_s24  ;;  %s6879_s27 = smov 126  }
 0x137   :  { %399 = vrot.lane.b32.xlu1 %v4314_v7, %s6955_s28  ;;  %373 = vrot.lane.b32.xlu0 %v4300_v6, %s6881_s26  ;;  %s7094_s28 = smov 119  }
 0x13b   :  { %387 = vrot.lane.b32.xlu1 %v4314_v7, %s6883_s24  ;;  %361 = vrot.lane.b32.xlu0 %v4300_v6, %s6879_s27  ;;  %s6889_s24 = smov 109  }
 0x13f   :  { %375 = vrot.lane.b32.xlu1 %v4314_v7, %s6881_s26  ;;  %349 = vrot.lane.b32.xlu0 %v4300_v6, %s4203_s7  ;;  %s6887_s26 = smov 3  }
 0x143   :  { %363 = vrot.lane.b32.xlu1 %v4314_v7, %s6879_s27  ;;  %578 = vrot.lane.b32.xlu0 %v4282_v1, %s4201_s30  ;;  %s6885_s27 = smov 2  }
 0x145   :  { %v4422_v9 = vpop.permute.xlu1 %292  ;;  %v4424_v10 = vpop.permute.xlu0 %303 }
 0x147   :  { %351 = vrot.lane.b32.xlu1 %v4314_v7, %s4203_s7  ;;  %584 = vrot.lane.b32.xlu0 %v4282_v1, %s4203_s7 }
 0x149   :  { %v4430_v11 = vpop.permute.xlu1 %580  ;;  %v4432_v12 = vpop.permute.xlu0 %281 }
 0x14b   :  { %338 = vrot.lane.b32.xlu1 %v4314_v7, %s4201_s30  ;;  %336 = vrot.lane.b32.xlu0 %v4300_v6, %s4201_s30 }
 0x14d   :  { %v4438_v13 = vpop.permute.xlu1 %586  ;;  %v4440_v14 = vpop.permute.xlu0 %270 }
 0x14f   :  { %327 = vrot.lane.b32.xlu1 %v4314_v7, %s6885_s27  ;;  %325 = vrot.lane.b32.xlu0 %v4300_v6, %s6885_s27  ;;  %s6891_s27 = smov 110  }
 0x151   :  { %v4446_v15 = vpop.permute.xlu0 %259  ;;  %v4448_v16 = vpop.permute.xlu1 %294 }
 0x152   :  { %v297_v54 = vsel %vm6904_vm4, %v4422_v9, %v4448_v16  ;;  %v298_v58 = vsel %vm6904_vm4, %v4448_v16, %v4422_v9 }
 0x153   :  { %316 = vrot.lane.b32.xlu1 %v4314_v7, %s6887_s26  ;;  %314 = vrot.lane.b32.xlu0 %v4300_v6, %s6887_s26  ;;  %s6893_s26 = smov 111  }
 0x155   :  { %v4454_v18 = vpop.permute.xlu0 %248  ;;  %v4456_v19 = vpop.permute.xlu1 %283 }
 0x156   :  { %v286_v59 = vsel %vm6902_vm6, %v4432_v12, %v4456_v19  ;;  %v287_v61 = vsel %vm6902_vm6, %v4456_v19, %v4432_v12 }
 0x157   :  { %567 = vrot.lane.b32.xlu1 %v4314_v7, %s6889_s24  ;;  %565 = vrot.lane.b32.xlu0 %v4300_v6, %s6889_s24  ;;  %s6895_s24 = smov 112  }
 0x159   :  { %v4462_v20 = vpop.permute.xlu0 %237  ;;  %v4464_v21 = vpop.permute.xlu1 %272 }
 0x15a   :  { %v275_v62 = vsel %vm6900_vm8, %v4440_v14, %v4464_v21 }
 0x15b   :  { %555 = vrot.lane.b32.xlu1 %v4314_v7, %s6891_s27  ;;  %553 = vrot.lane.b32.xlu0 %v4300_v6, %s6891_s27  ;;  %s6953_s27 = smov 113  }
 0x15d   :  { %v4470_v22 = vpop.permute.xlu0 %226  ;;  %v4472_v23 = vpop.permute.xlu1 %261 }
 0x15e   :  { %v264_v12 = vsel %vm6898_vm10, %v4446_v15, %v4472_v23 }
 0x15f   :  { %543 = vrot.lane.b32.xlu1 %v4314_v7, %s6893_s26  ;;  %541 = vrot.lane.b32.xlu0 %v4300_v6, %s6893_s26  ;;  %s6951_s26 = smov 114  }
 0x161   :  { %v4478_v24 = vpop.permute.xlu0 %215  ;;  %v4480_v25 = vpop.permute.xlu1 %250 }
 0x162   :  { %v253_v17 = vsel %vm6899_vm12, %v4454_v18, %v4480_v25 }
 0x163   :  { %531 = vrot.lane.b32.xlu1 %v4314_v7, %s6895_s24  ;;  %529 = vrot.lane.b32.xlu0 %v4300_v6, %s6895_s24  ;;  %s6949_s24 = smov 115  }
 0x165   :  { %v4486_v26 = vpop.permute.xlu0 %204  ;;  %v4488_v27 = vpop.permute.xlu1 %239 }
 0x167   :  { %519 = vrot.lane.b32.xlu1 %v4314_v7, %s6953_s27  ;;  %517 = vrot.lane.b32.xlu0 %v4300_v6, %s6953_s27  ;;  %s7093_s27 = smov 118  }
 0x169   :  { %v4494_v28 = vpop.permute.xlu0 %193  ;;  %v4496_v29 = vpop.permute.xlu1 %228 }
 0x16b   :  { %507 = vrot.lane.b32.xlu1 %v4314_v7, %s6951_s26  ;;  %505 = vrot.lane.b32.xlu0 %v4300_v6, %s6951_s26  ;;  %s7096_s26 = smov 121  }
 0x16d   :  { %v4502_v30 = vpop.permute.xlu0 %182  ;;  %v4504_v31 = vpop.permute.xlu1 %217 }
 0x16f   :  { %495 = vrot.lane.b32.xlu1 %v4314_v7, %s6949_s24  ;;  %493 = vrot.lane.b32.xlu0 %v4300_v6, %s6949_s24  ;;  %s7095_s24 = smov 120  }
 0x171   :  { %v4510_v32 = vpop.permute.xlu0 %171  ;;  %v4512_v33 = vpop.permute.xlu1 %206 }
 0x175   :  { %v4514_v34 = vpop.permute.xlu0 %160  ;;  %v4516_v35 = vpop.permute.xlu1 %195 }
 0x179   :  { %v4518_v36 = vpop.permute.xlu0 %149  ;;  %v4520_v37 = vpop.permute.xlu1 %184 }
 0x17d   :  { %v4522_v38 = vpop.permute.xlu0 %138  ;;  %v4524_v39 = vpop.permute.xlu1 %173 }
 0x181   :  { %v4526_v40 = vpop.permute.xlu0 %481  ;;  %v4528_v41 = vpop.permute.xlu1 %162 }
 0x185   :  { %v4530_v42 = vpop.permute.xlu0 %469  ;;  %v4532_v43 = vpop.permute.xlu1 %151 }
 0x189   :  { %v4534_v44 = vpop.permute.xlu0 %457  ;;  %v4536_v45 = vpop.permute.xlu1 %140 }
 0x18d   :  { %v4538_v46 = vpop.permute.xlu0 %445  ;;  %v4540_v47 = vpop.permute.xlu1 %483 }
 0x191   :  { %v4549_v49 = vpop.permute.xlu1 %471  ;;  %v306_v50 = vpop.permute.xlu0 %305 }
 0x192   :  { %v308_v51 = vsel %vm6906_vm2, %v4424_v10, %v306_v50  ;;  %v309_v52 = vsel %vm6906_vm2, %v306_v50, %v4424_v10  ;;  %v276_v10 = vsel %vm6900_vm8, %v4464_v21, %v4440_v14  ;;  %v265_v14 = vsel %vm6898_vm10, %v4472_v23, %v4446_v15  ;;  %vm4682_vm10 = vmneg %vm6903_vm1 }
 0x193   :  { %3517 = vmatprep.subr.msk.mxu1 %vm4545_vm3, %v308_v51  ;;  %v254_v23 = vsel %vm6899_vm12, %v4480_v25, %v4454_v18  ;;  %v242_v50 = vsel %vm6901_vm14, %v4462_v20, %v4488_v27  ;;  %v243_v18 = vsel %vm6901_vm14, %v4488_v27, %v4462_v20  ;;  %vm6905_vm12 = vcmp.lt.s32.totalorder %v4298_v5, 12 }
 0x194   :  { %3519 = vmatpush1.msk.msra.mxu1 %vm4545_vm3, %v309_v52  ;;  %v231_v25 = vsel %vm6903_vm1, %v4470_v22, %v4496_v29  ;;  %vm4701_vm8 = vmneg %vm6905_vm12  ;;  %v7033_v52 = vmov 0  ;;  %v232_v27 = vsel %vm6903_vm1, %v4496_v29, %v4470_v22  ;;  %vm6907_vm14 = vcmp.lt.s32.totalorder %v4298_v5, 13 }
 0x195   :  { %v4579_v56 = vpop.permute.xlu1 %459  ;;  %3521 = vmatprep.subr.msk.mxu1 %vm4560_vm5, %v297_v54  ;;  %v4583_v57 = vpop.permute.xlu0 %433  ;;  %v7034_v52 = vsel %vm4701_vm8, 4294967295, %v7033_v52  ;;  %vm4724_vm6 = vmneg %vm6907_vm14  ;;  %v221_v22 = vsel %vm6905_vm12, %v4504_v31, %v4478_v24  ;;  %vm6909_vm1 = vcmp.lt.s32.totalorder %v4298_v5, 14  ;;  %v209_v29 = vsel %vm6907_vm14, %v4486_v26, %v4512_v33 }
 0x196   :  { %3523 = vmatpush1.msk.msra.mxu1 %vm4560_vm5, %v298_v58  ;;  %v220_v58 = vsel %vm6905_vm12, %v4478_v24, %v4504_v31  ;;  %vm4743_vm4 = vmneg %vm6909_vm1  ;;  %v210_v31 = vsel %vm6907_vm14, %v4512_v33, %v4486_v26  ;;  %vm6912_vm12 = vcmp.lt.s32.totalorder %v4298_v5, 15  ;;  %v199_v26 = vsel %vm6909_vm1, %v4516_v35, %v4494_v28 }
 0x197   :  { %3525 = vmatprep.subr.msk.mxu1 %vm4575_vm7, %v286_v59  ;;  %v7035_v59 = vmov 0  ;;  %vm4766_vm2 = vmneg %vm6912_vm12  ;;  %vm6915_vm14 = vcmp.lt.s32.totalorder %v4298_v5, 16  ;;  %v187_v33 = vsel %vm6912_vm12, %v4502_v30, %v4520_v37 }
 0x198   :  { %3527 = vmatpush1.msk.msra.mxu1 %vm4575_vm7, %v287_v61  ;;  %v7036_v59 = vsel %vm4724_vm6, 4294967295, %v7035_v59  ;;  %v7037_v61 = vmov 0  ;;  %vm4785_vm0 = vmneg %vm6915_vm14 }
 0x199   :  { %v4621_v3 = vpop.permute.xlu1 %447  ;;  %3529 = vmatprep.subr.msk.mxu1 %vm4598_vm9, %v275_v62  ;;  %v4625_v9 = vpop.permute.xlu0 %421  ;;  %v7038_v61 = vsel %vm4743_vm4, 4294967295, %v7037_v61 }
 0x19a   :  { %3531 = vmatpush1.msk.msra.mxu1 %vm4598_vm9, %v276_v10  ;;  %v198_v10 = vsel %vm6909_vm1, %v4494_v28, %v4516_v35  ;;  %v188_v35 = vsel %vm6912_vm12, %v4520_v37, %v4502_v30  ;;  %vm6918_vm1 = vcmp.lt.s32.totalorder %v4298_v5, 17  ;;  %v177_v30 = vsel %vm6915_vm14, %v4524_v39, %v4510_v32 }
 0x19b   :  { %3533 = vmatprep.subr.msk.mxu1 %vm4617_vm11, %v264_v12  ;;  %v7039_v12 = vmov 0  ;;  %vm6919_vm12 = vcmp.lt.s32.totalorder %v4298_v5, 18  ;;  %v165_v37 = vsel %vm6918_vm1, %v4514_v34, %v4528_v41 }
 0x19c   :  { %3535 = vmatpush1.msk.msra.mxu1 %vm4617_vm11, %v265_v14  ;;  %v7040_v12 = vsel %vm4766_vm2, 4294967295, %v7039_v12  ;;  %v7041_v14 = vmov 0 }
 0x19d   :  { %v4663_v21 = vpop.permute.xlu1 %435  ;;  %3537 = vmatprep.subr.msk.mxu1 %vm4640_vm13, %v253_v17  ;;  %v4667_v15 = vpop.permute.xlu0 %409  ;;  %v7042_v14 = vsel %vm4785_vm0, 4294967295, %v7041_v14 }
 0x19e   :  { %3539 = vmatpush1.msk.msra.mxu1 %vm4640_vm13, %v254_v23  ;;  %v176_v23 = vsel %vm6915_vm14, %v4510_v32, %v4524_v39  ;;  %v166_v39 = vsel %vm6918_vm1, %v4528_v41, %v4514_v34  ;;  %vm6920_vm14 = vcmp.lt.s32.totalorder %v4298_v5, 19  ;;  %v155_v34 = vsel %vm6919_vm12, %v4532_v43, %v4518_v36 }
 0x19f   :  { %3541 = vmatprep.subr.msk.mxu1 %vm4659_vm15, %v242_v50  ;;  %v7043_v50 = vmov 0  ;;  %v143_v41 = vsel %vm6920_vm14, %v4522_v38, %v4536_v45 }
 0x1a0   :  { %3543 = vmatpush1.msk.msra.mxu1 %vm4659_vm15, %v243_v18  ;;  %v7045_v18 = vmov 0 }
 0x1a1   :  { %v4705_v54 = vpop.permute.xlu1 %423  ;;  %3545 = vmatprep.subr.msk.mxu1 %vm4682_vm10, %v231_v25  ;;  %v4709_v20 = vpop.permute.xlu0 %397 }
 0x1a2   :  { %3547 = vmatpush1.msk.msra.mxu1 %vm4682_vm10, %v232_v27  ;;  %v154_v27 = vsel %vm6919_vm12, %v4518_v36, %v4532_v43  ;;  %v144_v36 = vsel %vm6920_vm14, %v4536_v45, %v4522_v38 }
 0x1a3   :  { %3549 = vmatprep.subr.msk.mxu1 %vm4701_vm8, %v220_v58  ;;  %v7047_v58 = vmov 0 }
 0x1a4   :  { %3551 = vmatpush1.msk.msra.mxu1 %vm4701_vm8, %v221_v22 }
 0x1a5   :  { %v4747_v62 = vpop.permute.xlu1 %411  ;;  %3553 = vmatprep.subr.msk.mxu1 %vm4724_vm6, %v209_v29  ;;  %v4751_v24 = vpop.permute.xlu0 %385 }
 0x1a6   :  { %3555 = vmatpush1.msk.msra.mxu1 %vm4724_vm6, %v210_v31  ;;  %vm7053_vm6 = vcmp.lt.s32.totalorder %v4298_v5, 120 }
 0x1a7   :  { %3557 = vmatprep.subr.msk.mxu1 %vm4743_vm4, %v198_v10  ;;  %v592_v10 = vshrl.u32 %v34_v4, 7 }
 0x1a8   :  { %3559 = vmatpush1.msk.msra.mxu1 %vm4743_vm4, %v199_v26  ;;  %vm4808_vm4 = vmneg %vm6918_vm1  ;;  %vm6921_vm1 = vcmp.lt.s32.totalorder %v4298_v5, 116 }
 0x1a9   :  { %v4789_v17 = vpop.permute.xlu1 %399  ;;  %3561 = vmatprep.subr.msk.mxu1 %vm4766_vm2, %v187_v33  ;;  %v4793_v28 = vpop.permute.xlu0 %373  ;;  %v7044_v50 = vsel %vm4808_vm4, 4294967295, %v7043_v50  ;;  %v487_v43 = vsel %vm6921_vm1, %v4540_v47, %v4526_v40  ;;  %v486_v31 = vsel %vm6921_vm1, %v4526_v40, %v4540_v47 }
 0x1aa   :  { %3563 = vmatpush1.msk.msra.mxu1 %vm4766_vm2, %v188_v35  ;;  %vm4827_vm2 = vmneg %vm6919_vm12  ;;  %vm6924_vm12 = vcmp.lt.s32.totalorder %v4298_v5, 117 }
 0x1ab   :  { %3565 = vmatprep.subr.msk.mxu1 %vm4785_vm0, %v176_v23  ;;  %v7046_v18 = vsel %vm4827_vm2, 4294967295, %v7045_v18  ;;  %v475_v38 = vsel %vm6924_vm12, %v4549_v49, %v4530_v42  ;;  %v474_v40 = vsel %vm6924_vm12, %v4530_v42, %v4549_v49  ;;  %v593_v49 = vsub.s32 0, %v592_v10 }
 0x1ac   :  { %3567 = vmatpush1.msk.msra.mxu1 %vm4785_vm0, %v177_v30  ;;  %vm4850_vm0 = vmneg %vm6920_vm14  ;;  %vm6929_vm14 = vcmp.lt.s32.totalorder %v4298_v5, 118  ;;  %v439_v23 = vsel %vm7053_vm6, %v4663_v21, %v4583_v57 }
 0x1ad   :  { %v4831_v25 = vpop.permute.xlu1 %387  ;;  %3569 = vmatprep.subr.msk.mxu1 %vm4808_vm4, %v165_v37  ;;  %v4835_v32 = vpop.permute.xlu0 %361  ;;  %v7048_v58 = vsel %vm4850_vm0, 4294967295, %v7047_v58  ;;  %v463_v47 = vsel %vm6929_vm14, %v4579_v56, %v4534_v44  ;;  %v462_v4 = vsel %vm6929_vm14, %v4534_v44, %v4579_v56 }
 0x1ae   :  { %3571 = vmatpush1.msk.msra.mxu1 %vm4808_vm4, %v166_v39  ;;  %vm37_vm4 = vcmp.eq.s32.totalorder %v4298_v5, 127 }
 0x1af   :  { %3573 = vmatprep.subr.msk.mxu1 %vm4827_vm2, %v154_v27 }
 0x1b0   :  { %3575 = vmatpush1.msk.msra.mxu1 %vm4827_vm2, %v155_v34 }
 0x1b1   :  { %v4867_v22 = vpop.permute.xlu1 %375  ;;  %3577 = vmatprep.subr.msk.mxu1 %vm4850_vm0, %v143_v41  ;;  %v4871_v29 = vpop.permute.xlu0 %349 }
 0x1b2   :  { %3579 = vmatpush1.msk.msra.mxu1 %vm4850_vm0, %v144_v36  ;;  %vm36_vm0 = vcmp.eq.s32.totalorder %v4298_v5, 0 }
 0x1b3   :  { %3581 = vmatprep.subr.msk.mxu1 %vm6921_vm1, %v487_v43  ;;  %v590_v56 = vsel %vm36_vm0, 1, %v4226_v8 }
 0x1b4   :  { %3583 = vmatpush2.msk.msra.mxu1 %vm6921_vm1, %v486_v31  ;;  %v4958_v37 = vrot.slane %v590_v56, %v593_v49 }
 0x1b5   :  { %v4897_v45 = vpop.permute.xlu1 %363  ;;  %3585 = vmatprep.subr.msk.mxu1 %vm6924_vm12, %v475_v38  ;;  %v579_v26 = vpop.permute.xlu0 %578 }
 0x1b6   :  { %3587 = vmatpush2.msk.msra.mxu1 %vm6924_vm12, %v474_v40  ;;  %vm7049_vm12 = vcmp.lt.s32.totalorder %v4298_v5, 119 }
 0x1b7   :  { %3589 = vmatprep.subr.msk.mxu1 %vm6929_vm14, %v463_v47  ;;  %v451_v42 = vsel %vm7049_vm12, %v4621_v3, %v4538_v46  ;;  %vm7050_vm2 = vmmov %vm7049_vm12 }
 0x1b8   :  { %3591 = vmatpush2.msk.msra.mxu1 %vm6929_vm14, %v462_v4  ;;  %vm7051_vm1 = vmmov %vm7050_vm2  ;;  %vm6935_vm14 = vcmp.lt.s32.totalorder %v4298_v5, 121 }
 0x1b9   :  { %v4927_v33 = vpop.permute.xlu1 %351  ;;  %3593 = vmatprep.subr.msk.mxu1 %vm7050_vm2, %v451_v42  ;;  %v585_v35 = vpop.permute.xlu0 %584  ;;  %v450_v44 = vsel %vm7051_vm1, %v4538_v46, %v4621_v3  ;;  %vm7052_vm12 = vmmov %vm7051_vm1  ;;  %vm6934_vm1 = vcmp.lt.s32.totalorder %v4298_v5, 122  ;;  %v598_v3 = vsel %vm37_vm4, 1, %v4226_v8  ;;  %v427_v30 = vsel %vm6935_vm14, %v4705_v54, %v4625_v9 }
 0x1ba   :  { %3595 = vmatpush2.msk.msra.mxu1 %vm7052_vm12, %v450_v44  ;;  %vm7054_vm2 = vmmov %vm7053_vm6  ;;  %vm6939_vm4 = vcmp.lt.s32.totalorder %v4298_v5, 123  ;;  %vm6944_vm6 = vcmp.lt.s32.totalorder %v4298_v5, 1  ;;  %v415_v27 = vsel %vm6934_vm1, %v4747_v62, %v4667_v15  ;;  %v4978_v34 = vrot.slane %v598_v3, %v593_v49 }
 0x1bb   :  { %3597 = vmatprep.subr.msk.mxu1 %vm7054_vm2, %v439_v23  ;;  %vm7055_vm8 = vmmov %vm7054_vm2  ;;  %vm6941_vm12 = vcmp.lt.s32.totalorder %v4298_v5, 127  ;;  %v402_v43 = vsel %vm6939_vm4, %v4709_v20, %v4789_v17  ;;  %v7061_v3 = vmov 0 }
 0x1bc   :  { %v438_v46 = vsel %vm7055_vm8, %v4583_v57, %v4663_v21  ;;  %vm7056_vm0 = vmmov %vm7054_vm2  ;;  %v426_v21 = vsel %vm6935_vm14, %v4625_v9, %v4705_v54  ;;  %v414_v9 = vsel %vm6934_vm1, %v4667_v15, %v4747_v62  ;;  %vm6938_vm8 = vcmp.lt.s32.totalorder %v4298_v5, 124 }
 0x1bd   :  { %3599 = vmatpush2.msk.msra.mxu1 %vm7056_vm0, %v438_v46  ;;  %v4960_v39 = vpop.permute.xlu1 %338  ;;  %v4964_v57 = vpop.permute.xlu0 %336  ;;  %v403_v54 = vsel %vm6939_vm4, %v4789_v17, %v4709_v20  ;;  %vm6937_vm2 = vcmp.lt.s32.totalorder %v4298_v5, 125  ;;  %vm6943_vm0 = vcmp.eq.s32.totalorder %v4958_v37, 1  ;;  %v582_v15 = vsel %vm6944_vm6, %v579_v26, %v4430_v11 }
 0x1be   :  { %3601 = vmatprep.subr.msk.mxu1 %vm6935_vm14, %v427_v30  ;;  %v583_v62 = vsel %vm6944_vm6, %v4430_v11, %v579_v26  ;;  %v391_v31 = vsel %vm6938_vm8, %v4831_v25, %v4751_v24  ;;  %v588_v11 = vsel %vm6941_vm12, %v585_v35, %v4438_v13  ;;  %v589_v20 = vsel %vm6941_vm12, %v4438_v13, %v585_v35 }
 0x1bf   :  { %3603 = vmatpush2.msk.msra.mxu1 %vm6935_vm14, %v426_v21  ;;  %vm6940_vm14 = vcmp.eq.s32.totalorder %v4978_v34, 1  ;;  %v390_v17 = vsel %vm6938_vm8, %v4751_v24, %v4831_v25  ;;  %v596_v38 = vsel %vm6943_vm0, %v4282_v1, %v583_v62  ;;  %v597_v10 = vsel %vm6943_vm0, %v4286_v2, %v582_v15  ;;  %v48_v15 = vld [vmem:[#allocation3 + $0x20] sm:$0xff] }
 0x1c0   :  { %3605 = vmatprep.subr.msk.mxu1 %vm6934_vm1, %v415_v27  ;;  %v379_v13 = vsel %vm6937_vm2, %v4867_v22, %v4793_v28  ;;  %v378_v25 = vsel %vm6937_vm2, %v4793_v28, %v4867_v22  ;;  %v604_v40 = vsel %vm6940_vm14, %v4282_v1, %v588_v11  ;;  %v605_v47 = vsel %vm6940_vm14, %v4286_v2, %v589_v20  ;;  %v51_v11 = vld [vmem:[#allocation3 + $0x38] sm:$0xff] }
 0x1c1   :  { %3607 = vmatpush2.msk.msra.mxu1 %vm6934_vm1, %v414_v9  ;;  %v328_v41 = vpop.permute.xlu1 %327  ;;  %v326_v36 = vpop.permute.xlu0 %325  ;;  %vm6936_vm1 = vcmp.lt.s32.totalorder %v4298_v5, 126  ;;  %v608_v42 = vcombine.low %v596_v38, %v597_v10  ;;  %v355_v22 = vsel %vm6941_vm12, %v4927_v33, %v4871_v29  ;;  %v613_v49 = vcombine.low %v604_v40, %v605_v47  ;;  %v50_v10 = vld [vmem:[#allocation3 + $0x30] sm:$0xff] }
 0x1c2   :  { %3609 = vmatprep.subr.msk.mxu1 %vm6939_vm4, %v403_v54  ;;  %v367_v4 = vsel %vm6936_vm1, %v4897_v45, %v4835_v32  ;;  %v366_v28 = vsel %vm6936_vm1, %v4835_v32, %v4897_v45  ;;  %v354_v56 = vsel %vm6941_vm12, %v4871_v29, %v4927_v33  ;;  %v341_v29 = vsel %vm6944_vm6, %v4964_v57, %v4960_v39 }
 0x1c3   :  { %3611 = vmatpush2.msk.msra.mxu1 %vm6939_vm4, %v402_v43  ;;  %v610_v45 = vmax.f32 %v4282_v1, %v608_v42  ;;  %v7059_v33 = vmov 0  ;;  %vm6945_vm4 = vcmp.lt.s32.totalorder %v4298_v5, 3  ;;  %vm7063_vm0 = vcmask 1043456   ;;  %v53_v42 = vld [vmem:[#allocation3 + $0x48] sm:$0xff] }
 0x1c4   :  { %3613 = vmatprep.subr.msk.mxu1 %vm6938_vm8, %v391_v31  ;;  %vm5111_vm14 = vmneg %vm6945_vm4 }
 0x1c5   :  { %3615 = vmatpush2.msk.msra.mxu1 %vm6938_vm8, %v390_v17  ;;  %v317_v26 = vpop.permute.xlu1 %316  ;;  %v315_v24 = vpop.permute.xlu0 %314  ;;  %v615_v23 = vmax.f32 %v610_v45, %v613_v49  ;;  %v7062_v3 = vsel %vm5111_vm14, 4294967295, %v7061_v3 }
 0x1c6   :  { %3617 = vmatprep.subr.msk.mxu1 %vm6937_vm2, %v379_v13  ;;  %v320_v9 = vsel %vm6945_vm4, %v317_v26, %v315_v24 }
 0x1c7   :  { %3619 = vmatpush2.msk.msra.mxu1 %vm6937_vm2, %v378_v25  ;;  %vm6942_vm2 = vcmp.lt.s32.totalorder %v4298_v5, 2  ;;  %v617_v54 = vcombine.high %v615_v23, %v615_v23  ;;  %v54_v25 = vld [vmem:[#allocation3 + $0x50] sm:$0xff] }
 0x1c8   :  { %3621 = vmatprep.subr.msk.mxu1 %vm6936_vm1, %v367_v4  ;;  %vm5094_vm8 = vmneg %vm6942_vm2  ;;  %v331_v30 = vsel %vm6942_vm2, %v328_v41, %v326_v36 }
 0x1c9   :  { %3623 = vmatpush2.msk.msra.mxu1 %vm6936_vm1, %v366_v28  ;;  %v568_v35 = vpop.permute.xlu1 %567  ;;  %v566_v44 = vpop.permute.xlu0 %565  ;;  %vm5080_vm1 = vmneg %vm6944_vm6  ;;  %v7060_v33 = vsel %vm5094_vm8, 4294967295, %v7059_v33 }
 0x1ca   :  { %3625 = vmatprep.subr.msk.mxu1 %vm6941_vm12, %v355_v22 }
 0x1cb   :  { %3627 = vmatpush2.msk.msra.mxu1 %vm6941_vm12, %v354_v56  ;;  %vm6965_vm12 = vcmp.lt.s32.totalorder %v4298_v5, 109 }
 0x1cc   :  { %784 = vmatprep.subr.mxu1 %v4314_v7  ;;  %v330_v7 = vsel %vm6942_vm2, %v326_v36, %v328_v41  ;;  %vm6946_vm2 = vcmp.lt.s32.totalorder %v4298_v5, 110  ;;  %v571_v62 = vsel %vm6965_vm12, %v568_v35, %v566_v44  ;;  %v47_v41 = vld [vmem:[#allocation3 + $0x18] sm:$0xff]  ;;  %v570_v36 = vsel %vm6965_vm12, %v566_v44, %v568_v35 }
 0x1cd   :  { %785 = vmatpush2.msra.mxu1 %v4300_v6  ;;  %v556_v46 = vpop.permute.xlu1 %555  ;;  %v554_v1 = vpop.permute.xlu0 %553  ;;  %v342_v6 = vsel %vm6944_vm6, %v4960_v39, %v4964_v57  ;;  %v319_v39 = vsel %vm6945_vm4, %v315_v24, %v317_v26  ;;  %v44_v57 = vld [vmem:[#allocation3] sm:$0xff]  ;;  %vm7064_vm6 = vmmov %vm7063_vm0  ;;  %vm6964_vm4 = vcmp.lt.s32.totalorder %v4298_v5, 111 }
 0x1ce   :  { %3629 = vmatprep.subr.msk.mxu1 %vm5080_vm1, %v341_v29  ;;  %v559_v20 = vsel %vm6946_vm2, %v556_v46, %v554_v1  ;;  %v558_v17 = vsel %vm6946_vm2, %v554_v1, %v556_v46  ;;  %v46_v46 = vld [vmem:[#allocation3 + $0x10] sm:$0xff]  ;;  %v49_v1 = vld [vmem:[#allocation3 + $0x28] sm:$0xff] }
 0x1cf   :  { %3631 = vmatpush2.msk.msra.mxu1 %vm5080_vm1, %v342_v6  ;;  %v52_v6 = vld [vmem:[#allocation3 + $0x40] sm:$0xff] }
 0x1d0   :  { %3633 = vmatprep.subr.msk.mxu1 %vm5094_vm8, %v330_v7  ;;  %v55_v7 = vld [vmem:[#allocation3 + $0x58] sm:$0xff] }
 0x1d1   :  { %3635 = vmatpush2.msk.msra.mxu1 %vm5094_vm8, %v331_v30  ;;  %v544_v21 = vpop.permute.xlu1 %543  ;;  %v542_v27 = vpop.permute.xlu0 %541 }
 0x1d2   :  { %3637 = vmatprep.subr.msk.mxu1 %vm5111_vm14, %v319_v39  ;;  %v547_v38 = vsel %vm6964_vm4, %v544_v21, %v542_v27  ;;  %v546_v13 = vsel %vm6964_vm4, %v542_v27, %v544_v21 }
 0x1d3   :  { %3639 = vmatpush2.msk.msra.mxu1 %vm5111_vm14, %v320_v9 }
 0x1d4   :  { %793 = vmatmul.mubr.f32.vlgmr.msra.gmra.mxu1 %v44_v57  ;;  %3640 = vmatprep.subr.msk.mxu1 %vm7063_vm0, %v617_v54  ;;  %vm6948_vm0 = vcmp.lt.s32.totalorder %v4298_v5, 113 }
 0x1d5   :  { %3641 = vmatpush1.msk.msra.mxu1 %vm7064_vm6, %v615_v23  ;;  %798 = vmatprep.mubr.f32.mxu1 %v48_v15  ;;  %v532_v43 = vpop.permute.xlu1 %531  ;;  %v530_v31 = vpop.permute.xlu0 %529  ;;  %vm6947_vm6 = vcmp.lt.s32.totalorder %v4298_v5, 112 }
 0x1d6   :  { %3643 = vmatprep.subr.msk.mxu1 %vm6965_vm12, %v571_v62  ;;  %v535_v40 = vsel %vm6947_vm6, %v532_v43, %v530_v31  ;;  %v534_v47 = vsel %vm6947_vm6, %v530_v31, %v532_v43 }
 0x1d7   :  { %3645 = vmatpush1.msk.msra.mxu1 %vm6965_vm12, %v570_v36 }
 0x1d8   :  { %799 = vmatmul.mubr.f32.gmra.mxu1 %v47_v41  ;;  %3647 = vmatprep.subr.msk.mxu1 %vm6946_vm2, %v559_v20 }
 0x1d9   :  { %3649 = vmatpush1.msk.msra.mxu1 %vm6946_vm2, %v558_v17  ;;  %804 = vmatprep.mubr.f32.mxu1 %v51_v11  ;;  %v520_v26 = vpop.permute.xlu1 %519  ;;  %v518_v24 = vpop.permute.xlu0 %517  ;;  %vm6963_vm2 = vcmp.lt.s32.totalorder %v4298_v5, 114 }
 0x1da   :  { %3651 = vmatprep.subr.msk.mxu1 %vm6964_vm4, %v547_v38  ;;  %v523_v4 = vsel %vm6948_vm0, %v520_v26, %v518_v24  ;;  %v522_v28 = vsel %vm6948_vm0, %v518_v24, %v520_v26 }
 0x1db   :  { %3653 = vmatpush1.msk.msra.mxu1 %vm6964_vm4, %v546_v13 }
 0x1dc   :  { %805 = vmatmul.mubr.f32.gmra.mxu1 %v50_v10  ;;  %3655 = vmatprep.subr.msk.mxu1 %vm6947_vm6, %v535_v40 }
 0x1dd   :  { %3657 = vmatpush1.msk.msra.mxu1 %vm6947_vm6, %v534_v47  ;;  %810 = vmatprep.mubr.f32.mxu1 %v54_v25  ;;  %v508_v22 = vpop.permute.xlu1 %507  ;;  %v506_v49 = vpop.permute.xlu0 %505  ;;  %vm6962_vm6 = vcmp.lt.s32.totalorder %v4298_v5, 115 }
 0x1de   :  { %3659 = vmatprep.subr.msk.mxu1 %vm6948_vm0, %v523_v4  ;;  %v510_v35 = vsel %vm6963_vm2, %v506_v49, %v508_v22  ;;  %v511_v44 = vsel %vm6963_vm2, %v508_v22, %v506_v49 }
 0x1df   :  { %3661 = vmatpush1.msk.msra.mxu1 %vm6948_vm0, %v522_v28  ;;  %vm6961_vm0 = vcmask 719872  }
 0x1e0   :  { %811 = vmatmul.mubr.f32.gmra.mxu1 %v53_v42  ;;  %3663 = vmatprep.subr.msk.mxu1 %vm6963_vm2, %v511_v44 }
 0x1e1   :  { %3665 = vmatpush1.msk.msra.mxu1 %vm6963_vm2, %v510_v35  ;;  %881 = vmatprep.mubr.f32.mxu1 %v4198_v0  ;;  %v496_v56 = vpop.permute.xlu1 %495  ;;  %v494_v45 = vpop.permute.xlu0 %493 }
 0x1e2   :  { %v498_v29 = vsel %vm6962_vm6, %v494_v45, %v496_v56  ;;  %v499_v23 = vsel %vm6962_vm6, %v496_v56, %v494_v45 }
 0x1e3   :  { %3667 = vmatprep.subr.msk.mxu1 %vm6962_vm6, %v499_v23 }
 0x1e4   :  { %3669 = vmatpush1.msk.msra.mxu1 %vm6962_vm6, %v498_v29 }
 0x1e5   :  { %3462 = vmatmul.mubr.msk.f32.vlgmr.msra.gmra.mxu1 %vm6961_vm0, %v46_v46 }
 0x1e6   :  { %887 = vmatprep.mubr.f32.mxu1 %v4198_v0 }
 0x1e9   :  { %3463 = vmatmul.mubr.msk.f32.gmra.mxu1 %vm6961_vm0, %v49_v1 }
 0x1ea   :  { %893 = vmatprep.mubr.f32.mxu1 %v4198_v0 }
 0x1ed   :  { %3464 = vmatmul.mubr.msk.f32.gmra.mxu1 %vm6961_vm0, %v52_v6 }
 0x1ee   :  { %899 = vmatprep.mubr.f32.mxu1 %v4198_v0 }
 0x1f1   :  { %3465 = vmatmul.mubr.msk.f32.gmra.mxu1 %vm6961_vm0, %v55_v7 }
 0x1f2   :  { %1909 = vmatprep.mubr.f32.mxu1 %v4198_v0 }
 0x294   :  { %v794_v30 = vpop.f32.mrf.mxu1 }
 0x296   :  { %v796_v39 = vpop.f32.mrf.mxu1 }
 0x298   :  { %v800_v57 = vpop.f32.mrf.mxu1 }
 0x29a   :  { %v802_v21 = vpop.f32.mrf.mxu1 }
 0x29c   :  { %v806_v27 = vpop.f32.mrf.mxu1 }
 0x29e   :  { %v808_v9 = vpop.f32.mrf.mxu1 }
 0x2a0   :  { %v812_v54 = vpop.f32.mrf.mxu1 }
 0x2a2   :  { %v814_v15 = vpop.f32.mrf.mxu1 }
 0x2a5   :  { %v883_v62 = vpop.f32.mrf.mxu1 }
 0x2a6   :  { %v5203_v36 = vadd.f32 %v883_v62, %v794_v30 }
 0x2a7   :  { %v885_v41 = vpop.f32.mrf.mxu1 }
 0x2a8   :  { %v5205_v43 = vadd.f32 %v885_v41, %v796_v39  ;;  %v918_v7 = vmul.f32 %v5203_v36, %v5203_v36  ;;  %v42_v39 = vld [vmem:[%s6871_s4 + $0x18] sm:$0xff] }
 0x2a9   :  { %v889_v31 = vpop.f32.mrf.mxu1 }
 0x2aa   :  { %v5207_v11 = vadd.f32 %v889_v31, %v800_v57  ;;  %v906_v20 = vadd.f32 %v5205_v43, %v5203_v36  ;;  %v919_v6 = vmul.f32 %v5205_v43, %v5205_v43  ;;  %v4238_v57 = vmov 1  }
 0x2ab   :  { %v891_v17 = vpop.f32.mrf.mxu1 }
 0x2ac   :  { %v5211_v38 = vadd.f32 %v891_v17, %v802_v21  ;;  %907 = vadd.xlane.f32.xlu0 %v906_v20  ;;  %v920_v26 = vmul.f32 %v5207_v11, %v5207_v11  ;;  %v926_v30 = vadd.f32 %v919_v6, %v918_v7  ;;  %v40_v21 = vld [vmem:[%s6871_s4 + $0x8] sm:$0xff] }
 0x2ad   :  { %v895_v10 = vpop.f32.mrf.mxu1 }
 0x2ae   :  { %v909_v13 = vadd.f32 %v5211_v38, %v5207_v11  ;;  %v921_v24 = vmul.f32 %v5211_v38, %v5211_v38  ;;  %v5221_v42 = vadd.f32 %v895_v10, %v806_v27  ;;  %v41_v27 = vld [vmem:[%s6871_s4 + $0x10] sm:$0xff] }
 0x2af   :  { %v897_v25 = vpop.f32.mrf.mxu1 }
 0x2b0   :  { %v5219_v40 = vadd.f32 %v897_v25, %v808_v9  ;;  %910 = vadd.xlane.f32.xlu0 %v909_v13  ;;  %v929_v47 = vadd.f32 %v921_v24, %v920_v26  ;;  %v922_v45 = vmul.f32 %v5221_v42, %v5221_v42  ;;  %v39_v9 = vld [vmem:[%s6871_s4] sm:$0xff] }
 0x2b1   :  { %v901_v4 = vpop.f32.mrf.mxu1 }
 0x2b2   :  { %930 = vadd.xlane.f32.xlu1 %v929_v47  ;;  %v5223_v22 = vadd.f32 %v901_v4, %v812_v54  ;;  %v912_v35 = vadd.f32 %v5219_v40, %v5221_v42  ;;  %v923_v44 = vmul.f32 %v5219_v40, %v5219_v40 }
 0x2b3   :  { %v903_v28 = vpop.f32.mrf.mxu1 }
 0x2b4   :  { %v5225_v49 = vadd.f32 %v903_v28, %v814_v15  ;;  %v932_v23 = vadd.f32 %v923_v44, %v922_v45  ;;  %v924_v46 = vmul.f32 %v5223_v22, %v5223_v22 }
 0x2b6   :  { %913 = vadd.xlane.f32.xlu1 %v912_v35  ;;  %v915_v56 = vadd.f32 %v5225_v49, %v5223_v22  ;;  %v925_v29 = vmul.f32 %v5225_v49, %v5225_v49 }
 0x2b8   :  { %916 = vadd.xlane.f32.xlu0 %v915_v56  ;;  %v935_v1 = vadd.f32 %v925_v29, %v924_v46 }
 0x2ba   :  { %933 = vadd.xlane.f32.xlu1 %v932_v23 }
 0x2bc   :  { %936 = vadd.xlane.f32.xlu0 %v935_v1 }
 0x2c0   :  { %927 = vadd.xlane.f32.xlu0 %v926_v30 }
 0x2cb   :  { %999 = vperm.xlu1 %4045, %v42_v39  }
 0x2cf   :  { %4047 = vset.pattern.permute.xlu1 %v4238_v57 }
 0x2d0   :  { %1023 = vperm.xlu1 %4047, %v42_v39  }
 0x2d4   :  { %4048 = vset.pattern.permute.xlu1 %v4226_v8 }
 0x2d5   :  { %989 = vperm.xlu1 %4048, %v40_v21  }
 0x2d6   :  { %994 = vperm.xlu0 %4046, %v41_v27  }
 0x2d9   :  { %4049 = vset.pattern.permute.xlu1 %v4238_v57 }
 0x2da   :  { %1019 = vperm.xlu1 %4049, %v41_v27  }
 0x2de   :  { %4050 = vset.pattern.permute.xlu1 %v4226_v8 }
 0x2df   :  { %984 = vperm.xlu1 %4050, %v39_v9  }
 0x2e3   :  { %4051 = vset.pattern.permute.xlu1 %v4238_v57 }
 0x2e4   :  { %1015 = vperm.xlu1 %4051, %v40_v21  }
 0x2e8   :  { %1011 = vperm.xlu1 %4051, %v39_v9  }
 0x335   :  { %v908_v54 = vpop.xlane.xlu0 %907 }
 0x336   :  { %v938_v35 = vmul.f32 0.00390625, %v908_v54 }
 0x338   :  { %v946_v39 = vmul.f32 %v938_v35, %v938_v35 }
 0x339   :  { %v911_v15 = vpop.xlane.xlu0 %910 }
 0x33a   :  { %v939_v62 = vmul.f32 0.00390625, %v911_v15 }
 0x33b   :  { %v931_v41 = vpop.xlane.xlu1 %930 }
 0x33c   :  { %v943_v31 = vmul.f32 0.00390625, %v931_v41  ;;  %v947_v20 = vmul.f32 %v939_v62, %v939_v62 }
 0x33e   :  { %v951_v13 = vsub.f32 %v943_v31, %v947_v20 }
 0x33f   :  { %v914_v17 = vpop.xlane.xlu1 %913 }
 0x340   :  { %v940_v10 = vmul.f32 0.00390625, %v914_v17  ;;  %v955_v28 = vmax.f32 %v951_v13, 0.0 }
 0x341   :  { %v917_v26 = vpop.xlane.xlu0 %916 }
 0x342   :  { %v941_v24 = vmul.f32 0.00390625, %v917_v26  ;;  %v948_v47 = vmul.f32 %v940_v10, %v940_v10  ;;  %v967_v1 = vadd.f32 1e-05, %v955_v28  ;;  %v962_v20 = vsub.f32 %v5221_v42, %v940_v10 }
 0x343   :  { %v934_v25 = vpop.xlane.xlu1 %933  ;;  %v963_v17 = vsub.f32 %v5219_v40, %v940_v10  ;;  %v958_v40 = vsub.f32 %v5203_v36, %v938_v35  ;;  %v959_v10 = vsub.f32 %v5205_v43, %v938_v35 }
 0x344   :  { %v944_v4 = vmul.f32 0.00390625, %v934_v25  ;;  %v949_v56 = vmul.f32 %v941_v24, %v941_v24 }
 0x345   :  { %v937_v8 = vpop.xlane.xlu0 %936 }
 0x346   :  { %v952_v44 = vsub.f32 %v944_v4, %v948_v47  ;;  %v945_v45 = vmul.f32 0.00390625, %v937_v8  ;;  %v964_v47 = vsub.f32 %v5223_v22, %v941_v24  ;;  %v965_v4 = vsub.f32 %v5225_v49, %v941_v24 }
 0x347   :  { %v1000_v29 = vpop.permute.xlu1 %999 }
 0x348   :  { %v956_v23 = vmax.f32 %v952_v44, 0.0  ;;  %v953_v46 = vsub.f32 %v945_v45, %v949_v56  ;;  %v960_v45 = vsub.f32 %v5207_v11, %v939_v62 }
 0x349   :  { %v928_v6 = vpop.xlane.xlu0 %927 }
 0x34a   :  { %v968_v7 = vadd.f32 1e-05, %v956_v23  ;;  %v957_v30 = vmax.f32 %v953_v46, 0.0  ;;  %v942_v57 = vmul.f32 0.00390625, %v928_v6  ;;  %v961_v23 = vsub.f32 %v5211_v38, %v939_v62 }
 0x34b   :  { %v1024_v21 = vpop.permute.xlu1 %1023 }
 0x34c   :  { %4068 = vrsqrt.f32 %v968_v7  ;;  %v969_v27 = vadd.f32 1e-05, %v957_v30  ;;  %v950_v9 = vsub.f32 %v942_v57, %v946_v39 }
 0x34d   :  { %4070 = vrsqrt.f32 %v967_v1 }
 0x34e   :  { %4072 = vrsqrt.f32 %v969_v27  ;;  %v954_v15 = vmax.f32 %v950_v9, 0.0 }
 0x350   :  { %v966_v54 = vadd.f32 1e-05, %v954_v15  ;;  %v990_v41 = vpop.permute.xlu1 %989 }
 0x351   :  { %v995_v26 = vpop.permute.xlu0 %994 }
 0x352   :  { %4074 = vrsqrt.f32 %v966_v54 }
 0x355   :  { %v1020_v31 = vpop.permute.xlu1 %1019 }
 0x359   :  { %v4069_v13 = vpop.eup %4068 }
 0x35a   :  { %v4071_v25 = vpop.eup %4070  ;;  %v985_v28 = vpop.permute.xlu1 %984  ;;  %v978_v8 = vmul.f32 %v4069_v13, %v962_v20  ;;  %v979_v44 = vmul.f32 %v4069_v13, %v963_v17 }
 0x35b   :  { %v4073_v56 = vpop.eup %4072  ;;  %v976_v7 = vmul.f32 %v4071_v25, %v960_v45  ;;  %v977_v22 = vmul.f32 %v4071_v25, %v961_v23 }
 0x35c   :  { %v980_v46 = vmul.f32 %v4073_v56, %v964_v47  ;;  %v981_v1 = vmul.f32 %v4073_v56, %v965_v4  ;;  %v1006_v42 = vmul.f32 %v995_v26, %v978_v8  ;;  %v1007_v6 = vmul.f32 %v995_v26, %v979_v44 }
 0x35d   :  { %v1004_v35 = vmul.f32 %v990_v41, %v976_v7  ;;  %v1005_v20 = vmul.f32 %v990_v41, %v977_v22 }
 0x35e   :  { %v1008_v30 = vmul.f32 %v1000_v29, %v980_v46  ;;  %v1009_v49 = vmul.f32 %v1000_v29, %v981_v1  ;;  %v5265_v24 = vadd.f32 %v1020_v31, %v1006_v42  ;;  %v5267_v39 = vadd.f32 %v1020_v31, %v1007_v6 }
 0x35f   :  { %v4075_v57 = vpop.eup %4074  ;;  %v1016_v11 = vpop.permute.xlu1 %1015 }
 0x360   :  { %v1032_v27 = vadd.f32 %v1024_v21, %v1008_v30  ;;  %v1033_v38 = vadd.f32 %v1024_v21, %v1009_v49  ;;  %v974_v62 = vmul.f32 %v4075_v57, %v958_v40  ;;  %v975_v9 = vmul.f32 %v4075_v57, %v959_v10 }
 0x361   :  { %v1038_v15 = vmin.f32 %v5265_v24, 0.0  ;;  %v1039_v36 = vmin.f32 %v5267_v39, 0.0  ;;  %v1028_v4 = vadd.f32 %v1016_v11, %v1004_v35  ;;  %v1029_v8 = vadd.f32 %v1016_v11, %v1005_v20 }
 0x362   :  { %v1040_v54 = vmin.f32 %v1032_v27, 0.0  ;;  %v1041_v43 = vmin.f32 %v1033_v38, 0.0  ;;  %v1002_v17 = vmul.f32 %v985_v28, %v974_v62  ;;  %v1003_v29 = vmul.f32 %v985_v28, %v975_v9 }
 0x363   :  { %v1050_v13 = vmul.f32 1.442695, %v1038_v15  ;;  %v1052_v26 = vmul.f32 1.442695, %v1039_v36  ;;  %v1012_v31 = vpop.permute.xlu1 %1011  ;;  %v1036_v56 = vmin.f32 %v1028_v4, 0.0  ;;  %v1037_v45 = vmin.f32 %v1029_v8, 0.0 }
 0x364   :  { %v1054_v25 = vmul.f32 1.442695, %v1040_v54  ;;  %v1056_v47 = vmul.f32 1.442695, %v1041_v43  ;;  %v5271_v21 = vadd.f32 %v1012_v31, %v1002_v17  ;;  %v5273_v44 = vadd.f32 %v1012_v31, %v1003_v29 }
 0x365   :  { %4076 = vpow2.f32 %v1050_v13  ;;  %v1046_v23 = vmul.f32 1.442695, %v1036_v56  ;;  %v1048_v46 = vmul.f32 1.442695, %v1037_v45  ;;  %vm1080_vm0 = vcmp.gt.f32.partialorder %v1032_v27, 0.0 }
 0x366   :  { %4078 = vpow2.f32 %v1054_v25  ;;  %v1034_v41 = vmin.f32 %v5271_v21, 0.0  ;;  %v1035_v28 = vmin.f32 %v5273_v44, 0.0  ;;  %vm1078_vm6 = vcmp.gt.f32.partialorder %v5265_v24, 0.0 }
 0x367   :  { %4080 = vpow2.f32 %v1056_v47  ;;  %vm1079_vm2 = vcmp.gt.f32.partialorder %v5267_v39, 0.0  ;;  %vm1081_vm4 = vcmp.gt.f32.partialorder %v1033_v38, 0.0  ;;  %vm1076_vm12 = vcmp.gt.f32.partialorder %v1028_v4, 0.0 }
 0x368   :  { %4082 = vpow2.f32 %v1052_v26  ;;  %v1042_v1 = vmul.f32 1.442695, %v1034_v41  ;;  %v1044_v42 = vmul.f32 1.442695, %v1035_v28 }
 0x369   :  { %4084 = vpow2.f32 %v1046_v23 }
 0x36a   :  { %4086 = vpow2.f32 %v1048_v46 }
 0x36b   :  { %4088 = vpow2.f32 %v1042_v1 }
 0x36c   :  { %4090 = vpow2.f32 %v1044_v42 }
 0x372   :  { %v4077_v6 = vpop.eup %4076 }
 0x373   :  { %v4079_v40 = vpop.eup %4078  ;;  %v3470_v10 = vadd.f32 -1.0, %v4077_v6 }
 0x374   :  { %v4081_v7 = vpop.eup %4080  ;;  %v3472_v22 = vadd.f32 -1.0, %v4079_v40 }
 0x375   :  { %v4083_v30 = vpop.eup %4082  ;;  %v3473_v49 = vadd.f32 -1.0, %v4081_v7  ;;  %v1070_v57 = vmul.f32 1.6732632, %v3470_v10 }
 0x376   :  { %v1072_v11 = vmul.f32 1.6732632, %v3472_v22  ;;  %v3471_v62 = vadd.f32 -1.0, %v4083_v30  ;;  %v4085_v9 = vpop.eup %4084 }
 0x377   :  { %v1073_v15 = vmul.f32 1.6732632, %v3473_v49  ;;  %v4087_v36 = vpop.eup %4086  ;;  %v3468_v35 = vadd.f32 -1.0, %v4085_v9  ;;  %v1086_v13 = vsel %vm1078_vm6, %v5265_v24, %v1070_v57  ;;  %vm7065_vm6 = vcmp.lt.s32.totalorder %v4298_v5, 1 }
 0x378   :  { %v1088_v54 = vsel %vm1080_vm0, %v1032_v27, %v1072_v11  ;;  %v1071_v43 = vmul.f32 1.6732632, %v3471_v62  ;;  %v4089_v20 = vpop.eup %4088  ;;  %v3469_v26 = vadd.f32 -1.0, %v4087_v36  ;;  %vm1077_vm0 = vcmp.gt.f32.partialorder %v1029_v8, 0.0 }
 0x379   :  { %v1089_v17 = vsel %vm1081_vm4, %v1033_v38, %v1073_v15  ;;  %v5279_v29 = vmul.f32 1.050701, %v1088_v54  ;;  %v4091_v31 = vpop.eup %4090  ;;  %v1068_v56 = vmul.f32 1.6732632, %v3468_v35  ;;  %v3466_v45 = vadd.f32 -1.0, %v4089_v20 }
 0x37a   :  { %v5282_v25 = vmul.f32 1.050701, %v1089_v17  ;;  %v1087_v47 = vsel %vm1079_vm2, %v5267_v39, %v1071_v43  ;;  %v1069_v41 = vmul.f32 1.6732632, %v3469_v26  ;;  %v3467_v28 = vadd.f32 -1.0, %v4091_v31 }
 0x37b   :  { %v5285_v27 = vmul.f32 1.050701, %v1087_v47  ;;  %v1084_v23 = vsel %vm1076_vm12, %v1028_v4, %v1068_v56  ;;  %v1066_v38 = vmul.f32 1.6732632, %v3466_v45  ;;  %v5288_v46 = vmul.f32 1.050701, %v1086_v13 }
 0x37c   :  { %1141 = vmatprep.subr.mxu0 %v5282_v25  ;;  %v1085_v24 = vsel %vm1077_vm0, %v1029_v8, %v1069_v41  ;;  %v1067_v1 = vmul.f32 1.6732632, %v3467_v28  ;;  %vm1074_vm4 = vcmp.gt.f32.partialorder %v5271_v21, 0.0  ;;  %vm1075_vm2 = vcmp.gt.f32.partialorder %v5273_v44, 0.0  ;;  %vm7066_vm0 = vmmov %vm7065_vm6 }
 0x37d   :  { %1142 = vmatpush1.msra.mxu0 %v5279_v29  ;;  %v5292_v39 = vmul.f32 1.050701, %v1085_v24  ;;  %v1082_v42 = vsel %vm1074_vm4, %v5271_v21, %v1066_v38  ;;  %v5297_v4 = vmul.f32 1.050701, %v1084_v23  ;;  %v3474_v21 = vld [vmem:[%s6868_s1 + $0x8] sm:$0xff]  ;;  %vm6966_vm12 = vcmask 261120   ;;  %vm7067_vm4 = vmmov %vm7066_vm0 }
 0x37e   :  { %1143 = vmatprep.subr.mxu0 %v5285_v27  ;;  %v1083_v6 = vsel %vm1075_vm2, %v5273_v44, %v1067_v1  ;;  %v5300_v40 = vmul.f32 1.050701, %v1082_v42  ;;  %vm7068_vm2 = vmmov %vm7066_vm0 }
 0x37f   :  { %1144 = vmatpush1.msra.mxu0 %v5288_v46  ;;  %v5303_v8 = vmul.f32 1.050701, %v1083_v6  ;;  %vm7070_vm14 = vmmov %vm7066_vm0 }
 0x380   :  { %1145 = vmatprep.subr.mxu0 %v5292_v39  ;;  %1570 = vrot.lane.b32.xlu0 %v5300_v40, %s4201_s30  ;;  %vm7071_vm8 = vmmov %vm7066_vm0 }
 0x381   :  { %1146 = vmatpush1.msra.mxu0 %v5297_v4  ;;  %1578 = vrot.lane.b32.xlu1 %v5303_v8, %s4201_s30 }
 0x382   :  { %1147 = vmatprep.subr.mxu0 %v5303_v8 }
 0x383   :  { %1148 = vmatpush1.msra.mxu0 %v5300_v40 }
 0x384   :  { %3475 = vmatmul.mubr.msk.f32.vlgmr.msra.gmra.mxu0 %vm6966_vm12, %v3474_v21  ;;  %1594 = vrot.lane.b32.xlu0 %v5300_v40, %s4203_s7  ;;  %vm7069_vm12 = vmmov %vm7066_vm0 }
 0x385   :  { %1602 = vrot.lane.b32.xlu1 %v5303_v8, %s4203_s7 }
 0x388   :  { %1572 = vrot.lane.b32.xlu0 %v5297_v4, %s4201_s30 }
 0x389   :  { %1580 = vrot.lane.b32.xlu1 %v5292_v39, %s4201_s30 }
 0x38c   :  { %1596 = vrot.lane.b32.xlu0 %v5297_v4, %s4203_s7 }
 0x38d   :  { %1604 = vrot.lane.b32.xlu1 %v5292_v39, %s4203_s7 }
 0x390   :  { %1574 = vrot.lane.b32.xlu0 %v5288_v46, %s4201_s30 }
 0x391   :  { %1582 = vrot.lane.b32.xlu1 %v5285_v27, %s4201_s30 }
 0x394   :  { %1598 = vrot.lane.b32.xlu0 %v5288_v46, %s4203_s7 }
 0x395   :  { %1606 = vrot.lane.b32.xlu1 %v5285_v27, %s4203_s7 }
 0x398   :  { %1576 = vrot.lane.b32.xlu0 %v5279_v29, %s4201_s30 }
 0x399   :  { %1584 = vrot.lane.b32.xlu1 %v5282_v25, %s4201_s30 }
 0x39c   :  { %1600 = vrot.lane.b32.xlu0 %v5279_v29, %s4203_s7 }
 0x39d   :  { %1608 = vrot.lane.b32.xlu1 %v5282_v25, %s4203_s7 }
 0x3f2   :  { %v1571_v44 = vpop.permute.xlu0 %1570 }
 0x3f3   :  { %v1579_v10 = vpop.permute.xlu1 %1578 }
 0x3f4   :  { %v1586_v47 = vsel %vm7071_vm8, %v1571_v44, %v1579_v10 }
 0x3f6   :  { %v1595_v7 = vpop.permute.xlu0 %1594 }
 0x3f7   :  { %v1603_v22 = vpop.permute.xlu1 %1602 }
 0x3fa   :  { %v1573_v30 = vpop.permute.xlu0 %1572 }
 0x3fb   :  { %v1581_v49 = vpop.permute.xlu1 %1580 }
 0x3fc   :  { %v1587_v43 = vsel %vm7065_vm6, %v1573_v30, %v1581_v49  ;;  %v1591_v35 = vsel %vm7066_vm0, %v1581_v49, %v1573_v30  ;;  %vm7072_vm6 = vmmov %vm7066_vm0  ;;  %vm7073_vm0 = vcmp.eq.s32.totalorder %v4958_v37, 1 }
 0x3fd   :  { %v1590_v56 = vsel %vm7072_vm6, %v1579_v10, %v1571_v44  ;;  %vm7077_vm8 = vmmov %vm7073_vm0 }
 0x3fe   :  { %v1597_v57 = vpop.permute.xlu0 %1596  ;;  %v1621_v38 = vsel %vm7077_vm8, %v5292_v39, %v1587_v43 }
 0x3ff   :  { %v1605_v11 = vpop.permute.xlu1 %1604 }
 0x402   :  { %v1575_v62 = vpop.permute.xlu0 %1574 }
 0x403   :  { %v1583_v9 = vpop.permute.xlu1 %1582 }
 0x404   :  { %v1588_v17 = vsel %vm7067_vm4, %v1575_v62, %v1583_v9  ;;  %v1592_v13 = vsel %vm7068_vm2, %v1583_v9, %v1575_v62  ;;  %vm7074_vm4 = vmmov %vm7073_vm0  ;;  %vm7075_vm2 = vcmp.lt.s32.totalorder %v4298_v5, 127 }
 0x405   :  { %v1614_v28 = vsel %vm7075_vm2, %v1603_v22, %v1595_v7  ;;  %vm7079_vm6 = vmmov %vm7075_vm2  ;;  %v1622_v6 = vsel %vm7073_vm0, %v5288_v46, %v1592_v13 }
 0x406   :  { %v1599_v15 = vpop.permute.xlu0 %1598  ;;  %v1615_v42 = vsel %vm7079_vm6, %v1605_v11, %v1597_v57  ;;  %vm7082_vm8 = vmmov %vm7075_vm2  ;;  %vm7084_vm6 = vcmp.eq.s32.totalorder %v4978_v34, 1 }
 0x407   :  { %v1607_v36 = vpop.permute.xlu1 %1606 }
 0x408   :  { %v1612_v44 = vsel %vm7075_vm2, %v1599_v15, %v1607_v36 }
 0x40a   :  { %v1577_v54 = vpop.permute.xlu0 %1576 }
 0x40b   :  { %v1585_v20 = vpop.permute.xlu1 %1584 }
 0x40c   :  { %v1589_v26 = vsel %vm7069_vm12, %v1577_v54, %v1585_v20  ;;  %v1593_v31 = vsel %vm7070_vm14, %v1585_v20, %v1577_v54  ;;  %vm7076_vm14 = vmmov %vm7073_vm0 }
 0x40d   :  { %v1624_v45 = vsel %vm7073_vm0, %v5279_v29, %v1593_v31  ;;  %v1625_v41 = vsel %vm7074_vm4, %v5282_v25, %v1589_v26  ;;  %v1620_v23 = vsel %vm7076_vm14, %v5297_v4, %v1591_v35  ;;  %vm7078_vm12 = vmmov %vm7075_vm2 }
 0x40e   :  { %v1616_v24 = vsel %vm7078_vm12, %v1607_v36, %v1599_v15  ;;  %v1601_v1 = vpop.permute.xlu0 %1600  ;;  %vm7080_vm4 = vmmov %vm7073_vm0  ;;  %v1640_v30 = vmax.f32 %v5279_v29, %v1624_v45  ;;  %v1641_v9 = vmax.f32 %v5282_v25, %v1625_v41 }
 0x40f   :  { %v1623_v21 = vsel %vm7080_vm4, %v5285_v27, %v1588_v17  ;;  %v1609_v10 = vpop.permute.xlu1 %1608  ;;  %vm7081_vm14 = vmmov %vm7075_vm2 }
 0x410   :  { %v1613_v49 = vsel %vm7081_vm14, %v1601_v1, %v1609_v10  ;;  %v1617_v62 = vsel %vm7082_vm8, %v1609_v10, %v1601_v1  ;;  %vm7083_vm12 = vmmov %vm7075_vm2  ;;  %vm7088_vm14 = vcmp.eq.s32.totalorder %v4958_v37, 1 }
 0x411   :  { %v1611_v54 = vsel %vm7083_vm12, %v1597_v57, %v1605_v11  ;;  %v1632_v43 = vsel %vm7084_vm6, %v5279_v29, %v1613_v49  ;;  %vm7085_vm0 = vmmov %vm7084_vm6  ;;  %v1639_v57 = vmax.f32 %v5285_v27, %v1623_v21  ;;  %v1619_v29 = vsel %vm7088_vm14, %v5303_v8, %v1586_v47 }
 0x412   :  { %v1633_v15 = vsel %vm7085_vm0, %v5282_v25, %v1617_v62  ;;  %vm7086_vm4 = vmmov %vm7085_vm0  ;;  %v1648_v20 = vmax.f32 %v1640_v30, %v1632_v43  ;;  %v1610_v11 = vsel %vm7082_vm8, %v1595_v7, %v1603_v22  ;;  %v1638_v25 = vmax.f32 %v5288_v46, %v1622_v6 }
 0x413   :  { %v1631_v36 = vsel %vm7086_vm4, %v5285_v27, %v1616_v24  ;;  %vm7087_vm2 = vmmov %vm7085_vm0  ;;  %v1649_v17 = vmax.f32 %v1641_v9, %v1633_v15  ;;  %v1628_v27 = vsel %vm7085_vm0, %v5297_v4, %v1611_v54  ;;  %v1637_v47 = vmax.f32 %v5292_v39, %v1621_v38 }
 0x414   :  { %v1630_v35 = vsel %vm7087_vm2, %v5288_v46, %v1612_v44  ;;  %vm7089_vm12 = vmmov %vm7085_vm0  ;;  %v1647_v31 = vmax.f32 %v1639_v57, %v1631_v36  ;;  %v1636_v7 = vmax.f32 %v5297_v4, %v1620_v23  ;;  %v1635_v41 = vmax.f32 %v5303_v8, %v1619_v29 }
 0x415   :  { %v1629_v13 = vsel %vm7089_vm12, %v5292_v39, %v1615_v42  ;;  %vm7090_vm6 = vmmov %vm7088_vm14  ;;  %1855 = vmatprep.subr.mxu1 %v1649_v17  ;;  %v1646_v22 = vmax.f32 %v1638_v25, %v1630_v35  ;;  %vm7105_vm14 = vcmp.lt.s32.totalorder %v4298_v5, 4  ;;  %vm7108_vm12 = vcmp.lt.s32.totalorder %v4298_v5, 5 }
 0x416   :  { %v1618_v26 = vsel %vm7090_vm6, %v5300_v40, %v1590_v56  ;;  %1856 = vmatpush1.msra.mxu1 %v1648_v20  ;;  %vm7091_vm4 = vmmov %vm7085_vm0  ;;  %v1645_v45 = vmax.f32 %v1637_v47, %v1629_v13  ;;  %v1644_v1 = vmax.f32 %v1636_v7, %v1628_v27 }
 0x417   :  { %v1627_v46 = vsel %vm7091_vm4, %v5303_v8, %v1614_v28  ;;  %vm7092_vm2 = vmmov %vm7085_vm0  ;;  %1857 = vmatprep.subr.mxu1 %v1647_v31  ;;  %v1634_v24 = vmax.f32 %v5300_v40, %v1618_v26  ;;  %vm7110_vm0 = vcmp.lt.s32.totalorder %v4298_v5, 6  ;;  %v1102_v31 = vld [vmem:[#allocation3 + $0x68] sm:$0xff] }
 0x418   :  { %v1626_v56 = vsel %vm7092_vm2, %v5300_v40, %v1610_v11  ;;  %1858 = vmatpush1.msra.mxu1 %v1646_v22  ;;  %v1643_v39 = vmax.f32 %v1635_v41, %v1627_v46  ;;  %vm7106_vm8 = vmmov %vm7105_vm14  ;;  %vm7113_vm2 = vcmp.lt.s32.totalorder %v4298_v5, 7  ;;  %1820 = vmatprep.mubr.f32.mxu0 %v1102_v31 }
 0x419   :  { %1859 = vmatprep.subr.mxu1 %v1645_v45  ;;  %v1642_v4 = vmax.f32 %v1634_v24, %v1626_v56  ;;  %vm7109_vm6 = vmmov %vm7108_vm12 }
 0x41a   :  { %1860 = vmatpush1.msra.mxu1 %v1644_v1  ;;  %vm7111_vm4 = vmmov %vm7110_vm0 }
 0x41b   :  { %1861 = vmatprep.subr.mxu1 %v1643_v39 }
 0x41c   :  { %1862 = vmatpush1.msra.mxu1 %v1642_v4 }
 0x444   :  { %v5433_v23 = vpop.f32.mrf.mxu0 }
 0x445   :  { %1328 = vrot.lane.b32.xlu0 %v5433_v23, %s7011_s2  ;;  %1338 = vrot.lane.b32.xlu1 %v5433_v23, %s7013_s29 }
 0x446   :  { %v5439_v28 = vpop.f32.mrf.mxu0 }
 0x449   :  { %1318 = vrot.lane.b32.xlu0 %v5433_v23, %s7009_s6  ;;  %1340 = vrot.lane.b32.xlu1 %v5439_v28, %s7013_s29  ;;  %s7277_s29 = smov 10  }
 0x44d   :  { %1308 = vrot.lane.b32.xlu0 %v5433_v23, %s7007_s8  ;;  %1330 = vrot.lane.b32.xlu1 %v5439_v28, %s7011_s2  ;;  %s7276_s2 = smov 9  }
 0x451   :  { %1298 = vrot.lane.b32.xlu0 %v5433_v23, %s7005_s9  ;;  %1320 = vrot.lane.b32.xlu1 %v5439_v28, %s7009_s6  ;;  %s7272_s6 = smov 5  }
 0x455   :  { %1288 = vrot.lane.b32.xlu0 %v5433_v23, %s7003_s10  ;;  %1310 = vrot.lane.b32.xlu1 %v5439_v28, %s7007_s8  ;;  %s7273_s8 = smov 6  }
 0x459   :  { %1278 = vrot.lane.b32.xlu0 %v5433_v23, %s6993_s11  ;;  %1300 = vrot.lane.b32.xlu1 %v5439_v28, %s7005_s9  ;;  %s7274_s9 = smov 7  }
 0x45d   :  { %1268 = vrot.lane.b32.xlu0 %v5433_v23, %s6991_s12  ;;  %1290 = vrot.lane.b32.xlu1 %v5439_v28, %s7003_s10  ;;  %s7275_s10 = smov 8  }
 0x461   :  { %1258 = vrot.lane.b32.xlu0 %v5433_v23, %s6989_s13  ;;  %1280 = vrot.lane.b32.xlu1 %v5439_v28, %s6993_s11  ;;  %s7124_s11 = smov 115  }
 0x465   :  { %1248 = vrot.lane.b32.xlu0 %v5433_v23, %s6987_s14  ;;  %1270 = vrot.lane.b32.xlu1 %v5439_v28, %s6991_s12  ;;  %s7121_s12 = smov 3  }
 0x469   :  { %1238 = vrot.lane.b32.xlu0 %v5433_v23, %s6985_s15  ;;  %1260 = vrot.lane.b32.xlu1 %v5439_v28, %s6989_s13  ;;  %s7118_s13 = smov 114  }
 0x46d   :  { %1228 = vrot.lane.b32.xlu0 %v5433_v23, %s6983_s16  ;;  %1250 = vrot.lane.b32.xlu1 %v5439_v28, %s6987_s14  ;;  %s7115_s14 = smov 2  }
 0x471   :  { %1218 = vrot.lane.b32.xlu0 %v5433_v23, %s6981_s17  ;;  %1240 = vrot.lane.b32.xlu1 %v5439_v28, %s6985_s15  ;;  %s7112_s15 = smov 113  }
 0x475   :  { %1208 = vrot.lane.b32.xlu0 %v5433_v23, %s6979_s18  ;;  %1230 = vrot.lane.b32.xlu1 %v5439_v28, %s6983_s16  ;;  %s7107_s16 = smov 112  }
 0x479   :  { %1198 = vrot.lane.b32.xlu0 %v5433_v23, %s6977_s19  ;;  %1220 = vrot.lane.b32.xlu1 %v5439_v28, %s6981_s17  ;;  %s7104_s17 = smov 111  }
 0x47d   :  { %1188 = vrot.lane.b32.xlu0 %v5433_v23, %s6975_s20  ;;  %1210 = vrot.lane.b32.xlu1 %v5439_v28, %s6979_s18  ;;  %s7103_s18 = smov 110  }
 0x481   :  { %1490 = vrot.lane.b32.xlu0 %v5433_v23, %s6973_s21  ;;  %1200 = vrot.lane.b32.xlu1 %v5439_v28, %s6977_s19  ;;  %s7102_s19 = smov 126  }
 0x485   :  { %1480 = vrot.lane.b32.xlu0 %v5433_v23, %s6971_s22  ;;  %1190 = vrot.lane.b32.xlu1 %v5439_v28, %s6975_s20  ;;  %s7101_s20 = smov 109  }
 0x489   :  { %1470 = vrot.lane.b32.xlu0 %v5433_v23, %s7093_s27  ;;  %1492 = vrot.lane.b32.xlu1 %v5439_v28, %s6973_s21  ;;  %s7100_s21 = smov 125  }
 0x48d   :  { %1460 = vrot.lane.b32.xlu0 %v5433_v23, %s7094_s28  ;;  %1482 = vrot.lane.b32.xlu1 %v5439_v28, %s6971_s22  ;;  %s7099_s22 = smov 124  }
 0x491   :  { %1450 = vrot.lane.b32.xlu0 %v5433_v23, %s7095_s24  ;;  %1472 = vrot.lane.b32.xlu1 %v5439_v28, %s7093_s27 }
 0x495   :  { %1440 = vrot.lane.b32.xlu0 %v5433_v23, %s7096_s26  ;;  %1462 = vrot.lane.b32.xlu1 %v5439_v28, %s7094_s28 }
 0x499   :  { %1430 = vrot.lane.b32.xlu0 %v5433_v23, %s7097_s23  ;;  %1452 = vrot.lane.b32.xlu1 %v5439_v28, %s7095_s24 }
 0x49d   :  { %1420 = vrot.lane.b32.xlu0 %v5433_v23, %s7098_s25  ;;  %1442 = vrot.lane.b32.xlu1 %v5439_v28, %s7096_s26 }
 0x4a1   :  { %1410 = vrot.lane.b32.xlu0 %v5433_v23, %s7099_s22  ;;  %1432 = vrot.lane.b32.xlu1 %v5439_v28, %s7097_s23 }
 0x4a5   :  { %1400 = vrot.lane.b32.xlu0 %v5433_v23, %s7100_s21  ;;  %1422 = vrot.lane.b32.xlu1 %v5439_v28, %s7098_s25 }
 0x4a9   :  { %1560 = vrot.lane.b32.xlu0 %v5433_v23, %s7101_s20  ;;  %1412 = vrot.lane.b32.xlu1 %v5439_v28, %s7099_s22 }
 0x4ad   :  { %1390 = vrot.lane.b32.xlu0 %v5433_v23, %s7102_s19  ;;  %1402 = vrot.lane.b32.xlu1 %v5439_v28, %s7100_s21 }
 0x4b1   :  { %1550 = vrot.lane.b32.xlu0 %v5433_v23, %s7103_s18  ;;  %1562 = vrot.lane.b32.xlu1 %v5439_v28, %s7101_s20 }
 0x4b5   :  { %1380 = vrot.lane.b32.xlu0 %v5433_v23, %s4203_s7  ;;  %1392 = vrot.lane.b32.xlu1 %v5439_v28, %s7102_s19 }
 0x4b7   :  { %v1339_v40 = vpop.permute.xlu1 %1338  ;;  %v1329_v8 = vpop.permute.xlu0 %1328 }
 0x4b9   :  { %1540 = vrot.lane.b32.xlu0 %v5433_v23, %s7104_s17  ;;  %1552 = vrot.lane.b32.xlu1 %v5439_v28, %s7103_s18 }
 0x4bb   :  { %v1341_v38 = vpop.permute.xlu1 %1340  ;;  %v1319_v42 = vpop.permute.xlu0 %1318 }
 0x4bc   :  { %v1343_v6 = vsel %vm7105_vm14, %v1341_v38, %v1339_v40  ;;  %v1342_v21 = vsel %vm7106_vm8, %v1339_v40, %v1341_v38  ;;  %vm7114_vm14 = vmmov %vm7113_vm2  ;;  %vm7116_vm8 = vcmp.lt.s32.totalorder %v4298_v5, 8 }
 0x4bd   :  { %1530 = vrot.lane.b32.xlu0 %v5433_v23, %s7107_s16  ;;  %1382 = vrot.lane.b32.xlu1 %v5439_v28, %s4203_s7 }
 0x4be   :  { %3671 = vmatprep.subr.msk.mxu0 %vm4545_vm3, %v1342_v21 }
 0x4bf   :  { %3673 = vmatpush1.msk.msra.mxu0 %vm4545_vm3, %v1343_v6  ;;  %v1331_v44 = vpop.permute.xlu1 %1330  ;;  %v1309_v10 = vpop.permute.xlu0 %1308 }
 0x4c0   :  { %v1333_v30 = vsel %vm7108_vm12, %v1331_v44, %v1329_v8  ;;  %v1332_v49 = vsel %vm7109_vm6, %v1329_v8, %v1331_v44  ;;  %vm7117_vm12 = vmmov %vm7116_vm8  ;;  %vm7119_vm6 = vcmp.lt.s32.totalorder %v4298_v5, 9 }
 0x4c1   :  { %1368 = vrot.lane.b32.xlu0 %v5433_v23, %s4201_s30  ;;  %1542 = vrot.lane.b32.xlu1 %v5439_v28, %s7104_s17 }
 0x4c2   :  { %3675 = vmatprep.subr.msk.mxu0 %vm4560_vm5, %v1332_v49 }
 0x4c3   :  { %3677 = vmatpush1.msk.msra.mxu0 %vm4560_vm5, %v1333_v30  ;;  %v1321_v62 = vpop.permute.xlu1 %1320  ;;  %v1299_v9 = vpop.permute.xlu0 %1298 }
 0x4c4   :  { %v1323_v54 = vsel %vm7110_vm0, %v1321_v62, %v1319_v42  ;;  %v1322_v43 = vsel %vm7111_vm4, %v1319_v42, %v1321_v62  ;;  %vm7120_vm0 = vmmov %vm7119_vm6  ;;  %vm7122_vm4 = vcmp.lt.s32.totalorder %v4298_v5, 10 }
 0x4c5   :  { %1520 = vrot.lane.b32.xlu0 %v5433_v23, %s7112_s15  ;;  %1532 = vrot.lane.b32.xlu1 %v5439_v28, %s7107_s16 }
 0x4c6   :  { %3679 = vmatprep.subr.msk.mxu0 %vm4575_vm7, %v1322_v43 }
 0x4c7   :  { %3681 = vmatpush1.msk.msra.mxu0 %vm4575_vm7, %v1323_v54  ;;  %v1311_v15 = vpop.permute.xlu1 %1310  ;;  %v1289_v36 = vpop.permute.xlu0 %1288 }
 0x4c8   :  { %v1313_v35 = vsel %vm7113_vm2, %v1311_v15, %v1309_v10  ;;  %v1312_v20 = vsel %vm7114_vm14, %v1309_v10, %v1311_v15  ;;  %vm7123_vm2 = vmmov %vm7122_vm4  ;;  %vm7125_vm14 = vcmp.lt.s32.totalorder %v4298_v5, 11 }
 0x4c9   :  { %1358 = vrot.lane.b32.xlu0 %v5433_v23, %s7115_s14  ;;  %1370 = vrot.lane.b32.xlu1 %v5439_v28, %s4201_s30 }
 0x4ca   :  { %3683 = vmatprep.subr.msk.mxu0 %vm4598_vm9, %v1312_v20 }
 0x4cb   :  { %3685 = vmatpush1.msk.msra.mxu0 %vm4598_vm9, %v1313_v35  ;;  %v1301_v17 = vpop.permute.xlu1 %1300  ;;  %v1279_v57 = vpop.permute.xlu0 %1278 }
 0x4cc   :  { %v1303_v29 = vsel %vm7116_vm8, %v1301_v17, %v1299_v9  ;;  %v1302_v11 = vsel %vm7117_vm12, %v1299_v9, %v1301_v17  ;;  %vm7126_vm8 = vmmov %vm7125_vm14  ;;  %vm7127_vm12 = vcmp.lt.s32.totalorder %v4298_v5, 12 }
 0x4cd   :  { %1510 = vrot.lane.b32.xlu0 %v5433_v23, %s7118_s13  ;;  %1522 = vrot.lane.b32.xlu1 %v5439_v28, %s7112_s15 }
 0x4ce   :  { %3687 = vmatprep.subr.msk.mxu0 %vm4617_vm11, %v1302_v11 }
 0x4cf   :  { %3689 = vmatpush1.msk.msra.mxu0 %vm4617_vm11, %v1303_v29  ;;  %v1291_v25 = vpop.permute.xlu1 %1290  ;;  %v1269_v13 = vpop.permute.xlu0 %1268 }
 0x4d0   :  { %v1293_v26 = vsel %vm7119_vm6, %v1291_v25, %v1289_v36  ;;  %v1292_v27 = vsel %vm7120_vm0, %v1289_v36, %v1291_v25  ;;  %vm7128_vm6 = vmmov %vm7127_vm12  ;;  %vm7129_vm0 = vnez %v7034_v52 }
 0x4d1   :  { %1348 = vrot.lane.b32.xlu0 %v5433_v23, %s7121_s12  ;;  %1360 = vrot.lane.b32.xlu1 %v5439_v28, %s7115_s14 }
 0x4d2   :  { %3691 = vmatprep.subr.msk.mxu0 %vm4640_vm13, %v1292_v27 }
 0x4d3   :  { %3693 = vmatpush1.msk.msra.mxu0 %vm4640_vm13, %v1293_v26  ;;  %v1281_v47 = vpop.permute.xlu1 %1280  ;;  %v1259_v7 = vpop.permute.xlu0 %1258 }
 0x4d4   :  { %v1283_v22 = vsel %vm7122_vm4, %v1281_v47, %v1279_v57  ;;  %v1282_v46 = vsel %vm7123_vm2, %v1279_v57, %v1281_v47  ;;  %vm7130_vm4 = vcmp.lt.s32.totalorder %v4298_v5, 13 }
 0x4d5   :  { %1500 = vrot.lane.b32.xlu0 %v5433_v23, %s7124_s11  ;;  %1512 = vrot.lane.b32.xlu1 %v5439_v28, %s7118_s13  ;;  %vm7131_vm2 = vmmov %vm7130_vm4 }
 0x4d6   :  { %3695 = vmatprep.subr.msk.mxu0 %vm4659_vm15, %v1282_v46 }
 0x4d7   :  { %3697 = vmatpush1.msk.msra.mxu0 %vm4659_vm15, %v1283_v22  ;;  %v1271_v56 = vpop.permute.xlu1 %1270  ;;  %v1249_v45 = vpop.permute.xlu0 %1248 }
 0x4d8   :  { %v1273_v41 = vsel %vm7125_vm14, %v1271_v56, %v1269_v13  ;;  %v1272_v24 = vsel %vm7126_vm8, %v1269_v13, %v1271_v56  ;;  %vm7132_vm14 = vnez %v7036_v59  ;;  %vm7133_vm8 = vcmp.lt.s32.totalorder %v4298_v5, 14 }
 0x4d9   :  { %1350 = vrot.lane.b32.xlu1 %v5439_v28, %s7121_s12  ;;  %3699 = vmatprep.subr.msk.mxu0 %vm4682_vm10, %v1272_v24 }
 0x4da   :  { %3701 = vmatpush1.msk.msra.mxu0 %vm4682_vm10, %v1273_v41 }
 0x4db   :  { %v1261_v1 = vpop.permute.xlu1 %1260  ;;  %v1239_v39 = vpop.permute.xlu0 %1238 }
 0x4dc   :  { %v1263_v4 = vsel %vm7127_vm12, %v1261_v1, %v1259_v7  ;;  %v1262_v40 = vsel %vm7128_vm6, %v1259_v7, %v1261_v1  ;;  %vm7134_vm12 = vmmov %vm7133_vm8  ;;  %vm7135_vm6 = vnez %v7038_v61 }
 0x4dd   :  { %1502 = vrot.lane.b32.xlu1 %v5439_v28, %s7124_s11  ;;  %3703 = vmatprep.subr.msk.mxu0 %vm7129_vm0, %v1262_v40 }
 0x4de   :  { %3705 = vmatpush1.msk.msra.mxu0 %vm7129_vm0, %v1263_v4 }
 0x4df   :  { %v1251_v8 = vpop.permute.xlu1 %1250  ;;  %v1229_v38 = vpop.permute.xlu0 %1228 }
 0x4e0   :  { %v1253_v42 = vsel %vm7130_vm4, %v1251_v8, %v1249_v45  ;;  %v1252_v6 = vsel %vm7131_vm2, %v1249_v45, %v1251_v8  ;;  %vm7136_vm4 = vcmp.lt.s32.totalorder %v4298_v5, 15 }
 0x4e1   :  { %3707 = vmatprep.subr.msk.mxu0 %vm7132_vm14, %v1252_v6  ;;  %vm7137_vm2 = vmmov %vm7136_vm4 }
 0x4e2   :  { %3709 = vmatpush1.msk.msra.mxu0 %vm7132_vm14, %v1253_v42  ;;  %vm7138_vm14 = vnez %v7040_v12 }
 0x4e3   :  { %v1241_v21 = vpop.permute.xlu1 %1240  ;;  %v1219_v44 = vpop.permute.xlu0 %1218 }
 0x4e4   :  { %v1243_v10 = vsel %vm7133_vm8, %v1241_v21, %v1239_v39  ;;  %v1242_v30 = vsel %vm7134_vm12, %v1239_v39, %v1241_v21  ;;  %vm7139_vm8 = vcmp.lt.s32.totalorder %v4298_v5, 16 }
 0x4e5   :  { %3711 = vmatprep.subr.msk.mxu0 %vm7135_vm6, %v1242_v30  ;;  %vm7140_vm12 = vmmov %vm7139_vm8 }
 0x4e6   :  { %3713 = vmatpush1.msk.msra.mxu0 %vm7135_vm6, %v1243_v10  ;;  %vm7141_vm6 = vnez %v7042_v14 }
 0x4e7   :  { %v1231_v49 = vpop.permute.xlu1 %1230  ;;  %v1209_v62 = vpop.permute.xlu0 %1208 }
 0x4e8   :  { %v1233_v9 = vsel %vm7136_vm4, %v1231_v49, %v1229_v38  ;;  %v1232_v54 = vsel %vm7137_vm2, %v1229_v38, %v1231_v49  ;;  %vm7142_vm4 = vcmp.lt.s32.totalorder %v4298_v5, 17 }
 0x4e9   :  { %3715 = vmatprep.subr.msk.mxu0 %vm7138_vm14, %v1232_v54  ;;  %vm7143_vm2 = vmmov %vm7142_vm4 }
 0x4ea   :  { %3717 = vmatpush1.msk.msra.mxu0 %vm7138_vm14, %v1233_v9  ;;  %vm7144_vm14 = vnez %v7044_v50 }
 0x4eb   :  { %v1221_v43 = vpop.permute.xlu1 %1220  ;;  %v1199_v15 = vpop.permute.xlu0 %1198 }
 0x4ec   :  { %v1223_v36 = vsel %vm7139_vm8, %v1221_v43, %v1219_v44  ;;  %v1222_v35 = vsel %vm7140_vm12, %v1219_v44, %v1221_v43  ;;  %vm7145_vm8 = vcmp.lt.s32.totalorder %v4298_v5, 18 }
 0x4ed   :  { %3719 = vmatprep.subr.msk.mxu0 %vm7141_vm6, %v1222_v35  ;;  %vm7146_vm12 = vmmov %vm7145_vm8 }
 0x4ee   :  { %3721 = vmatpush1.msk.msra.mxu0 %vm7141_vm6, %v1223_v36  ;;  %vm7147_vm6 = vnez %v7046_v18 }
 0x4ef   :  { %v1211_v20 = vpop.permute.xlu1 %1210  ;;  %v1189_v17 = vpop.permute.xlu0 %1188 }
 0x4f0   :  { %v1213_v57 = vsel %vm7142_vm4, %v1211_v20, %v1209_v62  ;;  %v1212_v29 = vsel %vm7143_vm2, %v1209_v62, %v1211_v20  ;;  %vm7148_vm4 = vcmp.lt.s32.totalorder %v4298_v5, 19 }
 0x4f1   :  { %3723 = vmatprep.subr.msk.mxu0 %vm7144_vm14, %v1212_v29  ;;  %vm7149_vm2 = vmmov %vm7148_vm4 }
 0x4f2   :  { %3725 = vmatpush1.msk.msra.mxu0 %vm7144_vm14, %v1213_v57  ;;  %vm7150_vm14 = vnez %v7048_v58 }
 0x4f3   :  { %v1201_v11 = vpop.permute.xlu1 %1200  ;;  %v1491_v25 = vpop.permute.xlu0 %1490 }
 0x4f4   :  { %v1203_v13 = vsel %vm7145_vm8, %v1201_v11, %v1199_v15  ;;  %v1202_v26 = vsel %vm7146_vm12, %v1199_v15, %v1201_v11  ;;  %vm7151_vm8 = vcmp.lt.s32.totalorder %v4298_v5, 116 }
 0x4f5   :  { %3727 = vmatprep.subr.msk.mxu0 %vm7147_vm6, %v1202_v26  ;;  %vm7152_vm12 = vmmov %vm7151_vm8 }
 0x4f6   :  { %3729 = vmatpush1.msk.msra.mxu0 %vm7147_vm6, %v1203_v13  ;;  %vm7153_vm6 = vmmov %vm7151_vm8 }
 0x4f7   :  { %v1191_v27 = vpop.permute.xlu1 %1190  ;;  %v1481_v31 = vpop.permute.xlu0 %1480 }
 0x4f8   :  { %v1193_v47 = vsel %vm7148_vm4, %v1191_v27, %v1189_v17  ;;  %v1192_v7 = vsel %vm7149_vm2, %v1189_v17, %v1191_v27  ;;  %vm7154_vm4 = vmmov %vm7153_vm6  ;;  %vm7155_vm2 = vcmp.lt.s32.totalorder %v4298_v5, 117 }
 0x4f9   :  { %3731 = vmatprep.subr.msk.mxu0 %vm7150_vm14, %v1192_v7  ;;  %vm7157_vm0 = vmmov %vm7155_vm2 }
 0x4fa   :  { %3733 = vmatpush1.msk.msra.mxu0 %vm7150_vm14, %v1193_v47  ;;  %vm7156_vm14 = vmmov %vm7155_vm2 }
 0x4fb   :  { %v1493_v22 = vpop.permute.xlu1 %1492  ;;  %v1471_v46 = vpop.permute.xlu0 %1470 }
 0x4fc   :  { %v1494_v56 = vsel %vm7151_vm8, %v1491_v25, %v1493_v22  ;;  %v1495_v45 = vsel %vm7152_vm12, %v1493_v22, %v1491_v25  ;;  %vm7158_vm8 = vmmov %vm7157_vm0 }
 0x4fd   :  { %3735 = vmatprep.subr.msk.mxu0 %vm7153_vm6, %v1495_v45  ;;  %vm7159_vm6 = vcmp.lt.s32.totalorder %v4298_v5, 118 }
 0x4fe   :  { %3737 = vmatpush2.msk.msra.mxu0 %vm7154_vm4, %v1494_v56  ;;  %vm7160_vm12 = vmmov %vm7159_vm6 }
 0x4ff   :  { %v1483_v41 = vpop.permute.xlu1 %1482  ;;  %v1461_v24 = vpop.permute.xlu0 %1460  ;;  %vm7161_vm4 = vmmov %vm7159_vm6 }
 0x500   :  { %v1484_v1 = vsel %vm7155_vm2, %v1481_v31, %v1483_v41  ;;  %v1485_v39 = vsel %vm7156_vm14, %v1483_v41, %v1481_v31  ;;  %vm7162_vm2 = vmmov %vm7161_vm4 }
 0x501   :  { %3739 = vmatprep.subr.msk.mxu0 %vm7157_vm0, %v1485_v39  ;;  %vm7163_vm0 = vcmp.lt.s32.totalorder %v4298_v5, 119 }
 0x502   :  { %3741 = vmatpush2.msk.msra.mxu0 %vm7158_vm8, %v1484_v1  ;;  %vm7164_vm14 = vmmov %vm7163_vm0 }
 0x503   :  { %v1473_v4 = vpop.permute.xlu1 %1472  ;;  %v1451_v40 = vpop.permute.xlu0 %1450  ;;  %vm7165_vm8 = vmmov %vm7163_vm0 }
 0x504   :  { %v1474_v8 = vsel %vm7159_vm6, %v1471_v46, %v1473_v4  ;;  %v1475_v38 = vsel %vm7160_vm12, %v1473_v4, %v1471_v46  ;;  %vm7166_vm6 = vmmov %vm7163_vm0  ;;  %vm7167_vm12 = vcmp.lt.s32.totalorder %v4298_v5, 120 }
 0x505   :  { %3743 = vmatprep.subr.msk.mxu0 %vm7161_vm4, %v1475_v38  ;;  %vm7168_vm4 = vmmov %vm7167_vm12 }
 0x506   :  { %3745 = vmatpush2.msk.msra.mxu0 %vm7162_vm2, %v1474_v8  ;;  %vm7169_vm2 = vmmov %vm7168_vm4 }
 0x507   :  { %v1463_v42 = vpop.permute.xlu1 %1462  ;;  %v1441_v6 = vpop.permute.xlu0 %1440 }
 0x508   :  { %v1464_v21 = vsel %vm7163_vm0, %v1461_v24, %v1463_v42  ;;  %v1465_v44 = vsel %vm7164_vm14, %v1463_v42, %v1461_v24  ;;  %vm7170_vm0 = vmmov %vm7169_vm2  ;;  %vm7171_vm14 = vcmp.lt.s32.totalorder %v4298_v5, 121 }
 0x509   :  { %3747 = vmatprep.subr.msk.mxu0 %vm7165_vm8, %v1465_v44  ;;  %vm7172_vm8 = vmmov %vm7171_vm14 }
 0x50a   :  { %3749 = vmatpush2.msk.msra.mxu0 %vm7166_vm6, %v1464_v21  ;;  %vm7173_vm6 = vmmov %vm7172_vm8 }
 0x50b   :  { %v1453_v10 = vpop.permute.xlu1 %1452  ;;  %v1431_v30 = vpop.permute.xlu0 %1430 }
 0x50c   :  { %v1454_v49 = vsel %vm7167_vm12, %v1451_v40, %v1453_v10  ;;  %v1455_v62 = vsel %vm7168_vm4, %v1453_v10, %v1451_v40  ;;  %vm7174_vm12 = vmmov %vm7173_vm6  ;;  %vm7175_vm4 = vcmp.lt.s32.totalorder %v4298_v5, 122 }
 0x50d   :  { %3751 = vmatprep.subr.msk.mxu0 %vm7169_vm2, %v1455_v62  ;;  %vm7176_vm2 = vmmov %vm7175_vm4 }
 0x50e   :  { %3753 = vmatpush2.msk.msra.mxu0 %vm7170_vm0, %v1454_v49  ;;  %vm7177_vm0 = vmmov %vm7176_vm2 }
 0x50f   :  { %v1443_v9 = vpop.permute.xlu1 %1442  ;;  %v1421_v54 = vpop.permute.xlu0 %1420 }
 0x510   :  { %v1444_v43 = vsel %vm7171_vm14, %v1441_v6, %v1443_v9  ;;  %v1445_v15 = vsel %vm7172_vm8, %v1443_v9, %v1441_v6  ;;  %vm7178_vm14 = vmmov %vm7177_vm0  ;;  %vm7179_vm8 = vcmp.lt.s32.totalorder %v4298_v5, 123 }
 0x511   :  { %3755 = vmatprep.subr.msk.mxu0 %vm7173_vm6, %v1445_v15  ;;  %vm7180_vm6 = vmmov %vm7179_vm8 }
 0x512   :  { %3757 = vmatpush2.msk.msra.mxu0 %vm7174_vm12, %v1444_v43  ;;  %vm7181_vm12 = vmmov %vm7180_vm6 }
 0x513   :  { %v1433_v36 = vpop.permute.xlu1 %1432  ;;  %v1411_v35 = vpop.permute.xlu0 %1410 }
 0x514   :  { %v1434_v20 = vsel %vm7175_vm4, %v1431_v30, %v1433_v36  ;;  %v1435_v17 = vsel %vm7176_vm2, %v1433_v36, %v1431_v30  ;;  %vm7182_vm4 = vmmov %vm7180_vm6  ;;  %vm7183_vm2 = vcmp.lt.s32.totalorder %v4298_v5, 124 }
 0x515   :  { %3759 = vmatprep.subr.msk.mxu0 %vm7177_vm0, %v1435_v17  ;;  %vm7184_vm0 = vmmov %vm7183_vm2 }
 0x516   :  { %3761 = vmatpush2.msk.msra.mxu0 %vm7178_vm14, %v1434_v20  ;;  %vm7185_vm14 = vmmov %vm7184_vm0 }
 0x517   :  { %v1423_v57 = vpop.permute.xlu1 %1422  ;;  %v1401_v29 = vpop.permute.xlu0 %1400 }
 0x518   :  { %v1424_v11 = vsel %vm7179_vm8, %v1421_v54, %v1423_v57  ;;  %v1425_v25 = vsel %vm7180_vm6, %v1423_v57, %v1421_v54  ;;  %vm7186_vm8 = vmmov %vm7184_vm0  ;;  %vm7187_vm6 = vcmp.lt.s32.totalorder %v4298_v5, 125 }
 0x519   :  { %3763 = vmatprep.subr.msk.mxu0 %vm7181_vm12, %v1425_v25  ;;  %vm7188_vm12 = vmmov %vm7187_vm6 }
 0x51a   :  { %3765 = vmatpush2.msk.msra.mxu0 %vm7182_vm4, %v1424_v11  ;;  %vm7189_vm4 = vmmov %vm7187_vm6 }
 0x51b   :  { %v1413_v13 = vpop.permute.xlu1 %1412  ;;  %v1561_v26 = vpop.permute.xlu0 %1560 }
 0x51c   :  { %v1414_v27 = vsel %vm7183_vm2, %v1411_v35, %v1413_v13  ;;  %v1415_v31 = vsel %vm7184_vm0, %v1413_v13, %v1411_v35  ;;  %vm7190_vm2 = vmmov %vm7189_vm4  ;;  %vm7191_vm0 = vcmp.lt.s32.totalorder %v4298_v5, 109 }
 0x51d   :  { %3767 = vmatprep.subr.msk.mxu0 %vm7185_vm14, %v1415_v31  ;;  %vm7192_vm14 = vmmov %vm7191_vm0 }
 0x51e   :  { %3769 = vmatpush2.msk.msra.mxu0 %vm7186_vm8, %v1414_v27  ;;  %vm7193_vm8 = vmmov %vm7191_vm0 }
 0x51f   :  { %v1403_v47 = vpop.permute.xlu1 %1402  ;;  %v1391_v7 = vpop.permute.xlu0 %1390 }
 0x520   :  { %v1404_v22 = vsel %vm7187_vm6, %v1401_v29, %v1403_v47  ;;  %v1405_v46 = vsel %vm7188_vm12, %v1403_v47, %v1401_v29  ;;  %vm7194_vm6 = vmmov %vm7191_vm0  ;;  %vm7195_vm12 = vcmp.lt.s32.totalorder %v4298_v5, 126 }
 0x521   :  { %3771 = vmatprep.subr.msk.mxu0 %vm7189_vm4, %v1405_v46  ;;  %vm7196_vm4 = vmmov %vm7195_vm12 }
 0x522   :  { %3773 = vmatpush2.msk.msra.mxu0 %vm7190_vm2, %v1404_v22  ;;  %vm7197_vm2 = vmmov %vm7196_vm4 }
 0x523   :  { %v1563_v56 = vpop.permute.xlu1 %1562  ;;  %v1551_v45 = vpop.permute.xlu0 %1550 }
 0x524   :  { %v1564_v41 = vsel %vm7191_vm0, %v1561_v26, %v1563_v56  ;;  %v1565_v24 = vsel %vm7192_vm14, %v1563_v56, %v1561_v26  ;;  %vm7198_vm0 = vmmov %vm7197_vm2  ;;  %vm7199_vm14 = vcmp.lt.s32.totalorder %v4298_v5, 110 }
 0x525   :  { %3795 = vmatprep.subr.msk.mxu1 %vm7193_vm8, %v1565_v24  ;;  %vm7200_vm8 = vmmov %vm7199_vm14  ;;  %v1105_v24 = vld [vmem:[#allocation3 + $0x80] sm:$0xff] }
 0x526   :  { %3797 = vmatpush1.msk.msra.mxu1 %vm7194_vm6, %v1564_v41  ;;  %vm7201_vm6 = vmmov %vm7200_vm8  ;;  %v1101_v41 = vld [vmem:[#allocation3 + $0x60] sm:$0xff] }
 0x527   :  { %v1393_v1 = vpop.permute.xlu1 %1392  ;;  %v1381_v39 = vpop.permute.xlu0 %1380 }
 0x528   :  { %v1394_v4 = vsel %vm7195_vm12, %v1391_v7, %v1393_v1  ;;  %v1395_v40 = vsel %vm7196_vm4, %v1393_v1, %v1391_v7  ;;  %vm7202_vm12 = vmmov %vm7201_vm6  ;;  %vm7203_vm4 = vcmp.lt.s32.totalorder %v4298_v5, 127 }
 0x529   :  { %3775 = vmatprep.subr.msk.mxu0 %vm7197_vm2, %v1395_v40  ;;  %vm7204_vm2 = vmmov %vm7203_vm4 }
 0x52a   :  { %3777 = vmatpush2.msk.msra.mxu0 %vm7198_vm0, %v1394_v4  ;;  %vm7205_vm0 = vmmov %vm7204_vm2 }
 0x52b   :  { %v1553_v8 = vpop.permute.xlu1 %1552  ;;  %v1541_v38 = vpop.permute.xlu0 %1540 }
 0x52c   :  { %v1554_v42 = vsel %vm7199_vm14, %v1551_v45, %v1553_v8  ;;  %v1555_v6 = vsel %vm7200_vm8, %v1553_v8, %v1551_v45  ;;  %vm7206_vm14 = vmmov %vm7205_vm0  ;;  %vm7207_vm8 = vcmp.lt.s32.totalorder %v4298_v5, 111  ;;  %v1103_v8 = vld [vmem:[#allocation3 + $0x70] sm:$0xff] }
 0x52d   :  { %3799 = vmatprep.subr.msk.mxu1 %vm7201_vm6, %v1555_v6  ;;  %vm7208_vm6 = vmmov %vm7207_vm8  ;;  %v1106_v6 = vld [vmem:[#allocation3 + $0x88] sm:$0xff] }
 0x52e   :  { %3801 = vmatpush1.msk.msra.mxu1 %vm7202_vm12, %v1554_v42  ;;  %vm7209_vm12 = vmmov %vm7208_vm6  ;;  %v1108_v42 = vld [vmem:[#allocation3 + $0x98] sm:$0xff] }
 0x52f   :  { %v1383_v21 = vpop.permute.xlu1 %1382  ;;  %v1531_v44 = vpop.permute.xlu0 %1530 }
 0x530   :  { %v1384_v10 = vsel %vm7203_vm4, %v1381_v39, %v1383_v21  ;;  %v1385_v30 = vsel %vm7204_vm2, %v1383_v21, %v1381_v39  ;;  %vm7210_vm4 = vmmov %vm7208_vm6  ;;  %vm7211_vm2 = vcmp.lt.s32.totalorder %v4298_v5, 112  ;;  %v1107_v21 = vld [vmem:[#allocation3 + $0x90] sm:$0xff] }
 0x531   :  { %3779 = vmatprep.subr.msk.mxu0 %vm7205_vm0, %v1385_v30  ;;  %vm7212_vm0 = vmmov %vm7211_vm2  ;;  %v1110_v30 = vld [vmem:[#allocation3 + $0xa8] sm:$0xff] }
 0x532   :  { %3781 = vmatpush2.msk.msra.mxu0 %vm7206_vm14, %v1384_v10  ;;  %vm7213_vm14 = vmmov %vm7212_vm0  ;;  %v1109_v10 = vld [vmem:[#allocation3 + $0xa0] sm:$0xff] }
 0x533   :  { %v1543_v49 = vpop.permute.xlu1 %1542  ;;  %1812 = vmatprep.subr.mxu0 %v5439_v28  ;;  %v1369_v62 = vpop.permute.xlu0 %1368 }
 0x534   :  { %v1544_v9 = vsel %vm7207_vm8, %v1541_v38, %v1543_v49  ;;  %1813 = vmatpush2.msra.mxu0 %v5433_v23  ;;  %v1545_v54 = vsel %vm7208_vm6, %v1543_v49, %v1541_v38  ;;  %vm7214_vm8 = vmmov %vm7212_vm0  ;;  %vm7215_vm6 = vcmp.lt.s32.totalorder %v4298_v5, 1  ;;  %v1104_v38 = vld [vmem:[#allocation3 + $0x78] sm:$0xff] }
 0x535   :  { %3803 = vmatprep.subr.msk.mxu1 %vm7209_vm12, %v1545_v54  ;;  %vm7216_vm12 = vmmov %vm7215_vm6  ;;  %v1112_v49 = vld [vmem:[#allocation3 + $0xb8] sm:$0xff] }
 0x536   :  { %3805 = vmatpush1.msk.msra.mxu1 %vm7210_vm4, %v1544_v9  ;;  %vm7217_vm4 = vcmp.lt.s32.totalorder %v4298_v5, 113 }
 0x537   :  { %v1533_v43 = vpop.permute.xlu1 %1532  ;;  %v1521_v15 = vpop.permute.xlu0 %1520 }
 0x538   :  { %v1534_v28 = vsel %vm7211_vm2, %v1531_v44, %v1533_v43  ;;  %v1535_v36 = vsel %vm7212_vm0, %v1533_v43, %v1531_v44  ;;  %vm7218_vm2 = vmmov %vm7217_vm4  ;;  %v1111_v44 = vld [vmem:[#allocation3 + $0xb0] sm:$0xff] }
 0x539   :  { %3807 = vmatprep.subr.msk.mxu1 %vm7213_vm14, %v1535_v36  ;;  %vm7219_vm0 = vmmov %vm7218_vm2 }
 0x53a   :  { %3809 = vmatpush1.msk.msra.mxu1 %vm7214_vm8, %v1534_v28  ;;  %vm7220_vm14 = vmmov %vm7219_vm0  ;;  %vm7221_vm8 = vcmp.lt.s32.totalorder %v4298_v5, 2 }
 0x53b   :  { %v1371_v23 = vpop.permute.xlu1 %1370  ;;  %v1359_v17 = vpop.permute.xlu0 %1358 }
 0x53c   :  { %v1373_v35 = vsel %vm7215_vm6, %v1371_v23, %v1369_v62  ;;  %v1372_v20 = vsel %vm7216_vm12, %v1369_v62, %v1371_v23  ;;  %vm7222_vm6 = vmmov %vm7221_vm8  ;;  %vm7223_vm12 = vnez %v7060_v33  ;;  %v4239_v62 = vmov 2  }
 0x53d   :  { %3783 = vmatprep.subr.msk.mxu0 %vm5080_vm1, %v1372_v20  ;;  %4052 = vset.pattern.permute.xlu1 %v4239_v62 }
 0x53e   :  { %3785 = vmatpush2.msk.msra.mxu0 %vm5080_vm1, %v1373_v35  ;;  %4053 = vset.pattern.permute.xlu0 %v4239_v62 }
 0x53f   :  { %v1523_v57 = vpop.permute.xlu1 %1522  ;;  %v1511_v25 = vpop.permute.xlu0 %1510 }
 0x540   :  { %v1524_v29 = vsel %vm7217_vm4, %v1521_v15, %v1523_v57  ;;  %v1525_v11 = vsel %vm7218_vm2, %v1523_v57, %v1521_v15  ;;  %vm7224_vm4 = vcmp.lt.s32.totalorder %v4298_v5, 114 }
 0x541   :  { %3811 = vmatprep.subr.msk.mxu1 %vm7219_vm0, %v1525_v11  ;;  %vm7225_vm2 = vmmov %vm7224_vm4 }
 0x542   :  { %3813 = vmatpush1.msk.msra.mxu1 %vm7220_vm14, %v1524_v29  ;;  %vm7226_vm0 = vmmov %vm7225_vm2 }
 0x543   :  { %v1361_v13 = vpop.permute.xlu1 %1360  ;;  %v1349_v22 = vpop.permute.xlu0 %1348  ;;  %vm7227_vm14 = vmmov %vm7226_vm0 }
 0x544   :  { %v1363_v26 = vsel %vm7221_vm8, %v1361_v13, %v1359_v17  ;;  %v1362_v27 = vsel %vm7222_vm6, %v1359_v17, %v1361_v13  ;;  %vm7228_vm8 = vcmp.lt.s32.totalorder %v4298_v5, 3 }
 0x545   :  { %3787 = vmatprep.subr.msk.mxu0 %vm7223_vm12, %v1362_v27  ;;  %vm7229_vm6 = vmmov %vm7228_vm8 }
 0x546   :  { %3789 = vmatpush2.msk.msra.mxu0 %vm7223_vm12, %v1363_v26 }
 0x547   :  { %v1513_v31 = vpop.permute.xlu1 %1512  ;;  %v1501_v1 = vpop.permute.xlu0 %1500 }
 0x548   :  { %v1514_v47 = vsel %vm7224_vm4, %v1511_v25, %v1513_v31  ;;  %v1515_v7 = vsel %vm7225_vm2, %v1513_v31, %v1511_v25  ;;  %vm7230_vm4 = vnez %v7062_v3  ;;  %vm7231_vm2 = vcmp.lt.s32.totalorder %v4298_v5, 115 }
 0x549   :  { %3815 = vmatprep.subr.msk.mxu1 %vm7226_vm0, %v1515_v7  ;;  %vm7232_vm0 = vmmov %vm7231_vm2 }
 0x54a   :  { %3817 = vmatpush1.msk.msra.mxu1 %vm7227_vm14, %v1514_v47  ;;  %vm7233_vm14 = vmmov %vm7232_vm0 }
 0x54b   :  { %v1351_v46 = vpop.permute.xlu1 %1350 }
 0x54c   :  { %v1353_v56 = vsel %vm7228_vm8, %v1351_v46, %v1349_v22  ;;  %v1352_v45 = vsel %vm7229_vm6, %v1349_v22, %v1351_v46  ;;  %vm7234_vm8 = vmmov %vm7232_vm0  ;;  %vm7235_vm6 = vcmask 719872  }
 0x54d   :  { %3791 = vmatprep.subr.msk.mxu0 %vm7230_vm4, %v1352_v45 }
 0x54e   :  { %3793 = vmatpush2.msk.msra.mxu0 %vm7230_vm4, %v1353_v56 }
 0x54f   :  { %v1503_v39 = vpop.permute.xlu1 %1502  ;;  %1821 = vmatmul.mubr.f32.vlgmr.msra.gmra.mxu0 %v1101_v41 }
 0x550   :  { %v1504_v4 = vsel %vm7231_vm2, %v1501_v1, %v1503_v39  ;;  %v1505_v40 = vsel %vm7232_vm0, %v1503_v39, %v1501_v1  ;;  %1826 = vmatprep.mubr.f32.mxu0 %v1105_v24  ;;  %vm7236_vm2 = vmmov %vm7235_vm6 }
 0x551   :  { %3819 = vmatprep.subr.msk.mxu1 %vm7233_vm14, %v1505_v40  ;;  %vm7237_vm0 = vmmov %vm7236_vm2 }
 0x552   :  { %3821 = vmatpush1.msk.msra.mxu1 %vm7234_vm8, %v1504_v4  ;;  %vm7238_vm14 = vmmov %vm7237_vm0 }
 0x553   :  { %3476 = vmatmul.mubr.msk.f32.vlgmr.msra.gmra.mxu1 %vm7235_vm6, %v1103_v8  ;;  %1827 = vmatmul.mubr.f32.gmra.mxu0 %v1104_v38 }
 0x554   :  { %1915 = vmatprep.mubr.f32.mxu1 %v4198_v0  ;;  %1832 = vmatprep.mubr.f32.mxu0 %v1108_v42 }
 0x557   :  { %3477 = vmatmul.mubr.msk.f32.gmra.mxu1 %vm7236_vm2, %v1106_v6  ;;  %1833 = vmatmul.mubr.f32.gmra.mxu0 %v1107_v21 }
 0x558   :  { %1921 = vmatprep.mubr.f32.mxu1 %v4198_v0  ;;  %1838 = vmatprep.mubr.f32.mxu0 %v1111_v44 }
 0x55b   :  { %3478 = vmatmul.mubr.msk.f32.gmra.mxu1 %vm7237_vm0, %v1109_v10  ;;  %1839 = vmatmul.mubr.f32.gmra.mxu0 %v1110_v30 }
 0x55c   :  { %1927 = vmatprep.mubr.f32.mxu1 %v4198_v0 }
 0x55f   :  { %3479 = vmatmul.mubr.msk.f32.gmra.mxu1 %vm7238_vm14, %v1112_v49 }
 0x560   :  { %2204 = vmatprep.mubr.f32.mxu1 %v4198_v0 }
 0x60f   :  { %v1822_v9 = vpop.f32.mrf.mxu0 }
 0x611   :  { %v1824_v54 = vpop.f32.mrf.mxu0 }
 0x613   :  { %v1911_v43 = vpop.f32.mrf.mxu1  ;;  %v1828_v15 = vpop.f32.mrf.mxu0 }
 0x614   :  { %v5903_v23 = vadd.f32 %v1911_v43, %v1822_v9  ;;  %v4240_v43 = vmov 3  }
 0x615   :  { %v1913_v28 = vpop.f32.mrf.mxu1  ;;  %v1830_v36 = vpop.f32.mrf.mxu0 }
 0x616   :  { %v5905_v35 = vadd.f32 %v1913_v28, %v1824_v54  ;;  %v1946_v49 = vmul.f32 %v5903_v23, %v5903_v23  ;;  %v4164_v54 = vld [vmem:[%s6871_s4 + $0x18] sm:$0xff]  ;;  %v5955_v28 = vld [vmem:[%s6871_s4 + $0x10] sm:$0xff] }
 0x617   :  { %v1917_v20 = vpop.f32.mrf.mxu1  ;;  %v1834_v17 = vpop.f32.mrf.mxu0 }
 0x618   :  { %v5907_v57 = vadd.f32 %v1917_v20, %v1828_v15  ;;  %v1934_v29 = vadd.f32 %v5905_v35, %v5903_v23  ;;  %v1947_v10 = vmul.f32 %v5905_v35, %v5905_v35  ;;  %v5949_v15 = vld [vmem:[%s6871_s4 + $0x8] sm:$0xff] }
 0x619   :  { %v1919_v11 = vpop.f32.mrf.mxu1  ;;  %v1836_v25 = vpop.f32.mrf.mxu0 }
 0x61a   :  { %v5911_v13 = vadd.f32 %v1919_v11, %v1830_v36  ;;  %1935 = vadd.xlane.f32.xlu0 %v1934_v29  ;;  %v1948_v27 = vmul.f32 %v5907_v57, %v5907_v57  ;;  %v1954_v9 = vadd.f32 %v1947_v10, %v1946_v49  ;;  %v5962_v36 = vld [vmem:[%s6871_s4] sm:$0xff] }
 0x61b   :  { %v1923_v26 = vpop.f32.mrf.mxu1  ;;  %v1840_v7 = vpop.f32.mrf.mxu0 }
 0x61c   :  { %v1949_v31 = vmul.f32 %v5911_v13, %v5911_v13  ;;  %v1937_v47 = vadd.f32 %v5911_v13, %v5907_v57  ;;  %v5921_v41 = vadd.f32 %v1923_v26, %v1834_v17 }
 0x61d   :  { %v1925_v22 = vpop.f32.mrf.mxu1  ;;  %v1842_v24 = vpop.f32.mrf.mxu0 }
 0x61e   :  { %v5919_v46 = vadd.f32 %v1925_v22, %v1836_v25  ;;  %1938 = vadd.xlane.f32.xlu0 %v1937_v47  ;;  %v1957_v56 = vadd.f32 %v1949_v31, %v1948_v27  ;;  %v1950_v38 = vmul.f32 %v5921_v41, %v5921_v41 }
 0x61f   :  { %v1929_v45 = vpop.f32.mrf.mxu1 }
 0x620   :  { %1958 = vadd.xlane.f32.xlu1 %v1957_v56  ;;  %v1951_v39 = vmul.f32 %v5919_v46, %v5919_v46  ;;  %v5925_v4 = vadd.f32 %v1929_v45, %v1840_v7  ;;  %v1940_v8 = vadd.f32 %v5919_v46, %v5921_v41 }
 0x621   :  { %v1931_v1 = vpop.f32.mrf.mxu1 }
 0x622   :  { %v5927_v40 = vadd.f32 %v1931_v1, %v1842_v24  ;;  %v1952_v21 = vmul.f32 %v5925_v4, %v5925_v4  ;;  %v1960_v44 = vadd.f32 %v1951_v39, %v1950_v38 }
 0x624   :  { %v1953_v42 = vmul.f32 %v5927_v40, %v5927_v40  ;;  %1941 = vadd.xlane.f32.xlu1 %v1940_v8  ;;  %v1943_v6 = vadd.f32 %v5927_v40, %v5925_v4 }
 0x626   :  { %1944 = vadd.xlane.f32.xlu0 %v1943_v6  ;;  %v1963_v30 = vadd.f32 %v1953_v42, %v1952_v21 }
 0x628   :  { %1961 = vadd.xlane.f32.xlu1 %v1960_v44 }
 0x62a   :  { %1964 = vadd.xlane.f32.xlu0 %v1963_v30 }
 0x62e   :  { %1955 = vadd.xlane.f32.xlu0 %v1954_v9 }
 0x639   :  { %2023 = vperm.xlu1 %4052, %v4164_v54  }
 0x63d   :  { %4054 = vset.pattern.permute.xlu1 %v4240_v43 }
 0x63e   :  { %2047 = vperm.xlu1 %4054, %v4164_v54  }
 0x642   :  { %4055 = vset.pattern.permute.xlu1 %v4239_v62 }
 0x643   :  { %2015 = vperm.xlu1 %4055, %v5949_v15  }
 0x644   :  { %2019 = vperm.xlu0 %4053, %v5955_v28  }
 0x647   :  { %4056 = vset.pattern.permute.xlu1 %v4240_v43 }
 0x648   :  { %2043 = vperm.xlu1 %4056, %v5955_v28  }
 0x64c   :  { %4057 = vset.pattern.permute.xlu1 %v4239_v62 }
 0x64d   :  { %2011 = vperm.xlu1 %4057, %v5962_v36  }
 0x651   :  { %4058 = vset.pattern.permute.xlu1 %v4240_v43 }
 0x652   :  { %2039 = vperm.xlu1 %4058, %v5949_v15  }
 0x656   :  { %2035 = vperm.xlu1 %4058, %v5962_v36  }
 0x6a3   :  { %v1936_v20 = vpop.xlane.xlu0 %1935 }
 0x6a4   :  { %v1966_v39 = vmul.f32 0.00390625, %v1936_v20 }
 0x6a6   :  { %v1974_v54 = vmul.f32 %v1966_v39, %v1966_v39 }
 0x6a7   :  { %v1939_v17 = vpop.xlane.xlu0 %1938 }
 0x6a8   :  { %v1967_v29 = vmul.f32 0.00390625, %v1939_v17 }
 0x6a9   :  { %v1959_v11 = vpop.xlane.xlu1 %1958 }
 0x6aa   :  { %v1971_v25 = vmul.f32 0.00390625, %v1959_v11  ;;  %v1975_v26 = vmul.f32 %v1967_v29, %v1967_v29 }
 0x6ac   :  { %v1979_v31 = vsub.f32 %v1971_v25, %v1975_v26 }
 0x6ad   :  { %v1942_v27 = vpop.xlane.xlu1 %1941 }
 0x6ae   :  { %v1968_v62 = vmul.f32 0.00390625, %v1942_v27  ;;  %v1983_v24 = vmax.f32 %v1979_v31, 0.0 }
 0x6af   :  { %v1945_v47 = vpop.xlane.xlu0 %1944 }
 0x6b0   :  { %v1969_v7 = vmul.f32 0.00390625, %v1945_v47  ;;  %v1976_v56 = vmul.f32 %v1968_v62, %v1968_v62  ;;  %v1995_v10 = vadd.f32 1e-05, %v1983_v24  ;;  %v1990_v47 = vsub.f32 %v5921_v41, %v1968_v62 }
 0x6b1   :  { %v1962_v22 = vpop.xlane.xlu1 %1961 }
 0x6b2   :  { %v1972_v45 = vmul.f32 0.00390625, %v1962_v22  ;;  %v1977_v38 = vmul.f32 %v1969_v7, %v1969_v7  ;;  %v1991_v22 = vsub.f32 %v5919_v46, %v1968_v62  ;;  %v1986_v46 = vsub.f32 %v5903_v23, %v1966_v39 }
 0x6b3   :  { %v1965_v1 = vpop.xlane.xlu0 %1964  ;;  %v1987_v62 = vsub.f32 %v5905_v35, %v1966_v39 }
 0x6b4   :  { %v1980_v8 = vsub.f32 %v1972_v45, %v1976_v56  ;;  %v1973_v42 = vmul.f32 0.00390625, %v1965_v1  ;;  %v1992_v1 = vsub.f32 %v5925_v4, %v1969_v7 }
 0x6b5   :  { %v2024_v6 = vpop.permute.xlu1 %2023 }
 0x6b6   :  { %v1984_v21 = vmax.f32 %v1980_v8, 0.0  ;;  %v1981_v44 = vsub.f32 %v1973_v42, %v1977_v38  ;;  %v1993_v8 = vsub.f32 %v5927_v40, %v1969_v7 }
 0x6b7   :  { %v1956_v30 = vpop.xlane.xlu0 %1955 }
 0x6b8   :  { %v1996_v49 = vadd.f32 1e-05, %v1984_v21  ;;  %v1985_v9 = vmax.f32 %v1981_v44, 0.0  ;;  %v1970_v43 = vmul.f32 0.00390625, %v1956_v30  ;;  %v1989_v30 = vsub.f32 %v5911_v13, %v1967_v29 }
 0x6b9   :  { %v2048_v17 = vpop.permute.xlu1 %2047 }
 0x6ba   :  { %4092 = vrsqrt.f32 %v1996_v49  ;;  %v1997_v11 = vadd.f32 1e-05, %v1985_v9  ;;  %v1978_v25 = vsub.f32 %v1970_v43, %v1974_v54 }
 0x6bb   :  { %4094 = vrsqrt.f32 %v1995_v10  ;;  %v1988_v10 = vsub.f32 %v5907_v57, %v1967_v29 }
 0x6bc   :  { %4096 = vrsqrt.f32 %v1997_v11  ;;  %v1982_v26 = vmax.f32 %v1978_v25, 0.0 }
 0x6be   :  { %v1994_v20 = vadd.f32 1e-05, %v1982_v26  ;;  %v2016_v27 = vpop.permute.xlu1 %2015 }
 0x6bf   :  { %v2020_v45 = vpop.permute.xlu0 %2019 }
 0x6c0   :  { %4098 = vrsqrt.f32 %v1994_v20 }
 0x6c3   :  { %v2044_v31 = vpop.permute.xlu1 %2043 }
 0x6c7   :  { %v4093_v56 = vpop.eup %4092 }
 0x6c8   :  { %v4095_v24 = vpop.eup %4094  ;;  %v2012_v38 = vpop.permute.xlu1 %2011  ;;  %v2006_v42 = vmul.f32 %v4093_v56, %v1990_v47  ;;  %v2007_v21 = vmul.f32 %v4093_v56, %v1991_v22 }
 0x6c9   :  { %v4097_v44 = vpop.eup %4096  ;;  %v2004_v43 = vmul.f32 %v4095_v24, %v1988_v10  ;;  %v2005_v4 = vmul.f32 %v4095_v24, %v1989_v30 }
 0x6ca   :  { %v2008_v49 = vmul.f32 %v4097_v44, %v1992_v1  ;;  %v2009_v9 = vmul.f32 %v4097_v44, %v1993_v8  ;;  %v2030_v41 = vmul.f32 %v2020_v45, %v2006_v42  ;;  %v2031_v54 = vmul.f32 %v2020_v45, %v2007_v21 }
 0x6cb   :  { %v2028_v39 = vmul.f32 %v2016_v27, %v2004_v43  ;;  %v2029_v45 = vmul.f32 %v2016_v27, %v2005_v4 }
 0x6cc   :  { %v2032_v11 = vmul.f32 %v2024_v6, %v2008_v49  ;;  %v2033_v40 = vmul.f32 %v2024_v6, %v2009_v9  ;;  %v5975_v7 = vadd.f32 %v2044_v31, %v2030_v41  ;;  %v5977_v25 = vadd.f32 %v2044_v31, %v2031_v54 }
 0x6cd   :  { %v4099_v26 = vpop.eup %4098  ;;  %v2040_v57 = vpop.permute.xlu1 %2039 }
 0x6ce   :  { %v2056_v20 = vadd.f32 %v2048_v17, %v2032_v11  ;;  %v2057_v13 = vadd.f32 %v2048_v17, %v2033_v40  ;;  %v2002_v29 = vmul.f32 %v4099_v26, %v1986_v46  ;;  %v2003_v47 = vmul.f32 %v4099_v26, %v1987_v62 }
 0x6cf   :  { %v2062_v22 = vmin.f32 %v5975_v7, 0.0  ;;  %v2063_v23 = vmin.f32 %v5977_v25, 0.0  ;;  %v2052_v44 = vadd.f32 %v2040_v57, %v2028_v39  ;;  %v2053_v10 = vadd.f32 %v2040_v57, %v2029_v45 }
 0x6d0   :  { %v2064_v56 = vmin.f32 %v2056_v20, 0.0  ;;  %v2065_v35 = vmin.f32 %v2057_v13, 0.0  ;;  %v2026_v24 = vmul.f32 %v2012_v38, %v2002_v29  ;;  %v2027_v6 = vmul.f32 %v2012_v38, %v2003_v47 }
 0x6d1   :  { %v2074_v1 = vmul.f32 1.442695, %v2062_v22  ;;  %v2076_v8 = vmul.f32 1.442695, %v2063_v23  ;;  %v2036_v31 = vpop.permute.xlu1 %2035  ;;  %v2060_v49 = vmin.f32 %v2052_v44, 0.0  ;;  %v2061_v9 = vmin.f32 %v2053_v10, 0.0 }
 0x6d2   :  { %v2078_v42 = vmul.f32 1.442695, %v2064_v56  ;;  %v2080_v21 = vmul.f32 1.442695, %v2065_v35  ;;  %v5981_v17 = vadd.f32 %v2036_v31, %v2026_v24  ;;  %v5983_v30 = vadd.f32 %v2036_v31, %v2027_v6 }
 0x6d3   :  { %4100 = vpow2.f32 %v2074_v1  ;;  %v2070_v41 = vmul.f32 1.442695, %v2060_v49  ;;  %v2072_v54 = vmul.f32 1.442695, %v2061_v9  ;;  %vm2104_vm8 = vcmp.gt.f32.partialorder %v2056_v20, 0.0 }
 0x6d4   :  { %4102 = vpow2.f32 %v2078_v42  ;;  %v2058_v27 = vmin.f32 %v5981_v17, 0.0  ;;  %v2059_v38 = vmin.f32 %v5983_v30, 0.0  ;;  %vm2102_vm6 = vcmp.gt.f32.partialorder %v5975_v7, 0.0 }
 0x6d5   :  { %4104 = vpow2.f32 %v2080_v21  ;;  %vm2103_vm2 = vcmp.gt.f32.partialorder %v5977_v25, 0.0  ;;  %vm2105_vm0 = vcmp.gt.f32.partialorder %v2057_v13, 0.0  ;;  %vm2100_vm14 = vcmp.gt.f32.partialorder %v2052_v44, 0.0 }
 0x6d6   :  { %4106 = vpow2.f32 %v2076_v8  ;;  %v2066_v46 = vmul.f32 1.442695, %v2058_v27  ;;  %v2068_v62 = vmul.f32 1.442695, %v2059_v38 }
 0x6d7   :  { %4108 = vpow2.f32 %v2070_v41 }
 0x6d8   :  { %4110 = vpow2.f32 %v2072_v54 }
 0x6d9   :  { %4112 = vpow2.f32 %v2066_v46 }
 0x6da   :  { %4114 = vpow2.f32 %v2068_v62 }
 0x6e0   :  { %v4101_v43 = vpop.eup %4100 }
 0x6e1   :  { %v4103_v4 = vpop.eup %4102  ;;  %v3484_v11 = vadd.f32 -1.0, %v4101_v43 }
 0x6e2   :  { %v4105_v40 = vpop.eup %4104  ;;  %v3486_v26 = vadd.f32 -1.0, %v4103_v4 }
 0x6e3   :  { %v4107_v57 = vpop.eup %4106  ;;  %v3487_v29 = vadd.f32 -1.0, %v4105_v40  ;;  %v2094_v47 = vmul.f32 1.6732632, %v3484_v11 }
 0x6e4   :  { %v2096_v22 = vmul.f32 1.6732632, %v3486_v26  ;;  %v3485_v23 = vadd.f32 -1.0, %v4107_v57  ;;  %v4109_v56 = vpop.eup %4108 }
 0x6e5   :  { %v2097_v35 = vmul.f32 1.6732632, %v3487_v29  ;;  %v4111_v39 = vpop.eup %4110  ;;  %v3482_v6 = vadd.f32 -1.0, %v4109_v56  ;;  %v2110_v42 = vsel %vm2102_vm6, %v5975_v7, %v2094_v47  ;;  %vm2098_vm6 = vcmp.gt.f32.partialorder %v5981_v17, 0.0 }
 0x6e6   :  { %v2112_v45 = vsel %vm2104_vm8, %v2056_v20, %v2096_v22  ;;  %v2095_v24 = vmul.f32 1.6732632, %v3485_v23  ;;  %v4113_v1 = vpop.eup %4112  ;;  %v3483_v21 = vadd.f32 -1.0, %v4111_v39  ;;  %vm2101_vm8 = vcmp.gt.f32.partialorder %v2053_v10, 0.0 }
 0x6e7   :  { %v2113_v8 = vsel %vm2105_vm0, %v2057_v13, %v2097_v35  ;;  %v5989_v31 = vmul.f32 1.050701, %v2112_v45  ;;  %v4115_v49 = vpop.eup %4114  ;;  %v2092_v38 = vmul.f32 1.6732632, %v3482_v6  ;;  %v3480_v41 = vadd.f32 -1.0, %v4113_v1 }
 0x6e8   :  { %v5992_v9 = vmul.f32 1.050701, %v2113_v8  ;;  %v2111_v27 = vsel %vm2103_vm2, %v5977_v25, %v2095_v24  ;;  %v2093_v54 = vmul.f32 1.6732632, %v3483_v21  ;;  %v3481_v46 = vadd.f32 -1.0, %v4115_v49 }
 0x6e9   :  { %v5995_v20 = vmul.f32 1.050701, %v2111_v27  ;;  %v2108_v62 = vsel %vm2100_vm14, %v2052_v44, %v2092_v38  ;;  %v2090_v13 = vmul.f32 1.6732632, %v3480_v41  ;;  %v5998_v43 = vmul.f32 1.050701, %v2110_v42 }
 0x6ea   :  { %2164 = vmatprep.subr.mxu1 %v5992_v9  ;;  %v2109_v7 = vsel %vm2101_vm8, %v2053_v10, %v2093_v54  ;;  %v2091_v4 = vmul.f32 1.6732632, %v3481_v46  ;;  %vm2099_vm2 = vcmp.gt.f32.partialorder %v5983_v30, 0.0  ;;  %v6007_v44 = vmul.f32 1.050701, %v2108_v62 }
 0x6eb   :  { %2165 = vmatpush1.msra.mxu1 %v5989_v31  ;;  %v6002_v25 = vmul.f32 1.050701, %v2109_v7  ;;  %v2106_v11 = vsel %vm2098_vm6, %v5981_v17, %v2090_v13  ;;  %v3488_v17 = vld [vmem:[%s6868_s1 + $0x10] sm:$0xff]  ;;  %vm7239_vm0 = vcmask 261120   ;;  %vm7240_vm14 = vcmp.lt.s32.totalorder %v4298_v5, 1  ;;  %s7271_s1 = smov 4  }
 0x6ec   :  { %2166 = vmatprep.subr.mxu1 %v5995_v20  ;;  %v2107_v40 = vsel %vm2099_vm2, %v5983_v30, %v2091_v4  ;;  %v6010_v26 = vmul.f32 1.050701, %v2106_v11  ;;  %vm7241_vm8 = vmmov %vm7240_vm14 }
 0x6ed   :  { %2167 = vmatpush1.msra.mxu1 %v5998_v43  ;;  %v6013_v10 = vmul.f32 1.050701, %v2107_v40  ;;  %vm7242_vm6 = vmmov %vm7241_vm8 }
 0x6ee   :  { %2168 = vmatprep.subr.mxu1 %v6002_v25  ;;  %2593 = vrot.lane.b32.xlu1 %v6010_v26, %s4201_s30  ;;  %vm7243_vm2 = vmmov %vm7242_vm6 }
 0x6ef   :  { %2169 = vmatpush1.msra.mxu1 %v6007_v44  ;;  %2601 = vrot.lane.b32.xlu0 %v6013_v10, %s4201_s30 }
 0x6f0   :  { %2170 = vmatprep.subr.mxu1 %v6013_v10 }
 0x6f1   :  { %2171 = vmatpush1.msra.mxu1 %v6010_v26 }
 0x6f2   :  { %3489 = vmatmul.mubr.msk.f32.vlgmr.msra.gmra.mxu1 %vm7239_vm0, %v3488_v17  ;;  %2617 = vrot.lane.b32.xlu1 %v6010_v26, %s4203_s7  ;;  %vm7244_vm0 = vmmov %vm7243_vm2 }
 0x6f3   :  { %2932 = vmatprep.mubr.f32.mxu1 %v4198_v0  ;;  %2625 = vrot.lane.b32.xlu0 %v6013_v10, %s4203_s7  ;;  %vm7245_vm4 = vmmov %vm7244_vm0 }
 0x6f4   :  { %vm7246_vm12 = vmmov %vm7244_vm0 }
 0x6f6   :  { %2595 = vrot.lane.b32.xlu1 %v6007_v44, %s4201_s30 }
 0x6f7   :  { %2603 = vrot.lane.b32.xlu0 %v6002_v25, %s4201_s30 }
 0x6fa   :  { %2619 = vrot.lane.b32.xlu1 %v6007_v44, %s4203_s7 }
 0x6fb   :  { %2627 = vrot.lane.b32.xlu0 %v6002_v25, %s4203_s7 }
 0x6fe   :  { %2597 = vrot.lane.b32.xlu1 %v5998_v43, %s4201_s30 }
 0x6ff   :  { %2605 = vrot.lane.b32.xlu0 %v5995_v20, %s4201_s30 }
 0x702   :  { %2621 = vrot.lane.b32.xlu1 %v5998_v43, %s4203_s7 }
 0x703   :  { %2629 = vrot.lane.b32.xlu0 %v5995_v20, %s4203_s7 }
 0x706   :  { %2599 = vrot.lane.b32.xlu1 %v5989_v31, %s4201_s30 }
 0x707   :  { %2607 = vrot.lane.b32.xlu0 %v5992_v9, %s4201_s30 }
 0x70a   :  { %2623 = vrot.lane.b32.xlu1 %v5989_v31, %s4203_s7 }
 0x70b   :  { %2631 = vrot.lane.b32.xlu0 %v5992_v9, %s4203_s7 }
 0x760   :  { %v2594_v30 = vpop.permute.xlu1 %2593 }
 0x761   :  { %v2602_v57 = vpop.permute.xlu0 %2601 }
 0x762   :  { %v2609_v54 = vsel %vm7246_vm12, %v2594_v30, %v2602_v57 }
 0x764   :  { %v2618_v29 = vpop.permute.xlu1 %2617 }
 0x765   :  { %v2626_v47 = vpop.permute.xlu0 %2625 }
 0x768   :  { %v2596_v22 = vpop.permute.xlu1 %2595 }
 0x769   :  { %v2604_v23 = vpop.permute.xlu0 %2603 }
 0x76a   :  { %v2610_v8 = vsel %vm7240_vm14, %v2596_v22, %v2604_v23  ;;  %v2614_v42 = vsel %vm7241_vm8, %v2604_v23, %v2596_v22  ;;  %vm7247_vm14 = vmmov %vm7244_vm0  ;;  %vm7248_vm8 = vcmp.eq.s32.totalorder %v4958_v37, 1 }
 0x76b   :  { %v2613_v46 = vsel %vm7247_vm14, %v2602_v57, %v2594_v30 }
 0x76c   :  { %v2620_v56 = vpop.permute.xlu1 %2619 }
 0x76d   :  { %v2628_v35 = vpop.permute.xlu0 %2627 }
 0x770   :  { %v2598_v39 = vpop.permute.xlu1 %2597 }
 0x771   :  { %v2606_v45 = vpop.permute.xlu0 %2605 }
 0x772   :  { %v2611_v49 = vsel %vm7242_vm6, %v2598_v39, %v2606_v45  ;;  %v2615_v27 = vsel %vm7243_vm2, %v2606_v45, %v2598_v39  ;;  %vm7249_vm6 = vmmov %vm7248_vm8  ;;  %vm7250_vm2 = vcmp.lt.s32.totalorder %v4298_v5, 127 }
 0x773   :  { %v2637_v7 = vsel %vm7250_vm2, %v2626_v47, %v2618_v29 }
 0x774   :  { %v2622_v24 = vpop.permute.xlu1 %2621 }
 0x775   :  { %v2630_v6 = vpop.permute.xlu0 %2629 }
 0x778   :  { %v2600_v1 = vpop.permute.xlu1 %2599 }
 0x779   :  { %v2608_v21 = vpop.permute.xlu0 %2607 }
 0x77a   :  { %v2612_v38 = vsel %vm7244_vm0, %v2600_v1, %v2608_v21  ;;  %v2616_v41 = vsel %vm7245_vm4, %v2608_v21, %v2600_v1  ;;  %vm7251_vm4 = vmmov %vm7249_vm6 }
 0x77b   :  { %v2647_v62 = vsel %vm7248_vm8, %v5989_v31, %v2616_v41  ;;  %v2648_v13 = vsel %vm7249_vm6, %v5992_v9, %v2612_v38  ;;  %v2643_v4 = vsel %vm7251_vm4, %v6007_v44, %v2614_v42  ;;  %vm7252_vm12 = vmmov %vm7251_vm4 }
 0x77c   :  { %v2644_v11 = vsel %vm7252_vm12, %v6002_v25, %v2610_v8  ;;  %vm7253_vm0 = vmmov %vm7250_vm2  ;;  %v2624_v17 = vpop.permute.xlu1 %2623  ;;  %v2663_v45 = vmax.f32 %v5989_v31, %v2647_v62  ;;  %v2664_v42 = vmax.f32 %v5992_v9, %v2648_v13 }
 0x77d   :  { %v2639_v40 = vsel %vm7253_vm0, %v2630_v6, %v2622_v24  ;;  %vm7254_vm14 = vmmov %vm7253_vm0  ;;  %v2632_v39 = vpop.permute.xlu0 %2631  ;;  %v2634_v21 = vsel %vm7253_vm0, %v2620_v56, %v2628_v35 }
 0x77e   :  { %v2638_v30 = vsel %vm7254_vm14, %v2628_v35, %v2620_v56  ;;  %vm7255_vm8 = vmmov %vm7251_vm4  ;;  %vm7260_vm14 = vcmp.eq.s32.totalorder %v4978_v34, 1 }
 0x77f   :  { %v2645_v57 = vsel %vm7255_vm8, %v5998_v43, %v2615_v27  ;;  %vm7256_vm6 = vmmov %vm7251_vm4 }
 0x780   :  { %v2646_v22 = vsel %vm7256_vm6, %v5995_v20, %v2611_v49  ;;  %vm7257_vm2 = vmmov %vm7253_vm0 }
 0x781   :  { %v2635_v23 = vsel %vm7257_vm2, %v2622_v24, %v2630_v6  ;;  %vm7258_vm4 = vmmov %vm7253_vm0  ;;  %v2662_v56 = vmax.f32 %v5995_v20, %v2646_v22 }
 0x782   :  { %v2636_v1 = vsel %vm7258_vm4, %v2624_v17, %v2632_v39  ;;  %vm7259_vm12 = vmmov %vm7253_vm0  ;;  %vm7264_vm4 = vcmp.eq.s32.totalorder %v4958_v37, 1 }
 0x783   :  { %v2640_v8 = vsel %vm7259_vm12, %v2632_v39, %v2624_v17  ;;  %v2655_v49 = vsel %vm7260_vm14, %v5989_v31, %v2636_v1  ;;  %vm7261_vm8 = vmmov %vm7260_vm14  ;;  %v2642_v31 = vsel %vm7264_vm4, %v6013_v10, %v2609_v54  ;;  %v2660_v54 = vmax.f32 %v6002_v25, %v2644_v11 }
 0x784   :  { %v2656_v24 = vsel %vm7261_vm8, %v5992_v9, %v2640_v8  ;;  %vm7262_vm6 = vmmov %vm7261_vm8  ;;  %v2671_v38 = vmax.f32 %v2663_v45, %v2655_v49  ;;  %v2661_v9 = vmax.f32 %v5998_v43, %v2645_v57  ;;  %v2658_v17 = vmax.f32 %v6013_v10, %v2642_v31 }
 0x785   :  { %v2654_v6 = vsel %vm7262_vm6, %v5995_v20, %v2639_v40  ;;  %vm7263_vm2 = vmmov %vm7262_vm6  ;;  %v2672_v41 = vmax.f32 %v2664_v42, %v2656_v24 }
 0x786   :  { %v2653_v27 = vsel %vm7263_vm2, %v5998_v43, %v2635_v23  ;;  %vm7265_vm12 = vmmov %vm7253_vm0  ;;  %v2670_v40 = vmax.f32 %v2662_v56, %v2654_v6 }
 0x787   :  { %v2633_v35 = vsel %vm7265_vm12, %v2618_v29, %v2626_v47  ;;  %vm7266_vm0 = vmmov %vm7263_vm2  ;;  %2878 = vmatprep.subr.mxu1 %v2672_v41  ;;  %v2659_v29 = vmax.f32 %v6007_v44, %v2643_v4  ;;  %v2669_v47 = vmax.f32 %v2661_v9, %v2653_v27  ;;  %v2126_v9 = vld [vmem:[#allocation3 + $0xc8] sm:$0xff] }
 0x788   :  { %v2652_v62 = vsel %vm7266_vm0, %v6002_v25, %v2638_v30  ;;  %vm7267_vm14 = vmmov %vm7264_vm4  ;;  %2879 = vmatpush1.msra.mxu1 %v2671_v38  ;;  %vm7289_vm4 = vcmp.lt.s32.totalorder %v4298_v5, 4  ;;  %2843 = vmatprep.mubr.f32.mxu0 %v2126_v9 }
 0x789   :  { %v2641_v13 = vsel %vm7267_vm14, %v6010_v26, %v2613_v46  ;;  %vm7268_vm8 = vmmov %vm7266_vm0  ;;  %2880 = vmatprep.subr.mxu1 %v2670_v40  ;;  %v2668_v46 = vmax.f32 %v2660_v54, %v2652_v62 }
 0x78a   :  { %v2651_v20 = vsel %vm7268_vm8, %v6007_v44, %v2634_v21  ;;  %vm7269_vm6 = vmmov %vm7266_vm0  ;;  %v2657_v30 = vmax.f32 %v6010_v26, %v2641_v13  ;;  %2881 = vmatpush1.msra.mxu1 %v2669_v47 }
 0x78b   :  { %v2650_v43 = vsel %vm7269_vm6, %v6013_v10, %v2637_v7  ;;  %vm7270_vm2 = vmmov %vm7266_vm0  ;;  %v2667_v57 = vmax.f32 %v2659_v29, %v2651_v20  ;;  %2882 = vmatprep.subr.mxu1 %v2668_v46  ;;  %vm7291_vm0 = vcmp.lt.s32.totalorder %v4298_v5, 5 }
 0x78c   :  { %v2649_v37 = vsel %vm7270_vm2, %v6010_v26, %v2633_v35  ;;  %v2666_v25 = vmax.f32 %v2658_v17, %v2650_v43  ;;  %vm7290_vm12 = vmmov %vm7289_vm4 }
 0x78d   :  { %v2665_v44 = vmax.f32 %v2657_v30, %v2649_v37  ;;  %2883 = vmatpush1.msra.mxu1 %v2667_v57  ;;  %vm7292_vm14 = vmmov %vm7291_vm0 }
 0x78e   :  { %2884 = vmatprep.subr.mxu1 %v2666_v25 }
 0x78f   :  { %2885 = vmatpush1.msra.mxu1 %v2665_v44 }
 0x7b2   :  { %v6144_v4 = vpop.f32.mrf.mxu1 }
 0x7b3   :  { %2361 = vrot.lane.b32.xlu1 %v6144_v4, %s7271_s1 }
 0x7b4   :  { %v6148_v34 = vpop.f32.mrf.mxu1 }
 0x7b5   :  { %2363 = vrot.lane.b32.xlu0 %v6148_v34, %s7271_s1  ;;  %s7278_s1 = smov 11  }
 0x7b7   :  { %2351 = vrot.lane.b32.xlu1 %v6144_v4, %s7272_s6 }
 0x7b9   :  { %2353 = vrot.lane.b32.xlu0 %v6148_v34, %s7272_s6  ;;  %s7279_s6 = smov 12  }
 0x7bb   :  { %2341 = vrot.lane.b32.xlu1 %v6144_v4, %s7273_s8 }
 0x7bd   :  { %2343 = vrot.lane.b32.xlu0 %v6148_v34, %s7273_s8  ;;  %s7280_s8 = smov 13  }
 0x7bf   :  { %2331 = vrot.lane.b32.xlu1 %v6144_v4, %s7274_s9 }
 0x7c1   :  { %2333 = vrot.lane.b32.xlu0 %v6148_v34, %s7274_s9  ;;  %s7281_s9 = smov 14  }
 0x7c3   :  { %2321 = vrot.lane.b32.xlu1 %v6144_v4, %s7275_s10 }
 0x7c5   :  { %2323 = vrot.lane.b32.xlu0 %v6148_v34, %s7275_s10  ;;  %s7282_s10 = smov 15  }
 0x7c7   :  { %2311 = vrot.lane.b32.xlu1 %v6144_v4, %s7276_s2 }
 0x7c9   :  { %2313 = vrot.lane.b32.xlu0 %v6148_v34, %s7276_s2  ;;  %s7283_s2 = smov 16  }
 0x7cb   :  { %2301 = vrot.lane.b32.xlu1 %v6144_v4, %s7277_s29 }
 0x7cd   :  { %2303 = vrot.lane.b32.xlu0 %v6148_v34, %s7277_s29  ;;  %s7284_s29 = smov 17  }
 0x7cf   :  { %2291 = vrot.lane.b32.xlu1 %v6144_v4, %s7278_s1 }
 0x7d1   :  { %2293 = vrot.lane.b32.xlu0 %v6148_v34, %s7278_s1  ;;  %s7285_s1 = smov 18  }
 0x7d3   :  { %2281 = vrot.lane.b32.xlu1 %v6144_v4, %s7279_s6 }
 0x7d5   :  { %2283 = vrot.lane.b32.xlu0 %v6148_v34, %s7279_s6  ;;  %s7286_s6 = smov 19  }
 0x7d7   :  { %2271 = vrot.lane.b32.xlu1 %v6144_v4, %s7280_s8 }
 0x7d9   :  { %2273 = vrot.lane.b32.xlu0 %v6148_v34, %s7280_s8  ;;  %s7287_s8 = smov 116  }
 0x7db   :  { %2261 = vrot.lane.b32.xlu1 %v6144_v4, %s7281_s9 }
 0x7dd   :  { %2263 = vrot.lane.b32.xlu0 %v6148_v34, %s7281_s9  ;;  %s7288_s9 = smov 117  }
 0x7df   :  { %2251 = vrot.lane.b32.xlu1 %v6144_v4, %s7282_s10 }
 0x7e1   :  { %2253 = vrot.lane.b32.xlu0 %v6148_v34, %s7282_s10 }
 0x7e3   :  { %2241 = vrot.lane.b32.xlu1 %v6144_v4, %s7283_s2 }
 0x7e5   :  { %2243 = vrot.lane.b32.xlu0 %v6148_v34, %s7283_s2 }
 0x7e7   :  { %2231 = vrot.lane.b32.xlu1 %v6144_v4, %s7284_s29 }
 0x7e9   :  { %2233 = vrot.lane.b32.xlu0 %v6148_v34, %s7284_s29 }
 0x7eb   :  { %2221 = vrot.lane.b32.xlu1 %v6144_v4, %s7285_s1 }
 0x7ed   :  { %2223 = vrot.lane.b32.xlu0 %v6148_v34, %s7285_s1 }
 0x7ef   :  { %2211 = vrot.lane.b32.xlu1 %v6144_v4, %s7286_s6 }
 0x7f1   :  { %2213 = vrot.lane.b32.xlu0 %v6148_v34, %s7286_s6 }
 0x7f3   :  { %2513 = vrot.lane.b32.xlu1 %v6144_v4, %s7287_s8 }
 0x7f5   :  { %2515 = vrot.lane.b32.xlu0 %v6148_v34, %s7287_s8 }
 0x7f7   :  { %2503 = vrot.lane.b32.xlu1 %v6144_v4, %s7288_s9 }
 0x7f9   :  { %2505 = vrot.lane.b32.xlu0 %v6148_v34, %s7288_s9 }
 0x7fb   :  { %2493 = vrot.lane.b32.xlu1 %v6144_v4, %s7093_s27 }
 0x7fd   :  { %2495 = vrot.lane.b32.xlu0 %v6148_v34, %s7093_s27 }
 0x7ff   :  { %2483 = vrot.lane.b32.xlu1 %v6144_v4, %s7094_s28 }
 0x801   :  { %2485 = vrot.lane.b32.xlu0 %v6148_v34, %s7094_s28 }
 0x803   :  { %2473 = vrot.lane.b32.xlu1 %v6144_v4, %s7095_s24 }
 0x805   :  { %2475 = vrot.lane.b32.xlu0 %v6148_v34, %s7095_s24 }
 0x807   :  { %2463 = vrot.lane.b32.xlu1 %v6144_v4, %s7096_s26 }
 0x809   :  { %2465 = vrot.lane.b32.xlu0 %v6148_v34, %s7096_s26 }
 0x80b   :  { %2453 = vrot.lane.b32.xlu1 %v6144_v4, %s7097_s23 }
 0x80d   :  { %2455 = vrot.lane.b32.xlu0 %v6148_v34, %s7097_s23 }
 0x80f   :  { %2443 = vrot.lane.b32.xlu1 %v6144_v4, %s7098_s25 }
 0x811   :  { %2445 = vrot.lane.b32.xlu0 %v6148_v34, %s7098_s25 }
 0x813   :  { %2433 = vrot.lane.b32.xlu1 %v6144_v4, %s7099_s22 }
 0x815   :  { %2435 = vrot.lane.b32.xlu0 %v6148_v34, %s7099_s22 }
 0x817   :  { %2423 = vrot.lane.b32.xlu1 %v6144_v4, %s7100_s21 }
 0x819   :  { %2425 = vrot.lane.b32.xlu0 %v6148_v34, %s7100_s21 }
 0x81b   :  { %2583 = vrot.lane.b32.xlu1 %v6144_v4, %s7101_s20 }
 0x81d   :  { %2585 = vrot.lane.b32.xlu0 %v6148_v34, %s7101_s20 }
 0x81f   :  { %2413 = vrot.lane.b32.xlu1 %v6144_v4, %s7102_s19 }
 0x821   :  { %2415 = vrot.lane.b32.xlu0 %v6148_v34, %s7102_s19 }
 0x823   :  { %2573 = vrot.lane.b32.xlu1 %v6144_v4, %s7103_s18 }
 0x825   :  { %v2362_v26 = vpop.permute.xlu1 %2361  ;;  %2575 = vrot.lane.b32.xlu0 %v6148_v34, %s7103_s18 }
 0x827   :  { %2403 = vrot.lane.b32.xlu1 %v6144_v4, %s4203_s7  ;;  %v2364_v10 = vpop.permute.xlu0 %2363 }
 0x828   :  { %v2365_v7 = vsel %vm7289_vm4, %v2362_v26, %v2364_v10  ;;  %v2366_v11 = vsel %vm7290_vm12, %v2364_v10, %v2362_v26 }
 0x829   :  { %v2352_v22 = vpop.permute.xlu1 %2351  ;;  %2405 = vrot.lane.b32.xlu0 %v6148_v34, %s4203_s7  ;;  %3823 = vmatprep.subr.msk.mxu0 %vm4545_vm3, %v2365_v7  ;;  %v4241_v7 = vmov 4  }
 0x82a   :  { %3825 = vmatpush1.msk.msra.mxu0 %vm4545_vm3, %v2366_v11  ;;  %vm7293_vm3 = vcmp.lt.s32.totalorder %v4298_v5, 6  ;;  %4059 = vset.pattern.permute.xlu0 %v4241_v7 }
 0x82b   :  { %2563 = vrot.lane.b32.xlu1 %v6144_v4, %s7104_s17  ;;  %v2354_v23 = vpop.permute.xlu0 %2353  ;;  %vm7294_vm8 = vmmov %vm7293_vm3 }
 0x82c   :  { %v2355_v39 = vsel %vm7291_vm0, %v2352_v22, %v2354_v23  ;;  %v2356_v45 = vsel %vm7292_vm14, %v2354_v23, %v2352_v22  ;;  %4060 = vset.pattern.permute.xlu1 %v4241_v7 }
 0x82d   :  { %v2342_v1 = vpop.permute.xlu1 %2341  ;;  %2565 = vrot.lane.b32.xlu0 %v6148_v34, %s7104_s17  ;;  %3827 = vmatprep.subr.msk.mxu0 %vm4560_vm5, %v2355_v39 }
 0x82e   :  { %3829 = vmatpush1.msk.msra.mxu0 %vm4560_vm5, %v2356_v45  ;;  %vm7295_vm5 = vcmp.lt.s32.totalorder %v4298_v5, 7 }
 0x82f   :  { %2553 = vrot.lane.b32.xlu1 %v6144_v4, %s7107_s16  ;;  %v2344_v48 = vpop.permute.xlu0 %2343  ;;  %vm7296_vm6 = vmmov %vm7295_vm5 }
 0x830   :  { %v2345_v8 = vsel %vm7293_vm3, %v2342_v1, %v2344_v48  ;;  %v2346_v42 = vsel %vm7294_vm8, %v2344_v48, %v2342_v1  ;;  %vm7307_vm3 = vnez %v7034_v52 }
 0x831   :  { %v2332_v21 = vpop.permute.xlu1 %2331  ;;  %2555 = vrot.lane.b32.xlu0 %v6148_v34, %s7107_s16  ;;  %3831 = vmatprep.subr.msk.mxu0 %vm4575_vm7, %v2345_v8 }
 0x832   :  { %3833 = vmatpush1.msk.msra.mxu0 %vm4575_vm7, %v2346_v42  ;;  %vm7297_vm7 = vcmp.lt.s32.totalorder %v4298_v5, 8 }
 0x833   :  { %2391 = vrot.lane.b32.xlu1 %v6144_v4, %s4201_s30  ;;  %v2334_v53 = vpop.permute.xlu0 %2333  ;;  %vm7298_vm2 = vmmov %vm7297_vm7 }
 0x834   :  { %v2335_v49 = vsel %vm7295_vm5, %v2332_v21, %v2334_v53  ;;  %v2336_v24 = vsel %vm7296_vm6, %v2334_v53, %v2332_v21  ;;  %vm7310_vm5 = vnez %v7036_v59  ;;  %vm7311_vm6 = vcmp.lt.s32.totalorder %v4298_v5, 14 }
 0x835   :  { %v2322_v6 = vpop.permute.xlu1 %2321  ;;  %2393 = vrot.lane.b32.xlu0 %v6148_v34, %s4201_s30  ;;  %3835 = vmatprep.subr.msk.mxu0 %vm4598_vm9, %v2335_v49 }
 0x836   :  { %3837 = vmatpush1.msk.msra.mxu0 %vm4598_vm9, %v2336_v24  ;;  %vm7299_vm9 = vcmp.lt.s32.totalorder %v4298_v5, 9 }
 0x837   :  { %2543 = vrot.lane.b32.xlu1 %v6144_v4, %s7112_s15  ;;  %v2324_v55 = vpop.permute.xlu0 %2323  ;;  %vm7300_vm4 = vmmov %vm7299_vm9 }
 0x838   :  { %v2325_v27 = vsel %vm7297_vm7, %v2322_v6, %v2324_v55  ;;  %v2326_v38 = vsel %vm7298_vm2, %v2324_v55, %v2322_v6  ;;  %vm7312_vm7 = vmmov %vm7311_vm6  ;;  %vm7313_vm2 = vnez %v7038_v61 }
 0x839   :  { %v2312_v41 = vpop.permute.xlu1 %2311  ;;  %2545 = vrot.lane.b32.xlu0 %v6148_v34, %s7112_s15  ;;  %3839 = vmatprep.subr.msk.mxu0 %vm4617_vm11, %v2325_v27 }
 0x83a   :  { %3841 = vmatpush1.msk.msra.mxu0 %vm4617_vm11, %v2326_v38  ;;  %vm7301_vm11 = vcmp.lt.s32.totalorder %v4298_v5, 10 }
 0x83b   :  { %2381 = vrot.lane.b32.xlu1 %v6144_v4, %s7115_s14  ;;  %v2314_v60 = vpop.permute.xlu0 %2313  ;;  %vm7302_vm12 = vmmov %vm7301_vm11 }
 0x83c   :  { %v2315_v56 = vsel %vm7299_vm9, %v2312_v41, %v2314_v60  ;;  %v2316_v31 = vsel %vm7300_vm4, %v2314_v60, %v2312_v41  ;;  %vm7314_vm9 = vcmp.lt.s32.totalorder %v4298_v5, 15 }
 0x83d   :  { %v2302_v35 = vpop.permute.xlu1 %2301  ;;  %2383 = vrot.lane.b32.xlu0 %v6148_v34, %s7115_s14  ;;  %3843 = vmatprep.subr.msk.mxu0 %vm4640_vm13, %v2315_v56  ;;  %vm7315_vm4 = vmmov %vm7314_vm9 }
 0x83e   :  { %3845 = vmatpush1.msk.msra.mxu0 %vm4640_vm13, %v2316_v31  ;;  %vm7303_vm13 = vcmp.lt.s32.totalorder %v4298_v5, 11 }
 0x83f   :  { %2533 = vrot.lane.b32.xlu1 %v6144_v4, %s7118_s13  ;;  %v2304_v63 = vpop.permute.xlu0 %2303  ;;  %vm7304_vm0 = vmmov %vm7303_vm13 }
 0x840   :  { %v2305_v62 = vsel %vm7301_vm11, %v2302_v35, %v2304_v63  ;;  %v2306_v13 = vsel %vm7302_vm12, %v2304_v63, %v2302_v35  ;;  %vm7316_vm11 = vnez %v7040_v12  ;;  %vm7317_vm12 = vcmp.lt.s32.totalorder %v4298_v5, 16 }
 0x841   :  { %v2292_v20 = vpop.permute.xlu1 %2291  ;;  %2535 = vrot.lane.b32.xlu0 %v6148_v34, %s7118_s13  ;;  %3847 = vmatprep.subr.msk.mxu0 %vm4659_vm15, %v2305_v62 }
 0x842   :  { %3849 = vmatpush1.msk.msra.mxu0 %vm4659_vm15, %v2306_v13  ;;  %vm7305_vm15 = vcmp.lt.s32.totalorder %v4298_v5, 12 }
 0x843   :  { %2371 = vrot.lane.b32.xlu1 %v6144_v4, %s7121_s12  ;;  %v2294_v16 = vpop.permute.xlu0 %2293  ;;  %vm7306_vm14 = vmmov %vm7305_vm15 }
 0x844   :  { %v2295_v40 = vsel %vm7303_vm13, %v2292_v20, %v2294_v16  ;;  %v2296_v54 = vsel %vm7304_vm0, %v2294_v16, %v2292_v20  ;;  %vm7318_vm13 = vmmov %vm7317_vm12  ;;  %vm7319_vm0 = vnez %v7042_v14 }
 0x845   :  { %v2282_v29 = vpop.permute.xlu1 %2281  ;;  %2373 = vrot.lane.b32.xlu0 %v6148_v34, %s7121_s12  ;;  %3851 = vmatprep.subr.msk.mxu0 %vm4682_vm10, %v2295_v40 }
 0x846   :  { %3853 = vmatpush1.msk.msra.mxu0 %vm4682_vm10, %v2296_v54  ;;  %vm7308_vm10 = vcmp.lt.s32.totalorder %v4298_v5, 13 }
 0x847   :  { %2523 = vrot.lane.b32.xlu1 %v6144_v4, %s7124_s11  ;;  %v2284_v19 = vpop.permute.xlu0 %2283  ;;  %vm7309_vm8 = vmmov %vm7308_vm10 }
 0x848   :  { %v2285_v47 = vsel %vm7305_vm15, %v2282_v29, %v2284_v19  ;;  %v2286_v43 = vsel %vm7306_vm14, %v2284_v19, %v2282_v29  ;;  %vm7320_vm15 = vcmp.lt.s32.totalorder %v4298_v5, 17 }
 0x849   :  { %v2272_v37 = vpop.permute.xlu1 %2271  ;;  %2525 = vrot.lane.b32.xlu0 %v6148_v34, %s7124_s11  ;;  %3855 = vmatprep.subr.msk.mxu0 %vm7307_vm3, %v2285_v47  ;;  %vm7321_vm14 = vmmov %vm7320_vm15 }
 0x84a   :  { %3857 = vmatpush1.msk.msra.mxu0 %vm7307_vm3, %v2286_v43  ;;  %vm7322_vm3 = vnez %v7044_v50 }
 0x84b   :  { %v2274_v51 = vpop.permute.xlu0 %2273  ;;  %3038 = vperm.xlu1 %4060, %v5949_v15  }
 0x84c   :  { %v2275_v46 = vsel %vm7308_vm10, %v2272_v37, %v2274_v51  ;;  %v2276_v17 = vsel %vm7309_vm8, %v2274_v51, %v2272_v37  ;;  %vm7323_vm10 = vcmp.lt.s32.totalorder %v4298_v5, 18 }
 0x84d   :  { %v2262_v30 = vpop.permute.xlu1 %2261  ;;  %3859 = vmatprep.subr.msk.mxu0 %vm7310_vm5, %v2275_v46  ;;  %3034 = vperm.xlu0 %4059, %v5962_v36   ;;  %vm7324_vm8 = vmmov %vm7323_vm10 }
 0x84e   :  { %3861 = vmatpush1.msk.msra.mxu0 %vm7310_vm5, %v2276_v17  ;;  %vm7325_vm5 = vnez %v7046_v18 }
 0x84f   :  { %v2264_v57 = vpop.permute.xlu0 %2263 }
 0x850   :  { %v2265_v25 = vsel %vm7311_vm6, %v2262_v30, %v2264_v57  ;;  %v2266_v52 = vsel %vm7312_vm7, %v2264_v57, %v2262_v30  ;;  %vm7326_vm6 = vcmp.lt.s32.totalorder %v4298_v5, 19 }
 0x851   :  { %v2252_v44 = vpop.permute.xlu1 %2251  ;;  %3863 = vmatprep.subr.msk.mxu0 %vm7313_vm2, %v2265_v25  ;;  %3042 = vperm.xlu0 %4059, %v5955_v28   ;;  %vm7327_vm7 = vmmov %vm7326_vm6 }
 0x852   :  { %3865 = vmatpush1.msk.msra.mxu0 %vm7313_vm2, %v2266_v52  ;;  %vm7328_vm2 = vnez %v7048_v58 }
 0x853   :  { %v2254_v26 = vpop.permute.xlu0 %2253 }
 0x854   :  { %v2255_v10 = vsel %vm7314_vm9, %v2252_v44, %v2254_v26  ;;  %v2256_v59 = vsel %vm7315_vm4, %v2254_v26, %v2252_v44  ;;  %vm7329_vm9 = vcmp.lt.s32.totalorder %v4298_v5, 116 }
 0x855   :  { %v2242_v11 = vpop.permute.xlu1 %2241  ;;  %3867 = vmatprep.subr.msk.mxu0 %vm7316_vm11, %v2255_v10  ;;  %vm7330_vm4 = vmmov %vm7329_vm9 }
 0x856   :  { %3869 = vmatpush1.msk.msra.mxu0 %vm7316_vm11, %v2256_v59  ;;  %vm7331_vm11 = vmmov %vm7330_vm4 }
 0x857   :  { %v2244_v61 = vpop.permute.xlu0 %2243 }
 0x858   :  { %v2245_v22 = vsel %vm7317_vm12, %v2242_v11, %v2244_v61  ;;  %v2246_v23 = vsel %vm7318_vm13, %v2244_v61, %v2242_v11  ;;  %vm7332_vm12 = vmmov %vm7330_vm4  ;;  %vm7333_vm13 = vcmp.lt.s32.totalorder %v4298_v5, 117 }
 0x859   :  { %v2232_v39 = vpop.permute.xlu1 %2231  ;;  %3871 = vmatprep.subr.msk.mxu0 %vm7319_vm0, %v2245_v22 }
 0x85a   :  { %3873 = vmatpush1.msk.msra.mxu0 %vm7319_vm0, %v2246_v23  ;;  %vm7334_vm0 = vmmov %vm7333_vm13 }
 0x85b   :  { %v2234_v12 = vpop.permute.xlu0 %2233 }
 0x85c   :  { %v2235_v15 = vsel %vm7320_vm15, %v2232_v39, %v2234_v12  ;;  %v2236_v36 = vsel %vm7321_vm14, %v2234_v12, %v2232_v39  ;;  %vm7335_vm15 = vmmov %vm7334_vm0 }
 0x85d   :  { %v2222_v45 = vpop.permute.xlu1 %2221  ;;  %3875 = vmatprep.subr.msk.mxu0 %vm7322_vm3, %v2235_v15  ;;  %vm7336_vm14 = vmmov %vm7334_vm0 }
 0x85e   :  { %3877 = vmatpush1.msk.msra.mxu0 %vm7322_vm3, %v2236_v36  ;;  %vm7337_vm3 = vcmp.lt.s32.totalorder %v4298_v5, 118 }
 0x85f   :  { %v2224_v1 = vpop.permute.xlu0 %2223 }
 0x860   :  { %v2225_v28 = vsel %vm7323_vm10, %v2222_v45, %v2224_v1  ;;  %v2226_v14 = vsel %vm7324_vm8, %v2224_v1, %v2222_v45  ;;  %vm7338_vm10 = vmmov %vm7337_vm3 }
 0x861   :  { %v2212_v48 = vpop.permute.xlu1 %2211  ;;  %3879 = vmatprep.subr.msk.mxu0 %vm7325_vm5, %v2225_v28  ;;  %vm7339_vm8 = vmmov %vm7337_vm3 }
 0x862   :  { %3881 = vmatpush1.msk.msra.mxu0 %vm7325_vm5, %v2226_v14  ;;  %vm7340_vm5 = vmmov %vm7337_vm3 }
 0x863   :  { %v2214_v8 = vpop.permute.xlu0 %2213 }
 0x864   :  { %v2215_v42 = vsel %vm7326_vm6, %v2212_v48, %v2214_v8  ;;  %v2216_v50 = vsel %vm7327_vm7, %v2214_v8, %v2212_v48  ;;  %vm7341_vm6 = vcmp.lt.s32.totalorder %v4298_v5, 119 }
 0x865   :  { %v2514_v21 = vpop.permute.xlu1 %2513  ;;  %3883 = vmatprep.subr.msk.mxu0 %vm7328_vm2, %v2215_v42  ;;  %vm7342_vm7 = vmmov %vm7341_vm6 }
 0x866   :  { %3885 = vmatpush1.msk.msra.mxu0 %vm7328_vm2, %v2216_v50  ;;  %vm7343_vm2 = vmmov %vm7341_vm6 }
 0x867   :  { %v2516_v53 = vpop.permute.xlu0 %2515 }
 0x868   :  { %v2517_v49 = vsel %vm7329_vm9, %v2514_v21, %v2516_v53  ;;  %v2518_v18 = vsel %vm7330_vm4, %v2516_v53, %v2514_v21  ;;  %vm7344_vm9 = vmmov %vm7343_vm2  ;;  %vm7345_vm4 = vcmp.lt.s32.totalorder %v4298_v5, 120 }
 0x869   :  { %v2504_v24 = vpop.permute.xlu1 %2503  ;;  %3887 = vmatprep.subr.msk.mxu0 %vm7331_vm11, %v2518_v18  ;;  %vm7346_vm11 = vmmov %vm7345_vm4 }
 0x86a   :  { %3889 = vmatpush2.msk.msra.mxu0 %vm7332_vm12, %v2517_v49  ;;  %vm7347_vm12 = vmmov %vm7345_vm4 }
 0x86b   :  { %v2506_v6 = vpop.permute.xlu0 %2505 }
 0x86c   :  { %v2507_v55 = vsel %vm7333_vm13, %v2504_v24, %v2506_v6  ;;  %v2508_v58 = vsel %vm7334_vm0, %v2506_v6, %v2504_v24  ;;  %vm7348_vm13 = vmmov %vm7345_vm4  ;;  %vm7349_vm0 = vcmp.lt.s32.totalorder %v4298_v5, 121 }
 0x86d   :  { %v2494_v27 = vpop.permute.xlu1 %2493  ;;  %3891 = vmatprep.subr.msk.mxu0 %vm7335_vm15, %v2508_v58  ;;  %vm7350_vm15 = vmmov %vm7349_vm0 }
 0x86e   :  { %3893 = vmatpush2.msk.msra.mxu0 %vm7336_vm14, %v2507_v55  ;;  %vm7351_vm14 = vmmov %vm7349_vm0 }
 0x86f   :  { %v2496_v38 = vpop.permute.xlu0 %2495 }
 0x870   :  { %v2497_v41 = vsel %vm7337_vm3, %v2494_v27, %v2496_v38  ;;  %v2498_v60 = vsel %vm7338_vm10, %v2496_v38, %v2494_v27  ;;  %vm7352_vm3 = vmmov %vm7349_vm0  ;;  %vm7353_vm10 = vcmp.lt.s32.totalorder %v4298_v5, 122 }
 0x871   :  { %v2484_v56 = vpop.permute.xlu1 %2483  ;;  %3895 = vmatprep.subr.msk.mxu0 %vm7339_vm8, %v2498_v60  ;;  %vm7354_vm8 = vmmov %vm7353_vm10 }
 0x872   :  { %3897 = vmatpush2.msk.msra.mxu0 %vm7340_vm5, %v2497_v41  ;;  %vm7355_vm5 = vmmov %vm7354_vm8 }
 0x873   :  { %v2486_v31 = vpop.permute.xlu0 %2485 }
 0x874   :  { %v2487_v35 = vsel %vm7341_vm6, %v2484_v56, %v2486_v31  ;;  %v2488_v9 = vsel %vm7342_vm7, %v2486_v31, %v2484_v56  ;;  %vm7356_vm6 = vmmov %vm7355_vm5  ;;  %vm7357_vm7 = vcmp.lt.s32.totalorder %v4298_v5, 123 }
 0x875   :  { %v2474_v63 = vpop.permute.xlu1 %2473  ;;  %3899 = vmatprep.subr.msk.mxu0 %vm7343_vm2, %v2488_v9  ;;  %vm7358_vm2 = vmmov %vm7357_vm7 }
 0x876   :  { %3901 = vmatpush2.msk.msra.mxu0 %vm7344_vm9, %v2487_v35  ;;  %vm7359_vm9 = vmmov %vm7358_vm2 }
 0x877   :  { %v2476_v62 = vpop.permute.xlu0 %2475 }
 0x878   :  { %v2477_v13 = vsel %vm7345_vm4, %v2474_v63, %v2476_v62  ;;  %v2478_v20 = vsel %vm7346_vm11, %v2476_v62, %v2474_v63  ;;  %vm7360_vm4 = vmmov %vm7358_vm2  ;;  %vm7361_vm11 = vcmp.lt.s32.totalorder %v4298_v5, 124 }
 0x879   :  { %v2464_v16 = vpop.permute.xlu1 %2463  ;;  %3903 = vmatprep.subr.msk.mxu0 %vm7347_vm12, %v2478_v20  ;;  %vm7362_vm12 = vmmov %vm7361_vm11 }
 0x87a   :  { %3905 = vmatpush2.msk.msra.mxu0 %vm7348_vm13, %v2477_v13  ;;  %vm7363_vm13 = vmmov %vm7361_vm11 }
 0x87b   :  { %v2466_v40 = vpop.permute.xlu0 %2465 }
 0x87c   :  { %v2467_v54 = vsel %vm7349_vm0, %v2464_v16, %v2466_v40  ;;  %v2468_v29 = vsel %vm7350_vm15, %v2466_v40, %v2464_v16  ;;  %vm7364_vm0 = vmmov %vm7361_vm11  ;;  %vm7365_vm15 = vcmp.lt.s32.totalorder %v4298_v5, 125 }
 0x87d   :  { %v2454_v19 = vpop.permute.xlu1 %2453  ;;  %3907 = vmatprep.subr.msk.mxu0 %vm7351_vm14, %v2468_v29  ;;  %vm7366_vm14 = vmmov %vm7365_vm15 }
 0x87e   :  { %3909 = vmatpush2.msk.msra.mxu0 %vm7352_vm3, %v2467_v54  ;;  %vm7367_vm3 = vmmov %vm7366_vm14 }
 0x87f   :  { %v2456_v47 = vpop.permute.xlu0 %2455 }
 0x880   :  { %v2457_v43 = vsel %vm7353_vm10, %v2454_v19, %v2456_v47  ;;  %v2458_v37 = vsel %vm7354_vm8, %v2456_v47, %v2454_v19  ;;  %vm7368_vm10 = vmmov %vm7367_vm3  ;;  %vm7369_vm8 = vcmp.lt.s32.totalorder %v4298_v5, 109  ;;  %v2125_v19 = vld [vmem:[#allocation3 + $0xc0] sm:$0xff] }
 0x881   :  { %v2444_v51 = vpop.permute.xlu1 %2443  ;;  %3911 = vmatprep.subr.msk.mxu0 %vm7355_vm5, %v2458_v37  ;;  %vm7370_vm5 = vmmov %vm7369_vm8  ;;  %v2129_v47 = vld [vmem:[#allocation3 + $0xe0] sm:$0xff] }
 0x882   :  { %3913 = vmatpush2.msk.msra.mxu0 %vm7356_vm6, %v2457_v43  ;;  %vm7371_vm6 = vmmov %vm7370_vm5 }
 0x883   :  { %v2446_v46 = vpop.permute.xlu0 %2445 }
 0x884   :  { %v2447_v17 = vsel %vm7357_vm7, %v2444_v51, %v2446_v46  ;;  %v2448_v30 = vsel %vm7358_vm2, %v2446_v46, %v2444_v51  ;;  %vm7372_vm7 = vmmov %vm7370_vm5  ;;  %vm7373_vm2 = vcmp.lt.s32.totalorder %v4298_v5, 126 }
 0x885   :  { %v2434_v57 = vpop.permute.xlu1 %2433  ;;  %3915 = vmatprep.subr.msk.mxu0 %vm7359_vm9, %v2448_v30  ;;  %vm7374_vm9 = vmmov %vm7373_vm2  ;;  %v2128_v30 = vld [vmem:[#allocation3 + $0xd8] sm:$0xff] }
 0x886   :  { %3917 = vmatpush2.msk.msra.mxu0 %vm7360_vm4, %v2447_v17  ;;  %vm7375_vm4 = vmmov %vm7373_vm2  ;;  %v2127_v17 = vld [vmem:[#allocation3 + $0xd0] sm:$0xff] }
 0x887   :  { %v2436_v25 = vpop.permute.xlu0 %2435 }
 0x888   :  { %v2437_v52 = vsel %vm7361_vm11, %v2434_v57, %v2436_v25  ;;  %v2438_v44 = vsel %vm7362_vm12, %v2436_v25, %v2434_v57  ;;  %vm7376_vm11 = vmmov %vm7373_vm2  ;;  %vm7377_vm12 = vcmp.lt.s32.totalorder %v4298_v5, 110  ;;  %v2132_v57 = vld [vmem:[#allocation3 + $0xf8] sm:$0xff]  ;;  %v2130_v25 = vld [vmem:[#allocation3 + $0xe8] sm:$0xff] }
 0x889   :  { %v2424_v26 = vpop.permute.xlu1 %2423  ;;  %3919 = vmatprep.subr.msk.mxu0 %vm7363_vm13, %v2438_v44  ;;  %vm7378_vm13 = vmmov %vm7377_vm12  ;;  %v2135_v44 = vld [vmem:[#allocation3 + $0x110] sm:$0xff] }
 0x88a   :  { %3921 = vmatpush2.msk.msra.mxu0 %vm7364_vm0, %v2437_v52  ;;  %vm7379_vm0 = vmmov %vm7377_vm12  ;;  %v2131_v52 = vld [vmem:[#allocation3 + $0xf0] sm:$0xff] }
 0x88b   :  { %v2426_v10 = vpop.permute.xlu0 %2425 }
 0x88c   :  { %v2427_v59 = vsel %vm7365_vm15, %v2424_v26, %v2426_v10  ;;  %v2428_v7 = vsel %vm7366_vm14, %v2426_v10, %v2424_v26  ;;  %vm7380_vm15 = vmmov %vm7379_vm0  ;;  %vm7381_vm14 = vcmp.lt.s32.totalorder %v4298_v5, 127  ;;  %v2134_v26 = vld [vmem:[#allocation3 + $0x108] sm:$0xff]  ;;  %v2136_v10 = vld [vmem:[#allocation3 + $0x118] sm:$0xff] }
 0x88d   :  { %v2584_v11 = vpop.permute.xlu1 %2583  ;;  %3923 = vmatprep.subr.msk.mxu0 %vm7367_vm3, %v2428_v7  ;;  %vm7382_vm3 = vmmov %vm7381_vm14  ;;  %v3146_v7 = vld [vmem:[%s6870_s3 + $0x8] sm:$0xff] }
 0x88e   :  { %3925 = vmatpush2.msk.msra.mxu0 %vm7368_vm10, %v2427_v59  ;;  %vm7383_vm10 = vmmov %vm7382_vm3  ;;  %v3147_v59 = vld [vmem:[%s6870_s3 + $0x10] sm:$0xff] }
 0x88f   :  { %v2586_v61 = vpop.permute.xlu0 %2585 }
 0x890   :  { %v2587_v22 = vsel %vm7369_vm8, %v2584_v11, %v2586_v61  ;;  %v2588_v23 = vsel %vm7370_vm5, %v2586_v61, %v2584_v11  ;;  %vm7384_vm8 = vmmov %vm7382_vm3  ;;  %vm7385_vm5 = vcmp.lt.s32.totalorder %v4298_v5, 111  ;;  %v3148_v11 = vld [vmem:[%s6870_s3 + $0x18] sm:$0xff]  ;;  %v4242_v61 = vmov 5  }
 0x891   :  { %v2414_v39 = vpop.permute.xlu1 %2413  ;;  %3947 = vmatprep.subr.msk.mxu1 %vm7371_vm6, %v2588_v23  ;;  %vm7386_vm6 = vmmov %vm7385_vm5  ;;  %4061 = vset.pattern.permute.xlu1 %v4242_v61 }
 0x892   :  { %3949 = vmatpush1.msk.msra.mxu1 %vm7372_vm7, %v2587_v22  ;;  %vm7387_vm7 = vmmov %vm7385_vm5 }
 0x893   :  { %v2416_v12 = vpop.permute.xlu0 %2415 }
 0x894   :  { %v2417_v15 = vsel %vm7373_vm2, %v2414_v39, %v2416_v12  ;;  %v2418_v36 = vsel %vm7374_vm9, %v2416_v12, %v2414_v39  ;;  %vm7388_vm2 = vmmov %vm7385_vm5  ;;  %vm7389_vm9 = vcmp.lt.s32.totalorder %v4298_v5, 112 }
 0x895   :  { %v2574_v45 = vpop.permute.xlu1 %2573  ;;  %3927 = vmatprep.subr.msk.mxu0 %vm7375_vm4, %v2418_v36  ;;  %vm7390_vm4 = vmmov %vm7389_vm9 }
 0x896   :  { %3929 = vmatpush2.msk.msra.mxu0 %vm7376_vm11, %v2417_v15  ;;  %vm7391_vm11 = vmmov %vm7390_vm4 }
 0x897   :  { %v2576_v1 = vpop.permute.xlu0 %2575 }
 0x898   :  { %v2577_v28 = vsel %vm7377_vm12, %v2574_v45, %v2576_v1  ;;  %v2578_v14 = vsel %vm7378_vm13, %v2576_v1, %v2574_v45  ;;  %vm7392_vm12 = vmmov %vm7390_vm4  ;;  %vm7393_vm13 = vcmp.lt.s32.totalorder %v4298_v5, 1 }
 0x899   :  { %v2404_v48 = vpop.permute.xlu1 %2403  ;;  %3951 = vmatprep.subr.msk.mxu1 %vm7379_vm0, %v2578_v14  ;;  %vm7394_vm0 = vmmov %vm7393_vm13 }
 0x89a   :  { %3953 = vmatpush1.msk.msra.mxu1 %vm7380_vm15, %v2577_v28  ;;  %vm7395_vm15 = vcmp.lt.s32.totalorder %v4298_v5, 113 }
 0x89b   :  { %v2406_v8 = vpop.permute.xlu0 %2405 }
 0x89c   :  { %v2407_v42 = vsel %vm7381_vm14, %v2404_v48, %v2406_v8  ;;  %v2408_v50 = vsel %vm7382_vm3, %v2406_v8, %v2404_v48  ;;  %vm7396_vm14 = vmmov %vm7395_vm15 }
 0x89d   :  { %v2564_v21 = vpop.permute.xlu1 %2563  ;;  %3931 = vmatprep.subr.msk.mxu0 %vm7383_vm10, %v2408_v50  ;;  %vm7397_vm3 = vmmov %vm7396_vm14 }
 0x89e   :  { %3933 = vmatpush2.msk.msra.mxu0 %vm7384_vm8, %v2407_v42  ;;  %vm7398_vm10 = vmmov %vm7397_vm3  ;;  %vm7399_vm8 = vcmp.lt.s32.totalorder %v4298_v5, 2 }
 0x89f   :  { %2835 = vmatprep.subr.mxu0 %v6148_v34  ;;  %v2566_v53 = vpop.permute.xlu0 %2565 }
 0x8a0   :  { %v2567_v49 = vsel %vm7385_vm5, %v2564_v21, %v2566_v53  ;;  %v2568_v18 = vsel %vm7386_vm6, %v2566_v53, %v2564_v21  ;;  %2836 = vmatpush2.msra.mxu0 %v6144_v4  ;;  %vm7401_vm5 = vnez %v7060_v33  ;;  %vm7402_vm6 = vcmp.lt.s32.totalorder %v4298_v5, 114 }
 0x8a1   :  { %v2554_v24 = vpop.permute.xlu1 %2553  ;;  %3955 = vmatprep.subr.msk.mxu1 %vm7387_vm7, %v2568_v18  ;;  %vm7403_vm7 = vmmov %vm7402_vm6 }
 0x8a2   :  { %3957 = vmatpush1.msk.msra.mxu1 %vm7388_vm2, %v2567_v49  ;;  %vm7404_vm2 = vmmov %vm7402_vm6 }
 0x8a3   :  { %v2556_v6 = vpop.permute.xlu0 %2555 }
 0x8a4   :  { %v2557_v34 = vsel %vm7389_vm9, %v2554_v24, %v2556_v6  ;;  %v2558_v55 = vsel %vm7390_vm4, %v2556_v6, %v2554_v24  ;;  %vm7405_vm9 = vmmov %vm7404_vm2  ;;  %vm7406_vm4 = vcmp.lt.s32.totalorder %v4298_v5, 3 }
 0x8a5   :  { %v2392_v58 = vpop.permute.xlu1 %2391  ;;  %3959 = vmatprep.subr.msk.mxu1 %vm7391_vm11, %v2558_v55  ;;  %vm7407_vm11 = vmmov %vm7406_vm4 }
 0x8a6   :  { %3961 = vmatpush1.msk.msra.mxu1 %vm7392_vm12, %v2557_v34  ;;  %vm7408_vm12 = vnez %v7062_v3  ;;  %v4168_v3 = vld [vmem:[%s6867_s0] sm:$0xff] }
 0x8a7   :  { %v2394_v4 = vpop.permute.xlu0 %2393 }
 0x8a8   :  { %v2395_v27 = vsel %vm7393_vm13, %v2392_v58, %v2394_v4  ;;  %v2396_v38 = vsel %vm7394_vm0, %v2394_v4, %v2392_v58  ;;  %vm7409_vm13 = vcmask 1043456   ;;  %vm7410_vm0 = vcmp.lt.s32.totalorder %v4298_v5, 115  ;;  %v2133_v5 = vld [vmem:[#allocation3 + $0x100] sm:$0xff] }
 0x8a9   :  { %v2544_v41 = vpop.permute.xlu1 %2543  ;;  %3935 = vmatprep.subr.msk.mxu0 %vm5080_vm1, %v2395_v27 }
 0x8aa   :  { %3937 = vmatpush2.msk.msra.mxu0 %vm5080_vm1, %v2396_v38  ;;  %vm7400_vm1 = vmmov %vm7399_vm8 }
 0x8ab   :  { %v2546_v60 = vpop.permute.xlu0 %2545 }
 0x8ac   :  { %v2547_v56 = vsel %vm7395_vm15, %v2544_v41, %v2546_v60  ;;  %v2548_v31 = vsel %vm7396_vm14, %v2546_v60, %v2544_v41  ;;  %vm7411_vm15 = vmmov %vm7410_vm0 }
 0x8ad   :  { %v2382_v35 = vpop.permute.xlu1 %2381  ;;  %3963 = vmatprep.subr.msk.mxu1 %vm7397_vm3, %v2548_v31  ;;  %vm7412_vm14 = vmmov %vm7409_vm13 }
 0x8ae   :  { %3965 = vmatpush1.msk.msra.mxu1 %vm7398_vm10, %v2547_v56  ;;  %vm7413_vm3 = vmmov %vm7410_vm0 }
 0x8af   :  { %v2384_v9 = vpop.permute.xlu0 %2383  ;;  %vm7414_vm10 = vmmov %vm7410_vm0 }
 0x8b0   :  { %v2385_v63 = vsel %vm7399_vm8, %v2382_v35, %v2384_v9  ;;  %v2386_v32 = vsel %vm7400_vm1, %v2384_v9, %v2382_v35  ;;  %vm7415_vm8 = vcmask 719872   ;;  %vm7416_vm1 = vmmov %vm7409_vm13 }
 0x8b1   :  { %v2534_v62 = vpop.permute.xlu1 %2533  ;;  %3939 = vmatprep.subr.msk.mxu0 %vm7401_vm5, %v2385_v63 }
 0x8b2   :  { %3941 = vmatpush2.msk.msra.mxu0 %vm7401_vm5, %v2386_v32  ;;  %vm7417_vm5 = vmmov %vm7416_vm1 }
 0x8b3   :  { %v2536_v13 = vpop.permute.xlu0 %2535 }
 0x8b4   :  { %v2537_v20 = vsel %vm7402_vm6, %v2534_v62, %v2536_v13  ;;  %v2538_v16 = vsel %vm7403_vm7, %v2536_v13, %v2534_v62  ;;  %vm7418_vm6 = vmmov %vm7415_vm8 }
 0x8b5   :  { %v2372_v40 = vpop.permute.xlu1 %2371  ;;  %3967 = vmatprep.subr.msk.mxu1 %vm7404_vm2, %v2538_v16  ;;  %vm7419_vm7 = vmmov %vm7418_vm6 }
 0x8b6   :  { %3969 = vmatpush1.msk.msra.mxu1 %vm7405_vm9, %v2537_v20  ;;  %vm7420_vm2 = vmmov %vm7418_vm6  ;;  %vm7421_vm9 = vcmask 31744  }
 0x8b7   :  { %v2374_v54 = vpop.permute.xlu0 %2373 }
 0x8b8   :  { %v2375_v29 = vsel %vm7406_vm4, %v2372_v40, %v2374_v54  ;;  %v2376_v33 = vsel %vm7407_vm11, %v2374_v54, %v2372_v40  ;;  %vm7422_vm4 = vmmov %vm7421_vm9 }
 0x8b9   :  { %3943 = vmatprep.subr.msk.mxu0 %vm7408_vm12, %v2375_v29  ;;  %v2524_v43 = vpop.permute.xlu1 %2523  ;;  %vm7423_vm11 = vmmov %vm7422_vm4 }
 0x8ba   :  { %3945 = vmatpush2.msk.msra.mxu0 %vm7408_vm12, %v2376_v33  ;;  %vm7424_vm12 = vmmov %vm7422_vm4 }
 0x8bb   :  { %v2526_v37 = vpop.permute.xlu0 %2525  ;;  %2844 = vmatmul.mubr.f32.vlgmr.msra.gmra.mxu0 %v2125_v19  ;;  %3502 = vmatprep.subr.msk.mxu0 %vm7409_vm13, %v4286_v2 }
 0x8bc   :  { %v2527_v51 = vsel %vm7410_vm0, %v2524_v43, %v2526_v37  ;;  %v2528_v46 = vsel %vm7411_vm15, %v2526_v37, %v2524_v43  ;;  %2849 = vmatprep.mubr.f32.mxu0 %v2129_v47  ;;  %3503 = vmatpush1.msk.msra.mxu0 %vm7412_vm14, %v4168_v3  ;;  %v6698_v47 = vld [vmem:[%s6871_s4 + $0x18] sm:$0xff]  ;;  %v4170_v43 = vld [vmem:[%s6871_s4 + $0x8] sm:$0xff]  ;;  %v4243_v37 = vmov 6  }
 0x8bd   :  { %3971 = vmatprep.subr.msk.mxu1 %vm7413_vm3, %v2528_v46  ;;  %v4244_v46 = vmov 7  }
 0x8be   :  { %3973 = vmatpush1.msk.msra.mxu1 %vm7414_vm10, %v2527_v51  ;;  %v4171_v51 = vld [vmem:[%s6871_s4] sm:$0xff] }
 0x8bf   :  { %3490 = vmatmul.mubr.msk.f32.vlgmr.msra.gmra.mxu1 %vm7415_vm8, %v2127_v17  ;;  %2850 = vmatmul.mubr.f32.gmra.mxu0 %v2128_v30  ;;  %v4172_v17 = vld [vmem:[%s6871_s4 + $0x10] sm:$0xff] }
 0x8c0   :  { %2938 = vmatprep.mubr.f32.mxu1 %v4198_v0  ;;  %3974 = vmatprep.subr.msk.mxu1 %vm7416_vm1, %v4286_v2  ;;  %v3145_v2 = vld [vmem:[%s6870_s3] sm:$0xff] }
 0x8c1   :  { %2855 = vmatprep.mubr.f32.mxu0 %v2132_v57  ;;  %3975 = vmatpush1.msk.msra.mxu1 %vm7417_vm5, %v4168_v3 }
 0x8c3   :  { %3491 = vmatmul.mubr.msk.f32.gmra.mxu1 %vm7418_vm6, %v2130_v25  ;;  %2856 = vmatmul.mubr.f32.gmra.mxu0 %v2131_v52 }
 0x8c4   :  { %2944 = vmatprep.mubr.f32.mxu1 %v4198_v0  ;;  %2861 = vmatprep.mubr.f32.mxu0 %v2135_v44 }
 0x8c7   :  { %3492 = vmatmul.mubr.msk.f32.gmra.mxu1 %vm7419_vm7, %v2133_v5  ;;  %2862 = vmatmul.mubr.f32.gmra.mxu0 %v2134_v26 }
 0x8c8   :  { %2950 = vmatprep.mubr.f32.mxu1 %v4198_v0  ;;  %3225 = vmatprep.mubr.f32.mxu0 %v4198_v0 }
 0x8cb   :  { %3493 = vmatmul.mubr.msk.f32.gmra.mxu1 %vm7420_vm2, %v2136_v10  ;;  %3504 = vmatmul.mubr.msk.f32.vlgmr.msra.gmra.mxu0 %vm7421_vm9, %v3145_v2  ;;  %v6722_v10 = vpop.permute.xlu0 %3034  ;;  %v6724_v2 = vpop.permute.xlu1 %3038 }
 0x8cc   :  { %3237 = vmatprep.mubr.f32.mxu1 %v4198_v0  ;;  %3231 = vmatprep.mubr.f32.mxu0 %v4198_v0 }
 0x8cf   :  { %3506 = vmatmul.mubr.msk.f32.vlgmr.msra.gmra.mxu1 %vm7422_vm4, %v3147_v59  ;;  %3505 = vmatmul.mubr.msk.f32.gmra.mxu0 %vm7423_vm11, %v3146_v7  ;;  %v6726_v59 = vpop.permute.xlu0 %3042 }
 0x8d0   :  { %3243 = vmatprep.mubr.f32.mxu1 %v4198_v0 }
 0x8d3   :  { %3507 = vmatmul.mubr.msk.f32.gmra.mxu1 %vm7424_vm12, %v3148_v11 }
 0x97b   :  { %v2845_v22 = vpop.f32.mrf.mxu0 }
 0x97d   :  { %v2847_v23 = vpop.f32.mrf.mxu0 }
 0x97f   :  { %v2934_v39 = vpop.f32.mrf.mxu1  ;;  %v2851_v12 = vpop.f32.mrf.mxu0 }
 0x980   :  { %v6645_v15 = vadd.f32 %v2934_v39, %v2845_v22 }
 0x981   :  { %v2936_v36 = vpop.f32.mrf.mxu1  ;;  %v2853_v45 = vpop.f32.mrf.mxu0 }
 0x982   :  { %v6647_v1 = vadd.f32 %v2936_v36, %v2847_v23  ;;  %v2969_v14 = vmul.f32 %v6645_v15, %v6645_v15 }
 0x983   :  { %v2940_v28 = vpop.f32.mrf.mxu1  ;;  %v2857_v0 = vpop.f32.mrf.mxu0 }
 0x984   :  { %v2970_v48 = vmul.f32 %v6647_v1, %v6647_v1  ;;  %v6655_v49 = vadd.f32 %v2940_v28, %v2851_v12  ;;  %v2957_v29 = vadd.f32 %v6647_v1, %v6645_v15 }
 0x985   :  { %v2942_v8 = vpop.f32.mrf.mxu1  ;;  %v2859_v53 = vpop.f32.mrf.mxu0 }
 0x986   :  { %v6653_v42 = vadd.f32 %v2942_v8, %v2853_v45  ;;  %v2977_v50 = vadd.f32 %v2970_v48, %v2969_v14  ;;  %v2971_v33 = vmul.f32 %v6655_v49, %v6655_v49 }
 0x987   :  { %v2946_v21 = vpop.f32.mrf.mxu1  ;;  %v2863_v30 = vpop.f32.mrf.mxu0 }
 0x988   :  { %2978 = vadd.xlane.f32.xlu0 %v2977_v50  ;;  %v2960_v6 = vadd.f32 %v6653_v42, %v6655_v49  ;;  %v6661_v55 = vadd.f32 %v2946_v21, %v2857_v0  ;;  %v2972_v54 = vmul.f32 %v6653_v42, %v6653_v42 }
 0x989   :  { %v2948_v18 = vpop.f32.mrf.mxu1  ;;  %v2865_v3 = vpop.f32.mrf.mxu0 }
 0x98a   :  { %v6657_v24 = vadd.f32 %v2948_v18, %v2859_v53  ;;  %v2973_v41 = vmul.f32 %v6661_v55, %v6661_v55  ;;  %v2980_v19 = vadd.f32 %v2972_v54, %v2971_v33 }
 0x98b   :  { %v2952_v34 = vpop.f32.mrf.mxu1  ;;  %v6732_v22 = vpop.f32.mrf.mxu0 }
 0x98c   :  { %2961 = vadd.xlane.f32.xlu0 %v2960_v6  ;;  %v2974_v4 = vmul.f32 %v6657_v24, %v6657_v24  ;;  %v2963_v27 = vadd.f32 %v6657_v24, %v6661_v55  ;;  %v6714_v25 = vadd.f32 %v2952_v34, %v2863_v30  ;;  %v3262_v45 = vmul.f32 %v6732_v22, %v6732_v22 }
 0x98d   :  { %v2954_v58 = vpop.f32.mrf.mxu1  ;;  %v6734_v12 = vpop.f32.mrf.mxu0 }
 0x98e   :  { %v2983_v35 = vadd.f32 %v2974_v4, %v2973_v41  ;;  %v6712_v57 = vadd.f32 %v2954_v58, %v2865_v3  ;;  %v2975_v5 = vmul.f32 %v6714_v25, %v6714_v25  ;;  %v3250_v0 = vadd.f32 %v6734_v12, %v6732_v22 }
 0x98f   :  { %v6667_v38 = vpop.f32.mrf.mxu1  ;;  %v3263_v14 = vmul.f32 %v6734_v12, %v6734_v12  ;;  %v6742_v50 = vpop.f32.mrf.mxu0 }
 0x990   :  { %2964 = vadd.xlane.f32.xlu0 %v2963_v27  ;;  %v3266_v63 = vmul.f32 %v6667_v38, %v6667_v38  ;;  %v2976_v52 = vmul.f32 %v6712_v57, %v6712_v57  ;;  %v2966_v44 = vadd.f32 %v6712_v57, %v6714_v25 }
 0x991   :  { %v6671_v60 = vpop.f32.mrf.mxu1  ;;  %v3270_v4 = vadd.f32 %v3263_v14, %v3262_v45  ;;  %v6744_v27 = vpop.f32.mrf.mxu0 }
 0x992   :  { %v3256_v56 = vadd.f32 %v6671_v60, %v6667_v38  ;;  %v3267_v31 = vmul.f32 %v6671_v60, %v6671_v60  ;;  %v2986_v26 = vadd.f32 %v2976_v52, %v2975_v5 }
 0x993   :  { %v6677_v9 = vpop.f32.mrf.mxu1 }
 0x994   :  { %3257 = vadd.xlane.f32.xlu1 %v3256_v56  ;;  %2984 = vadd.xlane.f32.xlu0 %v2983_v35  ;;  %v3276_v32 = vadd.f32 %v3267_v31, %v3266_v63  ;;  %v3268_v13 = vmul.f32 %v6677_v9, %v6677_v9  ;;  %v3264_v35 = vmul.f32 %v6742_v50, %v6742_v50 }
 0x995   :  { %v6681_v62 = vpop.f32.mrf.mxu1  ;;  %v3253_v63 = vadd.f32 %v6744_v27, %v6742_v50 }
 0x996   :  { %v3259_v20 = vadd.f32 %v6681_v62, %v6677_v9  ;;  %v3269_v16 = vmul.f32 %v6681_v62, %v6681_v62 }
 0x998   :  { %3277 = vadd.xlane.f32.xlu1 %v3276_v32  ;;  %v3279_v40 = vadd.f32 %v3269_v16, %v3268_v13  ;;  %v3265_v32 = vmul.f32 %v6744_v27, %v6744_v27 }
 0x99c   :  { %3260 = vadd.xlane.f32.xlu1 %v3259_v20 }
 0x9a0   :  { %3280 = vadd.xlane.f32.xlu1 %v3279_v40 }
 0x9a4   :  { %2958 = vadd.xlane.f32.xlu1 %v2957_v29 }
 0x9a8   :  { %2981 = vadd.xlane.f32.xlu1 %v2980_v19 }
 0x9aa   :  { %3046 = vperm.xlu0 %4059, %v6698_v47  }
 0x9ae   :  { %4062 = vset.pattern.permute.xlu0 %v4242_v61 }
 0x9af   :  { %3062 = vperm.xlu0 %4062, %v4170_v43  }
 0x9b3   :  { %4063 = vset.pattern.permute.xlu0 %v4243_v37 }
 0x9b4   :  { %3327 = vperm.xlu0 %4063, %v4171_v51  }
 0x9b8   :  { %3339 = vperm.xlu0 %4063, %v6698_v47  }
 0x9b9   :  { %3058 = vperm.xlu1 %4061, %v4171_v51  }
 0x9bc   :  { %4066 = vset.pattern.permute.xlu0 %v4244_v46 }
 0x9bd   :  { %3066 = vperm.xlu1 %4061, %v4172_v17   ;;  %3355 = vperm.xlu0 %4066, %v4170_v43  }
 0x9c1   :  { %3070 = vperm.xlu1 %4061, %v6698_v47  }
 0x9c5   :  { %4064 = vset.pattern.permute.xlu1 %v4243_v37  ;;  %v3273_v37 = vadd.f32 %v3265_v32, %v3264_v35 }
 0x9c6   :  { %3331 = vperm.xlu1 %4064, %v4170_v43  }
 0x9ca   :  { %3335 = vperm.xlu1 %4064, %v4172_v17  }
 0x9ce   :  { %4065 = vset.pattern.permute.xlu1 %v4244_v46 }
 0x9cf   :  { %3351 = vperm.xlu1 %4065, %v4171_v51  }
 0x9f3   :  { %2967 = vadd.xlane.f32.xlu1 %v2966_v44 }
 0x9f7   :  { %2987 = vadd.xlane.f32.xlu1 %v2986_v26 }
 0xa08   :  { %3359 = vperm.xlu1 %4065, %v4172_v17  }
 0xa11   :  { %v2979_v61 = vpop.xlane.xlu0 %2978 }
 0xa12   :  { %v2993_v41 = vmul.f32 0.00390625, %v2979_v61 }
 0xa15   :  { %v2962_v36 = vpop.xlane.xlu0 %2961 }
 0xa16   :  { %v2990_v18 = vmul.f32 0.00390625, %v2962_v36 }
 0xa18   :  { %v2998_v40 = vmul.f32 %v2990_v18, %v2990_v18  ;;  %v3011_v14 = vsub.f32 %v6655_v49, %v2990_v18 }
 0xa19   :  { %v2965_v6 = vpop.xlane.xlu0 %2964 }
 0xa1a   :  { %v2991_v19 = vmul.f32 0.00390625, %v2965_v6 }
 0xa1c   :  { %v2999_v30 = vmul.f32 %v2991_v19, %v2991_v19 }
 0xa1d   :  { %v6728_v7 = vpop.xlane.xlu1 %3257  ;;  %v2985_v54 = vpop.xlane.xlu0 %2984 }
 0xa1e   :  { %v2995_v46 = vmul.f32 0.00390625, %v2985_v54 }
 0xa20   :  { %v3003_v3 = vsub.f32 %v2995_v46, %v2999_v30 }
 0xa21   :  { %v6730_v11 = vpop.xlane.xlu1 %3277 }
 0xa22   :  { %v3007_v26 = vmax.f32 %v3003_v3, 0.0 }
 0xa24   :  { %v3019_v36 = vadd.f32 1e-05, %v3007_v26 }
 0xa25   :  { %v3261_v23 = vpop.xlane.xlu1 %3260 }
 0xa26   :  { %v3285_v39 = vmul.f32 0.00390625, %v3261_v23 }
 0xa28   :  { %v3293_v48 = vmul.f32 %v3285_v39, %v3285_v39  ;;  %v3308_v52 = vsub.f32 %v6677_v9, %v3285_v39  ;;  %v3309_v44 = vsub.f32 %v6681_v62, %v3285_v39 }
 0xa29   :  { %v3281_v28 = vpop.xlane.xlu1 %3280 }
 0xa2a   :  { %v3289_v8 = vmul.f32 0.00390625, %v3281_v28 }
 0xa2c   :  { %v3297_v21 = vsub.f32 %v3289_v8, %v3293_v48  ;;  %3251 = vadd.xlane.f32.xlu1 %v3250_v0  ;;  %v3012_v48 = vsub.f32 %v6653_v42, %v2990_v18 }
 0xa2d   :  { %v2959_v53 = vpop.xlane.xlu1 %2958 }
 0xa2e   :  { %v3301_v34 = vmax.f32 %v3297_v21, 0.0  ;;  %v2989_v58 = vmul.f32 0.00390625, %v2959_v53 }
 0xa30   :  { %v3313_v56 = vadd.f32 1e-05, %v3301_v34  ;;  %v2997_v31 = vmul.f32 %v2989_v58, %v2989_v58  ;;  %3271 = vadd.xlane.f32.xlu1 %v3270_v4  ;;  %v3009_v45 = vsub.f32 %v6645_v15, %v2989_v58  ;;  %v3010_v28 = vsub.f32 %v6647_v1, %v2989_v58 }
 0xa31   :  { %v2982_v13 = vpop.xlane.xlu1 %2981  ;;  %v3013_v58 = vsub.f32 %v6661_v55, %v2991_v19 }
 0xa32   :  { %4116 = vrsqrt.f32 %v3313_v56  ;;  %v3001_v20 = vsub.f32 %v2993_v41, %v2997_v31  ;;  %v2994_v16 = vmul.f32 0.00390625, %v2982_v13  ;;  %v3288_v13 = vmul.f32 0.00390625, %v6730_v11 }
 0xa34   :  { %v3005_v29 = vmax.f32 %v3001_v20, 0.0  ;;  %v3002_v33 = vsub.f32 %v2994_v16, %v2998_v40  ;;  %3254 = vadd.xlane.f32.xlu1 %v3253_v63  ;;  %v3284_v63 = vmul.f32 0.00390625, %v6728_v7 }
 0xa35   :  { %v3059_v34 = vpop.permute.xlu1 %3058 }
 0xa36   :  { %v3017_v43 = vadd.f32 1e-05, %v3005_v29  ;;  %v3006_v51 = vmax.f32 %v3002_v33, 0.0  ;;  %v3292_v20 = vmul.f32 %v3284_v63, %v3284_v63 }
 0xa38   :  { %4118 = vrsqrt.f32 %v3017_v43  ;;  %v3018_v17 = vadd.f32 1e-05, %v3006_v51  ;;  %3274 = vadd.xlane.f32.xlu1 %v3273_v37  ;;  %v3296_v40 = vsub.f32 %v3288_v13, %v3292_v20  ;;  %v3047_v13 = vpop.permute.xlu0 %3046 }
 0xa39   :  { %v3067_v56 = vpop.permute.xlu1 %3066 }
 0xa3a   :  { %4120 = vrsqrt.f32 %v3018_v17  ;;  %v3300_v29 = vmax.f32 %v3296_v40, 0.0 }
 0xa3b   :  { %4122 = vrsqrt.f32 %v3019_v36 }
 0xa3c   :  { %v3312_v33 = vadd.f32 1e-05, %v3300_v29 }
 0xa3f   :  { %v4117_v5 = vpop.eup %4116 }
 0xa40   :  { %v6754_v61 = vmul.f32 %v4117_v5, %v3308_v52  ;;  %v6756_v23 = vmul.f32 %v4117_v5, %v3309_v44  ;;  %v3306_v52 = vsub.f32 %v6667_v38, %v3284_v63  ;;  %v3307_v44 = vsub.f32 %v6671_v60, %v3284_v63 }
 0xa45   :  { %v4119_v0 = vpop.eup %4118 }
 0xa46   :  { %v3025_v8 = vmul.f32 %v4119_v0, %v3009_v45  ;;  %v3026_v9 = vmul.f32 %v4119_v0, %v3010_v28 }
 0xa47   :  { %v4121_v21 = vpop.eup %4120 }
 0xa48   :  { %v3049_v62 = vmul.f32 %v6722_v10, %v3025_v8  ;;  %v3050_v39 = vmul.f32 %v6722_v10, %v3026_v9  ;;  %v3027_v53 = vmul.f32 %v4121_v21, %v3011_v14  ;;  %v3028_v6 = vmul.f32 %v4121_v21, %v3012_v48  ;;  %v4123_v18 = vpop.eup %4122 }
 0xa49   :  { %3363 = vperm.xlu1 %4065, %v6698_v47   ;;  %v3014_v10 = vsub.f32 %v6657_v24, %v2991_v19  ;;  %v3029_v4 = vmul.f32 %v4123_v18, %v3013_v58  ;;  %v6781_v24 = vpop.permute.xlu1 %3070 }
 0xa4a   :  { %v6765_v15 = vadd.f32 %v3059_v34, %v3049_v62  ;;  %v6767_v1 = vadd.f32 %v3059_v34, %v3050_v39  ;;  %v6770_v49 = vmul.f32 %v6724_v2, %v3027_v53  ;;  %v6773_v42 = vmul.f32 %v6724_v2, %v3028_v6 }
 0xa4b   :  { %v3030_v41 = vmul.f32 %v4123_v18, %v3014_v10  ;;  %v3053_v47 = vmul.f32 %v6726_v59, %v3029_v4 }
 0xa4c   :  { %vm3121_vm8 = vcmp.gt.f32.partialorder %v6765_v15, 0.0  ;;  %vm3122_vm1 = vcmp.gt.f32.partialorder %v6767_v1, 0.0 }
 0xa4d   :  { %v3054_v31 = vmul.f32 %v6726_v59, %v3030_v41  ;;  %v3077_v35 = vadd.f32 %v3067_v56, %v3053_v47  ;;  %v6783_v19 = vpop.permute.xlu1 %3331 }
 0xa4f   :  { %v3078_v32 = vadd.f32 %v3067_v56, %v3054_v31  ;;  %v3085_v2 = vmin.f32 %v3077_v35, 0.0  ;;  %vm3125_vm13 = vcmp.gt.f32.partialorder %v3077_v35, 0.0 }
 0xa51   :  { %v3086_v16 = vmin.f32 %v3078_v32, 0.0  ;;  %v3097_v55 = vmul.f32 1.442695, %v3085_v2  ;;  %v3336_v59 = vpop.permute.xlu1 %3335  ;;  %vm3126_vm0 = vcmp.gt.f32.partialorder %v3078_v32, 0.0 }
 0xa53   :  { %v3099_v54 = vmul.f32 1.442695, %v3086_v16  ;;  %4124 = vpow2.f32 %v3097_v55 }
 0xa55   :  { %4126 = vpow2.f32 %v3099_v54  ;;  %v6785_v37 = vpop.permute.xlu1 %3351 }
 0xa56   :  { %4128 = vrsqrt.f32 %v3312_v33 }
 0xa60   :  { %v4125_v7 = vpop.eup %4124 }
 0xa61   :  { %v3498_v11 = vadd.f32 -1.0, %v4125_v7 }
 0xa62   :  { %v4127_v43 = vpop.eup %4126 }
 0xa63   :  { %v3499_v51 = vadd.f32 -1.0, %v4127_v43  ;;  %v4129_v17 = vpop.eup %4128  ;;  %v3117_v3 = vmul.f32 1.6732632, %v3498_v11 }
 0xa64   :  { %v3322_v26 = vmul.f32 %v4129_v17, %v3306_v52  ;;  %v3323_v36 = vmul.f32 %v4129_v17, %v3307_v44  ;;  %v3063_v52 = vpop.permute.xlu0 %3062 }
 0xa65   :  { %v3118_v5 = vmul.f32 1.6732632, %v3499_v51  ;;  %v3133_v14 = vsel %vm3125_vm13, %v3077_v35, %v3117_v3  ;;  %v3081_v3 = vmin.f32 %v6765_v15, 0.0 }
 0xa66   :  { %v3346_v8 = vmul.f32 %v3336_v59, %v3322_v26  ;;  %v3347_v9 = vmul.f32 %v3336_v59, %v3323_v36  ;;  %v3141_v39 = vmul.f32 1.050701, %v3133_v14  ;;  %v6805_v36 = vadd.f32 %v3063_v52, %v6773_v42 }
 0xa67   :  { %v3134_v48 = vsel %vm3126_vm0, %v3078_v32, %v3118_v5  ;;  %v3089_v44 = vmul.f32 1.442695, %v3081_v3  ;;  %v6802_v5 = vadd.f32 %v3063_v52, %v6770_v49 }
 0xa68   :  { %v3142_v6 = vmul.f32 1.050701, %v3134_v48  ;;  %vm3124_vm6 = vcmp.gt.f32.partialorder %v6805_v36, 0.0 }
 0xa69   :  { %v3083_v48 = vmin.f32 %v6802_v5, 0.0  ;;  %vm3123_vm5 = vcmp.gt.f32.partialorder %v6802_v5, 0.0 }
 0xa7c   :  { %v2968_v46 = vpop.xlane.xlu1 %2967 }
 0xa7d   :  { %v2992_v30 = vmul.f32 0.00390625, %v2968_v46 }
 0xa7f   :  { %v3000_v28 = vmul.f32 %v2992_v30, %v2992_v30  ;;  %v3015_v47 = vsub.f32 %v6714_v25, %v2992_v30  ;;  %v3016_v31 = vsub.f32 %v6712_v57, %v2992_v30 }
 0xa80   :  { %v2988_v45 = vpop.xlane.xlu1 %2987 }
 0xa81   :  { %v2996_v0 = vmul.f32 0.00390625, %v2988_v45 }
 0xa83   :  { %v3004_v21 = vsub.f32 %v2996_v0, %v3000_v28 }
 0xa84   :  { %v3360_v62 = vpop.permute.xlu1 %3359 }
 0xa85   :  { %v3008_v53 = vmax.f32 %v3004_v21, 0.0  ;;  %v3370_v38 = vadd.f32 %v3360_v62, %v3346_v8  ;;  %v3371_v34 = vadd.f32 %v3360_v62, %v3347_v9  ;;  %v3084_v8 = vmin.f32 %v6805_v36, 0.0 }
 0xa87   :  { %v3020_v60 = vadd.f32 1e-05, %v3008_v53  ;;  %v3378_v18 = vadd.f32 %v3370_v38, %v3141_v39  ;;  %v3379_v58 = vadd.f32 %v3371_v34, %v3142_v6  ;;  %v3328_v39 = vpop.permute.xlu0 %3327  ;;  %v3093_v53 = vmul.f32 1.442695, %v3083_v48 }
 0xa88   :  { %v3095_v38 = vmul.f32 1.442695, %v3084_v8 }
 0xa89   :  { %4130 = vrsqrt.f32 %v3020_v60  ;;  %v3386_v10 = vmin.f32 %v3378_v18, 0.0  ;;  %v3387_v4 = vmin.f32 %v3379_v58, 0.0  ;;  %vm3426_vm15 = vcmp.gt.f32.partialorder %v3378_v18, 0.0 }
 0xa8a   :  { %vm3427_vm14 = vcmp.gt.f32.partialorder %v3379_v58, 0.0 }
 0xa8b   :  { %v3398_v41 = vmul.f32 1.442695, %v3386_v10  ;;  %v3400_v56 = vmul.f32 1.442695, %v3387_v4 }
 0xa8d   :  { %4132 = vpow2.f32 %v3398_v41  ;;  %v3340_v41 = vpop.permute.xlu0 %3339 }
 0xa8e   :  { %4134 = vpow2.f32 %v3400_v56 }
 0xa96   :  { %v4131_v35 = vpop.eup %4130 }
 0xa97   :  { %v3031_v63 = vmul.f32 %v4131_v35, %v3015_v47  ;;  %v3032_v32 = vmul.f32 %v4131_v35, %v3016_v31 }
 0xa99   :  { %v3055_v20 = vmul.f32 %v3047_v13, %v3031_v63  ;;  %v3056_v55 = vmul.f32 %v3047_v13, %v3032_v32  ;;  %v3348_v32 = vmul.f32 %v3340_v41, %v6754_v61  ;;  %v3349_v13 = vmul.f32 %v3340_v41, %v6756_v23 }
 0xa9a   :  { %v4133_v2 = vpop.eup %4132 }
 0xa9b   :  { %v4135_v16 = vpop.eup %4134  ;;  %v3512_v40 = vadd.f32 -1.0, %v4133_v2  ;;  %v3079_v59 = vadd.f32 %v6781_v24, %v3055_v20  ;;  %v3080_v25 = vadd.f32 %v6781_v24, %v3056_v55  ;;  %v3082_v24 = vmin.f32 %v6767_v1, 0.0 }
 0xa9c   :  { %v3513_v54 = vadd.f32 -1.0, %v4135_v16 }
 0xa9d   :  { %v3418_v29 = vmul.f32 1.6732632, %v3512_v40  ;;  %v3087_v51 = vmin.f32 %v3079_v59, 0.0  ;;  %v3088_v46 = vmin.f32 %v3080_v25, 0.0  ;;  %v3091_v26 = vmul.f32 1.442695, %v3082_v24 }
 0xa9e   :  { %v3419_v33 = vmul.f32 1.6732632, %v3513_v54  ;;  %vm3127_vm3 = vcmp.gt.f32.partialorder %v3079_v59, 0.0  ;;  %vm3128_vm10 = vcmp.gt.f32.partialorder %v3080_v25, 0.0 }
 0xa9f   :  { %v3434_v7 = vsel %vm3426_vm15, %v3378_v18, %v3418_v29  ;;  %v3101_v17 = vmul.f32 1.442695, %v3087_v51  ;;  %v3103_v30 = vmul.f32 1.442695, %v3088_v46 }
 0xaa0   :  { %v3435_v57 = vsel %vm3427_vm14, %v3379_v58, %v3419_v33  ;;  %v3442_v43 = vmul.f32 1.050701, %v3434_v7 }
 0xaa1   :  { %v3443_v11 = vmul.f32 1.050701, %v3435_v57  ;;  %4136 = vpow2.f32 %v3101_v17 }
 0xaa2   :  { %3450 = vst [vmem:[%s6872_s5 + $0x20] sm:$0xff] %v3442_v43  ;;  %4138 = vpow2.f32 %v3103_v30 }
 0xaa3   :  { %3451 = vst [vmem:[%s6872_s5 + $0x28] sm:$0xff] %v3443_v11  ;;  %4140 = vpow2.f32 %v3089_v44 }
 0xaa4   :  { %4142 = vpow2.f32 %v3091_v26 }
 0xaa5   :  { %4144 = vpow2.f32 %v3093_v53 }
 0xaa6   :  { %4146 = vpow2.f32 %v3095_v38 }
 0xaae   :  { %v4137_v0 = vpop.eup %4136 }
 0xaaf   :  { %v4139_v14 = vpop.eup %4138  ;;  %v3500_v62 = vadd.f32 -1.0, %v4137_v0 }
 0xab0   :  { %v3501_v42 = vadd.f32 -1.0, %v4139_v14  ;;  %v4141_v20 = vpop.eup %4140 }
 0xab1   :  { %v3119_v58 = vmul.f32 1.6732632, %v3500_v62  ;;  %v4143_v55 = vpop.eup %4142 }
 0xab2   :  { %v3120_v10 = vmul.f32 1.6732632, %v3501_v42  ;;  %v4145_v17 = vpop.eup %4144 }
 0xab3   :  { %v3135_v35 = vsel %vm3127_vm3, %v3079_v59, %v3119_v58  ;;  %v3494_v59 = vadd.f32 -1.0, %v4141_v20  ;;  %v4147_v24 = vpop.eup %4146  ;;  %v3496_v8 = vadd.f32 -1.0, %v4145_v17 }
 0xab4   :  { %v3136_v63 = vsel %vm3128_vm10, %v3080_v25, %v3120_v10  ;;  %v3143_v40 = vmul.f32 1.050701, %v3135_v35  ;;  %v3495_v25 = vadd.f32 -1.0, %v4143_v55 }
 0xab5   :  { %v3252_v45 = vpop.xlane.xlu1 %3251  ;;  %v3144_v29 = vmul.f32 1.050701, %v3136_v63  ;;  %v3113_v30 = vmul.f32 1.6732632, %v3494_v59  ;;  %v3115_v42 = vmul.f32 1.6732632, %v3496_v8 }
 0xab6   :  { %v6807_v28 = vmul.f32 0.00390625, %v3252_v45  ;;  %v3114_v3 = vmul.f32 1.6732632, %v3495_v25 }
 0xab7   :  { %v3129_v14 = vsel %vm3121_vm8, %v6765_v15, %v3113_v30  ;;  %v3131_v58 = vsel %vm3123_vm5, %v6802_v5, %v3115_v42 }
 0xab8   :  { %v3290_v49 = vmul.f32 %v6807_v28, %v6807_v28  ;;  %v3302_v52 = vsub.f32 %v6732_v22, %v6807_v28  ;;  %v3303_v44 = vsub.f32 %v6734_v12, %v6807_v28  ;;  %v3130_v48 = vsel %vm3122_vm1, %v6767_v1, %v3114_v3 }
 0xab9   :  { %v3272_v9 = vpop.xlane.xlu1 %3271  ;;  %v3138_v62 = vmul.f32 1.050701, %v3130_v48  ;;  %v3139_v63 = vmul.f32 1.050701, %v3131_v58 }
 0xaba   :  { %v3286_v21 = vmul.f32 0.00390625, %v3272_v9  ;;  %v3497_v9 = vadd.f32 -1.0, %v4147_v24 }
 0xabc   :  { %v3294_v6 = vsub.f32 %v3286_v21, %v3290_v49  ;;  %v3137_v21 = vmul.f32 1.050701, %v3129_v14  ;;  %v3116_v53 = vmul.f32 1.6732632, %v3497_v9 }
 0xabd   :  { %v3255_v34 = vpop.xlane.xlu1 %3254 }
 0xabe   :  { %v3298_v60 = vmax.f32 %v3294_v6, 0.0  ;;  %v6813_v18 = vmul.f32 0.00390625, %v3255_v34 }
 0xac0   :  { %v3310_v4 = vadd.f32 1e-05, %v3298_v60  ;;  %v3291_v47 = vmul.f32 %v6813_v18, %v6813_v18  ;;  %v3304_v15 = vsub.f32 %v6742_v50, %v6813_v18  ;;  %v3305_v1 = vsub.f32 %v6744_v27, %v6813_v18 }
 0xac1   :  { %v3275_v56 = vpop.xlane.xlu1 %3274 }
 0xac2   :  { %4148 = vrsqrt.f32 %v3310_v4  ;;  %v3287_v31 = vmul.f32 0.00390625, %v3275_v56 }
 0xac4   :  { %v3295_v2 = vsub.f32 %v3287_v31, %v3291_v47  ;;  %v3356_v47 = vpop.permute.xlu0 %3355 }
 0xac5   :  { %v3364_v16 = vpop.permute.xlu1 %3363 }
 0xac6   :  { %v3299_v54 = vmax.f32 %v3295_v2, 0.0  ;;  %v3372_v33 = vadd.f32 %v3364_v16, %v3348_v32  ;;  %v3373_v7 = vadd.f32 %v3364_v16, %v3349_v13 }
 0xac8   :  { %v3311_v57 = vadd.f32 1e-05, %v3299_v54  ;;  %v6819_v43 = vadd.f32 %v3372_v33, %v3143_v40  ;;  %v6821_v11 = vadd.f32 %v3373_v7, %v3144_v29 }
 0xaca   :  { %4150 = vrsqrt.f32 %v3311_v57  ;;  %v3388_v61 = vmin.f32 %v6819_v43, 0.0  ;;  %v3389_v23 = vmin.f32 %v6821_v11, 0.0  ;;  %vm3428_vm7 = vcmp.gt.f32.partialorder %v6819_v43, 0.0 }
 0xacb   :  { %vm3429_vm2 = vcmp.gt.f32.partialorder %v6821_v11, 0.0 }
 0xacc   :  { %v3402_v51 = vmul.f32 1.442695, %v3388_v61  ;;  %v3404_v46 = vmul.f32 1.442695, %v3389_v23 }
 0xace   :  { %4152 = vpow2.f32 %v3402_v51 }
 0xacf   :  { %v4149_v26 = vpop.eup %4148  ;;  %4154 = vpow2.f32 %v3404_v46 }
 0xad0   :  { %v3318_v45 = vmul.f32 %v4149_v26, %v3302_v52  ;;  %v3319_v0 = vmul.f32 %v4149_v26, %v3303_v44 }
 0xad2   :  { %v3342_v49 = vmul.f32 %v3328_v39, %v3318_v45  ;;  %v3343_v22 = vmul.f32 %v3328_v39, %v3319_v0 }
 0xad4   :  { %v3366_v12 = vadd.f32 %v6785_v37, %v3342_v49  ;;  %v3367_v28 = vadd.f32 %v6785_v37, %v3343_v22  ;;  %v3132_v37 = vsel %vm3124_vm6, %v6805_v36, %v3116_v53 }
 0xad5   :  { %v3140_v32 = vmul.f32 1.050701, %v3132_v37 }
 0xad6   :  { %v3374_v6 = vadd.f32 %v3366_v12, %v3137_v21  ;;  %v3375_v38 = vadd.f32 %v3367_v28, %v3138_v62 }
 0xad7   :  { %v4151_v34 = vpop.eup %4150 }
 0xad8   :  { %v3382_v39 = vmin.f32 %v3374_v6, 0.0  ;;  %v3383_v60 = vmin.f32 %v3375_v38, 0.0  ;;  %v3320_v10 = vmul.f32 %v4151_v34, %v3304_v15  ;;  %v3321_v4 = vmul.f32 %v4151_v34, %v3305_v1 }
 0xad9   :  { %vm3422_vm9 = vcmp.gt.f32.partialorder %v3374_v6, 0.0  ;;  %vm3423_vm4 = vcmp.gt.f32.partialorder %v3375_v38, 0.0 }
 0xada   :  { %v3390_v41 = vmul.f32 1.442695, %v3382_v39  ;;  %v3392_v56 = vmul.f32 1.442695, %v3383_v60  ;;  %v3344_v50 = vmul.f32 %v6783_v19, %v3320_v10  ;;  %v3345_v27 = vmul.f32 %v6783_v19, %v3321_v4 }
 0xadb   :  { %v4153_v31 = vpop.eup %4152 }
 0xadc   :  { %v4155_v18 = vpop.eup %4154  ;;  %4156 = vpow2.f32 %v3390_v41  ;;  %v3514_v35 = vadd.f32 -1.0, %v4153_v31  ;;  %v3368_v5 = vadd.f32 %v3356_v47, %v3344_v50  ;;  %v3369_v2 = vadd.f32 %v3356_v47, %v3345_v27 }
 0xadd   :  { %4158 = vpow2.f32 %v3392_v56  ;;  %v3515_v13 = vadd.f32 -1.0, %v4155_v18 }
 0xade   :  { %v3420_v36 = vmul.f32 1.6732632, %v3514_v35  ;;  %v3376_v16 = vadd.f32 %v3368_v5, %v3139_v63  ;;  %v3377_v40 = vadd.f32 %v3369_v2, %v3140_v32 }
 0xadf   :  { %v3421_v20 = vmul.f32 1.6732632, %v3515_v13 }
 0xae0   :  { %v3436_v55 = vsel %vm3428_vm7, %v6819_v43, %v3420_v36  ;;  %v3384_v29 = vmin.f32 %v3376_v16, 0.0  ;;  %v3385_v33 = vmin.f32 %v3377_v40, 0.0  ;;  %vm3424_vm11 = vcmp.gt.f32.partialorder %v3376_v16, 0.0 }
 0xae1   :  { %v3437_v19 = vsel %vm3429_vm2, %v6821_v11, %v3421_v20  ;;  %v3444_v54 = vmul.f32 1.050701, %v3436_v55  ;;  %vm3425_vm12 = vcmp.gt.f32.partialorder %v3377_v40, 0.0 }
 0xae2   :  { %v3445_v7 = vmul.f32 1.050701, %v3437_v19  ;;  %v3394_v57 = vmul.f32 1.442695, %v3384_v29  ;;  %v3396_v59 = vmul.f32 1.442695, %v3385_v33 }
 0xae3   :  { %3452 = vst [vmem:[%s6872_s5 + $0x30] sm:$0xff] %v3444_v54 }
 0xae4   :  { %3453 = vst [vmem:[%s6872_s5 + $0x38] sm:$0xff] %v3445_v7  ;;  %4160 = vpow2.f32 %v3394_v57 }
 0xae5   :  { %4162 = vpow2.f32 %v3396_v59 }
 0xae9   :  { %v4157_v25 = vpop.eup %4156 }
 0xaea   :  { %v4159_v43 = vpop.eup %4158  ;;  %v3508_v61 = vadd.f32 -1.0, %v4157_v25 }
 0xaeb   :  { %v3509_v11 = vadd.f32 -1.0, %v4159_v43 }
 0xaec   :  { %v3414_v23 = vmul.f32 1.6732632, %v3508_v61 }
 0xaed   :  { %v3415_v51 = vmul.f32 1.6732632, %v3509_v11 }
 0xaee   :  { %v3430_v46 = vsel %vm3422_vm9, %v3374_v6, %v3414_v23 }
 0xaef   :  { %v3431_v17 = vsel %vm3423_vm4, %v3375_v38, %v3415_v51  ;;  %v3438_v30 = vmul.f32 1.050701, %v3430_v46 }
 0xaf0   :  { %v3439_v3 = vmul.f32 1.050701, %v3431_v17 }
 0xaf1   :  { %3446 = vst [vmem:[%s6872_s5] sm:$0xff] %v3438_v30  ;;  %v4161_v24 = vpop.eup %4160 }
 0xaf2   :  { %3447 = vst [vmem:[%s6872_s5 + $0x8] sm:$0xff] %v3439_v3  ;;  %v4163_v52 = vpop.eup %4162  ;;  %v3510_v44 = vadd.f32 -1.0, %v4161_v24 }
 0xaf3   :  { %v3511_v26 = vadd.f32 -1.0, %v4163_v52 }
 0xaf4   :  { %v3416_v45 = vmul.f32 1.6732632, %v3510_v44 }
 0xaf5   :  { %v3417_v0 = vmul.f32 1.6732632, %v3511_v26 }
 0xaf6   :  { %v3432_v14 = vsel %vm3424_vm11, %v3376_v16, %v3416_v45 }
 0xaf7   :  { %v3433_v48 = vsel %vm3425_vm12, %v3377_v40, %v3417_v0  ;;  %v3440_v8 = vmul.f32 1.050701, %v3432_v14 }
 0xaf8   :  { %v3441_v9 = vmul.f32 1.050701, %v3433_v48 }
 0xaf9   :  { %3448 = vst [vmem:[%s6872_s5 + $0x10] sm:$0xff] %v3440_v8 }
 0xafa   :  { %3449 = vst [vmem:[%s6872_s5 + $0x18] sm:$0xff] %v3441_v9 }
 0xafb   :  { %3458 = vsyncpa [#allocation4], 1 }

</bundles_post_ra>
